<compile_context>
chip_gen: v7x
topology: tpu7x:2x2x1
jax: 0.10.0
libtpu: 0.0.40
codegen_flags: <defaults>
</compile_context>

<pallas_src>
import functools

import jax
import jax.numpy as jnp
from jax.experimental import pallas as pl
from jax.experimental.pallas import tpu as pltpu


def _cdiv(a, b):
    return -(-a // b)


# ----------------------------------------------------------------------------
# Fused kernel: conv1..conv4 (+bias+ReLU+pool) + linear, all in VMEM.
# Activation layout: (h, w, nb, C)  ->  matmul rows = (h, w, b), lanes = C.
# ----------------------------------------------------------------------------
def classifier_kernel(x_ref, B1_ref, b1_ref, w2_ref, b2_ref, w3_ref, b3_ref,
                      w4_ref, b4_ref, wfc_ref, bfc_ref, o_ref,
                      pad2_ref, pad3_ref, pad4_ref, *, nb):
    f32 = jnp.float32

    # ---------------- stage 1: conv 1 -> 36 (cin == 1 special case) ----------
    # x_ref: (18, nb, 18) = zero-padded input, rows = (h_pad, b), lanes = w_pad.
    # U_kh[(hh, b), (w, c)] = sum_win x[hh, b, win] * B1[kh][win, w*36 + c]
    lhs = x_ref[...].reshape(18 * nb, 18)                        # free relabel
    u = [jnp.dot(lhs, B1_ref[k], preferred_element_type=f32).reshape(18, nb, 16 * 36)
         for k in range(3)]
    # sum over kh via leading-dim shifted slices (h padding handled by zero rows)
    y1 = u[0][0:16] + u[1][1:17] + u[2][2:18]                    # (16, nb, 576)

    # 2x2 max-pool. h is a leading dim -> free split; w lives in 36-wide lane
    # blocks -> pairwise max of lane slices, restacked on a new leading w dim.
    y1 = y1.reshape(8, 2, nb, 16 * 36)
    y1 = jnp.maximum(y1[:, 0], y1[:, 1])                         # (8, nb, 576)
    cols = []
    for wo in range(8):
        lo = (2 * wo) * 36
        cols.append(jnp.maximum(y1[:, :, lo:lo + 36],
                                y1[:, :, lo + 36:lo + 72]))      # (8, nb, 36)
    h = jnp.stack(cols, axis=1)                                  # (8, 8, nb, 36)
    # Dropout(p=0.5) -> identity in eval mode; bias + ReLU (commute with pool)
    h = jnp.maximum(h + b1_ref[...], 0.0)

    # ---------------- stages 2-4: shift-accumulate 3x3 convs ------------------
    def conv_stage(x, pad_ref, w_ref, b_ref, H, W, cin, cout):
        # Zero the whole padded scratch every grid step (keeps the border zero
        # and is safe under megacore 'parallel' sharding), then write interior.
        pad_ref[...] = jnp.zeros(pad_ref.shape, f32)
        pad_ref[1:H + 1, 1:W + 1, :, :] = x
        M = H * W * nb
        acc = jnp.zeros((M, cout), f32)
        for kh in range(3):
            for kw in range(3):
                # tap slice is entirely on leading dims -> cheap; reshape is a
                # free relabel because nb is a multiple of 8.
                tap = pad_ref[kh:kh + H, kw:kw + W, :, :].reshape(M, cin)
                acc = acc + jnp.dot(tap, w_ref[kh * 3 + kw],
                                    preferred_element_type=f32)
        y = acc.reshape(H, W, nb, cout)
        # 2x2 max-pool, stride 2: both spatial dims are leading dims.
        y = y.reshape(H // 2, 2, W, nb, cout)
        y = jnp.maximum(y[:, 0], y[:, 1])
        y = y.reshape(H // 2, W // 2, 2, nb, cout)
        y = jnp.maximum(y[:, :, 0], y[:, :, 1])                  # (H/2, W/2, nb, cout)
        # Dropout -> identity (eval); bias + ReLU after pool (equivalent).
        return jnp.maximum(y + b_ref[...], 0.0)

    h = conv_stage(h, pad2_ref, w2_ref, b2_ref, 8, 8, 36, 72)    # (4, 4, nb, 72)
    h = conv_stage(h, pad3_ref, w3_ref, b3_ref, 4, 4, 72, 144)   # (2, 2, nb, 144)
    h = conv_stage(h, pad4_ref, w4_ref, b4_ref, 2, 2, 144, 288)  # (1, 1, nb, 288)

    feat = h.reshape(nb, 288)                                    # == torch .squeeze()
    logits = jnp.dot(feat, wfc_ref[...], preferred_element_type=f32) + bfc_ref[...]
    o_ref[...] = logits.astype(o_ref.dtype)                      # (nb, 128) lane-dense


# ----------------------------------------------------------------------------
# Wrapper (layout plumbing + pallas_call)
# ----------------------------------------------------------------------------
def classifier_forward(x_nchw, params, *, batch_block=None):
    n = x_nchw.shape[0]
    assert x_nchw.shape[1:] == (1, 16, 16), "pipeline assumes (N, 1, 16, 16) input"
    x = x_nchw.reshape(n, 16, 16).astype(jnp.float32)

    # ---- generation-aware sizing (v7x: 64 MiB VMEM, v5e/v6e: 128 MiB) -------
    try:
        vmem_cap = int(pltpu.get_tpu_info().vmem_capacity_bytes)
    except Exception:
        vmem_cap = 64 * 1024 * 1024
    if batch_block is None:
        batch_block = 32 if vmem_cap >= 96 * 1024 * 1024 else 16
    vmem_limit = int(min(vmem_cap // 2, 64 * 1024 * 1024))

    # nb multiple of 8; force >= 2 grid steps so both v7x TensorCores get work.
    nb = min(batch_block, 8 * _cdiv(_cdiv(max(n, 1), 2), 8))
    nb = max(nb, 8)
    grid = max(2, _cdiv(n, nb))
    n_pad = grid * nb

    # ---- input: (h, b, w) with 'same' padding on h and w done once here -----
    x_t = jnp.transpose(x, (1, 0, 2))                            # (16, n, 16)
    x_t = jnp.pad(x_t, ((1, 1), (0, 0), (1, 1)))                 # (18, n, 18)
    if n_pad != n:
        x_t = jnp.pad(x_t, ((0, 0), (0, n_pad - n), (0, 0)))     # (18, n_pad, 18)

    # ---- weights -------------------------------------------------------------
    (w1, b1), (w2, b2), (w3, b3), (w4, b4) = params["convs"]     # w: (3,3,cin,cout)

    # stage-1 banded matrices: B1[kh][win, w*36 + c] = w1[kh, win - w, 0, c]
    kw_i = jnp.arange(3)[:, None, None]
    win_i = jnp.arange(18)[None, :, None]
    w_i = jnp.arange(16)[None, None, :]
    sel = (win_i == w_i + kw_i).astype(jnp.float32)              # (3, 18, 16)
    B1 = jnp.einsum("kvw,hkc->hvwc", sel, w1[:, :, 0, :]).reshape(3, 18, 16 * 36)

    b1_r = b1.reshape(1, -1)
    w2_r, w3_r, w4_r = (w.reshape(9, w.shape[2], w.shape[3]) for w in (w2, w3, w4))
    b2_r, b3_r, b4_r = (b.reshape(1, -1) for b in (b2, b3, b4))

    # lane-dense FC output: pad 10 -> 128 (extra FLOPs are free, MXU is idle)
    wfc_p = jnp.pad(params["w_fc"], ((0, 0), (0, 128 - 10)))     # (288, 128)
    bfc_p = jnp.pad(params["b_fc"].reshape(1, -1), ((0, 0), (0, 128 - 10)))

    def _const(a):  # weight/bias resident across all grid steps
        nd = a.ndim
        return pl.BlockSpec(a.shape, lambda i, _nd=nd: (0,) * _nd)

    kernel = functools.partial(classifier_kernel, nb=nb)
    out = pl.pallas_call(
        kernel,
        out_shape=jax.ShapeDtypeStruct((n_pad, 128), jnp.float32),
        grid_spec=pltpu.PrefetchScalarGridSpec(
            num_scalar_prefetch=0,
            grid=(grid,),
            in_specs=[
                pl.BlockSpec((18, nb, 18), lambda i: (0, i, 0)),
                _const(B1), _const(b1_r),
                _const(w2_r), _const(b2_r),
                _const(w3_r), _const(b3_r),
                _const(w4_r), _const(b4_r),
                _const(wfc_p), _const(bfc_p),
            ],
            out_specs=pl.BlockSpec((nb, 128), lambda i: (i, 0)),
            scratch_shapes=[
                pltpu.VMEM((10, 10, nb, 36), jnp.float32),   # padded stage-2 input
                pltpu.VMEM((6, 6, nb, 72), jnp.float32),     # padded stage-3 input
                pltpu.VMEM((4, 4, nb, 144), jnp.float32),    # padded stage-4 input
            ],
        ),
        compiler_params=pltpu.CompilerParams(
            dimension_semantics=("parallel",),   # batch grid shards across TCs
            vmem_limit_bytes=vmem_limit,
        ),
    )(x_t, B1, b1_r, w2_r, b2_r, w3_r, b3_r, w4_r, b4_r, wfc_p, bfc_p)
    return out[:n, :10]


# ----------------------------------------------------------------------------
# Deterministic parameter init (PyTorch-default-like uniform fan-in bounds).
# NOTE: if loading real PyTorch weights, permute conv weights
# (cout,cin,kh,kw)->(kh,kw,cin,cout) and transpose the Linear weight.
# ----------------------------------------------------------------------------
def init_params(key):
    chans = [(1, 36), (36, 72), (72, 144), (144, 288)]
    convs = []
    for (cin, cout) in chans:
        key, k1, k2 = jax.random.split(key, 3)
        bound = 1.0 / jnp.sqrt(cin * 3 * 3)
        w = jax.random.uniform(k1, (3, 3, cin, cout), jnp.float32, -bound, bound)
        b = jax.random.uniform(k2, (cout,), jnp.float32, -bound, bound)
        convs.append((w, b))
    key, k1, k2 = jax.random.split(key, 3)
    bound = 1.0 / jnp.sqrt(288.0)
    w_fc = jax.random.uniform(k1, (288, 10), jnp.float32, -bound, bound)
    b_fc = jax.random.uniform(k2, (10,), jnp.float32, -bound, bound)
    return {"convs": convs, "w_fc": w_fc, "b_fc": b_fc}


# ----------------------------------------------------------------------------
if __name__ == "__main__":
    key = jax.random.PRNGKey(0)
    pkey, xkey = jax.random.split(key)
    params = init_params(pkey)

    # Input: batch=2, 1 channel, 16x16 spatial (NCHW, like the PyTorch module).
    x = jax.random.normal(xkey, (2, 1, 16, 16), dtype=jnp.float32)

    fwd = jax.jit(lambda xin: classifier_forward(xin, params))
    logits = fwd(x)
    jax.block_until_ready(logits)
    assert logits.shape == (2, 10), logits.shape
    print("KERNEL_OK")
</pallas_src>

<mosaic_0001>
module attributes {stable_mosaic.version = 11 : i64} {
  func.func @classifier_kernel(%arg0: i32, %arg1: memref<18x8x18xf32, #tpu.memory_space<vmem>>, %arg2: memref<3x18x576xf32, #tpu.memory_space<vmem>>, %arg3: memref<1x36xf32, #tpu.memory_space<vmem>>, %arg4: memref<9x36x72xf32, #tpu.memory_space<vmem>>, %arg5: memref<1x72xf32, #tpu.memory_space<vmem>>, %arg6: memref<9x72x144xf32, #tpu.memory_space<vmem>>, %arg7: memref<1x144xf32, #tpu.memory_space<vmem>>, %arg8: memref<9x144x288xf32, #tpu.memory_space<vmem>>, %arg9: memref<1x288xf32, #tpu.memory_space<vmem>>, %arg10: memref<288x128xf32, #tpu.memory_space<vmem>>, %arg11: memref<1x128xf32, #tpu.memory_space<vmem>>, %arg12: memref<8x128xf32, #tpu.memory_space<vmem>>, %arg13: memref<10x10x8x36xf32, #tpu.memory_space<vmem>>, %arg14: memref<6x6x8x72xf32, #tpu.memory_space<vmem>>, %arg15: memref<4x4x8x144xf32, #tpu.memory_space<vmem>>) attributes {dimension_semantics = [#tpu.dimension_semantics<parallel>], iteration_bounds = array<i64: 2>, scalar_prefetch = 0 : i64, scratch_operands = 3 : i64, tpu.core_type = #tpu.core_type<tc>, window_params = [{transform_indices = @transform_0, window_bounds = array<i64: 18, 8, 18>}, {pipeline_mode = #tpu.pipeline_mode<synchronous>, transform_indices = @transform_1, window_bounds = array<i64: 3, 18, 576>}, {pipeline_mode = #tpu.pipeline_mode<synchronous>, transform_indices = @transform_2, window_bounds = array<i64: 1, 36>}, {pipeline_mode = #tpu.pipeline_mode<synchronous>, transform_indices = @transform_3, window_bounds = array<i64: 9, 36, 72>}, {pipeline_mode = #tpu.pipeline_mode<synchronous>, transform_indices = @transform_4, window_bounds = array<i64: 1, 72>}, {pipeline_mode = #tpu.pipeline_mode<synchronous>, transform_indices = @transform_5, window_bounds = array<i64: 9, 72, 144>}, {pipeline_mode = #tpu.pipeline_mode<synchronous>, transform_indices = @transform_6, window_bounds = array<i64: 1, 144>}, {pipeline_mode = #tpu.pipeline_mode<synchronous>, transform_indices = @transform_7, window_bounds = array<i64: 9, 144, 288>}, {pipeline_mode = #tpu.pipeline_mode<synchronous>, transform_indices = @transform_8, window_bounds = array<i64: 1, 288>}, {pipeline_mode = #tpu.pipeline_mode<synchronous>, transform_indices = @transform_9, window_bounds = array<i64: 288, 128>}, {pipeline_mode = #tpu.pipeline_mode<synchronous>, transform_indices = @transform_10, window_bounds = array<i64: 1, 128>}, {transform_indices = @transform_11, window_bounds = array<i64: 8, 128>}]} {
    %c0 = arith.constant 0 : index
    %c0_0 = arith.constant 0 : index
    %c0_1 = arith.constant 0 : index
    %0 = vector.load %arg1[%c0, %c0_0, %c0_1] : memref<18x8x18xf32, #tpu.memory_space<vmem>>, vector<18x8x18xf32>
    %1 = vector.shape_cast %0 : vector<18x8x18xf32> to vector<144x18xf32>
    %c0_2 = arith.constant 0 : index
    %c0_3 = arith.constant 0 : index
    %c0_4 = arith.constant 0 : index
    %2 = vector.load %arg2[%c0_2, %c0_3, %c0_4] : memref<3x18x576xf32, #tpu.memory_space<vmem>>, vector<1x18x576xf32>
    %3 = vector.shape_cast %2 : vector<1x18x576xf32> to vector<18x576xf32>
    %cst = arith.constant dense<0.000000e+00> : vector<144x576xf32>
    %4 = tpu.matmul %1, %3, %cst {dimension_numbers = #tpu.dot_dimension_numbers<[1], [0], [0], [1], [0, 0, 1, 1], [], []>} : vector<144x18xf32>, vector<18x576xf32>, vector<144x576xf32> -> vector<144x576xf32>
    %5 = vector.shape_cast %4 : vector<144x576xf32> to vector<18x8x576xf32>
    %c1 = arith.constant 1 : index
    %c0_5 = arith.constant 0 : index
    %c0_6 = arith.constant 0 : index
    %6 = vector.load %arg2[%c1, %c0_5, %c0_6] : memref<3x18x576xf32, #tpu.memory_space<vmem>>, vector<1x18x576xf32>
    %7 = vector.shape_cast %6 : vector<1x18x576xf32> to vector<18x576xf32>
    %cst_7 = arith.constant dense<0.000000e+00> : vector<144x576xf32>
    %8 = tpu.matmul %1, %7, %cst_7 {dimension_numbers = #tpu.dot_dimension_numbers<[1], [0], [0], [1], [0, 0, 1, 1], [], []>} : vector<144x18xf32>, vector<18x576xf32>, vector<144x576xf32> -> vector<144x576xf32>
    %9 = vector.shape_cast %8 : vector<144x576xf32> to vector<18x8x576xf32>
    %c2 = arith.constant 2 : index
    %c0_8 = arith.constant 0 : index
    %c0_9 = arith.constant 0 : index
    %10 = vector.load %arg2[%c2, %c0_8, %c0_9] : memref<3x18x576xf32, #tpu.memory_space<vmem>>, vector<1x18x576xf32>
    %11 = vector.shape_cast %10 : vector<1x18x576xf32> to vector<18x576xf32>
    %cst_10 = arith.constant dense<0.000000e+00> : vector<144x576xf32>
    %12 = tpu.matmul %1, %11, %cst_10 {dimension_numbers = #tpu.dot_dimension_numbers<[1], [0], [0], [1], [0, 0, 1, 1], [], []>} : vector<144x18xf32>, vector<18x576xf32>, vector<144x576xf32> -> vector<144x576xf32>
    %13 = vector.shape_cast %12 : vector<144x576xf32> to vector<18x8x576xf32>
    %14 = vector.extract_strided_slice %5 {offsets = [0, 0, 0], sizes = [16, 8, 576], strides = [1, 1, 1]} : vector<18x8x576xf32> to vector<16x8x576xf32>
    %15 = vector.extract_strided_slice %9 {offsets = [1, 0, 0], sizes = [16, 8, 576], strides = [1, 1, 1]} : vector<18x8x576xf32> to vector<16x8x576xf32>
    %16 = arith.addf %14, %15 : vector<16x8x576xf32>
    %17 = vector.extract_strided_slice %13 {offsets = [2, 0, 0], sizes = [16, 8, 576], strides = [1, 1, 1]} : vector<18x8x576xf32> to vector<16x8x576xf32>
    %18 = arith.addf %16, %17 : vector<16x8x576xf32>
    %19 = vector.shape_cast %18 : vector<16x8x576xf32> to vector<8x2x8x576xf32>
    %20 = vector.extract_strided_slice %19 {offsets = [0, 0, 0, 0], sizes = [8, 1, 8, 576], strides = [1, 1, 1, 1]} : vector<8x2x8x576xf32> to vector<8x1x8x576xf32>
    %21 = vector.shape_cast %20 : vector<8x1x8x576xf32> to vector<8x8x576xf32>
    %22 = vector.extract_strided_slice %19 {offsets = [0, 1, 0, 0], sizes = [8, 1, 8, 576], strides = [1, 1, 1, 1]} : vector<8x2x8x576xf32> to vector<8x1x8x576xf32>
    %23 = vector.shape_cast %22 : vector<8x1x8x576xf32> to vector<8x8x576xf32>
    %24 = arith.maximumf %21, %23 : vector<8x8x576xf32>
    %25 = vector.extract_strided_slice %24 {offsets = [0, 0, 0], sizes = [8, 8, 36], strides = [1, 1, 1]} : vector<8x8x576xf32> to vector<8x8x36xf32>
    %26 = vector.extract_strided_slice %24 {offsets = [0, 0, 36], sizes = [8, 8, 36], strides = [1, 1, 1]} : vector<8x8x576xf32> to vector<8x8x36xf32>
    %27 = arith.maximumf %25, %26 : vector<8x8x36xf32>
    %28 = vector.extract_strided_slice %24 {offsets = [0, 0, 72], sizes = [8, 8, 36], strides = [1, 1, 1]} : vector<8x8x576xf32> to vector<8x8x36xf32>
    %29 = vector.extract_strided_slice %24 {offsets = [0, 0, 108], sizes = [8, 8, 36], strides = [1, 1, 1]} : vector<8x8x576xf32> to vector<8x8x36xf32>
    %30 = arith.maximumf %28, %29 : vector<8x8x36xf32>
    %31 = vector.extract_strided_slice %24 {offsets = [0, 0, 144], sizes = [8, 8, 36], strides = [1, 1, 1]} : vector<8x8x576xf32> to vector<8x8x36xf32>
    %32 = vector.extract_strided_slice %24 {offsets = [0, 0, 180], sizes = [8, 8, 36], strides = [1, 1, 1]} : vector<8x8x576xf32> to vector<8x8x36xf32>
    %33 = arith.maximumf %31, %32 : vector<8x8x36xf32>
    %34 = vector.extract_strided_slice %24 {offsets = [0, 0, 216], sizes = [8, 8, 36], strides = [1, 1, 1]} : vector<8x8x576xf32> to vector<8x8x36xf32>
    %35 = vector.extract_strided_slice %24 {offsets = [0, 0, 252], sizes = [8, 8, 36], strides = [1, 1, 1]} : vector<8x8x576xf32> to vector<8x8x36xf32>
    %36 = arith.maximumf %34, %35 : vector<8x8x36xf32>
    %37 = vector.extract_strided_slice %24 {offsets = [0, 0, 288], sizes = [8, 8, 36], strides = [1, 1, 1]} : vector<8x8x576xf32> to vector<8x8x36xf32>
    %38 = vector.extract_strided_slice %24 {offsets = [0, 0, 324], sizes = [8, 8, 36], strides = [1, 1, 1]} : vector<8x8x576xf32> to vector<8x8x36xf32>
    %39 = arith.maximumf %37, %38 : vector<8x8x36xf32>
    %40 = vector.extract_strided_slice %24 {offsets = [0, 0, 360], sizes = [8, 8, 36], strides = [1, 1, 1]} : vector<8x8x576xf32> to vector<8x8x36xf32>
    %41 = vector.extract_strided_slice %24 {offsets = [0, 0, 396], sizes = [8, 8, 36], strides = [1, 1, 1]} : vector<8x8x576xf32> to vector<8x8x36xf32>
    %42 = arith.maximumf %40, %41 : vector<8x8x36xf32>
    %43 = vector.extract_strided_slice %24 {offsets = [0, 0, 432], sizes = [8, 8, 36], strides = [1, 1, 1]} : vector<8x8x576xf32> to vector<8x8x36xf32>
    %44 = vector.extract_strided_slice %24 {offsets = [0, 0, 468], sizes = [8, 8, 36], strides = [1, 1, 1]} : vector<8x8x576xf32> to vector<8x8x36xf32>
    %45 = arith.maximumf %43, %44 : vector<8x8x36xf32>
    %46 = vector.extract_strided_slice %24 {offsets = [0, 0, 504], sizes = [8, 8, 36], strides = [1, 1, 1]} : vector<8x8x576xf32> to vector<8x8x36xf32>
    %47 = vector.extract_strided_slice %24 {offsets = [0, 0, 540], sizes = [8, 8, 36], strides = [1, 1, 1]} : vector<8x8x576xf32> to vector<8x8x36xf32>
    %48 = arith.maximumf %46, %47 : vector<8x8x36xf32>
    %49 = vector.shape_cast %27 : vector<8x8x36xf32> to vector<8x1x8x36xf32>
    %50 = vector.shape_cast %30 : vector<8x8x36xf32> to vector<8x1x8x36xf32>
    %51 = vector.shape_cast %33 : vector<8x8x36xf32> to vector<8x1x8x36xf32>
    %52 = vector.shape_cast %36 : vector<8x8x36xf32> to vector<8x1x8x36xf32>
    %53 = vector.shape_cast %39 : vector<8x8x36xf32> to vector<8x1x8x36xf32>
    %54 = vector.shape_cast %42 : vector<8x8x36xf32> to vector<8x1x8x36xf32>
    %55 = vector.shape_cast %45 : vector<8x8x36xf32> to vector<8x1x8x36xf32>
    %56 = vector.shape_cast %48 : vector<8x8x36xf32> to vector<8x1x8x36xf32>
    %57 = tpu.concatenate %49, %50, %51, %52, %53, %54, %55, %56 in 1 : vector<8x1x8x36xf32>, vector<8x1x8x36xf32>, vector<8x1x8x36xf32>, vector<8x1x8x36xf32>, vector<8x1x8x36xf32>, vector<8x1x8x36xf32>, vector<8x1x8x36xf32>, vector<8x1x8x36xf32> -> vector<8x8x8x36xf32>
    %c0_11 = arith.constant 0 : index
    %c0_12 = arith.constant 0 : index
    %58 = vector.load %arg3[%c0_11, %c0_12] : memref<1x36xf32, #tpu.memory_space<vmem>>, vector<1x36xf32>
    %59 = vector.shape_cast %58 : vector<1x36xf32> to vector<1x1x1x36xf32>
    %60 = vector.broadcast %59 : vector<1x1x1x36xf32> to vector<8x8x8x36xf32>
    %61 = arith.addf %57, %60 : vector<8x8x8x36xf32>
    %cst_13 = arith.constant 0.000000e+00 : f32
    %62 = vector.broadcast %cst_13 : f32 to vector<8x8x8x36xf32>
    %63 = arith.maximumf %61, %62 : vector<8x8x8x36xf32>
    %cst_14 = arith.constant 0.000000e+00 : f32
    %64 = vector.broadcast %cst_14 : f32 to vector<10x10x8x36xf32>
    %c0_15 = arith.constant 0 : index
    %c0_16 = arith.constant 0 : index
    %c0_17 = arith.constant 0 : index
    %c0_18 = arith.constant 0 : index
    %65 = vector.load %arg13[%c0_15, %c0_16, %c0_17, %c0_18] : memref<10x10x8x36xf32, #tpu.memory_space<vmem>>, vector<10x10x8x36xf32>
    tpu.vector_store %arg13[%c0_15, %c0_16, %c0_17, %c0_18], %64 {strides = array<i32>} : memref<10x10x8x36xf32, #tpu.memory_space<vmem>>, vector<10x10x8x36xf32>,
    %c1_19 = arith.constant 1 : index
    %c1_20 = arith.constant 1 : index
    %c0_21 = arith.constant 0 : index
    %c0_22 = arith.constant 0 : index
    %66 = vector.load %arg13[%c1_19, %c1_20, %c0_21, %c0_22] : memref<10x10x8x36xf32, #tpu.memory_space<vmem>>, vector<8x8x8x36xf32>
    tpu.vector_store %arg13[%c1_19, %c1_20, %c0_21, %c0_22], %63 {strides = array<i32>} : memref<10x10x8x36xf32, #tpu.memory_space<vmem>>, vector<8x8x8x36xf32>,
    %cst_23 = arith.constant 0.000000e+00 : f32
    %67 = vector.broadcast %cst_23 : f32 to vector<512x72xf32>
    %c0_24 = arith.constant 0 : index
    %c0_25 = arith.constant 0 : index
    %c0_26 = arith.constant 0 : index
    %c0_27 = arith.constant 0 : index
    %68 = vector.load %arg13[%c0_24, %c0_25, %c0_26, %c0_27] : memref<10x10x8x36xf32, #tpu.memory_space<vmem>>, vector<8x8x8x36xf32>
    %69 = vector.shape_cast %68 : vector<8x8x8x36xf32> to vector<512x36xf32>
    %c0_28 = arith.constant 0 : index
    %c0_29 = arith.constant 0 : index
    %c0_30 = arith.constant 0 : index
    %70 = vector.load %arg4[%c0_28, %c0_29, %c0_30] : memref<9x36x72xf32, #tpu.memory_space<vmem>>, vector<1x36x72xf32>
    %71 = vector.shape_cast %70 : vector<1x36x72xf32> to vector<36x72xf32>
    %cst_31 = arith.constant dense<0.000000e+00> : vector<512x72xf32>
    %72 = tpu.matmul %69, %71, %cst_31 {dimension_numbers = #tpu.dot_dimension_numbers<[1], [0], [0], [1], [0, 0, 1, 1], [], []>} : vector<512x36xf32>, vector<36x72xf32>, vector<512x72xf32> -> vector<512x72xf32>
    %73 = arith.addf %67, %72 : vector<512x72xf32>
    %c0_32 = arith.constant 0 : index
    %c1_33 = arith.constant 1 : index
    %c0_34 = arith.constant 0 : index
    %c0_35 = arith.constant 0 : index
    %74 = vector.load %arg13[%c0_32, %c1_33, %c0_34, %c0_35] : memref<10x10x8x36xf32, #tpu.memory_space<vmem>>, vector<8x8x8x36xf32>
    %75 = vector.shape_cast %74 : vector<8x8x8x36xf32> to vector<512x36xf32>
    %c1_36 = arith.constant 1 : index
    %c0_37 = arith.constant 0 : index
    %c0_38 = arith.constant 0 : index
    %76 = vector.load %arg4[%c1_36, %c0_37, %c0_38] : memref<9x36x72xf32, #tpu.memory_space<vmem>>, vector<1x36x72xf32>
    %77 = vector.shape_cast %76 : vector<1x36x72xf32> to vector<36x72xf32>
    %cst_39 = arith.constant dense<0.000000e+00> : vector<512x72xf32>
    %78 = tpu.matmul %75, %77, %cst_39 {dimension_numbers = #tpu.dot_dimension_numbers<[1], [0], [0], [1], [0, 0, 1, 1], [], []>} : vector<512x36xf32>, vector<36x72xf32>, vector<512x72xf32> -> vector<512x72xf32>
    %79 = arith.addf %73, %78 : vector<512x72xf32>
    %c0_40 = arith.constant 0 : index
    %c2_41 = arith.constant 2 : index
    %c0_42 = arith.constant 0 : index
    %c0_43 = arith.constant 0 : index
    %80 = vector.load %arg13[%c0_40, %c2_41, %c0_42, %c0_43] : memref<10x10x8x36xf32, #tpu.memory_space<vmem>>, vector<8x8x8x36xf32>
    %81 = vector.shape_cast %80 : vector<8x8x8x36xf32> to vector<512x36xf32>
    %c2_44 = arith.constant 2 : index
    %c0_45 = arith.constant 0 : index
    %c0_46 = arith.constant 0 : index
    %82 = vector.load %arg4[%c2_44, %c0_45, %c0_46] : memref<9x36x72xf32, #tpu.memory_space<vmem>>, vector<1x36x72xf32>
    %83 = vector.shape_cast %82 : vector<1x36x72xf32> to vector<36x72xf32>
    %cst_47 = arith.constant dense<0.000000e+00> : vector<512x72xf32>
    %84 = tpu.matmul %81, %83, %cst_47 {dimension_numbers = #tpu.dot_dimension_numbers<[1], [0], [0], [1], [0, 0, 1, 1], [], []>} : vector<512x36xf32>, vector<36x72xf32>, vector<512x72xf32> -> vector<512x72xf32>
    %85 = arith.addf %79, %84 : vector<512x72xf32>
    %c1_48 = arith.constant 1 : index
    %c0_49 = arith.constant 0 : index
    %c0_50 = arith.constant 0 : index
    %c0_51 = arith.constant 0 : index
    %86 = vector.load %arg13[%c1_48, %c0_49, %c0_50, %c0_51] : memref<10x10x8x36xf32, #tpu.memory_space<vmem>>, vector<8x8x8x36xf32>
    %87 = vector.shape_cast %86 : vector<8x8x8x36xf32> to vector<512x36xf32>
    %c3 = arith.constant 3 : index
    %c0_52 = arith.constant 0 : index
    %c0_53 = arith.constant 0 : index
    %88 = vector.load %arg4[%c3, %c0_52, %c0_53] : memref<9x36x72xf32, #tpu.memory_space<vmem>>, vector<1x36x72xf32>
    %89 = vector.shape_cast %88 : vector<1x36x72xf32> to vector<36x72xf32>
    %cst_54 = arith.constant dense<0.000000e+00> : vector<512x72xf32>
    %90 = tpu.matmul %87, %89, %cst_54 {dimension_numbers = #tpu.dot_dimension_numbers<[1], [0], [0], [1], [0, 0, 1, 1], [], []>} : vector<512x36xf32>, vector<36x72xf32>, vector<512x72xf32> -> vector<512x72xf32>
    %91 = arith.addf %85, %90 : vector<512x72xf32>
    %c1_55 = arith.constant 1 : index
    %c1_56 = arith.constant 1 : index
    %c0_57 = arith.constant 0 : index
    %c0_58 = arith.constant 0 : index
    %92 = vector.load %arg13[%c1_55, %c1_56, %c0_57, %c0_58] : memref<10x10x8x36xf32, #tpu.memory_space<vmem>>, vector<8x8x8x36xf32>
    %93 = vector.shape_cast %92 : vector<8x8x8x36xf32> to vector<512x36xf32>
    %c4 = arith.constant 4 : index
    %c0_59 = arith.constant 0 : index
    %c0_60 = arith.constant 0 : index
    %94 = vector.load %arg4[%c4, %c0_59, %c0_60] : memref<9x36x72xf32, #tpu.memory_space<vmem>>, vector<1x36x72xf32>
    %95 = vector.shape_cast %94 : vector<1x36x72xf32> to vector<36x72xf32>
    %cst_61 = arith.constant dense<0.000000e+00> : vector<512x72xf32>
    %96 = tpu.matmul %93, %95, %cst_61 {dimension_numbers = #tpu.dot_dimension_numbers<[1], [0], [0], [1], [0, 0, 1, 1], [], []>} : vector<512x36xf32>, vector<36x72xf32>, vector<512x72xf32> -> vector<512x72xf32>
    %97 = arith.addf %91, %96 : vector<512x72xf32>
    %c1_62 = arith.constant 1 : index
    %c2_63 = arith.constant 2 : index
    %c0_64 = arith.constant 0 : index
    %c0_65 = arith.constant 0 : index
    %98 = vector.load %arg13[%c1_62, %c2_63, %c0_64, %c0_65] : memref<10x10x8x36xf32, #tpu.memory_space<vmem>>, vector<8x8x8x36xf32>
    %99 = vector.shape_cast %98 : vector<8x8x8x36xf32> to vector<512x36xf32>
    %c5 = arith.constant 5 : index
    %c0_66 = arith.constant 0 : index
    %c0_67 = arith.constant 0 : index
    %100 = vector.load %arg4[%c5, %c0_66, %c0_67] : memref<9x36x72xf32, #tpu.memory_space<vmem>>, vector<1x36x72xf32>
    %101 = vector.shape_cast %100 : vector<1x36x72xf32> to vector<36x72xf32>
    %cst_68 = arith.constant dense<0.000000e+00> : vector<512x72xf32>
    %102 = tpu.matmul %99, %101, %cst_68 {dimension_numbers = #tpu.dot_dimension_numbers<[1], [0], [0], [1], [0, 0, 1, 1], [], []>} : vector<512x36xf32>, vector<36x72xf32>, vector<512x72xf32> -> vector<512x72xf32>
    %103 = arith.addf %97, %102 : vector<512x72xf32>
    %c2_69 = arith.constant 2 : index
    %c0_70 = arith.constant 0 : index
    %c0_71 = arith.constant 0 : index
    %c0_72 = arith.constant 0 : index
    %104 = vector.load %arg13[%c2_69, %c0_70, %c0_71, %c0_72] : memref<10x10x8x36xf32, #tpu.memory_space<vmem>>, vector<8x8x8x36xf32>
    %105 = vector.shape_cast %104 : vector<8x8x8x36xf32> to vector<512x36xf32>
    %c6 = arith.constant 6 : index
    %c0_73 = arith.constant 0 : index
    %c0_74 = arith.constant 0 : index
    %106 = vector.load %arg4[%c6, %c0_73, %c0_74] : memref<9x36x72xf32, #tpu.memory_space<vmem>>, vector<1x36x72xf32>
    %107 = vector.shape_cast %106 : vector<1x36x72xf32> to vector<36x72xf32>
    %cst_75 = arith.constant dense<0.000000e+00> : vector<512x72xf32>
    %108 = tpu.matmul %105, %107, %cst_75 {dimension_numbers = #tpu.dot_dimension_numbers<[1], [0], [0], [1], [0, 0, 1, 1], [], []>} : vector<512x36xf32>, vector<36x72xf32>, vector<512x72xf32> -> vector<512x72xf32>
    %109 = arith.addf %103, %108 : vector<512x72xf32>
    %c2_76 = arith.constant 2 : index
    %c1_77 = arith.constant 1 : index
    %c0_78 = arith.constant 0 : index
    %c0_79 = arith.constant 0 : index
    %110 = vector.load %arg13[%c2_76, %c1_77, %c0_78, %c0_79] : memref<10x10x8x36xf32, #tpu.memory_space<vmem>>, vector<8x8x8x36xf32>
    %111 = vector.shape_cast %110 : vector<8x8x8x36xf32> to vector<512x36xf32>
    %c7 = arith.constant 7 : index
    %c0_80 = arith.constant 0 : index
    %c0_81 = arith.constant 0 : index
    %112 = vector.load %arg4[%c7, %c0_80, %c0_81] : memref<9x36x72xf32, #tpu.memory_space<vmem>>, vector<1x36x72xf32>
    %113 = vector.shape_cast %112 : vector<1x36x72xf32> to vector<36x72xf32>
    %cst_82 = arith.constant dense<0.000000e+00> : vector<512x72xf32>
    %114 = tpu.matmul %111, %113, %cst_82 {dimension_numbers = #tpu.dot_dimension_numbers<[1], [0], [0], [1], [0, 0, 1, 1], [], []>} : vector<512x36xf32>, vector<36x72xf32>, vector<512x72xf32> -> vector<512x72xf32>
    %115 = arith.addf %109, %114 : vector<512x72xf32>
    %c2_83 = arith.constant 2 : index
    %c2_84 = arith.constant 2 : index
    %c0_85 = arith.constant 0 : index
    %c0_86 = arith.constant 0 : index
    %116 = vector.load %arg13[%c2_83, %c2_84, %c0_85, %c0_86] : memref<10x10x8x36xf32, #tpu.memory_space<vmem>>, vector<8x8x8x36xf32>
    %117 = vector.shape_cast %116 : vector<8x8x8x36xf32> to vector<512x36xf32>
    %c8 = arith.constant 8 : index
    %c0_87 = arith.constant 0 : index
    %c0_88 = arith.constant 0 : index
    %118 = vector.load %arg4[%c8, %c0_87, %c0_88] : memref<9x36x72xf32, #tpu.memory_space<vmem>>, vector<1x36x72xf32>
    %119 = vector.shape_cast %118 : vector<1x36x72xf32> to vector<36x72xf32>
    %cst_89 = arith.constant dense<0.000000e+00> : vector<512x72xf32>
    %120 = tpu.matmul %117, %119, %cst_89 {dimension_numbers = #tpu.dot_dimension_numbers<[1], [0], [0], [1], [0, 0, 1, 1], [], []>} : vector<512x36xf32>, vector<36x72xf32>, vector<512x72xf32> -> vector<512x72xf32>
    %121 = arith.addf %115, %120 : vector<512x72xf32>
    %122 = vector.shape_cast %121 : vector<512x72xf32> to vector<8x8x8x72xf32>
    %123 = vector.shape_cast %122 : vector<8x8x8x72xf32> to vector<4x2x8x8x72xf32>
    %124 = vector.extract_strided_slice %123 {offsets = [0, 0, 0, 0, 0], sizes = [4, 1, 8, 8, 72], strides = [1, 1, 1, 1, 1]} : vector<4x2x8x8x72xf32> to vector<4x1x8x8x72xf32>
    %125 = vector.shape_cast %124 : vector<4x1x8x8x72xf32> to vector<4x8x8x72xf32>
    %126 = vector.extract_strided_slice %123 {offsets = [0, 1, 0, 0, 0], sizes = [4, 1, 8, 8, 72], strides = [1, 1, 1, 1, 1]} : vector<4x2x8x8x72xf32> to vector<4x1x8x8x72xf32>
    %127 = vector.shape_cast %126 : vector<4x1x8x8x72xf32> to vector<4x8x8x72xf32>
    %128 = arith.maximumf %125, %127 : vector<4x8x8x72xf32>
    %129 = vector.shape_cast %128 : vector<4x8x8x72xf32> to vector<4x4x2x8x72xf32>
    %130 = vector.extract_strided_slice %129 {offsets = [0, 0, 0, 0, 0], sizes = [4, 4, 1, 8, 72], strides = [1, 1, 1, 1, 1]} : vector<4x4x2x8x72xf32> to vector<4x4x1x8x72xf32>
    %131 = vector.shape_cast %130 : vector<4x4x1x8x72xf32> to vector<4x4x8x72xf32>
    %132 = vector.extract_strided_slice %129 {offsets = [0, 0, 1, 0, 0], sizes = [4, 4, 1, 8, 72], strides = [1, 1, 1, 1, 1]} : vector<4x4x2x8x72xf32> to vector<4x4x1x8x72xf32>
    %133 = vector.shape_cast %132 : vector<4x4x1x8x72xf32> to vector<4x4x8x72xf32>
    %134 = arith.maximumf %131, %133 : vector<4x4x8x72xf32>
    %c0_90 = arith.constant 0 : index
    %c0_91 = arith.constant 0 : index
    %135 = vector.load %arg5[%c0_90, %c0_91] : memref<1x72xf32, #tpu.memory_space<vmem>>, vector<1x72xf32>
    %136 = vector.shape_cast %135 : vector<1x72xf32> to vector<1x1x1x72xf32>
    %137 = vector.broadcast %136 : vector<1x1x1x72xf32> to vector<4x4x8x72xf32>
    %138 = arith.addf %134, %137 : vector<4x4x8x72xf32>
    %cst_92 = arith.constant 0.000000e+00 : f32
    %139 = vector.broadcast %cst_92 : f32 to vector<4x4x8x72xf32>
    %140 = arith.maximumf %138, %139 : vector<4x4x8x72xf32>
    %cst_93 = arith.constant 0.000000e+00 : f32
    %141 = vector.broadcast %cst_93 : f32 to vector<6x6x8x72xf32>
    %c0_94 = arith.constant 0 : index
    %c0_95 = arith.constant 0 : index
    %c0_96 = arith.constant 0 : index
    %c0_97 = arith.constant 0 : index
    %142 = vector.load %arg14[%c0_94, %c0_95, %c0_96, %c0_97] : memref<6x6x8x72xf32, #tpu.memory_space<vmem>>, vector<6x6x8x72xf32>
    tpu.vector_store %arg14[%c0_94, %c0_95, %c0_96, %c0_97], %141 {strides = array<i32>} : memref<6x6x8x72xf32, #tpu.memory_space<vmem>>, vector<6x6x8x72xf32>,
    %c1_98 = arith.constant 1 : index
    %c1_99 = arith.constant 1 : index
    %c0_100 = arith.constant 0 : index
    %c0_101 = arith.constant 0 : index
    %143 = vector.load %arg14[%c1_98, %c1_99, %c0_100, %c0_101] : memref<6x6x8x72xf32, #tpu.memory_space<vmem>>, vector<4x4x8x72xf32>
    tpu.vector_store %arg14[%c1_98, %c1_99, %c0_100, %c0_101], %140 {strides = array<i32>} : memref<6x6x8x72xf32, #tpu.memory_space<vmem>>, vector<4x4x8x72xf32>,
    %cst_102 = arith.constant 0.000000e+00 : f32
    %144 = vector.broadcast %cst_102 : f32 to vector<128x144xf32>
    %c0_103 = arith.constant 0 : index
    %c0_104 = arith.constant 0 : index
    %c0_105 = arith.constant 0 : index
    %c0_106 = arith.constant 0 : index
    %145 = vector.load %arg14[%c0_103, %c0_104, %c0_105, %c0_106] : memref<6x6x8x72xf32, #tpu.memory_space<vmem>>, vector<4x4x8x72xf32>
    %146 = vector.shape_cast %145 : vector<4x4x8x72xf32> to vector<128x72xf32>
    %c0_107 = arith.constant 0 : index
    %c0_108 = arith.constant 0 : index
    %c0_109 = arith.constant 0 : index
    %147 = vector.load %arg6[%c0_107, %c0_108, %c0_109] : memref<9x72x144xf32, #tpu.memory_space<vmem>>, vector<1x72x144xf32>
    %148 = vector.shape_cast %147 : vector<1x72x144xf32> to vector<72x144xf32>
    %cst_110 = arith.constant dense<0.000000e+00> : vector<128x144xf32>
    %149 = tpu.matmul %146, %148, %cst_110 {dimension_numbers = #tpu.dot_dimension_numbers<[1], [0], [0], [1], [0, 0, 1, 1], [], []>} : vector<128x72xf32>, vector<72x144xf32>, vector<128x144xf32> -> vector<128x144xf32>
    %150 = arith.addf %144, %149 : vector<128x144xf32>
    %c0_111 = arith.constant 0 : index
    %c1_112 = arith.constant 1 : index
    %c0_113 = arith.constant 0 : index
    %c0_114 = arith.constant 0 : index
    %151 = vector.load %arg14[%c0_111, %c1_112, %c0_113, %c0_114] : memref<6x6x8x72xf32, #tpu.memory_space<vmem>>, vector<4x4x8x72xf32>
    %152 = vector.shape_cast %151 : vector<4x4x8x72xf32> to vector<128x72xf32>
    %c1_115 = arith.constant 1 : index
    %c0_116 = arith.constant 0 : index
    %c0_117 = arith.constant 0 : index
    %153 = vector.load %arg6[%c1_115, %c0_116, %c0_117] : memref<9x72x144xf32, #tpu.memory_space<vmem>>, vector<1x72x144xf32>
    %154 = vector.shape_cast %153 : vector<1x72x144xf32> to vector<72x144xf32>
    %cst_118 = arith.constant dense<0.000000e+00> : vector<128x144xf32>
    %155 = tpu.matmul %152, %154, %cst_118 {dimension_numbers = #tpu.dot_dimension_numbers<[1], [0], [0], [1], [0, 0, 1, 1], [], []>} : vector<128x72xf32>, vector<72x144xf32>, vector<128x144xf32> -> vector<128x144xf32>
    %156 = arith.addf %150, %155 : vector<128x144xf32>
    %c0_119 = arith.constant 0 : index
    %c2_120 = arith.constant 2 : index
    %c0_121 = arith.constant 0 : index
    %c0_122 = arith.constant 0 : index
    %157 = vector.load %arg14[%c0_119, %c2_120, %c0_121, %c0_122] : memref<6x6x8x72xf32, #tpu.memory_space<vmem>>, vector<4x4x8x72xf32>
    %158 = vector.shape_cast %157 : vector<4x4x8x72xf32> to vector<128x72xf32>
    %c2_123 = arith.constant 2 : index
    %c0_124 = arith.constant 0 : index
    %c0_125 = arith.constant 0 : index
    %159 = vector.load %arg6[%c2_123, %c0_124, %c0_125] : memref<9x72x144xf32, #tpu.memory_space<vmem>>, vector<1x72x144xf32>
    %160 = vector.shape_cast %159 : vector<1x72x144xf32> to vector<72x144xf32>
    %cst_126 = arith.constant dense<0.000000e+00> : vector<128x144xf32>
    %161 = tpu.matmul %158, %160, %cst_126 {dimension_numbers = #tpu.dot_dimension_numbers<[1], [0], [0], [1], [0, 0, 1, 1], [], []>} : vector<128x72xf32>, vector<72x144xf32>, vector<128x144xf32> -> vector<128x144xf32>
    %162 = arith.addf %156, %161 : vector<128x144xf32>
    %c1_127 = arith.constant 1 : index
    %c0_128 = arith.constant 0 : index
    %c0_129 = arith.constant 0 : index
    %c0_130 = arith.constant 0 : index
    %163 = vector.load %arg14[%c1_127, %c0_128, %c0_129, %c0_130] : memref<6x6x8x72xf32, #tpu.memory_space<vmem>>, vector<4x4x8x72xf32>
    %164 = vector.shape_cast %163 : vector<4x4x8x72xf32> to vector<128x72xf32>
    %c3_131 = arith.constant 3 : index
    %c0_132 = arith.constant 0 : index
    %c0_133 = arith.constant 0 : index
    %165 = vector.load %arg6[%c3_131, %c0_132, %c0_133] : memref<9x72x144xf32, #tpu.memory_space<vmem>>, vector<1x72x144xf32>
    %166 = vector.shape_cast %165 : vector<1x72x144xf32> to vector<72x144xf32>
    %cst_134 = arith.constant dense<0.000000e+00> : vector<128x144xf32>
    %167 = tpu.matmul %164, %166, %cst_134 {dimension_numbers = #tpu.dot_dimension_numbers<[1], [0], [0], [1], [0, 0, 1, 1], [], []>} : vector<128x72xf32>, vector<72x144xf32>, vector<128x144xf32> -> vector<128x144xf32>
    %168 = arith.addf %162, %167 : vector<128x144xf32>
    %c1_135 = arith.constant 1 : index
    %c1_136 = arith.constant 1 : index
    %c0_137 = arith.constant 0 : index
    %c0_138 = arith.constant 0 : index
    %169 = vector.load %arg14[%c1_135, %c1_136, %c0_137, %c0_138] : memref<6x6x8x72xf32, #tpu.memory_space<vmem>>, vector<4x4x8x72xf32>
    %170 = vector.shape_cast %169 : vector<4x4x8x72xf32> to vector<128x72xf32>
    %c4_139 = arith.constant 4 : index
    %c0_140 = arith.constant 0 : index
    %c0_141 = arith.constant 0 : index
    %171 = vector.load %arg6[%c4_139, %c0_140, %c0_141] : memref<9x72x144xf32, #tpu.memory_space<vmem>>, vector<1x72x144xf32>
    %172 = vector.shape_cast %171 : vector<1x72x144xf32> to vector<72x144xf32>
    %cst_142 = arith.constant dense<0.000000e+00> : vector<128x144xf32>
    %173 = tpu.matmul %170, %172, %cst_142 {dimension_numbers = #tpu.dot_dimension_numbers<[1], [0], [0], [1], [0, 0, 1, 1], [], []>} : vector<128x72xf32>, vector<72x144xf32>, vector<128x144xf32> -> vector<128x144xf32>
    %174 = arith.addf %168, %173 : vector<128x144xf32>
    %c1_143 = arith.constant 1 : index
    %c2_144 = arith.constant 2 : index
    %c0_145 = arith.constant 0 : index
    %c0_146 = arith.constant 0 : index
    %175 = vector.load %arg14[%c1_143, %c2_144, %c0_145, %c0_146] : memref<6x6x8x72xf32, #tpu.memory_space<vmem>>, vector<4x4x8x72xf32>
    %176 = vector.shape_cast %175 : vector<4x4x8x72xf32> to vector<128x72xf32>
    %c5_147 = arith.constant 5 : index
    %c0_148 = arith.constant 0 : index
    %c0_149 = arith.constant 0 : index
    %177 = vector.load %arg6[%c5_147, %c0_148, %c0_149] : memref<9x72x144xf32, #tpu.memory_space<vmem>>, vector<1x72x144xf32>
    %178 = vector.shape_cast %177 : vector<1x72x144xf32> to vector<72x144xf32>
    %cst_150 = arith.constant dense<0.000000e+00> : vector<128x144xf32>
    %179 = tpu.matmul %176, %178, %cst_150 {dimension_numbers = #tpu.dot_dimension_numbers<[1], [0], [0], [1], [0, 0, 1, 1], [], []>} : vector<128x72xf32>, vector<72x144xf32>, vector<128x144xf32> -> vector<128x144xf32>
    %180 = arith.addf %174, %179 : vector<128x144xf32>
    %c2_151 = arith.constant 2 : index
    %c0_152 = arith.constant 0 : index
    %c0_153 = arith.constant 0 : index
    %c0_154 = arith.constant 0 : index
    %181 = vector.load %arg14[%c2_151, %c0_152, %c0_153, %c0_154] : memref<6x6x8x72xf32, #tpu.memory_space<vmem>>, vector<4x4x8x72xf32>
    %182 = vector.shape_cast %181 : vector<4x4x8x72xf32> to vector<128x72xf32>
    %c6_155 = arith.constant 6 : index
    %c0_156 = arith.constant 0 : index
    %c0_157 = arith.constant 0 : index
    %183 = vector.load %arg6[%c6_155, %c0_156, %c0_157] : memref<9x72x144xf32, #tpu.memory_space<vmem>>, vector<1x72x144xf32>
    %184 = vector.shape_cast %183 : vector<1x72x144xf32> to vector<72x144xf32>
    %cst_158 = arith.constant dense<0.000000e+00> : vector<128x144xf32>
    %185 = tpu.matmul %182, %184, %cst_158 {dimension_numbers = #tpu.dot_dimension_numbers<[1], [0], [0], [1], [0, 0, 1, 1], [], []>} : vector<128x72xf32>, vector<72x144xf32>, vector<128x144xf32> -> vector<128x144xf32>
    %186 = arith.addf %180, %185 : vector<128x144xf32>
    %c2_159 = arith.constant 2 : index
    %c1_160 = arith.constant 1 : index
    %c0_161 = arith.constant 0 : index
    %c0_162 = arith.constant 0 : index
    %187 = vector.load %arg14[%c2_159, %c1_160, %c0_161, %c0_162] : memref<6x6x8x72xf32, #tpu.memory_space<vmem>>, vector<4x4x8x72xf32>
    %188 = vector.shape_cast %187 : vector<4x4x8x72xf32> to vector<128x72xf32>
    %c7_163 = arith.constant 7 : index
    %c0_164 = arith.constant 0 : index
    %c0_165 = arith.constant 0 : index
    %189 = vector.load %arg6[%c7_163, %c0_164, %c0_165] : memref<9x72x144xf32, #tpu.memory_space<vmem>>, vector<1x72x144xf32>
    %190 = vector.shape_cast %189 : vector<1x72x144xf32> to vector<72x144xf32>
    %cst_166 = arith.constant dense<0.000000e+00> : vector<128x144xf32>
    %191 = tpu.matmul %188, %190, %cst_166 {dimension_numbers = #tpu.dot_dimension_numbers<[1], [0], [0], [1], [0, 0, 1, 1], [], []>} : vector<128x72xf32>, vector<72x144xf32>, vector<128x144xf32> -> vector<128x144xf32>
    %192 = arith.addf %186, %191 : vector<128x144xf32>
    %c2_167 = arith.constant 2 : index
    %c2_168 = arith.constant 2 : index
    %c0_169 = arith.constant 0 : index
    %c0_170 = arith.constant 0 : index
    %193 = vector.load %arg14[%c2_167, %c2_168, %c0_169, %c0_170] : memref<6x6x8x72xf32, #tpu.memory_space<vmem>>, vector<4x4x8x72xf32>
    %194 = vector.shape_cast %193 : vector<4x4x8x72xf32> to vector<128x72xf32>
    %c8_171 = arith.constant 8 : index
    %c0_172 = arith.constant 0 : index
    %c0_173 = arith.constant 0 : index
    %195 = vector.load %arg6[%c8_171, %c0_172, %c0_173] : memref<9x72x144xf32, #tpu.memory_space<vmem>>, vector<1x72x144xf32>
    %196 = vector.shape_cast %195 : vector<1x72x144xf32> to vector<72x144xf32>
    %cst_174 = arith.constant dense<0.000000e+00> : vector<128x144xf32>
    %197 = tpu.matmul %194, %196, %cst_174 {dimension_numbers = #tpu.dot_dimension_numbers<[1], [0], [0], [1], [0, 0, 1, 1], [], []>} : vector<128x72xf32>, vector<72x144xf32>, vector<128x144xf32> -> vector<128x144xf32>
    %198 = arith.addf %192, %197 : vector<128x144xf32>
    %199 = vector.shape_cast %198 : vector<128x144xf32> to vector<4x4x8x144xf32>
    %200 = vector.shape_cast %199 : vector<4x4x8x144xf32> to vector<2x2x4x8x144xf32>
    %201 = vector.extract_strided_slice %200 {offsets = [0, 0, 0, 0, 0], sizes = [2, 1, 4, 8, 144], strides = [1, 1, 1, 1, 1]} : vector<2x2x4x8x144xf32> to vector<2x1x4x8x144xf32>
    %202 = vector.shape_cast %201 : vector<2x1x4x8x144xf32> to vector<2x4x8x144xf32>
    %203 = vector.extract_strided_slice %200 {offsets = [0, 1, 0, 0, 0], sizes = [2, 1, 4, 8, 144], strides = [1, 1, 1, 1, 1]} : vector<2x2x4x8x144xf32> to vector<2x1x4x8x144xf32>
    %204 = vector.shape_cast %203 : vector<2x1x4x8x144xf32> to vector<2x4x8x144xf32>
    %205 = arith.maximumf %202, %204 : vector<2x4x8x144xf32>
    %206 = vector.shape_cast %205 : vector<2x4x8x144xf32> to vector<2x2x2x8x144xf32>
    %207 = vector.extract_strided_slice %206 {offsets = [0, 0, 0, 0, 0], sizes = [2, 2, 1, 8, 144], strides = [1, 1, 1, 1, 1]} : vector<2x2x2x8x144xf32> to vector<2x2x1x8x144xf32>
    %208 = vector.shape_cast %207 : vector<2x2x1x8x144xf32> to vector<2x2x8x144xf32>
    %209 = vector.extract_strided_slice %206 {offsets = [0, 0, 1, 0, 0], sizes = [2, 2, 1, 8, 144], strides = [1, 1, 1, 1, 1]} : vector<2x2x2x8x144xf32> to vector<2x2x1x8x144xf32>
    %210 = vector.shape_cast %209 : vector<2x2x1x8x144xf32> to vector<2x2x8x144xf32>
    %211 = arith.maximumf %208, %210 : vector<2x2x8x144xf32>
    %c0_175 = arith.constant 0 : index
    %c0_176 = arith.constant 0 : index
    %212 = vector.load %arg7[%c0_175, %c0_176] : memref<1x144xf32, #tpu.memory_space<vmem>>, vector<1x144xf32>
    %213 = vector.shape_cast %212 : vector<1x144xf32> to vector<1x1x1x144xf32>
    %214 = vector.broadcast %213 : vector<1x1x1x144xf32> to vector<2x2x8x144xf32>
    %215 = arith.addf %211, %214 : vector<2x2x8x144xf32>
    %cst_177 = arith.constant 0.000000e+00 : f32
    %216 = vector.broadcast %cst_177 : f32 to vector<2x2x8x144xf32>
    %217 = arith.maximumf %215, %216 : vector<2x2x8x144xf32>
    %cst_178 = arith.constant 0.000000e+00 : f32
    %218 = vector.broadcast %cst_178 : f32 to vector<4x4x8x144xf32>
    %c0_179 = arith.constant 0 : index
    %c0_180 = arith.constant 0 : index
    %c0_181 = arith.constant 0 : index
    %c0_182 = arith.constant 0 : index
    %219 = vector.load %arg15[%c0_179, %c0_180, %c0_181, %c0_182] : memref<4x4x8x144xf32, #tpu.memory_space<vmem>>, vector<4x4x8x144xf32>
    tpu.vector_store %arg15[%c0_179, %c0_180, %c0_181, %c0_182], %218 {strides = array<i32>} : memref<4x4x8x144xf32, #tpu.memory_space<vmem>>, vector<4x4x8x144xf32>,
    %c1_183 = arith.constant 1 : index
    %c1_184 = arith.constant 1 : index
    %c0_185 = arith.constant 0 : index
    %c0_186 = arith.constant 0 : index
    %220 = vector.load %arg15[%c1_183, %c1_184, %c0_185, %c0_186] : memref<4x4x8x144xf32, #tpu.memory_space<vmem>>, vector<2x2x8x144xf32>
    tpu.vector_store %arg15[%c1_183, %c1_184, %c0_185, %c0_186], %217 {strides = array<i32>} : memref<4x4x8x144xf32, #tpu.memory_space<vmem>>, vector<2x2x8x144xf32>,
    %cst_187 = arith.constant 0.000000e+00 : f32
    %221 = vector.broadcast %cst_187 : f32 to vector<32x288xf32>
    %c0_188 = arith.constant 0 : index
    %c0_189 = arith.constant 0 : index
    %c0_190 = arith.constant 0 : index
    %c0_191 = arith.constant 0 : index
    %222 = vector.load %arg15[%c0_188, %c0_189, %c0_190, %c0_191] : memref<4x4x8x144xf32, #tpu.memory_space<vmem>>, vector<2x2x8x144xf32>
    %223 = vector.shape_cast %222 : vector<2x2x8x144xf32> to vector<32x144xf32>
    %c0_192 = arith.constant 0 : index
    %c0_193 = arith.constant 0 : index
    %c0_194 = arith.constant 0 : index
    %224 = vector.load %arg8[%c0_192, %c0_193, %c0_194] : memref<9x144x288xf32, #tpu.memory_space<vmem>>, vector<1x144x288xf32>
    %225 = vector.shape_cast %224 : vector<1x144x288xf32> to vector<144x288xf32>
    %cst_195 = arith.constant dense<0.000000e+00> : vector<32x288xf32>
    %226 = tpu.matmul %223, %225, %cst_195 {dimension_numbers = #tpu.dot_dimension_numbers<[1], [0], [0], [1], [0, 0, 1, 1], [], []>} : vector<32x144xf32>, vector<144x288xf32>, vector<32x288xf32> -> vector<32x288xf32>
    %227 = arith.addf %221, %226 : vector<32x288xf32>
    %c0_196 = arith.constant 0 : index
    %c1_197 = arith.constant 1 : index
    %c0_198 = arith.constant 0 : index
    %c0_199 = arith.constant 0 : index
    %228 = vector.load %arg15[%c0_196, %c1_197, %c0_198, %c0_199] : memref<4x4x8x144xf32, #tpu.memory_space<vmem>>, vector<2x2x8x144xf32>
    %229 = vector.shape_cast %228 : vector<2x2x8x144xf32> to vector<32x144xf32>
    %c1_200 = arith.constant 1 : index
    %c0_201 = arith.constant 0 : index
    %c0_202 = arith.constant 0 : index
    %230 = vector.load %arg8[%c1_200, %c0_201, %c0_202] : memref<9x144x288xf32, #tpu.memory_space<vmem>>, vector<1x144x288xf32>
    %231 = vector.shape_cast %230 : vector<1x144x288xf32> to vector<144x288xf32>
    %cst_203 = arith.constant dense<0.000000e+00> : vector<32x288xf32>
    %232 = tpu.matmul %229, %231, %cst_203 {dimension_numbers = #tpu.dot_dimension_numbers<[1], [0], [0], [1], [0, 0, 1, 1], [], []>} : vector<32x144xf32>, vector<144x288xf32>, vector<32x288xf32> -> vector<32x288xf32>
    %233 = arith.addf %227, %232 : vector<32x288xf32>
    %c0_204 = arith.constant 0 : index
    %c2_205 = arith.constant 2 : index
    %c0_206 = arith.constant 0 : index
    %c0_207 = arith.constant 0 : index
    %234 = vector.load %arg15[%c0_204, %c2_205, %c0_206, %c0_207] : memref<4x4x8x144xf32, #tpu.memory_space<vmem>>, vector<2x2x8x144xf32>
    %235 = vector.shape_cast %234 : vector<2x2x8x144xf32> to vector<32x144xf32>
    %c2_208 = arith.constant 2 : index
    %c0_209 = arith.constant 0 : index
    %c0_210 = arith.constant 0 : index
    %236 = vector.load %arg8[%c2_208, %c0_209, %c0_210] : memref<9x144x288xf32, #tpu.memory_space<vmem>>, vector<1x144x288xf32>
    %237 = vector.shape_cast %236 : vector<1x144x288xf32> to vector<144x288xf32>
    %cst_211 = arith.constant dense<0.000000e+00> : vector<32x288xf32>
    %238 = tpu.matmul %235, %237, %cst_211 {dimension_numbers = #tpu.dot_dimension_numbers<[1], [0], [0], [1], [0, 0, 1, 1], [], []>} : vector<32x144xf32>, vector<144x288xf32>, vector<32x288xf32> -> vector<32x288xf32>
    %239 = arith.addf %233, %238 : vector<32x288xf32>
    %c1_212 = arith.constant 1 : index
    %c0_213 = arith.constant 0 : index
    %c0_214 = arith.constant 0 : index
    %c0_215 = arith.constant 0 : index
    %240 = vector.load %arg15[%c1_212, %c0_213, %c0_214, %c0_215] : memref<4x4x8x144xf32, #tpu.memory_space<vmem>>, vector<2x2x8x144xf32>
    %241 = vector.shape_cast %240 : vector<2x2x8x144xf32> to vector<32x144xf32>
    %c3_216 = arith.constant 3 : index
    %c0_217 = arith.constant 0 : index
    %c0_218 = arith.constant 0 : index
    %242 = vector.load %arg8[%c3_216, %c0_217, %c0_218] : memref<9x144x288xf32, #tpu.memory_space<vmem>>, vector<1x144x288xf32>
    %243 = vector.shape_cast %242 : vector<1x144x288xf32> to vector<144x288xf32>
    %cst_219 = arith.constant dense<0.000000e+00> : vector<32x288xf32>
    %244 = tpu.matmul %241, %243, %cst_219 {dimension_numbers = #tpu.dot_dimension_numbers<[1], [0], [0], [1], [0, 0, 1, 1], [], []>} : vector<32x144xf32>, vector<144x288xf32>, vector<32x288xf32> -> vector<32x288xf32>
    %245 = arith.addf %239, %244 : vector<32x288xf32>
    %c1_220 = arith.constant 1 : index
    %c1_221 = arith.constant 1 : index
    %c0_222 = arith.constant 0 : index
    %c0_223 = arith.constant 0 : index
    %246 = vector.load %arg15[%c1_220, %c1_221, %c0_222, %c0_223] : memref<4x4x8x144xf32, #tpu.memory_space<vmem>>, vector<2x2x8x144xf32>
    %247 = vector.shape_cast %246 : vector<2x2x8x144xf32> to vector<32x144xf32>
    %c4_224 = arith.constant 4 : index
    %c0_225 = arith.constant 0 : index
    %c0_226 = arith.constant 0 : index
    %248 = vector.load %arg8[%c4_224, %c0_225, %c0_226] : memref<9x144x288xf32, #tpu.memory_space<vmem>>, vector<1x144x288xf32>
    %249 = vector.shape_cast %248 : vector<1x144x288xf32> to vector<144x288xf32>
    %cst_227 = arith.constant dense<0.000000e+00> : vector<32x288xf32>
    %250 = tpu.matmul %247, %249, %cst_227 {dimension_numbers = #tpu.dot_dimension_numbers<[1], [0], [0], [1], [0, 0, 1, 1], [], []>} : vector<32x144xf32>, vector<144x288xf32>, vector<32x288xf32> -> vector<32x288xf32>
    %251 = arith.addf %245, %250 : vector<32x288xf32>
    %c1_228 = arith.constant 1 : index
    %c2_229 = arith.constant 2 : index
    %c0_230 = arith.constant 0 : index
    %c0_231 = arith.constant 0 : index
    %252 = vector.load %arg15[%c1_228, %c2_229, %c0_230, %c0_231] : memref<4x4x8x144xf32, #tpu.memory_space<vmem>>, vector<2x2x8x144xf32>
    %253 = vector.shape_cast %252 : vector<2x2x8x144xf32> to vector<32x144xf32>
    %c5_232 = arith.constant 5 : index
    %c0_233 = arith.constant 0 : index
    %c0_234 = arith.constant 0 : index
    %254 = vector.load %arg8[%c5_232, %c0_233, %c0_234] : memref<9x144x288xf32, #tpu.memory_space<vmem>>, vector<1x144x288xf32>
    %255 = vector.shape_cast %254 : vector<1x144x288xf32> to vector<144x288xf32>
    %cst_235 = arith.constant dense<0.000000e+00> : vector<32x288xf32>
    %256 = tpu.matmul %253, %255, %cst_235 {dimension_numbers = #tpu.dot_dimension_numbers<[1], [0], [0], [1], [0, 0, 1, 1], [], []>} : vector<32x144xf32>, vector<144x288xf32>, vector<32x288xf32> -> vector<32x288xf32>
    %257 = arith.addf %251, %256 : vector<32x288xf32>
    %c2_236 = arith.constant 2 : index
    %c0_237 = arith.constant 0 : index
    %c0_238 = arith.constant 0 : index
    %c0_239 = arith.constant 0 : index
    %258 = vector.load %arg15[%c2_236, %c0_237, %c0_238, %c0_239] : memref<4x4x8x144xf32, #tpu.memory_space<vmem>>, vector<2x2x8x144xf32>
    %259 = vector.shape_cast %258 : vector<2x2x8x144xf32> to vector<32x144xf32>
    %c6_240 = arith.constant 6 : index
    %c0_241 = arith.constant 0 : index
    %c0_242 = arith.constant 0 : index
    %260 = vector.load %arg8[%c6_240, %c0_241, %c0_242] : memref<9x144x288xf32, #tpu.memory_space<vmem>>, vector<1x144x288xf32>
    %261 = vector.shape_cast %260 : vector<1x144x288xf32> to vector<144x288xf32>
    %cst_243 = arith.constant dense<0.000000e+00> : vector<32x288xf32>
    %262 = tpu.matmul %259, %261, %cst_243 {dimension_numbers = #tpu.dot_dimension_numbers<[1], [0], [0], [1], [0, 0, 1, 1], [], []>} : vector<32x144xf32>, vector<144x288xf32>, vector<32x288xf32> -> vector<32x288xf32>
    %263 = arith.addf %257, %262 : vector<32x288xf32>
    %c2_244 = arith.constant 2 : index
    %c1_245 = arith.constant 1 : index
    %c0_246 = arith.constant 0 : index
    %c0_247 = arith.constant 0 : index
    %264 = vector.load %arg15[%c2_244, %c1_245, %c0_246, %c0_247] : memref<4x4x8x144xf32, #tpu.memory_space<vmem>>, vector<2x2x8x144xf32>
    %265 = vector.shape_cast %264 : vector<2x2x8x144xf32> to vector<32x144xf32>
    %c7_248 = arith.constant 7 : index
    %c0_249 = arith.constant 0 : index
    %c0_250 = arith.constant 0 : index
    %266 = vector.load %arg8[%c7_248, %c0_249, %c0_250] : memref<9x144x288xf32, #tpu.memory_space<vmem>>, vector<1x144x288xf32>
    %267 = vector.shape_cast %266 : vector<1x144x288xf32> to vector<144x288xf32>
    %cst_251 = arith.constant dense<0.000000e+00> : vector<32x288xf32>
    %268 = tpu.matmul %265, %267, %cst_251 {dimension_numbers = #tpu.dot_dimension_numbers<[1], [0], [0], [1], [0, 0, 1, 1], [], []>} : vector<32x144xf32>, vector<144x288xf32>, vector<32x288xf32> -> vector<32x288xf32>
    %269 = arith.addf %263, %268 : vector<32x288xf32>
    %c2_252 = arith.constant 2 : index
    %c2_253 = arith.constant 2 : index
    %c0_254 = arith.constant 0 : index
    %c0_255 = arith.constant 0 : index
    %270 = vector.load %arg15[%c2_252, %c2_253, %c0_254, %c0_255] : memref<4x4x8x144xf32, #tpu.memory_space<vmem>>, vector<2x2x8x144xf32>
    %271 = vector.shape_cast %270 : vector<2x2x8x144xf32> to vector<32x144xf32>
    %c8_256 = arith.constant 8 : index
    %c0_257 = arith.constant 0 : index
    %c0_258 = arith.constant 0 : index
    %272 = vector.load %arg8[%c8_256, %c0_257, %c0_258] : memref<9x144x288xf32, #tpu.memory_space<vmem>>, vector<1x144x288xf32>
    %273 = vector.shape_cast %272 : vector<1x144x288xf32> to vector<144x288xf32>
    %cst_259 = arith.constant dense<0.000000e+00> : vector<32x288xf32>
    %274 = tpu.matmul %271, %273, %cst_259 {dimension_numbers = #tpu.dot_dimension_numbers<[1], [0], [0], [1], [0, 0, 1, 1], [], []>} : vector<32x144xf32>, vector<144x288xf32>, vector<32x288xf32> -> vector<32x288xf32>
    %275 = arith.addf %269, %274 : vector<32x288xf32>
    %276 = vector.shape_cast %275 : vector<32x288xf32> to vector<2x2x8x288xf32>
    %277 = vector.shape_cast %276 : vector<2x2x8x288xf32> to vector<1x2x2x8x288xf32>
    %278 = vector.extract_strided_slice %277 {offsets = [0, 0, 0, 0, 0], sizes = [1, 1, 2, 8, 288], strides = [1, 1, 1, 1, 1]} : vector<1x2x2x8x288xf32> to vector<1x1x2x8x288xf32>
    %279 = vector.shape_cast %278 : vector<1x1x2x8x288xf32> to vector<1x2x8x288xf32>
    %280 = vector.extract_strided_slice %277 {offsets = [0, 1, 0, 0, 0], sizes = [1, 1, 2, 8, 288], strides = [1, 1, 1, 1, 1]} : vector<1x2x2x8x288xf32> to vector<1x1x2x8x288xf32>
    %281 = vector.shape_cast %280 : vector<1x1x2x8x288xf32> to vector<1x2x8x288xf32>
    %282 = arith.maximumf %279, %281 : vector<1x2x8x288xf32>
    %283 = vector.shape_cast %282 : vector<1x2x8x288xf32> to vector<1x1x2x8x288xf32>
    %284 = vector.extract_strided_slice %283 {offsets = [0, 0, 0, 0, 0], sizes = [1, 1, 1, 8, 288], strides = [1, 1, 1, 1, 1]} : vector<1x1x2x8x288xf32> to vector<1x1x1x8x288xf32>
    %285 = vector.shape_cast %284 : vector<1x1x1x8x288xf32> to vector<1x1x8x288xf32>
    %286 = vector.extract_strided_slice %283 {offsets = [0, 0, 1, 0, 0], sizes = [1, 1, 1, 8, 288], strides = [1, 1, 1, 1, 1]} : vector<1x1x2x8x288xf32> to vector<1x1x1x8x288xf32>
    %287 = vector.shape_cast %286 : vector<1x1x1x8x288xf32> to vector<1x1x8x288xf32>
    %288 = arith.maximumf %285, %287 : vector<1x1x8x288xf32>
    %c0_260 = arith.constant 0 : index
    %c0_261 = arith.constant 0 : index
    %289 = vector.load %arg9[%c0_260, %c0_261] : memref<1x288xf32, #tpu.memory_space<vmem>>, vector<1x288xf32>
    %290 = vector.shape_cast %289 : vector<1x288xf32> to vector<1x1x1x288xf32>
    %291 = vector.broadcast %290 : vector<1x1x1x288xf32> to vector<1x1x8x288xf32>
    %292 = arith.addf %288, %291 : vector<1x1x8x288xf32>
    %cst_262 = arith.constant 0.000000e+00 : f32
    %293 = vector.broadcast %cst_262 : f32 to vector<1x1x8x288xf32>
    %294 = arith.maximumf %292, %293 : vector<1x1x8x288xf32>
    %295 = vector.shape_cast %294 : vector<1x1x8x288xf32> to vector<8x288xf32>
    %c0_263 = arith.constant 0 : index
    %c0_264 = arith.constant 0 : index
    %296 = vector.load %arg10[%c0_263, %c0_264] : memref<288x128xf32, #tpu.memory_space<vmem>>, vector<288x128xf32>
    %cst_265 = arith.constant dense<0.000000e+00> : vector<8x128xf32>
    %297 = tpu.matmul %295, %296, %cst_265 {dimension_numbers = #tpu.dot_dimension_numbers<[1], [0], [0], [1], [0, 0, 1, 1], [], []>} : vector<8x288xf32>, vector<288x128xf32>, vector<8x128xf32> -> vector<8x128xf32>
    %c0_266 = arith.constant 0 : index
    %c0_267 = arith.constant 0 : index
    %298 = vector.load %arg11[%c0_266, %c0_267] : memref<1x128xf32, #tpu.memory_space<vmem>>, vector<1x128xf32>
    %299 = vector.broadcast %298 : vector<1x128xf32> to vector<8x128xf32>
    %300 = arith.addf %297, %299 : vector<8x128xf32>
    %c0_268 = arith.constant 0 : index
    %c0_269 = arith.constant 0 : index
    %301 = vector.load %arg12[%c0_268, %c0_269] : memref<8x128xf32, #tpu.memory_space<vmem>>, vector<8x128xf32>
    tpu.vector_store %arg12[%c0_268, %c0_269], %300 {strides = array<i32>} : memref<8x128xf32, #tpu.memory_space<vmem>>, vector<8x128xf32>,
    return
  }
  func.func @transform_0(%arg0: i32) -> (i32, i32, i32) {
    %c0_i32 = arith.constant 0 : i32
    %c0_i32_0 = arith.constant 0 : i32
    %c0_i32_1 = arith.constant 0 : i32
    return %c0_i32, %arg0, %c0_i32_0 : i32, i32, i32
  }
  func.func @transform_1(%arg0: i32) -> (i32, i32, i32) {
    %c0_i32 = arith.constant 0 : i32
    %c0_i32_0 = arith.constant 0 : i32
    %c0_i32_1 = arith.constant 0 : i32
    %c0_i32_2 = arith.constant 0 : i32
    return %c0_i32, %c0_i32_0, %c0_i32_1 : i32, i32, i32
  }
  func.func @transform_2(%arg0: i32) -> (i32, i32) {
    %c0_i32 = arith.constant 0 : i32
    %c0_i32_0 = arith.constant 0 : i32
    %c0_i32_1 = arith.constant 0 : i32
    return %c0_i32, %c0_i32_0 : i32, i32
  }
  func.func @transform_3(%arg0: i32) -> (i32, i32, i32) {
    %c0_i32 = arith.constant 0 : i32
    %c0_i32_0 = arith.constant 0 : i32
    %c0_i32_1 = arith.constant 0 : i32
    %c0_i32_2 = arith.constant 0 : i32
    return %c0_i32, %c0_i32_0, %c0_i32_1 : i32, i32, i32
  }
  func.func @transform_4(%arg0: i32) -> (i32, i32) {
    %c0_i32 = arith.constant 0 : i32
    %c0_i32_0 = arith.constant 0 : i32
    %c0_i32_1 = arith.constant 0 : i32
    return %c0_i32, %c0_i32_0 : i32, i32
  }
  func.func @transform_5(%arg0: i32) -> (i32, i32, i32) {
    %c0_i32 = arith.constant 0 : i32
    %c0_i32_0 = arith.constant 0 : i32
    %c0_i32_1 = arith.constant 0 : i32
    %c0_i32_2 = arith.constant 0 : i32
    return %c0_i32, %c0_i32_0, %c0_i32_1 : i32, i32, i32
  }
  func.func @transform_6(%arg0: i32) -> (i32, i32) {
    %c0_i32 = arith.constant 0 : i32
    %c0_i32_0 = arith.constant 0 : i32
    %c0_i32_1 = arith.constant 0 : i32
    return %c0_i32, %c0_i32_0 : i32, i32
  }
  func.func @transform_7(%arg0: i32) -> (i32, i32, i32) {
    %c0_i32 = arith.constant 0 : i32
    %c0_i32_0 = arith.constant 0 : i32
    %c0_i32_1 = arith.constant 0 : i32
    %c0_i32_2 = arith.constant 0 : i32
    return %c0_i32, %c0_i32_0, %c0_i32_1 : i32, i32, i32
  }
  func.func @transform_8(%arg0: i32) -> (i32, i32) {
    %c0_i32 = arith.constant 0 : i32
    %c0_i32_0 = arith.constant 0 : i32
    %c0_i32_1 = arith.constant 0 : i32
    return %c0_i32, %c0_i32_0 : i32, i32
  }
  func.func @transform_9(%arg0: i32) -> (i32, i32) {
    %c0_i32 = arith.constant 0 : i32
    %c0_i32_0 = arith.constant 0 : i32
    %c0_i32_1 = arith.constant 0 : i32
    return %c0_i32, %c0_i32_0 : i32, i32
  }
  func.func @transform_10(%arg0: i32) -> (i32, i32) {
    %c0_i32 = arith.constant 0 : i32
    %c0_i32_0 = arith.constant 0 : i32
    %c0_i32_1 = arith.constant 0 : i32
    return %c0_i32, %c0_i32_0 : i32, i32
  }
  func.func @transform_11(%arg0: i32) -> (i32, i32) {
    %c0_i32 = arith.constant 0 : i32
    %c0_i32_0 = arith.constant 0 : i32
    return %arg0, %c0_i32 : i32, i32
  }
}

</mosaic_0001>

<bundles_post_ra>
// kernel: _lambda_.1
= control target key start
LH: loop header
LB: loop body
LE: loop exit
PB: predicated region body
PF: predicated region fallthrough
CT: control target
= control target key end

     0   :  { %16 = vsyncpa [#allocation7], 0  ;;  %s20135_s17 = smov 0   ;;  %s20137_s18 = smov 0   ;;  %s26019_s0 = inlined_call_operand.vmem [shape: f32[18,16,18], index: 0, kind: input, shape index: {}]   ;;  %s26020_s1 = inlined_call_operand.vmem [shape: f32[3,18,576], index: 1, kind: input, shape index: {}]   ;;  %s26021_s2 = inlined_call_operand.vmem [shape: f32[1,36], index: 2, kind: input, shape index: {}]   ;;  %s26022_s3 = inlined_call_operand.vmem [shape: f32[9,36,72], index: 3, kind: input, shape index: {}]   ;;  %s26023_s4 = inlined_call_operand.vmem [shape: f32[1,72], index: 4, kind: input, shape index: {}]   ;;  %s26024_s5 = inlined_call_operand.hbm [shape: f32[9,72,144], index: 5, kind: input, shape index: {}]   ;;  %s26025_s6 = inlined_call_operand.vmem [shape: f32[1,144], index: 6, kind: input, shape index: {}]   ;;  %s26026_s7 = inlined_call_operand.vmem [shape: f32[9,144,288], index: 7, kind: input, shape index: {}]   ;;  %s26027_s8 = inlined_call_operand.vmem [shape: f32[1,288], index: 8, kind: input, shape index: {}]   ;;  %s26028_s9 = inlined_call_operand.vmem [shape: f32[288,128], index: 9, kind: input, shape index: {}]   ;;  %s26029_s10 = inlined_call_operand.vmem [shape: f32[1,128], index: 10, kind: input, shape index: {}]   ;;  %s26030_s11 = inlined_call_operand.vmem [shape: f32[16,128], index: 11, kind: output, shape index: {}]  }
   0x1   :  { %s20139_s19 = smov 0  }
   0x2 LB: > { %s20151_s20 = sadd.s32 4294967295, %s20059_s19   ;;  %s20154_s21 = sadd.s32 1, %s20059_s19   ;;  %s20059_s19 = sphi %s20139_s19, %s26132_s19   ;;  %s20055_s18 = sphi %s20137_s18, %s26131_s18   ;;  %s20051_s17 = sphi %s20135_s17, %s26130_s17  }
   0x3   : > { %s26_s22 = ssub.s32 %s20059_s19, %s20154_s21  ;;  %s29_s23 = sadd.s32 1, %s20055_s18 }
   0x4   : > { %p27_p0 = scmp.eq.s32.totalorder %s26_s22, 0  ;;  %p36_p1 = scmp.ne.s32.totalorder %s20055_s18, %s20051_s17 }
   0x5   : > { %p37_p2 = scmp.eq.s32.totalorder %s20059_s19, 0  ;;  %p14779_p3 = scmp.ge.s32.totalorder %s20059_s19, 1 }
   0x6   : > { %s20164_s24 = scalar_select %p27_p0, %s20055_s18, %s29_s23  }
   0x7   : > { %p20166_p4 = por %p37_p2, %p36_p1  ;;  %p289_p5 = scmp.lt.s32.totalorder %s20059_s19, 3 }
   0x8   : > { %26069 = sst [smem:[#allocation9_spill]] %s20164_s24  ;;  %p26031_p6 = scmp.eq.s32.totalorder %s20151_s20, 0 }
   0x9   : > { %s26070_s25 = scalar_select %p20166_p4, 1, 0 }
   0xa   : > { %p20172_p7 = pnand %p14779_p3, %p289_p5  ;;  %s20061_s27 = smov [#allocation6]  }
   0xb   : > { %s313_s28 = sshll.u32 %s20061_s27, 4  ;;  %s20005_s13 = scalar_lea.hbm %s26024_s5, 20736  ;;  %s314_s28 = int_to_ptr.vmem [resolvable:$true] %s313_s28 }
   0xc   : > { %s26071_s26 = scalar_select %p20172_p7, 1, 0 }
   0xd   : > { %p19951_p8 = pneg %p20172_p7  ;;  %p20006_p10 = scmp.ne.s32.totalorder %s26024_s5, %s20005_s13 }
   0xe   : > { %p20012_p0 = scmp.lt.u32.totalorder %s20005_s13, %s26024_s5 }
   0xf   : > { %p20180_p9 = pnand %p26031_p6, %p19951_p8 }
  0x11   : > { %p20007_p11 = pneg %p20180_p9 }
  0x13   : > { %p20008_p12 = pnand %p20007_p11, %p20006_p10 }
  0x15   : > { %p20009_p13 = pneg %p20008_p12 }
  0x17   : > { %p20014_p1 = pnand %p20012_p0, %p20009_p13 }
  0x19   : > { %20017 = shalt.err (!%p20014_p1)
}
  0x1a   : > { %s20018_s23 = scalar_lea.vmem %s314_s28, 20736  ;;  %p20026_p8 = scmp.lt.s32.totalorder %s314_s28, %s314_s28 }
  0x1b   : > { %p20019_p2 = scmp.ne.s32.totalorder %s314_s28, %s20018_s23  ;;  %p20027_p6 = scmp.lt.s32.totalorder %s20018_s23, %s20018_s23 }
  0x1d   : > { %p20021_p3 = pnand %p20019_p2, %p20007_p11  ;;  %p20028_p7 = por %p20027_p6, %p20026_p8 }
  0x1f   : > { %p20022_p5 = pneg %p20021_p3 }
  0x21   : > { %p20029_p4 = pnand %p20028_p7, %p20022_p5 }
  0x23   : > { %20032 = shalt.err (!%p20029_p4)
}
  0x24   : > { %s20062_s27 = smov 256   ;;  %s20063_s30 = smov 16  }
  0x25   : > { %19954 = dma.hbm_to_vmem [thread:$0]  (!%p20180_p9), %s26024_s5, 20736, %s314_s28, [#allocation7], %s20062_s27, %s20062_s27, %s20063_s30  }
  0x26   : > { %p14781_p10 = scmp.ge.s32.totalorder %s20059_s19, 2 }
  0x27   : > { %p26073_p12 = scmp.ne.s32.totalorder (!%p14781_p10), %s26070_s25, 0 }
  0x28   : > { %338 = sbr.rel (%p14781_p10) target bundleno = 60 (0x3c), region = 56 }
  0x2f   : > { %341 = sbr.rel (!%p26073_p12) target bundleno = 60 (0x3c), region = 60  ;;  %s343_s13 = sand.u32 (%p26073_p12), 1, %s20055_s18  }
  0x30   : > { %s14782_s15 = sshll.u32 (%p26073_p12), %s20059_s19, 3  ;;  %s19945_s16 = smul.u32 (%p26073_p12), 144, %s343_s13 }
  0x31   : > { %s20208_s24 = scalar_lea.vmem (%p26073_p12), %s26019_s0, %s14782_s15 }
  0x32   : > { %v409_v0 = vld [vmem:[%s20208_s24] sm:$0xff] (%p26073_p12)  ;;  %v411_v1 = vld [vmem:[%s20208_s24 + $0x10] sm:$0xff] (%p26073_p12)  ;;  %s345_s19 = scalar_lea.vmem (%p26073_p12), [#allocation5], %s19945_s16 }
  0x33   : > { %v413_v2 = vld [vmem:[%s20208_s24 + $0x20] sm:$0xff] (%p26073_p12)  ;;  %v415_v3 = vld [vmem:[%s20208_s24 + $0x30] sm:$0xff] (%p26073_p12)  ;;  %410 = vst [vmem:[%s345_s19] sm:$0xff] (%p26073_p12), %v409_v0  ;;  %412 = vst [vmem:[%s345_s19 + $0x8] sm:$0xff] (%p26073_p12), %v411_v1 }
  0x34   : > { %v417_v4 = vld [vmem:[%s20208_s24 + $0x40] sm:$0xff] (%p26073_p12)  ;;  %v419_v5 = vld [vmem:[%s20208_s24 + $0x50] sm:$0xff] (%p26073_p12)  ;;  %414 = vst [vmem:[%s345_s19 + $0x10] sm:$0xff] (%p26073_p12), %v413_v2  ;;  %416 = vst [vmem:[%s345_s19 + $0x18] sm:$0xff] (%p26073_p12), %v415_v3 }
  0x35   : > { %418 = vst [vmem:[%s345_s19 + $0x20] sm:$0xff] (%p26073_p12), %v417_v4  ;;  %420 = vst [vmem:[%s345_s19 + $0x28] sm:$0xff] (%p26073_p12), %v419_v5  ;;  %v421_v6 = vld [vmem:[%s20208_s24 + $0x60] sm:$0xff] (%p26073_p12)  ;;  %v423_v7 = vld [vmem:[%s20208_s24 + $0x70] sm:$0xff] (%p26073_p12) }
  0x36   : > { %v425_v8 = vld [vmem:[%s20208_s24 + $0x80] sm:$0xff]  ;;  %422 = vst [vmem:[%s345_s19 + $0x30] sm:$0xff] %v421_v6  ;;  %424 = vst [vmem:[%s345_s19 + $0x38] sm:$0xff] %v423_v7  ;;  %v427_v9 = vld [vmem:[%s20208_s24 + $0x90] sm:$0xff] }
  0x37   : > { %426 = vst [vmem:[%s345_s19 + $0x40] sm:$0xff] %v425_v8  ;;  %v429_v10 = vld [vmem:[%s20208_s24 + $0xa0] sm:$0xff]  ;;  %v431_v11 = vld [vmem:[%s20208_s24 + $0xb0] sm:$0xff]  ;;  %428 = vst [vmem:[%s345_s19 + $0x48] sm:$0xff] %v427_v9 }
  0x38   : > { %430 = vst [vmem:[%s345_s19 + $0x50] sm:$0xff] %v429_v10  ;;  %432 = vst [vmem:[%s345_s19 + $0x58] sm:$0xff] %v431_v11  ;;  %v433_v12 = vld [vmem:[%s20208_s24 + $0xc0] sm:$0xff]  ;;  %v435_v13 = vld [vmem:[%s20208_s24 + $0xd0] sm:$0xff] }
  0x39   : > { %v437_v14 = vld [vmem:[%s20208_s24 + $0xe0] sm:$0xff]  ;;  %434 = vst [vmem:[%s345_s19 + $0x60] sm:$0xff] %v433_v12  ;;  %436 = vst [vmem:[%s345_s19 + $0x68] sm:$0xff] %v435_v13  ;;  %v439_v15 = vld [vmem:[%s20208_s24 + $0xf0] sm:$0xff] }
  0x3a   : > { %438 = vst [vmem:[%s345_s19 + $0x70] sm:$0xff] %v437_v14  ;;  %v441_v16 = vld [vmem:[%s20208_s24 + $0x100] sm:$0xff]  ;;  %v443_v17 = vld [vmem:[%s20208_s24 + $0x110] sm:$0xff]  ;;  %440 = vst [vmem:[%s345_s19 + $0x78] sm:$0xff] %v439_v15 }
  0x3b   : > { %442 = vst [vmem:[%s345_s19 + $0x80] sm:$0xff] %v441_v16  ;;  %444 = vst [vmem:[%s345_s19 + $0x88] sm:$0xff] %v443_v17 }
  0x3c PF: > { %p26074_p4 = scmp.ne.s32.totalorder %s26071_s26, 0 }
  0x3e   : > { %453 = sbr.rel (%p26074_p4) target bundleno = 3877 (0xf25), region = 98 }
  0x45   : > { %s456_s25 = sand.u32 1, %s20051_s17   ;;  %p26075_p6 = scmp.eq.s32.totalorder %s20151_s20, 0 }
  0x46   : > { %s19946_s28 = smul.u32 144, %s456_s25 }
  0x48   : > { %s20231_s29 = scalar_lea.vmem [#allocation5], %s19946_s28 }
  0x49   : > { %20046 = dma.done.wait (%p26075_p6), [#allocation7], 20736   ;;  %p26076_p7 = pmov %p26075_p6 }
  0x4a   : > { %v20064_v18 = vmov 0.0   ;;  %v521_v19 = vld [vmem:[%s26020_s1 + $0x8] sm:$0xff]  ;;  %v526_v20 = vld [vmem:[%s26020_s1 + $0x30] sm:$0xff]  ;;  %v520_v21 = vld [vmem:[%s26020_s1] sm:$0xff]  ;;  %vm590_vm0 = vcmask 1041408   ;;  %vm535_vm1 = vcmask 146432  }
  0x4b   : > { %20048 = vsyncadd (%p26076_p7), [#allocation7], 4294946560  ;;  %670 = vmatprep.mubr.f32.mxu0 %v20064_v18  ;;  %12113 = vst [vmem:[#allocation4] sm:$0xff] %v20064_v18  ;;  %724 = vmatprep.mubr.f32.mxu1 %v20064_v18  ;;  %v18060_v22 = vpack.c.bf16 %v526_v20, %v521_v19  ;;  %v525_v23 = vld [vmem:[%s26020_s1 + $0x28] sm:$0xff]  ;;  %v531_v25 = vld [vmem:[%s26020_s1 + $0x58] sm:$0x3] }
  0x4c   : > { %v18062_v24 = vpack.c.bf16 %v525_v23, %v520_v21  ;;  %v524_v26 = vld [vmem:[%s26020_s1 + $0x20] sm:$0xff]  ;;  %v529_v27 = vld [vmem:[%s26020_s1 + $0x48] sm:$0xff]  ;;  %v530_v28 = vld [vmem:[%s26020_s1 + $0x50] sm:$0x3]  ;;  %vm3023_vm2 = vcmask 293888   ;;  %vm3521_vm3 = vcmask 1043456  }
  0x4d   : > { %18061 = vmatprep.subr.bf16.mxu0 %v18060_v22  ;;  %18917 = vmatprep.subr.bf16.mxu1 %v18060_v22  ;;  %v523_v29 = vld [vmem:[%s26020_s1 + $0x18] sm:$0xff]  ;;  %v528_v30 = vld [vmem:[%s26020_s1 + $0x40] sm:$0xff]  ;;  %v18068_v33 = vpack.c.bf16 %v529_v27, %v524_v26  ;;  %v522_v34 = vld [vmem:[%s26020_s1 + $0x10] sm:$0xff]  ;;  %3035 = vst.msk [vmem:[#allocation2 + $0x58] sm:$0xff] %vm3023_vm2, %v20064_v18  ;;  %s20065_s14 = smov 92   ;;  %vm2405_vm4 = vcmask 752640  }
  0x4e   : > { %18063 = vmatpush1.bf16.msra.mxu0 %v18062_v24  ;;  %18919 = vmatpush1.bf16.msra.mxu1 %v18062_v24  ;;  %v20273_v31 = vld [vmem:[%s20231_s29] sm:$0xff]  ;;  %v20276_v32 = vld [vmem:[%s20231_s29 + $0x48] sm:$0xff]  ;;  %v18064_v36 = vpack.c.bf16 %v528_v30, %v523_v29  ;;  %v20298_v39 = vld [vmem:[%s20231_s29 + $0x50] sm:$0xff]  ;;  %3024 = vst.msk [vmem:[#allocation2] sm:$0xff] %vm3023_vm2, %v20064_v18  ;;  %s20066_s16 = smov 56   ;;  %s20067_s22 = smov 112  }
  0x4f   : > { %14786 = vmatprep.subr.msk.mxu0 %vm590_vm0, %v531_v25  ;;  %18918 = vmatprep.subr.msk.mxu1 %vm590_vm0, %v531_v25  ;;  %v527_v35 = vld [vmem:[%s26020_s1 + $0x38] sm:$0xff]  ;;  %v534_v37 = vld [vmem:[%s26020_s1 + $0x70] sm:$0x3]  ;;  %v14846_v41 = vld [vmem:[%s26020_s1 + $0x80] sm:$0xff]  ;;  %3025 = vst.msk [vmem:[#allocation2 + $0x8] sm:$0xff] %vm3023_vm2, %v20064_v18  ;;  %s20068_s23 = smov 8  }
  0x50   : > { %v20295_v38 = vld [vmem:[%s20231_s29 + $0x8] sm:$0xff]  ;;  %v18066_v40 = vpack.c.bf16 %v527_v35, %v522_v34  ;;  %v14848_v45 = vld [vmem:[%s26020_s1 + $0x90] sm:$0xff]  ;;  %v20326_v48 = vld [vmem:[%s20231_s29 + $0x58] sm:$0xff]  ;;  %3026 = vst.msk [vmem:[#allocation2 + $0x10] sm:$0xff] %vm3023_vm2, %v20064_v18  ;;  %s20069_s19 = smov 96   ;;  %s20070_s25 = smov 40  }
  0x51   : > { %v14851_v42 = vld [vmem:[%s26020_s1 + $0xa8] sm:$0xff]  ;;  %v14853_v46 = vld [vmem:[%s26020_s1 + $0xb8] sm:$0xff]  ;;  %v20323_v47 = vld [vmem:[%s20231_s29 + $0x10] sm:$0xff]  ;;  %3027 = vst.msk [vmem:[#allocation2 + $0x18] sm:$0xff] %vm3023_vm2, %v20064_v18  ;;  %s20071_s28 = smov 24   ;;  %s20072_s24 = smov 80  }
  0x52   : > { %14787 = vmatpush1.msk.msra.mxu0 %vm590_vm0, %v530_v28  ;;  %18920 = vmatpush1.msk.msra.mxu1 %vm590_vm0, %v530_v28  ;;  %v18072_v43 = vpack.c.bf16 %v14851_v42, %v14846_v41  ;;  %v533_v44 = vld [vmem:[%s26020_s1 + $0x68] sm:$0x3]  ;;  %v532_v49 = vld [vmem:[%s26020_s1 + $0x60] sm:$0x3]  ;;  %v18076_v50 = vpack.c.bf16 %v14853_v46, %v14848_v45  ;;  %v14845_v63 = vld [vmem:[%s26020_s1 + $0x78] sm:$0xff]  ;;  %3028 = vst.msk [vmem:[#allocation2 + $0x20] sm:$0xff] %vm3023_vm2, %v20064_v18 }
  0x53   : > { %14788 = vmatmul.mubr.msk.f32.vlgmr.msra.gmra.mrb[0].mxu0 %vm535_vm1, %v20273_v31  ;;  %14797 = vmatmul.mubr.msk.f32.vlgmr.msra.gmra.mrb[0].mxu1 %vm535_vm1, %v20276_v32  ;;  %v20341_v51 = vld [vmem:[%s20231_s29 + $0x18] sm:$0xff]  ;;  %v20344_v52 = vld [vmem:[%s20231_s29 + $0x60] sm:$0xff]  ;;  %v20357_v54 = vld [vmem:[%s20231_s29 + $0x68] sm:$0xff]  ;;  %3029 = vst.msk [vmem:[#allocation2 + $0x28] sm:$0xff] %vm3023_vm2, %v20064_v18  ;;  %vm2871_vm5 = vcmask 64512   ;;  %vm2782_vm6 = vcmask 195584  }
  0x54   : > { %18069 = vmatprep.subr.bf16.mxu0 %v18068_v33  ;;  %676 = vmatprep.mubr.f32.mxu0 %v20064_v18  ;;  %v20354_v53 = vld [vmem:[%s20231_s29 + $0x20] sm:$0xff]  ;;  %v20366_v55 = vld [vmem:[%s20231_s29 + $0x28] sm:$0xff]  ;;  %v20369_v56 = vld [vmem:[%s20231_s29 + $0x70] sm:$0xff]  ;;  %3030 = vst.msk [vmem:[#allocation2 + $0x30] sm:$0xff] %vm3023_vm2, %v20064_v18  ;;  %vm9581_vm7 = vcmask 588800   ;;  %vm12114_vm8 = vcmask 130048  }
  0x55   : > { %18071 = vmatpush3.bf16.msra.mxu0 %v18068_v33  ;;  %730 = vmatprep.mubr.f32.mxu1 %v20064_v18  ;;  %v20378_v57 = vld [vmem:[%s20231_s29 + $0x30] sm:$0xff]  ;;  %v20381_v58 = vld [vmem:[%s20231_s29 + $0x78] sm:$0xff]  ;;  %v20393_v60 = vld [vmem:[%s20231_s29 + $0x80] sm:$0xff]  ;;  %3031 = vst.msk [vmem:[#allocation2 + $0x38] sm:$0xff] %vm3023_vm2, %v20064_v18  ;;  %vm20074_vm9 = vmmov 0   ;;  %vm14561_vm10 = vcmask 261120  }
  0x56   : > { %18065 = vmatprep.subr.bf16.mxu1 %v18064_v36  ;;  %17000 = vmatprep.subr.msk.mxu0 %vm590_vm0, %v534_v37  ;;  %v20390_v59 = vld [vmem:[%s20231_s29 + $0x38] sm:$0xff]  ;;  %v20402_v61 = vld [vmem:[%s20231_s29 + $0x40] sm:$0xff]  ;;  %v20405_v62 = vld [vmem:[%s20231_s29 + $0x88] sm:$0xff]  ;;  %3032 = vst.msk [vmem:[#allocation2 + $0x40] sm:$0xff] %vm3023_vm2, %v20064_v18  ;;  %p498_p9 = scmp.lt.s32.totalorder %s20151_s20, 1 }
  0x57   : > { %14789 = vmatmul.mubr.msk.f32.gmra.mrb[2].mxu0 %vm535_vm1, %v20295_v38  ;;  %14798 = vmatmul.mubr.msk.f32.gmra.mrb[2].mxu1 %vm535_vm1, %v20298_v39  ;;  %v14850_v0 = vld [vmem:[%s26020_s1 + $0xa0] sm:$0xff]  ;;  %v14847_v1 = vld [vmem:[%s26020_s1 + $0x88] sm:$0xff]  ;;  %v14852_v2 = vld [vmem:[%s26020_s1 + $0xb0] sm:$0xff]  ;;  %3033 = vst.msk [vmem:[#allocation2 + $0x48] sm:$0xff] %vm3023_vm2, %v20064_v18 }
  0x58   : > { %18067 = vmatpush1.bf16.msra.mxu1 %v18066_v40  ;;  %682 = vmatprep.mubr.f32.mxu0 %v20064_v18  ;;  %v18074_v3 = vpack.c.bf16 %v14850_v0, %v14845_v63  ;;  %v18078_v4 = vpack.c.bf16 %v14852_v2, %v14847_v1  ;;  %v14856_v5 = vld [vmem:[%s26020_s1 + $0xd0] sm:$0x3]  ;;  %v14920_v6 = vld [vmem:[%s26020_s1 + $0xf8] sm:$0xff]  ;;  %v14925_v7 = vld [vmem:[%s26020_s1 + $0x120] sm:$0xff]  ;;  %3034 = vst.msk [vmem:[#allocation2 + $0x50] sm:$0xff] %vm3023_vm2, %v20064_v18  ;;  %s26134_s20 = smov (!%p498_p9, %s20151_s20), 1 }
  0x59   : > { %736 = vmatprep.mubr.f32.mxu1 %v20064_v18  ;;  %17001 = vmatpush3.msk.msra.mxu0 %vm590_vm0, %v534_v37  ;;  %v14858_v8 = vld [vmem:[%s26020_s1 + $0xe0] sm:$0x3]  ;;  %v14849_v9 = vld [vmem:[%s26020_s1 + $0x98] sm:$0xff]  ;;  %v14855_v11 = vld [vmem:[%s26020_s1 + $0xc8] sm:$0x3]  ;;  %v18084_v12 = vpack.c.bf16 %v14925_v7, %v14920_v6  ;;  %3036 = vst.msk [vmem:[#allocation2 + $0x60] sm:$0xff] %vm3023_vm2, %v20064_v18 }
  0x5a   : > { %14806 = vmatprep.subr.msk.mxu1 %vm590_vm0, %v533_v44  ;;  %18073 = vmatprep.subr.bf16.mxu0 %v18072_v43  ;;  %v14854_v10 = vld [vmem:[%s26020_s1 + $0xc0] sm:$0xff]  ;;  %v14857_v13 = vld [vmem:[%s26020_s1 + $0xd8] sm:$0x3]  ;;  %v14919_v15 = vld [vmem:[%s26020_s1 + $0xf0] sm:$0xff]  ;;  %3037 = vst.msk [vmem:[#allocation2 + $0x68] sm:$0xff] %vm3023_vm2, %v20064_v18 }
  0x5b   : > { %14790 = vmatmul.mubr.msk.f32.gmra.mrb[4].mxu0 %vm535_vm1, %v20323_v47  ;;  %14799 = vmatmul.mubr.msk.f32.gmra.mrb[4].mxu1 %vm535_vm1, %v20326_v48  ;;  %v20459_v14 = vpack.c.bf16 %v14854_v10, %v14849_v9  ;;  %v14924_v16 = vld [vmem:[%s26020_s1 + $0x118] sm:$0xff]  ;;  %v14930_v19 = vld [vmem:[%s26020_s1 + $0x148] sm:$0x3]  ;;  %v14923_v20 = vld [vmem:[%s26020_s1 + $0x110] sm:$0xff]  ;;  %3038 = vst.msk [vmem:[#allocation2 + $0x70] sm:$0xff] %vm3023_vm2, %v20064_v18 }
  0x5c   : > { %688 = vmatprep.mubr.f32.mxu0 %v20064_v18  ;;  %742 = vmatprep.mubr.f32.mxu1 %v20064_v18  ;;  %v18086_v17 = vpack.c.bf16 %v14924_v16, %v14919_v15  ;;  %v14928_v21 = vld [vmem:[%s26020_s1 + $0x138] sm:$0xff]  ;;  %v14929_v22 = vld [vmem:[%s26020_s1 + $0x140] sm:$0x3]  ;;  %v14859_v24 = vld [vmem:[%s26020_s1 + $0xe8] sm:$0x3]  ;;  %3039 = vst.msk [vmem:[#allocation2 + $0x78] sm:$0xff] %vm3023_vm2, %v20064_v18 }
  0x5d   : > { %14807 = vmatpush1.msk.msra.mxu1 %vm590_vm0, %v532_v49  ;;  %v20544_v23 = vpack.c.bf16 %v14928_v21, %v14923_v20  ;;  %v14922_v25 = vld [vmem:[%s26020_s1 + $0x108] sm:$0xff]  ;;  %v14927_v26 = vld [vmem:[%s26020_s1 + $0x130] sm:$0xff]  ;;  %v14933_v28 = vld [vmem:[%s26020_s1 + $0x160] sm:$0x3]  ;;  %3040 = vst.msk [vmem:[#allocation2 + $0x80] sm:$0xff] %vm3023_vm2, %v20064_v18 }
  0x5e   : > { %18077 = vmatprep.subr.bf16.mxu1 %v18076_v50  ;;  %v18088_v27 = vpack.c.bf16 %v14927_v26, %v14922_v25  ;;  %v14921_v29 = vld [vmem:[%s26020_s1 + $0x100] sm:$0xff]  ;;  %v14926_v30 = vld [vmem:[%s26020_s1 + $0x128] sm:$0xff]  ;;  %v14932_v34 = vld [vmem:[%s26020_s1 + $0x158] sm:$0x3]  ;;  %3041 = vst.msk [vmem:[#allocation2 + $0x88] sm:$0xff] %vm3023_vm2, %v20064_v18 }
  0x5f   : > { %14791 = vmatmul.mubr.msk.f32.gmra.mrb[6].mxu0 %vm535_vm1, %v20341_v51  ;;  %14800 = vmatmul.mubr.msk.f32.gmra.mrb[6].mxu1 %vm535_vm1, %v20344_v52  ;;  %v18090_v33 = vpack.c.bf16 %v14926_v30, %v14921_v29  ;;  %v14931_v35 = vld [vmem:[%s26020_s1 + $0x150] sm:$0x3]  ;;  %v14994_v16 = vld [vmem:[%s26022_s3 + $0x28] sm:$0xff]  ;;  %3042 = vst.msk [vmem:[#allocation2 + $0x90] sm:$0xff] %vm3023_vm2, %v20064_v18  ;;  %3043 = vst.msk [vmem:[#allocation2 + $0x98] sm:$0xff] %vm3023_vm2, %v20064_v18 }
  0x60   : > { %694 = vmatprep.mubr.f32.mxu0 %v20064_v18  ;;  %748 = vmatprep.mubr.f32.mxu1 %v20064_v18  ;;  %3044 = vst.msk [vmem:[#allocation2 + $0xa0] sm:$0xff] %vm3023_vm2, %v20064_v18  ;;  %3045 = vst.msk [vmem:[#allocation2 + $0xa8] sm:$0xff] %vm3023_vm2, %v20064_v18  ;;  %v19995_v20 = vld [vmem:[#allocation4] sm:$0xff]  ;;  %v3259_v26 = vld [vmem:[#allocation2 + $0x8] sm:$0xff] }
  0x61   : > { %3046 = vst.msk [vmem:[#allocation2 + $0xb0] sm:$0xff] %vm3023_vm2, %v20064_v18  ;;  %3047 = vst.msk [vmem:[#allocation2 + $0xb8] sm:$0xff] %vm3023_vm2, %v20064_v18  ;;  %v3261_v30 = vld [vmem:[#allocation2 + $0x18] sm:$0xff] }
  0x62   : > { %3048 = vst.msk [vmem:[#allocation2 + $0xc0] sm:$0xff] %vm3023_vm2, %v20064_v18  ;;  %3049 = vst.msk [vmem:[#allocation2 + $0xc8] sm:$0xff] %vm3023_vm2, %v20064_v18 }
  0x63   : > { %14792 = vmatmul.mubr.msk.f32.gmra.mrb[8].mxu0 %vm535_vm1, %v20354_v53  ;;  %14801 = vmatmul.mubr.msk.f32.gmra.mrb[8].mxu1 %vm535_vm1, %v20357_v54  ;;  %3050 = vst.msk [vmem:[#allocation2 + $0xd0] sm:$0xff] %vm3023_vm2, %v20064_v18  ;;  %3051 = vst.msk [vmem:[#allocation2 + $0xd8] sm:$0xff] %vm3023_vm2, %v20064_v18 }
  0x64   : > { %700 = vmatprep.mubr.f32.mxu0 %v20064_v18  ;;  %754 = vmatprep.mubr.f32.mxu1 %v20064_v18  ;;  %3052 = vst.msk [vmem:[#allocation2 + $0xe0] sm:$0xff] %vm3023_vm2, %v20064_v18  ;;  %3053 = vst.msk [vmem:[#allocation2 + $0xe8] sm:$0xff] %vm3023_vm2, %v20064_v18 }
  0x65   : > { %3054 = vst.msk [vmem:[#allocation2 + $0xf0] sm:$0xff] %vm3023_vm2, %v20064_v18  ;;  %3055 = vst.msk [vmem:[#allocation2 + $0xf8] sm:$0xff] %vm3023_vm2, %v20064_v18 }
  0x66   : > { %3056 = vst.msk [vmem:[#allocation2 + $0x100] sm:$0xff] %vm3023_vm2, %v20064_v18  ;;  %3057 = vst.msk [vmem:[#allocation2 + $0x108] sm:$0xff] %vm3023_vm2, %v20064_v18 }
  0x67   : > { %14793 = vmatmul.mubr.msk.f32.gmra.mrb[10].mxu0 %vm535_vm1, %v20366_v55  ;;  %14802 = vmatmul.mubr.msk.f32.gmra.mrb[10].mxu1 %vm535_vm1, %v20369_v56  ;;  %3058 = vst.msk [vmem:[#allocation2 + $0x110] sm:$0xff] %vm3023_vm2, %v20064_v18  ;;  %3059 = vst.msk [vmem:[#allocation2 + $0x118] sm:$0xff] %vm3023_vm2, %v20064_v18 }
  0x68   : > { %706 = vmatprep.mubr.f32.mxu0 %v20064_v18  ;;  %760 = vmatprep.mubr.f32.mxu1 %v20064_v18  ;;  %3060 = vst.msk [vmem:[#allocation2 + $0x120] sm:$0xff] %vm3023_vm2, %v20064_v18  ;;  %3061 = vst.msk [vmem:[#allocation2 + $0x128] sm:$0xff] %vm3023_vm2, %v20064_v18 }
  0x69   : > { %3062 = vst.msk [vmem:[#allocation2 + $0x130] sm:$0xff] %vm3023_vm2, %v20064_v18  ;;  %3063 = vst.msk [vmem:[#allocation2 + $0x138] sm:$0xff] %vm3023_vm2, %v20064_v18 }
  0x6a   : > { %3064 = vst.msk [vmem:[#allocation2 + $0x140] sm:$0xff] %vm3023_vm2, %v20064_v18  ;;  %3065 = vst.msk [vmem:[#allocation2 + $0x148] sm:$0xff] %vm3023_vm2, %v20064_v18 }
  0x6b   : > { %14794 = vmatmul.mubr.msk.f32.gmra.mrb[12].mxu0 %vm535_vm1, %v20378_v57  ;;  %14803 = vmatmul.mubr.msk.f32.gmra.mrb[12].mxu1 %vm535_vm1, %v20381_v58  ;;  %3066 = vst.msk [vmem:[#allocation2 + $0x150] sm:$0xff] %vm3023_vm2, %v20064_v18  ;;  %3067 = vst.msk [vmem:[#allocation2 + $0x158] sm:$0xff] %vm3023_vm2, %v20064_v18 }
  0x6c   : > { %712 = vmatprep.mubr.f32.mxu0 %v20064_v18  ;;  %766 = vmatprep.mubr.f32.mxu1 %v20064_v18  ;;  %3068 = vst.msk [vmem:[#allocation2 + $0x160] sm:$0xff] %vm3023_vm2, %v20064_v18  ;;  %3069 = vst.msk [vmem:[#allocation2 + $0x168] sm:$0xff] %vm3023_vm2, %v20064_v18 }
  0x6d   : > { %3070 = vst.msk [vmem:[#allocation2 + $0x170] sm:$0xff] %vm3023_vm2, %v20064_v18  ;;  %3071 = vst.msk [vmem:[#allocation2 + $0x178] sm:$0xff] %vm3023_vm2, %v20064_v18 }
  0x6e   : > { %3072 = vst.msk [vmem:[#allocation2 + $0x180] sm:$0xff] %vm3023_vm2, %v20064_v18  ;;  %3073 = vst.msk [vmem:[#allocation2 + $0x188] sm:$0xff] %vm3023_vm2, %v20064_v18 }
  0x6f   : > { %14795 = vmatmul.mubr.msk.f32.gmra.mrb[14].mxu0 %vm535_vm1, %v20390_v59  ;;  %14804 = vmatmul.mubr.msk.f32.gmra.mrb[14].mxu1 %vm535_vm1, %v20393_v60  ;;  %3074 = vst.msk [vmem:[#allocation2 + $0x190] sm:$0xff] %vm3023_vm2, %v20064_v18  ;;  %3075 = vst.msk [vmem:[#allocation2 + $0x198] sm:$0xff] %vm3023_vm2, %v20064_v18 }
  0x70   : > { %718 = vmatprep.mubr.f32.mxu0 %v20064_v18  ;;  %770 = vmatprep.mubr.f32.mxu1 %v20064_v18  ;;  %3076 = vst.msk [vmem:[#allocation2 + $0x1a0] sm:$0xff] %vm3023_vm2, %v20064_v18  ;;  %3077 = vst.msk [vmem:[#allocation2 + $0x1a8] sm:$0xff] %vm3023_vm2, %v20064_v18 }
  0x71   : > { %3078 = vst.msk [vmem:[#allocation2 + $0x1b0] sm:$0xff] %vm3023_vm2, %v20064_v18  ;;  %3079 = vst.msk [vmem:[#allocation2 + $0x1b8] sm:$0xff] %vm3023_vm2, %v20064_v18 }
  0x72   : > { %3080 = vst.msk [vmem:[#allocation2 + $0x1c0] sm:$0xff] %vm3023_vm2, %v20064_v18  ;;  %3081 = vst.msk [vmem:[#allocation2 + $0x1c8] sm:$0xff] %vm3023_vm2, %v20064_v18 }
  0x73   : > { %14796 = vmatmul.mubr.msk.f32.gmra.mrb[16].mxu0 %vm535_vm1, %v20402_v61  ;;  %14805 = vmatmul.mubr.msk.f32.gmra.mrb[16].mxu1 %vm535_vm1, %v20405_v62  ;;  %3082 = vst.msk [vmem:[#allocation2 + $0x1d0] sm:$0xff] %vm3023_vm2, %v19995_v20  ;;  %3083 = vst.msk [vmem:[#allocation2 + $0x1d8] sm:$0xff] %vm3023_vm2, %v19995_v20 }
  0x74   : > { %839 = vmatprep.mubr.f32.mxu1 %v20064_v18  ;;  %17002 = vmatprep.mubr.msk.f32.mxu0 %vm535_vm1, %v20273_v31  ;;  %3084 = vst.msk [vmem:[#allocation2 + $0x1e0] sm:$0xff] %vm3023_vm2, %v19995_v20  ;;  %3085 = vst.msk [vmem:[#allocation2 + $0x1e8] sm:$0xff] %vm3023_vm2, %v19995_v20 }
  0x75   : > { %3086 = vst.msk [vmem:[#allocation2 + $0x1f0] sm:$0xff] %vm3023_vm2, %v19995_v20  ;;  %3087 = vst.msk [vmem:[#allocation2 + $0x1f8] sm:$0xff] %vm3023_vm2, %v19995_v20 }
  0x76   : > { %3088 = vst.msk [vmem:[#allocation2 + $0x200] sm:$0xff] %vm3023_vm2, %v19995_v20  ;;  %3089 = vst.msk [vmem:[#allocation2 + $0x208] sm:$0xff] %vm3023_vm2, %v19995_v20 }
  0x77   : > { %14808 = vmatmul.mubr.msk.f32.vlgmr.msra.gmra.mrb[18].mxu1 %vm535_vm1, %v20273_v31  ;;  %17003 = vmatmul.mubr.msk.f32.vlgmr.msra.gmra.mrb[18].mxu0 %vm535_vm1, %v20295_v38  ;;  %3090 = vst.msk [vmem:[#allocation2 + $0x210] sm:$0xff] %vm3023_vm2, %v19995_v20  ;;  %3091 = vst.msk [vmem:[#allocation2 + $0x218] sm:$0xff] %vm3023_vm2, %v19995_v20 }
  0x78   : > { %18075 = vmatpush1.bf16.msra.mxu0 %v18074_v3  ;;  %845 = vmatprep.mubr.f32.mxu1 %v20064_v18  ;;  %3092 = vst.msk [vmem:[#allocation2 + $0x220] sm:$0xff] %vm3023_vm2, %v19995_v20  ;;  %3093 = vst.msk [vmem:[#allocation2 + $0x228] sm:$0xff] %vm3023_vm2, %v19995_v20 }
  0x79   : > { %17005 = vmatprep.mubr.msk.f32.mxu0 %vm535_vm1, %v20323_v47  ;;  %18079 = vmatpush1.bf16.msra.mxu1 %v18078_v4  ;;  %3094 = vst.msk [vmem:[#allocation2 + $0x230] sm:$0xff] %vm3023_vm2, %v19995_v20  ;;  %3095 = vst.msk [vmem:[#allocation2 + $0x238] sm:$0xff] %vm3023_vm2, %v19995_v20 }
  0x7a   : > { %14860 = vmatprep.subr.msk.mxu0 %vm590_vm0, %v14856_v5  ;;  %14880 = vmatprep.subr.msk.mxu1 %vm590_vm0, %v14858_v8  ;;  %3096 = vst.msk [vmem:[#allocation2 + $0x240] sm:$0xff] %vm3023_vm2, %v19995_v20  ;;  %3097 = vst.msk [vmem:[#allocation2 + $0x248] sm:$0xff] %vm3023_vm2, %v19995_v20 }
  0x7b   : > { %14809 = vmatmul.mubr.msk.f32.gmra.mrb[20].mxu1 %vm535_vm1, %v20295_v38  ;;  %17006 = vmatmul.mubr.msk.f32.gmra.mrb[20].mxu0 %vm535_vm1, %v20341_v51  ;;  %3098 = vst.msk [vmem:[#allocation2 + $0x250] sm:$0xff] %vm3023_vm2, %v19995_v20  ;;  %3099 = vst.msk [vmem:[#allocation2 + $0x258] sm:$0xff] %vm3023_vm2, %v19995_v20 }
  0x7c   : > { %851 = vmatprep.mubr.f32.mxu1 %v20064_v18  ;;  %17008 = vmatprep.mubr.msk.f32.mxu0 %vm535_vm1, %v20354_v53  ;;  %3100 = vst.msk [vmem:[#allocation2 + $0x260] sm:$0xff] %vm3023_vm2, %v19995_v20  ;;  %3101 = vst.msk [vmem:[#allocation2 + $0x268] sm:$0xff] %vm3023_vm2, %v19995_v20 }
  0x7d   : > { %14861 = vmatpush1.msk.msra.mxu0 %vm590_vm0, %v14855_v11  ;;  %14881 = vmatpush1.msk.msra.mxu1 %vm590_vm0, %v14857_v13  ;;  %3102 = vst.msk [vmem:[#allocation2 + $0x270] sm:$0xff] %vm3023_vm2, %v19995_v20  ;;  %3103 = vst.msk [vmem:[#allocation2 + $0x278] sm:$0xff] %vm3023_vm2, %v19995_v20 }
  0x7e   : > { %18085 = vmatprep.subr.bf16.mxu0 %v18084_v12  ;;  %18081 = vmatprep.subr.bf16.mxu1 %v20459_v14  ;;  %3104 = vst.msk [vmem:[#allocation2 + $0x280] sm:$0xff] %vm3023_vm2, %v19995_v20  ;;  %3105 = vst.msk [vmem:[#allocation2 + $0x288] sm:$0xff] %vm3023_vm2, %v19995_v20 }
  0x7f   : > { %14810 = vmatmul.mubr.msk.f32.gmra.mrb[22].mxu1 %vm535_vm1, %v20323_v47  ;;  %17009 = vmatmul.mubr.msk.f32.gmra.mrb[22].mxu0 %vm535_vm1, %v20366_v55  ;;  %3106 = vst.msk [vmem:[#allocation2 + $0x290] sm:$0xff] %vm3023_vm2, %v19995_v20  ;;  %3107 = vst.msk [vmem:[#allocation2 + $0x298] sm:$0xff] %vm3023_vm2, %v19995_v20 }
  0x80   : > { %857 = vmatprep.mubr.f32.mxu1 %v20064_v18  ;;  %17011 = vmatprep.mubr.msk.f32.mxu0 %vm535_vm1, %v20378_v57  ;;  %3108 = vst.msk [vmem:[#allocation2 + $0x2a0] sm:$0xff] %vm3023_vm2, %v19995_v20  ;;  %3109 = vst.msk [vmem:[#allocation2 + $0x2a8] sm:$0xff] %vm3023_vm2, %v19995_v20 }
  0x81   : > { %3110 = vst.msk [vmem:[#allocation2 + $0x2b0] sm:$0xff] %vm3023_vm2, %v19995_v20  ;;  %3111 = vst.msk [vmem:[#allocation2 + $0x2b8] sm:$0xff] %vm3023_vm2, %v19995_v20 }
  0x82   : > { %3112 = vst.msk [vmem:[#allocation2 + $0x2c0] sm:$0xff] %vm3023_vm2, %v19995_v20  ;;  %3113 = vst.msk [vmem:[#allocation2 + $0x2c8] sm:$0xff] %vm3023_vm2, %v19995_v20 }
  0x83   : > { %14811 = vmatmul.mubr.msk.f32.gmra.mrb[24].mxu1 %vm535_vm1, %v20341_v51  ;;  %17012 = vmatmul.mubr.msk.f32.gmra.mrb[24].mxu0 %vm535_vm1, %v20390_v59  ;;  %3114 = vst.msk [vmem:[#allocation2 + $0x2d0] sm:$0xff] %vm3023_vm2, %v19995_v20  ;;  %3115 = vst.msk [vmem:[#allocation2 + $0x2d8] sm:$0xff] %vm3023_vm2, %v19995_v20 }
  0x84   : > { %863 = vmatprep.mubr.f32.mxu1 %v20064_v18  ;;  %17014 = vmatprep.mubr.msk.f32.mxu0 %vm535_vm1, %v20402_v61  ;;  %3116 = vst.msk [vmem:[#allocation2 + $0x2e0] sm:$0xff] %vm3023_vm2, %v19995_v20  ;;  %3117 = vst.msk [vmem:[#allocation2 + $0x2e8] sm:$0xff] %vm3023_vm2, %v19995_v20 }
  0x85   : > { %3118 = vst.msk [vmem:[#allocation2 + $0x2f0] sm:$0xff] %vm3023_vm2, %v19995_v20  ;;  %3119 = vst.msk [vmem:[#allocation2 + $0x2f8] sm:$0xff] %vm3023_vm2, %v19995_v20 }
  0x86   : > { %3120 = vst.msk [vmem:[#allocation2 + $0x300] sm:$0xff] %vm3023_vm2, %v19995_v20  ;;  %3121 = vst.msk [vmem:[#allocation2 + $0x308] sm:$0xff] %vm3023_vm2, %v19995_v20 }
  0x87   : > { %14812 = vmatmul.mubr.msk.f32.gmra.mrb[26].mxu1 %vm535_vm1, %v20354_v53  ;;  %17015 = vmatmul.mubr.msk.f32.gmra.mrb[26].mxu0 %vm535_vm1, %v20276_v32  ;;  %3122 = vst.msk [vmem:[#allocation2 + $0x310] sm:$0xff] %vm3023_vm2, %v19995_v20  ;;  %3123 = vst.msk [vmem:[#allocation2 + $0x318] sm:$0xff] %vm3023_vm2, %v19995_v20 }
  0x88   : > { %869 = vmatprep.mubr.f32.mxu1 %v20064_v18  ;;  %17017 = vmatprep.mubr.msk.f32.mxu0 %vm535_vm1, %v20298_v39 }
  0x8b   : > { %14813 = vmatmul.mubr.msk.f32.gmra.mrb[28].mxu1 %vm535_vm1, %v20366_v55  ;;  %17018 = vmatmul.mubr.msk.f32.gmra.mrb[28].mxu0 %vm535_vm1, %v20326_v48 }
  0x8c   : > { %875 = vmatprep.mubr.f32.mxu1 %v20064_v18  ;;  %17020 = vmatprep.mubr.msk.f32.mxu0 %vm535_vm1, %v20344_v52 }
  0x8f   : > { %14814 = vmatmul.mubr.msk.f32.gmra.mrb[30].mxu1 %vm535_vm1, %v20378_v57  ;;  %17021 = vmatmul.mubr.msk.f32.gmra.mrb[30].mxu0 %vm535_vm1, %v20357_v54 }
  0x90   : > { %881 = vmatprep.mubr.f32.mxu1 %v20064_v18  ;;  %17023 = vmatprep.mubr.msk.f32.mxu0 %vm535_vm1, %v20369_v56 }
  0x93   : > { %14815 = vmatmul.mubr.msk.f32.gmra.mrb[32].mxu1 %vm535_vm1, %v20390_v59  ;;  %17024 = vmatmul.mubr.msk.f32.gmra.mrb[32].mxu0 %vm535_vm1, %v20381_v58 }
  0x94   : > { %887 = vmatprep.mubr.f32.mxu1 %v20064_v18  ;;  %17026 = vmatprep.mubr.msk.f32.mxu0 %vm535_vm1, %v20393_v60 }
  0x97   : > { %14816 = vmatmul.mubr.msk.f32.gmra.mrb[34].mxu1 %vm535_vm1, %v20402_v61  ;;  %17027 = vmatmul.mubr.msk.f32.gmra.mrb[34].mxu0 %vm535_vm1, %v20405_v62 }
  0x98   : > { %893 = vmatprep.mubr.f32.mxu1 %v20064_v18  ;;  %1192 = vmatprep.mubr.f32.mxu0 %v20064_v18 }
  0x9b   : > { %14817 = vmatmul.mubr.msk.f32.gmra.mrb[36].mxu1 %vm535_vm1, %v20276_v32  ;;  %14862 = vmatmul.mubr.msk.f32.vlgmr.msra.gmra.mrb[36].mxu0 %vm535_vm1, %v20273_v31 }
  0x9c   : > { %18087 = vmatpush1.bf16.msra.mxu0 %v18086_v17  ;;  %899 = vmatprep.mubr.f32.mxu1 %v20064_v18 }
  0x9d   : > { %1196 = vmatprep.mubr.f32.mxu0 %v20064_v18  ;;  %14934 = vmatprep.subr.msk.mxu0 %vm590_vm0, %v14930_v19  ;;  %v20962_v19 = vld [vmem:[%s26022_s3 + $0x40] sm:$0xff] }
  0x9f   : > { %14818 = vmatmul.mubr.msk.f32.gmra.mrb[38].mxu1 %vm535_vm1, %v20298_v39  ;;  %14863 = vmatmul.mubr.msk.f32.gmra.mrb[0].mxu0 %vm535_vm1, %v20295_v38 }
  0xa0   : > { %905 = vmatprep.mubr.f32.mxu1 %v20064_v18  ;;  %1202 = vmatprep.mubr.f32.mxu0 %v20064_v18 }
  0xa1   : > { %14935 = vmatpush1.msk.msra.mxu0 %vm590_vm0, %v14929_v22 }
  0xa2   : > { %18093 = vmatprep.subr.bf16.mxu0 %v20544_v23 }
  0xa3   : > { %14819 = vmatmul.mubr.msk.f32.gmra.mrb[40].mxu1 %vm535_vm1, %v20326_v48  ;;  %14864 = vmatmul.mubr.msk.f32.gmra.mrb[2].mxu0 %vm535_vm1, %v20323_v47 }
  0xa4   : > { %911 = vmatprep.mubr.f32.mxu1 %v20064_v18  ;;  %1208 = vmatprep.mubr.f32.mxu0 %v20064_v18 }
  0xa7   : > { %14820 = vmatmul.mubr.msk.f32.gmra.mrb[42].mxu1 %vm535_vm1, %v20344_v52  ;;  %14865 = vmatmul.mubr.msk.f32.gmra.mrb[4].mxu0 %vm535_vm1, %v20341_v51 }
  0xa8   : > { %917 = vmatprep.mubr.f32.mxu1 %v20064_v18  ;;  %1214 = vmatprep.mubr.f32.mxu0 %v20064_v18 }
  0xab   : > { %14821 = vmatmul.mubr.msk.f32.gmra.mrb[44].mxu1 %vm535_vm1, %v20357_v54  ;;  %14866 = vmatmul.mubr.msk.f32.gmra.mrb[6].mxu0 %vm535_vm1, %v20354_v53 }
  0xac   : > { %923 = vmatprep.mubr.f32.mxu1 %v20064_v18  ;;  %1220 = vmatprep.mubr.f32.mxu0 %v20064_v18 }
  0xaf   : > { %14822 = vmatmul.mubr.msk.f32.gmra.mrb[46].mxu1 %vm535_vm1, %v20369_v56  ;;  %14867 = vmatmul.mubr.msk.f32.gmra.mrb[8].mxu0 %vm535_vm1, %v20366_v55 }
  0xb0   : > { %929 = vmatprep.mubr.f32.mxu1 %v20064_v18  ;;  %1226 = vmatprep.mubr.f32.mxu0 %v20064_v18 }
  0xb3   : > { %14823 = vmatmul.mubr.msk.f32.gmra.mrb[48].mxu1 %vm535_vm1, %v20381_v58  ;;  %14868 = vmatmul.mubr.msk.f32.gmra.mrb[10].mxu0 %vm535_vm1, %v20378_v57 }
  0xb4   : > { %935 = vmatprep.mubr.f32.mxu1 %v20064_v18  ;;  %1232 = vmatprep.mubr.f32.mxu0 %v20064_v18 }
  0xb7   : > { %14824 = vmatmul.mubr.msk.f32.gmra.mrb[50].mxu1 %vm535_vm1, %v20393_v60  ;;  %14869 = vmatmul.mubr.msk.f32.gmra.mrb[12].mxu0 %vm535_vm1, %v20390_v59 }
  0xb8   : > { %939 = vmatprep.mubr.f32.mxu1 %v20064_v18  ;;  %1238 = vmatprep.mubr.f32.mxu0 %v20064_v18 }
  0xbb   : > { %14825 = vmatmul.mubr.msk.f32.gmra.mrb[52].mxu1 %vm535_vm1, %v20405_v62  ;;  %14870 = vmatmul.mubr.msk.f32.gmra.mrb[14].mxu0 %vm535_vm1, %v20402_v61 }
  0xbc   : > { %1244 = vmatprep.mubr.f32.mxu0 %v20064_v18  ;;  %1361 = vmatprep.mubr.f32.mxu1 %v20064_v18 }
  0xbf   : > { %14871 = vmatmul.mubr.msk.f32.gmra.mrb[16].mxu0 %vm535_vm1, %v20276_v32  ;;  %14882 = vmatmul.mubr.msk.f32.vlgmr.msra.gmra.mrb[54].mxu1 %vm535_vm1, %v20273_v31 }
  0xc0   : > { %1250 = vmatprep.mubr.f32.mxu0 %v20064_v18  ;;  %1365 = vmatprep.mubr.f32.mxu1 %v20064_v18 }
  0xc1   : > { %18083 = vmatpush3.bf16.msra.mxu1 %v20459_v14 }
  0xc2   : > { %17033 = vmatprep.subr.msk.mxu1 %vm590_vm0, %v14859_v24 }
  0xc3   : > { %14872 = vmatmul.mubr.msk.f32.gmra.mrb[38].mxu0 %vm535_vm1, %v20298_v39  ;;  %14883 = vmatmul.mubr.msk.f32.gmra.mrb[18].mxu1 %vm535_vm1, %v20295_v38 }
  0xc4   : > { %1256 = vmatprep.mubr.f32.mxu0 %v20064_v18  ;;  %1371 = vmatprep.mubr.f32.mxu1 %v20064_v18 }
  0xc5   : > { %17034 = vmatpush3.msk.msra.mxu1 %vm590_vm0, %v14859_v24  ;;  %v14998_v24 = vld [vmem:[%s26022_s3 + $0x48] sm:$0xf] }
  0xc6   : > { %18089 = vmatprep.subr.bf16.mxu1 %v18088_v27  ;;  %v3260_v27 = vld [vmem:[#allocation2 + $0x10] sm:$0xff] }
  0xc7   : > { %14873 = vmatmul.mubr.msk.f32.gmra.mrb[40].mxu0 %vm535_vm1, %v20326_v48  ;;  %14884 = vmatmul.mubr.msk.f32.gmra.mrb[20].mxu1 %vm535_vm1, %v20323_v47 }
  0xc8   : > { %1262 = vmatprep.mubr.f32.mxu0 %v20064_v18  ;;  %1377 = vmatprep.mubr.f32.mxu1 %v20064_v18 }
  0xcb   : > { %14874 = vmatmul.mubr.msk.f32.gmra.mrb[42].mxu0 %vm535_vm1, %v20344_v52  ;;  %14885 = vmatmul.mubr.msk.f32.gmra.mrb[22].mxu1 %vm535_vm1, %v20341_v51 }
  0xcc   : > { %1268 = vmatprep.mubr.f32.mxu0 %v20064_v18  ;;  %1383 = vmatprep.mubr.f32.mxu1 %v20064_v18 }
  0xcf   : > { %14875 = vmatmul.mubr.msk.f32.gmra.mrb[44].mxu0 %vm535_vm1, %v20357_v54  ;;  %14886 = vmatmul.mubr.msk.f32.gmra.mrb[24].mxu1 %vm535_vm1, %v20354_v53 }
  0xd0   : > { %1274 = vmatprep.mubr.f32.mxu0 %v20064_v18  ;;  %1389 = vmatprep.mubr.f32.mxu1 %v20064_v18 }
  0xd3   : > { %14876 = vmatmul.mubr.msk.f32.gmra.mrb[46].mxu0 %vm535_vm1, %v20369_v56  ;;  %14887 = vmatmul.mubr.msk.f32.gmra.mrb[26].mxu1 %vm535_vm1, %v20366_v55 }
  0xd4   : > { %1280 = vmatprep.mubr.f32.mxu0 %v20064_v18  ;;  %1395 = vmatprep.mubr.f32.mxu1 %v20064_v18 }
  0xd7   : > { %14877 = vmatmul.mubr.msk.f32.gmra.mrb[48].mxu0 %vm535_vm1, %v20381_v58  ;;  %14888 = vmatmul.mubr.msk.f32.gmra.mrb[28].mxu1 %vm535_vm1, %v20378_v57 }
  0xd8   : > { %1286 = vmatprep.mubr.f32.mxu0 %v20064_v18  ;;  %1401 = vmatprep.mubr.f32.mxu1 %v20064_v18 }
  0xdb   : > { %14878 = vmatmul.mubr.msk.f32.gmra.mrb[50].mxu0 %vm535_vm1, %v20393_v60  ;;  %14889 = vmatmul.mubr.msk.f32.gmra.mrb[30].mxu1 %vm535_vm1, %v20390_v59 }
  0xdc   : > { %1292 = vmatprep.mubr.f32.mxu0 %v20064_v18  ;;  %1407 = vmatprep.mubr.f32.mxu1 %v20064_v18 }
  0xdf   : > { %14879 = vmatmul.mubr.msk.f32.gmra.mrb[52].mxu0 %vm535_vm1, %v20405_v62  ;;  %14890 = vmatmul.mubr.msk.f32.gmra.mrb[32].mxu1 %vm535_vm1, %v20402_v61 }
  0xe0   : > { %1413 = vmatprep.mubr.f32.mxu1 %v20064_v18  ;;  %1714 = vmatprep.mubr.f32.mxu0 %v20064_v18 }
  0xe3   : > { %14891 = vmatmul.mubr.msk.f32.gmra.mrb[34].mxu1 %vm535_vm1, %v20276_v32  ;;  %14936 = vmatmul.mubr.msk.f32.vlgmr.msra.gmra.mrb[54].mxu0 %vm535_vm1, %v20273_v31 }
  0xe4   : > { %18095 = vmatpush3.bf16.msra.mxu0 %v20544_v23  ;;  %1419 = vmatprep.mubr.f32.mxu1 %v20064_v18 }
  0xe5   : > { %1718 = vmatprep.mubr.f32.mxu0 %v20064_v18  ;;  %17066 = vmatprep.subr.msk.mxu0 %vm590_vm0, %v14933_v28 }
  0xe7   : > { %14892 = vmatmul.mubr.msk.f32.gmra.mrb[36].mxu1 %vm535_vm1, %v20298_v39  ;;  %14937 = vmatmul.mubr.msk.f32.gmra.mrb[56].mxu0 %vm535_vm1, %v20295_v38 }
  0xe8   : > { %1425 = vmatprep.mubr.f32.mxu1 %v20064_v18  ;;  %1722 = vmatprep.mubr.f32.mxu0 %v20064_v18 }
  0xe9   : > { %17067 = vmatpush3.msk.msra.mxu0 %vm590_vm0, %v14933_v28 }
  0xeb   : > { %14893 = vmatmul.mubr.msk.f32.gmra.mrb[38].mxu1 %vm535_vm1, %v20326_v48  ;;  %14938 = vmatmul.mubr.msk.f32.gmra.mrb[0].mxu0 %vm535_vm1, %v20323_v47 }
  0xec   : > { %1431 = vmatprep.mubr.f32.mxu1 %v20064_v18  ;;  %1728 = vmatprep.mubr.f32.mxu0 %v20064_v18 }
  0xef   : > { %14894 = vmatmul.mubr.msk.f32.gmra.mrb[40].mxu1 %vm535_vm1, %v20344_v52  ;;  %14939 = vmatmul.mubr.msk.f32.gmra.mrb[2].mxu0 %vm535_vm1, %v20341_v51 }
  0xf0   : > { %1437 = vmatprep.mubr.f32.mxu1 %v20064_v18  ;;  %1734 = vmatprep.mubr.f32.mxu0 %v20064_v18 }
  0xf3   : > { %14895 = vmatmul.mubr.msk.f32.gmra.mrb[42].mxu1 %vm535_vm1, %v20357_v54  ;;  %14940 = vmatmul.mubr.msk.f32.gmra.mrb[4].mxu0 %vm535_vm1, %v20354_v53 }
  0xf4   : > { %1443 = vmatprep.mubr.f32.mxu1 %v20064_v18  ;;  %1740 = vmatprep.mubr.f32.mxu0 %v20064_v18 }
  0xf7   : > { %14896 = vmatmul.mubr.msk.f32.gmra.mrb[44].mxu1 %vm535_vm1, %v20369_v56  ;;  %14941 = vmatmul.mubr.msk.f32.gmra.mrb[6].mxu0 %vm535_vm1, %v20366_v55 }
  0xf8   : > { %1449 = vmatprep.mubr.f32.mxu1 %v20064_v18  ;;  %1746 = vmatprep.mubr.f32.mxu0 %v20064_v18 }
  0xfb   : > { %14897 = vmatmul.mubr.msk.f32.gmra.mrb[46].mxu1 %vm535_vm1, %v20381_v58  ;;  %14942 = vmatmul.mubr.msk.f32.gmra.mrb[8].mxu0 %vm535_vm1, %v20378_v57 }
  0xfc   : > { %1455 = vmatprep.mubr.f32.mxu1 %v20064_v18  ;;  %1752 = vmatprep.mubr.f32.mxu0 %v20064_v18 }
  0xff   : > { %14898 = vmatmul.mubr.msk.f32.gmra.mrb[48].mxu1 %vm535_vm1, %v20393_v60  ;;  %14943 = vmatmul.mubr.msk.f32.gmra.mrb[10].mxu0 %vm535_vm1, %v20390_v59 }
 0x100   : > { %1461 = vmatprep.mubr.f32.mxu1 %v20064_v18  ;;  %1758 = vmatprep.mubr.f32.mxu0 %v20064_v18 }
 0x103   : > { %14899 = vmatmul.mubr.msk.f32.gmra.mrb[56].mxu1 %vm535_vm1, %v20405_v62  ;;  %14944 = vmatmul.mubr.msk.f32.gmra.mrb[12].mxu0 %vm535_vm1, %v20402_v61 }
 0x104   : > { %17035 = vmatprep.mubr.msk.f32.mxu1 %vm535_vm1, %v20273_v31  ;;  %1764 = vmatprep.mubr.f32.mxu0 %v20064_v18 }
 0x107   : > { %17036 = vmatmul.mubr.msk.f32.vlgmr.msra.gmra.mrb[58].mxu1 %vm535_vm1, %v20295_v38  ;;  %14945 = vmatmul.mubr.msk.f32.gmra.mrb[14].mxu0 %vm535_vm1, %v20276_v32 }
 0x108   : > { %17038 = vmatprep.mubr.msk.f32.mxu1 %vm535_vm1, %v20323_v47  ;;  %1770 = vmatprep.mubr.f32.mxu0 %v20064_v18 }
 0x109   : > { %18091 = vmatpush1.bf16.msra.mxu1 %v18090_v33  ;;  %v3262_v33 = vld [vmem:[#allocation2 + $0x20] sm:$0xff] }
 0x10a   : > { %14954 = vmatprep.subr.msk.mxu1 %vm590_vm0, %v14932_v34 }
 0x10b   : > { %17039 = vmatmul.mubr.msk.f32.gmra.mrb[60].mxu1 %vm535_vm1, %v20341_v51  ;;  %14946 = vmatmul.mubr.msk.f32.gmra.mrb[16].mxu0 %vm535_vm1, %v20298_v39 }
 0x10c   : > { %17041 = vmatprep.mubr.msk.f32.mxu1 %vm535_vm1, %v20354_v53  ;;  %1776 = vmatprep.mubr.f32.mxu0 %v20064_v18 }
 0x10d   : > { %14955 = vmatpush1.msk.msra.mxu1 %vm590_vm0, %v14931_v35 }
 0x10f   : > { %17042 = vmatmul.mubr.msk.f32.gmra.mrb[62].mxu1 %vm535_vm1, %v20366_v55  ;;  %14947 = vmatmul.mubr.msk.f32.gmra.mrb[38].mxu0 %vm535_vm1, %v20326_v48 }
 0x110   : > { %17044 = vmatprep.mubr.msk.f32.mxu1 %vm535_vm1, %v20378_v57  ;;  %1782 = vmatprep.mubr.f32.mxu0 %v20064_v18 }
 0x113   : > { %17045 = vmatmul.mubr.msk.f32.gmra.mrb[64].mxu1 %vm535_vm1, %v20390_v59  ;;  %14948 = vmatmul.mubr.msk.f32.gmra.mrb[40].mxu0 %vm535_vm1, %v20344_v52 }
 0x114   : > { %17047 = vmatprep.mubr.msk.f32.mxu1 %vm535_vm1, %v20402_v61  ;;  %1788 = vmatprep.mubr.f32.mxu0 %v20064_v18 }
 0x117   : > { %17048 = vmatmul.mubr.msk.f32.gmra.mrb[66].mxu1 %vm535_vm1, %v20276_v32  ;;  %14949 = vmatmul.mubr.msk.f32.gmra.mrb[42].mxu0 %vm535_vm1, %v20357_v54 }
 0x118   : > { %17050 = vmatprep.mubr.msk.f32.mxu1 %vm535_vm1, %v20298_v39  ;;  %1794 = vmatprep.mubr.f32.mxu0 %v20064_v18 }
 0x11b   : > { %17051 = vmatmul.mubr.msk.f32.gmra.mrb[68].mxu1 %vm535_vm1, %v20326_v48  ;;  %14950 = vmatmul.mubr.msk.f32.gmra.mrb[44].mxu0 %vm535_vm1, %v20369_v56 }
 0x11c   : > { %17053 = vmatprep.mubr.msk.f32.mxu1 %vm535_vm1, %v20344_v52  ;;  %1800 = vmatprep.mubr.f32.mxu0 %v20064_v18 }
 0x11f   : > { %17054 = vmatmul.mubr.msk.f32.gmra.mrb[70].mxu1 %vm535_vm1, %v20357_v54  ;;  %14951 = vmatmul.mubr.msk.f32.gmra.mrb[46].mxu0 %vm535_vm1, %v20381_v58 }
 0x120   : > { %17056 = vmatprep.mubr.msk.f32.mxu1 %vm535_vm1, %v20369_v56  ;;  %1806 = vmatprep.mubr.f32.mxu0 %v20064_v18 }
 0x123   : > { %17057 = vmatmul.mubr.msk.f32.gmra.mrb[72].mxu1 %vm535_vm1, %v20381_v58  ;;  %14952 = vmatmul.mubr.msk.f32.gmra.mrb[48].mxu0 %vm535_vm1, %v20393_v60 }
 0x124   : > { %17059 = vmatprep.mubr.msk.f32.mxu1 %vm535_vm1, %v20393_v60  ;;  %1812 = vmatprep.mubr.f32.mxu0 %v20064_v18 }
 0x126   : > { %v20793_v36 = vpop.f32.mrb[0].mxu1 }
 0x127   : > { %17060 = vmatmul.mubr.msk.f32.gmra.mrb[74].mxu1 %vm535_vm1, %v20405_v62  ;;  %14953 = vmatmul.mubr.msk.f32.gmra.mrb[50].mxu0 %vm535_vm1, %v20405_v62  ;;  %v20799_v37 = vpop.f32.mrb[1].mxu1 }
 0x128   : > { %1883 = vmatprep.mubr.f32.mxu1 %v20064_v18  ;;  %17068 = vmatprep.mubr.msk.f32.mxu0 %vm535_vm1, %v20273_v31 }
 0x12a   : > { %v20804_v40 = vpop.f32.mrb[2].mxu1 }
 0x12b   : > { %14956 = vmatmul.mubr.msk.f32.vlgmr.msra.gmra.mrb[76].mxu1 %vm535_vm1, %v20273_v31  ;;  %17069 = vmatmul.mubr.msk.f32.vlgmr.msra.gmra.mrb[58].mxu0 %vm535_vm1, %v20295_v38  ;;  %v20810_v41 = vpop.f32.mrb[3].mxu1 }
 0x12c   : > { %1887 = vmatprep.mubr.f32.mxu1 %v20064_v18  ;;  %17071 = vmatprep.mubr.msk.f32.mxu0 %vm535_vm1, %v20323_v47 }
 0x12e   : > { %v20815_v42 = vpop.f32.mrb[4].mxu1 }
 0x12f   : > { %14957 = vmatmul.mubr.msk.f32.gmra.mrb[78].mxu1 %vm535_vm1, %v20295_v38  ;;  %17072 = vmatmul.mubr.msk.f32.gmra.mrb[60].mxu0 %vm535_vm1, %v20341_v51  ;;  %v20821_v43 = vpop.f32.mrb[5].mxu1 }
 0x130   : > { %1891 = vmatprep.mubr.f32.mxu1 %v20064_v18  ;;  %17074 = vmatprep.mubr.msk.f32.mxu0 %vm535_vm1, %v20354_v53 }
 0x132   : > { %v20826_v31 = vpop.f32.mrb[6].mxu1 }
 0x133   : > { %14958 = vmatmul.mubr.msk.f32.gmra.mrb[18].mxu1 %vm535_vm1, %v20323_v47  ;;  %17075 = vmatmul.mubr.msk.f32.gmra.mrb[62].mxu0 %vm535_vm1, %v20366_v55  ;;  %v20832_v44 = vpop.f32.mrb[7].mxu1 }
 0x134   : > { %1897 = vmatprep.mubr.f32.mxu1 %v20064_v18  ;;  %17077 = vmatprep.mubr.msk.f32.mxu0 %vm535_vm1, %v20378_v57 }
 0x136   : > { %v20837_v38 = vpop.f32.mrb[8].mxu1 }
 0x137   : > { %14959 = vmatmul.mubr.msk.f32.gmra.mrb[20].mxu1 %vm535_vm1, %v20341_v51  ;;  %17078 = vmatmul.mubr.msk.f32.gmra.mrb[64].mxu0 %vm535_vm1, %v20390_v59  ;;  %v20843_v45 = vpop.f32.mrb[9].mxu1 }
 0x138   : > { %1903 = vmatprep.mubr.f32.mxu1 %v20064_v18  ;;  %17080 = vmatprep.mubr.msk.f32.mxu0 %vm535_vm1, %v20402_v61 }
 0x13a   : > { %v20848_v46 = vpop.f32.mrb[10].mxu1 }
 0x13b   : > { %14960 = vmatmul.mubr.msk.f32.gmra.mrb[22].mxu1 %vm535_vm1, %v20354_v53  ;;  %17081 = vmatmul.mubr.msk.f32.gmra.mrb[66].mxu0 %vm535_vm1, %v20276_v32  ;;  %v20854_v47 = vpop.f32.mrb[11].mxu1 }
 0x13c   : > { %1909 = vmatprep.mubr.f32.mxu1 %v20064_v18  ;;  %17083 = vmatprep.mubr.msk.f32.mxu0 %vm535_vm1, %v20298_v39 }
 0x13e   : > { %v20859_v49 = vpop.f32.mrb[12].mxu1 }
 0x13f   : > { %14961 = vmatmul.mubr.msk.f32.gmra.mrb[24].mxu1 %vm535_vm1, %v20366_v55  ;;  %17084 = vmatmul.mubr.msk.f32.gmra.mrb[68].mxu0 %vm535_vm1, %v20326_v48  ;;  %v20865_v50 = vpop.f32.mrb[13].mxu1 }
 0x140   : > { %1915 = vmatprep.mubr.f32.mxu1 %v20064_v18  ;;  %17086 = vmatprep.mubr.msk.f32.mxu0 %vm535_vm1, %v20344_v52 }
 0x142   : > { %v768_v51 = vpop.f32.mrb[14].mxu1 }
 0x143   : > { %14962 = vmatmul.mubr.msk.f32.gmra.mrb[26].mxu1 %vm535_vm1, %v20378_v57  ;;  %17087 = vmatmul.mubr.msk.f32.gmra.mrb[70].mxu0 %vm535_vm1, %v20357_v54  ;;  %v769_v53 = vpop.f32.mrb[15].mxu1  ;;  %v3263_v51 = vld [vmem:[#allocation2 + $0x28] sm:$0xff] }
 0x144   : > { %1921 = vmatprep.mubr.f32.mxu1 %v20064_v18  ;;  %17089 = vmatprep.mubr.msk.f32.mxu0 %vm535_vm1, %v20369_v56  ;;  %v3264_v53 = vld [vmem:[#allocation2 + $0x30] sm:$0xff] }
 0x146   : > { %v772_v55 = vpop.f32.mrb[16].mxu1 }
 0x147   : > { %14963 = vmatmul.mubr.msk.f32.gmra.mrb[28].mxu1 %vm535_vm1, %v20390_v59  ;;  %17090 = vmatmul.mubr.msk.f32.gmra.mrb[72].mxu0 %vm535_vm1, %v20381_v58  ;;  %v773_v63 = vpop.f32.mrb[17].mxu1 }
 0x148   : > { %1927 = vmatprep.mubr.f32.mxu1 %v20064_v18  ;;  %17092 = vmatprep.mubr.msk.f32.mxu0 %vm535_vm1, %v20393_v60 }
 0x14a   : > { %v20884_v57 = vpop.f32.mrb[18].mxu0 }
 0x14b   : > { %v20886_v0 = vpop.f32.mrb[19].mxu0  ;;  %14964 = vmatmul.mubr.msk.f32.gmra.mrb[30].mxu1 %vm535_vm1, %v20402_v61  ;;  %17093 = vmatmul.mubr.msk.f32.gmra.mrb[74].mxu0 %vm535_vm1, %v20405_v62 }
 0x14c   : > { %1933 = vmatprep.mubr.f32.mxu1 %v20064_v18  ;;  %9817 = vmatprep.mubr.f32.mxu0 %v20064_v18 }
 0x14e   : > { %v20894_v59 = vpop.f32.mrb[20].mxu0 }
 0x14f   : > { %v20896_v1 = vpop.f32.mrb[21].mxu0  ;;  %14965 = vmatmul.mubr.msk.f32.gmra.mrb[32].mxu1 %vm535_vm1, %v20276_v32 }
 0x150   : > { %1939 = vmatprep.mubr.f32.mxu1 %v20064_v18 }
 0x152   : > { %v20901_v2 = vpop.f32.mrb[22].mxu0 }
 0x153   : > { %v20903_v3 = vpop.f32.mrb[23].mxu0  ;;  %14966 = vmatmul.mubr.msk.f32.gmra.mrb[34].mxu1 %vm535_vm1, %v20298_v39 }
 0x154   : > { %1945 = vmatprep.mubr.f32.mxu1 %v20064_v18 }
 0x156   : > { %v20908_v61 = vpop.f32.mrb[24].mxu0 }
 0x157   : > { %v20910_v4 = vpop.f32.mrb[25].mxu0  ;;  %14967 = vmatmul.mubr.msk.f32.gmra.mrb[36].mxu1 %vm535_vm1, %v20326_v48 }
 0x158   : > { %1951 = vmatprep.mubr.f32.mxu1 %v20064_v18 }
 0x15a   : > { %v20915_v32 = vpop.f32.mrb[26].mxu0 }
 0x15b   : > { %v20917_v5 = vpop.f32.mrb[27].mxu0  ;;  %14968 = vmatmul.mubr.msk.f32.gmra.mrb[38].mxu1 %vm535_vm1, %v20344_v52 }
 0x15c   : > { %1957 = vmatprep.mubr.f32.mxu1 %v20064_v18 }
 0x15e   : > { %v20922_v39 = vpop.f32.mrb[28].mxu0 }
 0x15f   : > { %v20924_v6 = vpop.f32.mrb[29].mxu0  ;;  %14969 = vmatmul.mubr.msk.f32.gmra.mrb[40].mxu1 %vm535_vm1, %v20357_v54 }
 0x160   : > { %1963 = vmatprep.mubr.f32.mxu1 %v20064_v18 }
 0x162   : > { %v20929_v48 = vpop.f32.mrb[30].mxu0 }
 0x163   : > { %v20931_v7 = vpop.f32.mrb[31].mxu0  ;;  %14970 = vmatmul.mubr.msk.f32.gmra.mrb[42].mxu1 %vm535_vm1, %v20369_v56 }
 0x164   : > { %1969 = vmatprep.mubr.f32.mxu1 %v20064_v18 }
 0x166   : > { %v20936_v52 = vpop.f32.mrb[32].mxu0 }
 0x167   : > { %v20938_v8 = vpop.f32.mrb[33].mxu0  ;;  %14971 = vmatmul.mubr.msk.f32.gmra.mrb[44].mxu1 %vm535_vm1, %v20381_v58 }
 0x168   : > { %1975 = vmatprep.mubr.f32.mxu1 %v20064_v18 }
 0x16a   : > { %v17028_v54 = vpop.f32.mrb[34].mxu0 }
 0x16b   : > { %v1090_v9 = vpop.f32.mrb[35].mxu0  ;;  %14972 = vmatmul.mubr.msk.f32.gmra.mrb[46].mxu1 %vm535_vm1, %v20393_v60  ;;  %v14995_v60 = vld [vmem:[%s26022_s3 + $0x30] sm:$0xff] }
 0x16c   : > { %1981 = vmatprep.mubr.f32.mxu1 %v20064_v18  ;;  %v18096_v17 = vpack.c.bf16 %v14995_v60, %v14994_v16  ;;  %v3265_v9 = vld [vmem:[#allocation2 + $0x38] sm:$0xff] }
 0x16e   : > { %v1194_v10 = vpop.f32.mrb[36].mxu0  ;;  %18097 = vmatprep.subr.bf16.mxu1 %v18096_v17 }
 0x16f   : > { %v1195_v56 = vpop.f32.mrb[37].mxu0  ;;  %14973 = vmatmul.mubr.msk.f32.gmra.mrb[48].mxu1 %vm535_vm1, %v20405_v62  ;;  %v20957_v62 = vld [vmem:[%s26022_s3 + $0x38] sm:$0xff] }
 0x170   : > { %18099 = vmatpush3.bf16.msra.mxu1 %v18096_v17  ;;  %v18100_v18 = vpack.c.bf16 %v20962_v19, %v20957_v62  ;;  %17105 = vmatprep.mubr.msk.f32.mxu1 %vm3023_vm2, %v3259_v26  ;;  %v3266_v56 = vld [vmem:[#allocation2 + $0x40] sm:$0xff] }
 0x172   : > { %18101 = vmatprep.subr.bf16.mxu1 %v18100_v18 }
 0x174   : > { %18103 = vmatpush3.bf16.msra.mxu1 %v18100_v18 }
 0x175   : > { %17103 = vmatprep.subr.msk.mxu1 %vm3521_vm3, %v14998_v24 }
 0x178   : > { %17104 = vmatpush3.msk.msra.mxu1 %vm3521_vm3, %v14998_v24 }
 0x179   : > { %17106 = vmatmul.mubr.msk.f32.vlgmr.msra.gmra.mrb[80].mxu1 %vm3023_vm2, %v3260_v27 }
 0x17a   : > { %17108 = vmatprep.mubr.msk.f32.mxu1 %vm3023_vm2, %v3261_v30 }
 0x17d   : > { %17109 = vmatmul.mubr.msk.f32.gmra.mrb[82].mxu1 %vm3023_vm2, %v3262_v33 }
 0x17e   : > { %17111 = vmatprep.mubr.msk.f32.mxu1 %vm3023_vm2, %v3263_v51 }
 0x181   : > { %17112 = vmatmul.mubr.msk.f32.gmra.mrb[84].mxu1 %vm3023_vm2, %v3264_v53 }
 0x182   : > { %17114 = vmatprep.mubr.msk.f32.mxu1 %vm3023_vm2, %v3265_v9 }
 0x185   : > { %17115 = vmatmul.mubr.msk.f32.gmra.mrb[86].mxu1 %vm3023_vm2, %v3266_v56 }
 0x18a   : > { %v937_v11 = vpop.f32.mrb[50].mxu1 }
 0x18b   : > { %v938_v12 = vpop.f32.mrb[51].mxu1 }
 0x18e   : > { %v941_v13 = vpop.f32.mrb[52].mxu1 }
 0x18f   : > { %v942_v14 = vpop.f32.mrb[53].mxu1 }
 0x192   : > { %v1363_v15 = vpop.f32.mrb[54].mxu1 }
 0x193   : > { %v1364_v58 = vpop.f32.mrb[55].mxu1 }
 0x1b2   : > { %v1294_v21 = vpop.f32.mrb[52].mxu0 }
 0x1b3   : > { %v1295_v22 = vpop.f32.mrb[53].mxu0 }
 0x1b6   : > { %v1716_v23 = vpop.f32.mrb[54].mxu0 }
 0x1b7   : > { %v1717_v25 = vpop.f32.mrb[55].mxu0 }
 0x1ba   : > { %v1720_v28 = vpop.f32.mrb[56].mxu0 }
 0x1bb   : > { %v1721_v29 = vpop.f32.mrb[57].mxu0 }
 0x1be   : > { %v1724_v34 = vpop.f32.mrb[0].mxu0 }
 0x1bf   : > { %v1726_v35 = vpop.f32.mrb[1].mxu0 }
 0x1c2   : > { %v1730_v55 = vpop.f32.mrb[2].mxu0 }
 0x1c3   : > { %v21135_v63 = vmax.f32 %v1724_v34, %v1730_v55  ;;  %v1732_v54 = vpop.f32.mrb[3].mxu0 }
 0x1c4   : > { %v21137_v10 = vmax.f32 %v1726_v35, %v1732_v54 }
 0x1c5   : > { %2349 = vrot.lane.b32.xlu0 %v21135_v63, %s20065_s14 }
 0x1c6   : > { %v1736_v11 = vpop.f32.mrb[4].mxu0 }
 0x1c7   : > { %v1738_v12 = vpop.f32.mrb[5].mxu0 }
 0x1c9   : > { %2389 = vrot.lane.b32.xlu0 %v21137_v10, %s20065_s14 }
 0x1ca   : > { %v1742_v13 = vpop.f32.mrb[6].mxu0 }
 0x1cb   : > { %v21145_v14 = vmax.f32 %v1736_v11, %v1742_v13  ;;  %v1744_v15 = vpop.f32.mrb[7].mxu0 }
 0x1cc   : > { %v21147_v58 = vmax.f32 %v1738_v12, %v1744_v15 }
 0x1cd   : > { %2351 = vrot.lane.b32.xlu1 %v21145_v14, %s20065_s14 }
 0x1ce   : > { %2391 = vrot.lane.b32.xlu0 %v21147_v58, %s20065_s14  ;;  %v1748_v16 = vpop.f32.mrb[8].mxu0 }
 0x1cf   : > { %v1750_v60 = vpop.f32.mrb[9].mxu0 }
 0x1d2   : > { %v1754_v17 = vpop.f32.mrb[10].mxu0 }
 0x1d3   : > { %v21153_v62 = vmax.f32 %v1748_v16, %v1754_v17  ;;  %v1756_v19 = vpop.f32.mrb[11].mxu0 }
 0x1d4   : > { %v21155_v20 = vmax.f32 %v1750_v60, %v1756_v19 }
 0x1d5   : > { %2353 = vrot.lane.b32.xlu0 %v21153_v62, %s20065_s14 }
 0x1d6   : > { %2393 = vrot.lane.b32.xlu1 %v21155_v20, %s20065_s14  ;;  %v1760_v18 = vpop.f32.mrb[12].mxu0  ;;  %v1463_v21 = vpop.f32.mrb[56].mxu1 }
 0x1d7   : > { %v1762_v22 = vpop.f32.mrb[13].mxu0  ;;  %v1464_v23 = vpop.f32.mrb[57].mxu1 }
 0x1da   : > { %v17037_v24 = vpop.f32.mrb[58].mxu1  ;;  %v1766_v25 = vpop.f32.mrb[14].mxu0 }
 0x1db   : > { %v21162_v26 = vadd.f32 %v17037_v24, %v20886_v0  ;;  %v21164_v27 = vmax.f32 %v1760_v18, %v1766_v25  ;;  %v1768_v28 = vpop.f32.mrb[15].mxu0  ;;  %v1532_v29 = vpop.f32.mrb[59].mxu1 }
 0x1dc   : > { %v21166_v30 = vmax.f32 %v1762_v22, %v1768_v28 }
 0x1dd   : > { %2355 = vrot.lane.b32.xlu1 %v21164_v27, %s20065_s14 }
 0x1de   : > { %v17040_v33 = vpop.f32.mrb[60].mxu1  ;;  %2395 = vrot.lane.b32.xlu0 %v21166_v30, %s20065_s14  ;;  %v1772_v34 = vpop.f32.mrb[16].mxu0 }
 0x1df   : > { %v21173_v35 = vadd.f32 %v17040_v33, %v20896_v1  ;;  %v1541_v51 = vpop.f32.mrb[61].mxu1  ;;  %v1774_v0 = vpop.f32.mrb[17].mxu0 }
 0x1e0   : > { %v21176_v53 = vadd.f32 %v20884_v57, %v1541_v51 }
 0x1e2   : > { %v17043_v55 = vpop.f32.mrb[62].mxu1  ;;  %v1778_v54 = vpop.f32.mrb[38].mxu0 }
 0x1e3   : > { %v21179_v9 = vadd.f32 %v17043_v55, %v20903_v3  ;;  %v18921_v56 = vadd.f32 %v1778_v54, %v20793_v36  ;;  %v1551_v11 = vpop.f32.mrb[63].mxu1  ;;  %v1780_v12 = vpop.f32.mrb[39].mxu0 }
 0x1e4   : > { %v21183_v13 = vadd.f32 %v20894_v59, %v1551_v11  ;;  %v18922_v1 = vadd.f32 %v1780_v12, %v20799_v37 }
 0x1e5   : > { %v21186_v15 = vmax.f32 %v1772_v34, %v18921_v56 }
 0x1e6   : > { %v21188_v16 = vmax.f32 %v1774_v0, %v18922_v1  ;;  %v17046_v57 = vpop.f32.mrb[64].mxu1  ;;  %v1784_v60 = vpop.f32.mrb[40].mxu0 }
 0x1e7   : > { %v21191_v17 = vadd.f32 %v17046_v57, %v20910_v4  ;;  %v18923_v3 = vadd.f32 %v1784_v60, %v20804_v40  ;;  %v1561_v19 = vpop.f32.mrb[65].mxu1  ;;  %2357 = vrot.lane.b32.xlu1 %v21186_v15, %s20065_s14  ;;  %v1786_v36 = vpop.f32.mrb[41].mxu0 }
 0x1e8   : > { %v21197_v59 = vadd.f32 %v20901_v2, %v1561_v19  ;;  %v18924_v37 = vadd.f32 %v1786_v36, %v20810_v41  ;;  %2397 = vrot.lane.b32.xlu0 %v21188_v16, %s20065_s14 }
 0x1ea   : > { %v17049_v18 = vpop.f32.mrb[66].mxu1  ;;  %v1790_v21 = vpop.f32.mrb[42].mxu0 }
 0x1eb   : > { %v21203_v4 = vadd.f32 %v17049_v18, %v20917_v5  ;;  %v18925_v40 = vadd.f32 %v1790_v21, %v20815_v42  ;;  %v1571_v22 = vpop.f32.mrb[67].mxu1  ;;  %v1792_v23 = vpop.f32.mrb[43].mxu0 }
 0x1ec   : > { %v21207_v24 = vadd.f32 %v20908_v61, %v1571_v22  ;;  %v18926_v2 = vadd.f32 %v1792_v23, %v20821_v43 }
 0x1ed   : > { %v21210_v25 = vmax.f32 %v18923_v3, %v18925_v40 }
 0x1ee   : > { %v21212_v41 = vmax.f32 %v18924_v37, %v18926_v2  ;;  %v17052_v28 = vpop.f32.mrb[68].mxu1  ;;  %v1796_v29 = vpop.f32.mrb[44].mxu0 }
 0x1ef   : > { %v21215_v33 = vadd.f32 %v17052_v28, %v20924_v6  ;;  %v18927_v5 = vadd.f32 %v1796_v29, %v20826_v31  ;;  %v1581_v34 = vpop.f32.mrb[69].mxu1  ;;  %2359 = vrot.lane.b32.xlu1 %v21210_v25, %s20065_s14  ;;  %v1798_v42 = vpop.f32.mrb[45].mxu0 }
 0x1f0   : > { %v21221_v61 = vadd.f32 %v20915_v32, %v1581_v34  ;;  %v18928_v43 = vadd.f32 %v1798_v42, %v20832_v44  ;;  %2399 = vrot.lane.b32.xlu0 %v21212_v41, %s20065_s14 }
 0x1f2   : > { %v17055_v51 = vpop.f32.mrb[70].mxu1  ;;  %v1802_v0 = vpop.f32.mrb[46].mxu0 }
 0x1f3   : > { %v21227_v6 = vadd.f32 %v17055_v51, %v20931_v7  ;;  %v18929_v31 = vadd.f32 %v1802_v0, %v20837_v38  ;;  %v1591_v55 = vpop.f32.mrb[71].mxu1  ;;  %v1804_v54 = vpop.f32.mrb[47].mxu0 }
 0x1f4   : > { %v21231_v56 = vadd.f32 %v20922_v39, %v1591_v55  ;;  %v18930_v32 = vadd.f32 %v1804_v54, %v20843_v45 }
 0x1f5   : > { %v21234_v11 = vmax.f32 %v18927_v5, %v18929_v31 }
 0x1f6   : > { %v21236_v44 = vmax.f32 %v18928_v43, %v18930_v32  ;;  %v17058_v12 = vpop.f32.mrb[72].mxu1  ;;  %v1808_v1 = vpop.f32.mrb[48].mxu0 }
 0x1f7   : > { %v21239_v57 = vadd.f32 %v17058_v12, %v20938_v8  ;;  %v18931_v7 = vadd.f32 %v1808_v1, %v20848_v46  ;;  %v1601_v60 = vpop.f32.mrb[73].mxu1  ;;  %2361 = vrot.lane.b32.xlu1 %v21234_v11, %s20065_s14  ;;  %v1810_v38 = vpop.f32.mrb[49].mxu0 }
 0x1f8   : > { %v21245_v39 = vadd.f32 %v20929_v48, %v1601_v60  ;;  %v18932_v45 = vadd.f32 %v1810_v38, %v20854_v47  ;;  %2401 = vrot.lane.b32.xlu0 %v21236_v44, %s20065_s14 }
 0x1fa   : > { %v17061_v3 = vpop.f32.mrb[74].mxu1  ;;  %v1814_v19 = vpop.f32.mrb[50].mxu0 }
 0x1fb   : > { %v18933_v8 = vadd.f32 %v1814_v19, %v20859_v49  ;;  %v1611_v36 = vpop.f32.mrb[75].mxu1  ;;  %v1816_v37 = vpop.f32.mrb[51].mxu0 }
 0x1fc   : > { %v21252_v46 = vadd.f32 %v20936_v52, %v1611_v36  ;;  %v18934_v18 = vadd.f32 %v1816_v37, %v20865_v50 }
 0x1fd   : > { %v21255_v21 = vmax.f32 %v18931_v7, %v18933_v8 }
 0x1fe   : > { %v21257_v48 = vmax.f32 %v18932_v45, %v18934_v18  ;;  %v17070_v40 = vpop.f32.mrb[58].mxu0  ;;  %v1885_v47 = vpop.f32.mrb[76].mxu1 }
 0x1ff   : > { %v2054_v22 = vpop.f32.mrb[59].mxu0  ;;  %v1886_v23 = vpop.f32.mrb[77].mxu1 }
 0x202   : > { %v17073_v2 = vpop.f32.mrb[60].mxu0  ;;  %v1889_v28 = vpop.f32.mrb[78].mxu1 }
 0x203   : > { %v2230_v29 = vadd.f32 %v17073_v2, %v21176_v53  ;;  %v2062_v49 = vpop.f32.mrb[61].mxu0  ;;  %v1890_v5 = vpop.f32.mrb[79].mxu1 }
 0x204   : > { %v2225_v34 = vadd.f32 %v21162_v26, %v2062_v49 }
 0x206   : > { %v21261_v52 = vmax.f32 %v2225_v34, %v2230_v29  ;;  %v1893_v42 = vpop.f32.mrb[18].mxu1  ;;  %v17076_v50 = vpop.f32.mrb[62].mxu0 }
 0x207   : > { %v2240_v43 = vadd.f32 %v17076_v50, %v21183_v13  ;;  %v1895_v51 = vpop.f32.mrb[19].mxu1  ;;  %v2072_v0 = vpop.f32.mrb[63].mxu0 }
 0x208   : > { %v2235_v31 = vadd.f32 %v21173_v35, %v2072_v0  ;;  %2566 = vrot.lane.b32.xlu0 %v21261_v52, %s20065_s14 }
 0x20a   : > { %v21267_v55 = vmax.f32 %v2235_v31, %v2240_v43  ;;  %v1899_v53 = vpop.f32.mrb[20].mxu1  ;;  %v17079_v54 = vpop.f32.mrb[64].mxu0 }
 0x20b   : > { %v21269_v32 = vmax.f32 %v1893_v42, %v1899_v53  ;;  %v2250_v26 = vadd.f32 %v17079_v54, %v21197_v59  ;;  %v1901_v12 = vpop.f32.mrb[21].mxu1  ;;  %v2082_v1 = vpop.f32.mrb[65].mxu0 }
 0x20c   : > { %v21272_v7 = vmax.f32 %v1895_v51, %v1901_v12  ;;  %v2245_v13 = vadd.f32 %v21179_v9, %v2082_v1  ;;  %2568 = vrot.lane.b32.xlu1 %v21267_v55, %s20065_s14 }
 0x20e   : > { %v21277_v35 = vmax.f32 %v2245_v13, %v2250_v26  ;;  %v1905_v60 = vpop.f32.mrb[22].mxu1  ;;  %v17082_v38 = vpop.f32.mrb[66].mxu0 }
 0x20f   : > { %v2260_v45 = vadd.f32 %v17082_v38, %v21207_v24  ;;  %v1907_v3 = vpop.f32.mrb[23].mxu1  ;;  %v2092_v19 = vpop.f32.mrb[67].mxu0 }
 0x210   : > { %v2255_v8 = vadd.f32 %v21191_v17, %v2092_v19  ;;  %2454 = vrot.lane.b32.xlu1 %v21269_v32, %s20065_s14  ;;  %2570 = vrot.lane.b32.xlu0 %v21277_v35, %s20065_s14 }
 0x212   : > { %v21285_v9 = vmax.f32 %v2255_v8, %v2260_v45  ;;  %v1911_v59 = vpop.f32.mrb[24].mxu1  ;;  %v17085_v36 = vpop.f32.mrb[68].mxu0 }
 0x213   : > { %v21287_v37 = vmax.f32 %v1905_v60, %v1911_v59  ;;  %v2270_v18 = vadd.f32 %v17085_v36, %v21221_v61  ;;  %v1913_v40 = vpop.f32.mrb[25].mxu1  ;;  %v2102_v24 = vpop.f32.mrb[69].mxu0 }
 0x214   : > { %v21290_v47 = vmax.f32 %v1907_v3, %v1913_v40  ;;  %v2265_v17 = vadd.f32 %v21203_v4, %v2102_v24  ;;  %2518 = vrot.lane.b32.xlu1 %v21272_v7, %s20065_s14 }
 0x216   : > { %v21295_v22 = vmax.f32 %v2265_v17, %v2270_v18  ;;  %v1917_v23 = vpop.f32.mrb[26].mxu1  ;;  %2520 = vrot.lane.b32.xlu0 %v21290_v47, %s20065_s14  ;;  %v17088_v2 = vpop.f32.mrb[70].mxu0 }
 0x217   : > { %v2280_v28 = vadd.f32 %v17088_v2, %v21231_v56  ;;  %v1919_v29 = vpop.f32.mrb[27].mxu1  ;;  %v2112_v61 = vpop.f32.mrb[71].mxu0 }
 0x218   : > { %v2275_v49 = vadd.f32 %v21215_v33, %v2112_v61  ;;  %2572 = vrot.lane.b32.xlu1 %v21285_v9, %s20065_s14 }
 0x21a   : > { %v21303_v4 = vmax.f32 %v2275_v49, %v2280_v28  ;;  %v1923_v5 = vpop.f32.mrb[28].mxu1  ;;  %v17091_v34 = vpop.f32.mrb[72].mxu0  ;;  %v21350_v28 = vld [vmem:[%s26021_s2] ss:$0 sm:$0xff] }
 0x21b   : > { %v21305_v42 = vmax.f32 %v1917_v23, %v1923_v5  ;;  %v2290_v50 = vadd.f32 %v17091_v34, %v21245_v39  ;;  %v1925_v43 = vpop.f32.mrb[29].mxu1  ;;  %v2122_v51 = vpop.f32.mrb[73].mxu0 }
 0x21c   : > { %v21308_v0 = vmax.f32 %v1919_v29, %v1925_v43  ;;  %v2285_v56 = vadd.f32 %v21227_v6, %v2122_v51  ;;  %2456 = vrot.lane.b32.xlu1 %v21287_v37, %s20065_s14 }
 0x21d   : > { %2458 = vrot.lane.b32.xlu0 %v21305_v42, %s20065_s14 }
 0x21e   : > { %v21315_v33 = vmax.f32 %v2285_v56, %v2290_v50  ;;  %v1929_v31 = vpop.f32.mrb[30].mxu1  ;;  %v17094_v53 = vpop.f32.mrb[74].mxu0 }
 0x21f   : > { %v2300_v54 = vadd.f32 %v17094_v53, %v21252_v46  ;;  %v1931_v26 = vpop.f32.mrb[31].mxu1  ;;  %v2132_v39 = vpop.f32.mrb[75].mxu0 }
 0x220   : > { %v2295_v12 = vadd.f32 %v21239_v57, %v2132_v39  ;;  %2574 = vrot.lane.b32.xlu1 %v21295_v22, %s20065_s14 }
 0x222   : > { %v21321_v6 = vmax.f32 %v2295_v12, %v2300_v54  ;;  %v1935_v1 = vpop.f32.mrb[32].mxu1 }
 0x223   : > { %v21323_v13 = vmax.f32 %v1929_v31, %v1935_v1  ;;  %v1937_v60 = vpop.f32.mrb[33].mxu1 }
 0x224   : > { %v21325_v38 = vmax.f32 %v1931_v26, %v1937_v60  ;;  %2576 = vrot.lane.b32.xlu1 %v21303_v4, %s20065_s14 }
 0x226   : > { %v1941_v45 = vpop.f32.mrb[34].mxu1  ;;  %2524 = vrot.lane.b32.xlu0 %v21325_v38, %s20065_s14 }
 0x227   : > { %v1943_v46 = vpop.f32.mrb[35].mxu1 }
 0x228   : > { %2522 = vrot.lane.b32.xlu1 %v21308_v0, %s20065_s14 }
 0x22a   : > { %v1947_v57 = vpop.f32.mrb[36].mxu1 }
 0x22b   : > { %v21333_v3 = vmax.f32 %v1941_v45, %v1947_v57  ;;  %v1949_v19 = vpop.f32.mrb[37].mxu1 }
 0x22c   : > { %v21335_v8 = vmax.f32 %v1943_v46, %v1949_v19  ;;  %2460 = vrot.lane.b32.xlu1 %v21323_v13, %s20065_s14 }
 0x22e   : > { %v1953_v59 = vpop.f32.mrb[38].mxu1 }
 0x22f   : > { %v1955_v36 = vpop.f32.mrb[39].mxu1 }
 0x230   : > { %2462 = vrot.lane.b32.xlu1 %v21333_v3, %s20065_s14 }
 0x232   : > { %v1959_v18 = vpop.f32.mrb[40].mxu1 }
 0x233   : > { %v21341_v40 = vmax.f32 %v1953_v59, %v1959_v18  ;;  %v1961_v24 = vpop.f32.mrb[41].mxu1 }
 0x234   : > { %v21343_v17 = vmax.f32 %v1955_v36, %v1961_v24  ;;  %2526 = vrot.lane.b32.xlu1 %v21335_v8, %s20065_s14 }
 0x236   : > { %v1965_v23 = vpop.f32.mrb[42].mxu1 }
 0x237   : > { %v1967_v2 = vpop.f32.mrb[43].mxu1  ;;  %v2350_v29 = vpop.permute.xlu0 %2349 }
 0x238   : > { %v2373_v61 = vmax.f32 %v21135_v63, %v2350_v29  ;;  %2464 = vrot.lane.b32.xlu1 %v21341_v40, %s20065_s14 }
 0x23a   : > { %v2895_v49 = vadd.f32 %v21350_v28, %v2373_v61  ;;  %v1971_v5 = vpop.f32.mrb[44].mxu1 }
 0x23b   : > { %v21356_v34 = vmax.f32 %v1965_v23, %v1971_v5  ;;  %v1973_v50 = vpop.f32.mrb[45].mxu1  ;;  %v21358_v43 = vpop.permute.xlu0 %2389 }
 0x23c   : > { %v2959_v51 = vmax.f32 %v2895_v49, 0.0  ;;  %v21360_v56 = vmax.f32 %v1967_v2, %v1973_v50  ;;  %2528 = vrot.lane.b32.xlu1 %v21343_v17, %s20065_s14  ;;  %v2406_v31 = vsel %vm2405_vm4, %v2350_v29, %v21358_v43  ;;  %v2438_v26 = vmax.f32 %v21137_v10, %v21358_v43 }
 0x23d   : > { %v2422_v53 = vmax.f32 %v21135_v63, %v2406_v31 }
 0x23e   : > { %3125 = vst.msk [vmem:[#allocation2 + $0x58] sm:$0xff] %vm3023_vm2, %v2959_v51  ;;  %v1977_v54 = vpop.f32.mrb[46].mxu1 }
 0x23f   : > { %v1979_v39 = vpop.f32.mrb[47].mxu1  ;;  %v2352_v12 = vpop.permute.xlu1 %2351  ;;  %2614 = vrot.lane.b32.xlu0 %v2422_v53, %s20066_s16 }
 0x240   : > { %v2374_v1 = vmax.f32 %v21145_v14, %v2352_v12  ;;  %v21372_v60 = vpop.permute.xlu0 %2391  ;;  %2646 = vrot.lane.b32.xlu1 %v2438_v26, %s20067_s22 }
 0x241   : > { %v2407_v63 = vsel %vm2405_vm4, %v2352_v12, %v21372_v60  ;;  %v2439_v45 = vmax.f32 %v21147_v58, %v21372_v60 }
 0x242   : > { %v2903_v46 = vadd.f32 %v21350_v28, %v2374_v1  ;;  %v1983_v57 = vpop.f32.mrb[48].mxu1  ;;  %v2423_v19 = vmax.f32 %v21145_v14, %v2407_v63 }
 0x243   : > { %v21381_v59 = vmax.f32 %v1977_v54, %v1983_v57  ;;  %v1985_v36 = vpop.f32.mrb[49].mxu1 }
 0x244   : > { %v2967_v18 = vmax.f32 %v2903_v46, 0.0  ;;  %v21383_v24 = vmax.f32 %v1979_v39, %v1985_v36  ;;  %2616 = vrot.lane.b32.xlu0 %v2423_v19, %s20066_s16  ;;  %2648 = vrot.lane.b32.xlu1 %v2439_v45, %s20067_s22 }
 0x245   : > { %v3267_v23 = vld [vmem:[#allocation2 + $0x58] sm:$0xff] }
 0x246   : > { %3133 = vst.msk [vmem:[#allocation2 + $0xa8] sm:$0xff] %vm3023_vm2, %v2967_v18  ;;  %17117 = vmatprep.mubr.msk.f32.mxu1 %vm3023_vm2, %v3267_v23 }
 0x247   : > { %v2354_v2 = vpop.permute.xlu0 %2353 }
 0x248   : > { %v2375_v29 = vmax.f32 %v21153_v62, %v2354_v2  ;;  %v21390_v61 = vpop.permute.xlu1 %2393 }
 0x249   : > { %v2408_v14 = vsel %vm2405_vm4, %v2354_v2, %v21390_v61 }
 0x24a   : > { %v2911_v49 = vadd.f32 %v21350_v28, %v2375_v29  ;;  %v2424_v5 = vmax.f32 %v21153_v62, %v2408_v14 }
 0x24c   : > { %v2975_v50 = vmax.f32 %v2911_v49, 0.0  ;;  %2618 = vrot.lane.b32.xlu0 %v2424_v5, %s20066_s16 }
 0x24e   : > { %3141 = vst.msk [vmem:[#allocation2 + $0xf8] sm:$0xff] %vm3023_vm2, %v2975_v50 }
 0x24f   : > { %v21398_v51 = vpop.permute.xlu1 %2355 }
 0x250   : > { %v2376_v31 = vmax.f32 %v21164_v27, %v21398_v51  ;;  %v21418_v19 = vpop.permute.xlu0 %2395 }
 0x252   : > { %v2919_v53 = vadd.f32 %v21350_v28, %v2376_v31 }
 0x254   : > { %v2983_v54 = vmax.f32 %v2919_v53, 0.0 }
 0x256   : > { %3149 = vst.msk [vmem:[#allocation2 + $0x148] sm:$0xff] %vm3023_vm2, %v2983_v54 }
 0x259   : > { %v21404_v26 = vpop.permute.xlu1 %2357 }
 0x25a   : > { %v2377_v62 = vmax.f32 %v21186_v15, %v21404_v26  ;;  %v21423_v23 = vpop.permute.xlu0 %2397 }
 0x25c   : > { %v2927_v39 = vadd.f32 %v21350_v28, %v2377_v62 }
 0x25e   : > { %v2991_v12 = vmax.f32 %v2927_v39, 0.0 }
 0x260   : > { %3157 = vst.msk [vmem:[#allocation2 + $0x198] sm:$0xff] %vm3023_vm2, %v2991_v12 }
 0x261   : > { %v21410_v1 = vpop.permute.xlu1 %2359 }
 0x262   : > { %v2378_v63 = vmax.f32 %v21210_v25, %v21410_v1  ;;  %v21426_v29 = vpop.permute.xlu0 %2399 }
 0x264   : > { %v2935_v45 = vadd.f32 %v21350_v28, %v2378_v63 }
 0x266   : > { %v2999_v46 = vmax.f32 %v2935_v45, 0.0 }
 0x268   : > { %3165 = vst.msk [vmem:[#allocation2 + $0x1e8] sm:$0xff] %vm3023_vm2, %v2999_v46 }
 0x269   : > { %v21416_v57 = vpop.permute.xlu1 %2361 }
 0x26a   : > { %v2379_v36 = vmax.f32 %v21234_v11, %v21416_v57  ;;  %v21428_v14 = vpop.permute.xlu0 %2401 }
 0x26c   : > { %v2943_v18 = vadd.f32 %v21350_v28, %v2379_v36 }
 0x26e   : > { %v3007_v2 = vmax.f32 %v2943_v18, 0.0 }
 0x270   : > { %3173 = vst.msk [vmem:[#allocation2 + $0x238] sm:$0xff] %vm3023_vm2, %v3007_v2 }
 0x27a   : > { %v2567_v49 = vpop.permute.xlu0 %2566 }
 0x27b   : > { %v2590_v5 = vmax.f32 %v21272_v7, %v2567_v49  ;;  %v2591_v50 = vmax.f32 %v21261_v52, %v2567_v49 }
 0x27d   : > { %2841 = vrot.lane.b32.xlu0 %v2591_v50, %s20068_s23  ;;  %2839 = vrot.lane.b32.xlu1 %v2590_v5, %s20068_s23 }
 0x27e   : > { %v2569_v31 = vpop.permute.xlu1 %2568 }
 0x27f   : > { %v2592_v53 = vmax.f32 %v21290_v47, %v2569_v31  ;;  %v2593_v54 = vmax.f32 %v21267_v55, %v2569_v31 }
 0x281   : > { %2845 = vrot.lane.b32.xlu0 %v2593_v54, %s20068_s23  ;;  %2843 = vrot.lane.b32.xlu1 %v2592_v53, %s20068_s23  ;;  %v2409_v54 = vsel %vm2405_vm4, %v21398_v51, %v21418_v19 }
 0x282   : > { %v2455_v62 = vpop.permute.xlu1 %2454  ;;  %v2571_v36 = vpop.permute.xlu0 %2570 }
 0x283   : > { %v2502_v39 = vmax.f32 %v21269_v32, %v2455_v62  ;;  %v2470_v52 = vsel %vm2405_vm4, %v21358_v43, %v2455_v62  ;;  %v2440_v43 = vmax.f32 %v21155_v20, %v21390_v61  ;;  %v2594_v53 = vmax.f32 %v21308_v0, %v2571_v36 }
 0x284   : > { %v2486_v63 = vmax.f32 %v21137_v10, %v2470_v52 }
 0x285   : > { %2710 = vrot.lane.b32.xlu0 %v2502_v39, %s20069_s19 }
 0x286   : > { %v2519_v12 = vpop.permute.xlu1 %2518 }
 0x287   : > { %v2542_v45 = vmax.f32 %v21269_v32, %v2519_v12  ;;  %v2543_v46 = vmax.f32 %v21272_v7, %v2519_v12  ;;  %v2441_v12 = vmax.f32 %v21166_v30, %v21418_v19 }
 0x288   : > { %v2521_v7 = vpop.permute.xlu0 %2520 }
 0x289   : > { %2678 = vrot.lane.b32.xlu0 %v2486_v63, %s20070_s25  ;;  %2750 = vrot.lane.b32.xlu1 %v2542_v45, %s20071_s28  ;;  %v2544_v5 = vmax.f32 %v21287_v37, %v2521_v7  ;;  %v2545_v52 = vmax.f32 %v21290_v47, %v2521_v7 }
 0x28a   : > { %v21446_v55 = vpop.permute.xlu1 %2572 }
 0x28b   : > { %v2596_v47 = vmax.f32 %v21325_v38, %v21446_v55 }
 0x28d   : > { %2752 = vrot.lane.b32.xlu0 %v2543_v46, %s20071_s28  ;;  %2650 = vrot.lane.b32.xlu1 %v2440_v43, %s20067_s22 }
 0x28e   : > { %v2457_v10 = vpop.permute.xlu1 %2456 }
 0x28f   : > { %v2503_v18 = vmax.f32 %v21287_v37, %v2457_v10  ;;  %v2471_v2 = vsel %vm2405_vm4, %v21372_v60, %v2457_v10  ;;  %v2595_v60 = vmax.f32 %v21277_v35, %v2571_v36  ;;  %v3254_v37 = vld [vmem:[%s26022_s3 + $0x8] sm:$0xff]  ;;  %v2425_v35 = vmax.f32 %v21164_v27, %v2409_v54  ;;  %v2459_v45 = vpop.permute.xlu0 %2458 }
 0x290   : > { %v2487_v50 = vmax.f32 %v21147_v58, %v2471_v2  ;;  %v3253_v58 = vld [vmem:[%s26022_s3] sm:$0xff]  ;;  %v2504_v43 = vmax.f32 %v21305_v42, %v2459_v45  ;;  %v2472_v10 = vsel %vm2405_vm4, %v21390_v61, %v2459_v45  ;;  %v2410_v36 = vsel %vm2405_vm4, %v21404_v26, %v21423_v23 }
 0x291   : > { %2799 = vrot.lane.b32.xlu0 %v2543_v46, %s20072_s24  ;;  %2466 = vrot.lane.b32.xlu1 %v21356_v34, %s20065_s14  ;;  %v18104_v39 = vpack.c.bf16 %v3254_v37, %v3253_v58  ;;  %v2488_v2 = vmax.f32 %v21155_v20, %v2472_v10  ;;  %v2597_v26 = vmax.f32 %v21285_v9, %v21446_v55 }
 0x292   : > { %v21456_v32 = vpop.permute.xlu1 %2574 }
 0x293   : > { %18105 = vmatprep.subr.bf16.mxu1 %v18104_v39 }
 0x294   : > { %18107 = vmatpush3.bf16.msra.mxu1 %v18104_v39 }
 0x295   : > { %2712 = vrot.lane.b32.xlu0 %v2503_v18, %s20069_s19  ;;  %2530 = vrot.lane.b32.xlu1 %v21360_v56, %s20065_s14 }
 0x296   : > { %v21464_v49 = vpop.permute.xlu1 %2576 }
 0x298   : > { %v2525_v18 = vpop.permute.xlu0 %2524 }
 0x299   : > { %2680 = vrot.lane.b32.xlu0 %v2487_v50, %s20070_s25  ;;  %2754 = vrot.lane.b32.xlu1 %v2544_v5, %s20071_s28  ;;  %v2426_v5 = vmax.f32 %v21186_v15, %v2410_v36  ;;  %v2549_v37 = vmax.f32 %v21325_v38, %v2525_v18 }
 0x29a   : > { %v2523_v31 = vpop.permute.xlu1 %2522 }
 0x29b   : > { %v2546_v27 = vmax.f32 %v21305_v42, %v2523_v31  ;;  %v2547_v39 = vmax.f32 %v21308_v0, %v2523_v31 }
 0x29d   : > { %2849 = vrot.lane.b32.xlu0 %v2595_v60, %s20068_s23  ;;  %2847 = vrot.lane.b32.xlu1 %v2594_v53, %s20068_s23 }
 0x29e   : > { %v21483_v62 = vpop.permute.xlu1 %2460 }
 0x29f   : > { %v2505_v53 = vmax.f32 %v21323_v13, %v21483_v62 }
 0x2a1   : > { %2620 = vrot.lane.b32.xlu0 %v2425_v35, %s20066_s16  ;;  %2578 = vrot.lane.b32.xlu1 %v21315_v33, %s20065_s14 }
 0x2a2   : > { %v21489_v51 = vpop.permute.xlu1 %2462 }
 0x2a3   : > { %v2474_v0 = vsel %vm2405_vm4, %v21423_v23, %v21489_v51 }
 0x2a5   : > { %2756 = vrot.lane.b32.xlu0 %v2545_v52, %s20071_s28  ;;  %2652 = vrot.lane.b32.xlu1 %v2441_v12, %s20067_s22  ;;  %v2599_v12 = vmax.f32 %v21295_v22, %v21456_v32  ;;  %v2490_v22 = vmax.f32 %v21188_v16, %v2474_v0 }
 0x2a6   : > { %v21496_v63 = vpop.permute.xlu1 %2526 }
 0x2a9   : > { %2801 = vrot.lane.b32.xlu0 %v2545_v52, %s20072_s24  ;;  %2758 = vrot.lane.b32.xlu1 %v2546_v27, %s20071_s28 }
 0x2aa   : > { %v21501_v46 = vpop.permute.xlu1 %2464 }
 0x2ad   : > { %2714 = vrot.lane.b32.xlu0 %v2504_v43, %s20069_s19  ;;  %2851 = vrot.lane.b32.xlu1 %v2596_v47, %s20068_s23  ;;  %v2442_v47 = vmax.f32 %v21188_v16, %v21423_v23  ;;  %v2473_v43 = vsel %vm2405_vm4, %v21418_v19, %v21483_v62  ;;  %v2548_v16 = vmax.f32 %v21323_v13, %v2525_v18  ;;  %v3256_v23 = vld [vmem:[%s26022_s3 + $0x18] sm:$0xff] }
 0x2ae   : > { %v21513_v7 = vpop.permute.xlu1 %2528  ;;  %v2489_v36 = vmax.f32 %v21166_v30, %v2473_v43  ;;  %v2443_v19 = vmax.f32 %v21212_v41, %v21426_v29  ;;  %v3255_v30 = vld [vmem:[%s26022_s3 + $0x10] sm:$0xff]  ;;  %v2598_v13 = vmax.f32 %v21335_v8, %v21456_v32  ;;  %v2600_v18 = vmax.f32 %v21343_v17, %v21464_v49 }
 0x2af   : > { %v18108_v62 = vpack.c.bf16 %v3256_v23, %v3255_v30  ;;  %v2412_v32 = vsel %vm2405_vm4, %v21416_v57, %v21428_v14  ;;  %v2475_v57 = vsel %vm2405_vm4, %v21426_v29, %v21501_v46 }
 0x2b1   : > { %v2615_v50 = vpop.permute.xlu0 %2614  ;;  %2682 = vrot.lane.b32.xlu0 %v2488_v2, %s20070_s25  ;;  %2622 = vrot.lane.b32.xlu1 %v2426_v5, %s20066_s16  ;;  %v2550_v2 = vmax.f32 %v21333_v3, %v21496_v63  ;;  %v2551_v5 = vmax.f32 %v21335_v8, %v21496_v63  ;;  %v2507_v63 = vmax.f32 %v21341_v40, %v21501_v46 }
 0x2b2   : > { %v2896_v42 = vadd.f32 %v21350_v28, %v2615_v50  ;;  %v2647_v61 = vpop.permute.xlu1 %2646  ;;  %18109 = vmatprep.subr.bf16.mxu1 %v18108_v62  ;;  %v2506_v50 = vmax.f32 %v21333_v3, %v21489_v51  ;;  %v2553_v8 = vmax.f32 %v21343_v17, %v21513_v7  ;;  %v2428_v51 = vmax.f32 %v21234_v11, %v2412_v32  ;;  %v3257_v11 = vld [vmem:[%s26022_s3 + $0x20] sm:$0xf] }
 0x2b3   : > { %v2897_v60 = vadd.f32 %v21350_v28, %v2647_v61  ;;  %18111 = vmatpush3.bf16.msra.mxu1 %v18108_v62  ;;  %v2601_v17 = vmax.f32 %v21303_v4, %v21464_v49  ;;  %v2444_v4 = vmax.f32 %v21236_v44, %v21428_v14 }
 0x2b4   : > { %v2960_v54 = vmax.f32 %v2896_v42, 0.0  ;;  %v2411_v42 = vsel %vm2405_vm4, %v21410_v1, %v21426_v29  ;;  %v2491_v1 = vmax.f32 %v21212_v41, %v2475_v57  ;;  %17209 = vmatprep.subr.msk.mxu1 %vm3521_vm3, %v3257_v11 }
 0x2b5   : > { %v2961_v20 = vmax.f32 %v2897_v60, 0.0  ;;  %2853 = vrot.lane.b32.xlu0 %v2597_v26, %s20068_s23  ;;  %2716 = vrot.lane.b32.xlu1 %v2505_v53, %s20069_s19  ;;  %v2427_v3 = vmax.f32 %v21210_v25, %v2411_v42  ;;  %v2552_v25 = vmax.f32 %v21341_v40, %v21513_v7 }
 0x2b6   : > { %3126 = vst.msk [vmem:[#allocation2 + $0x60] sm:$0xff] %vm3023_vm2, %v2960_v54  ;;  %v2617_v15 = vpop.permute.xlu0 %2616  ;;  %v2649_v58 = vpop.permute.xlu1 %2648 }
 0x2b7   : > { %3127 = vst.msk [vmem:[#allocation2 + $0x68] sm:$0xff] %vm3023_vm2, %v2961_v20  ;;  %v2904_v9 = vadd.f32 %v21350_v28, %v2617_v15  ;;  %v2905_v55 = vadd.f32 %v21350_v28, %v2649_v58  ;;  %17210 = vmatpush3.msk.msra.mxu1 %vm3521_vm3, %v3257_v11 }
 0x2b9   : > { %v2968_v35 = vmax.f32 %v2904_v9, 0.0  ;;  %v2969_v52 = vmax.f32 %v2905_v55, 0.0  ;;  %2760 = vrot.lane.b32.xlu0 %v2547_v39, %s20071_s28  ;;  %2764 = vrot.lane.b32.xlu1 %v2549_v37, %s20071_s28 }
 0x2bb   : > { %3134 = vst.msk [vmem:[#allocation2 + $0xb0] sm:$0xff] %vm3023_vm2, %v2968_v35  ;;  %3135 = vst.msk [vmem:[#allocation2 + $0xb8] sm:$0xff] %vm3023_vm2, %v2969_v52 }
 0x2bd   : > { %2803 = vrot.lane.b32.xlu0 %v2547_v39, %s20072_s24  ;;  %2857 = vrot.lane.b32.xlu1 %v2599_v12, %s20068_s23  ;;  %v21544_v38 = vld [vmem:[#allocation2 + $0x60] sm:$0xff] }
 0x2be   : > { %17118 = vmatmul.mubr.msk.f32.gmra.mrb[88].mxu1 %vm3023_vm2, %v21544_v38  ;;  %v2619_v31 = vpop.permute.xlu0 %2618  ;;  %v21548_v27 = vld [vmem:[#allocation2 + $0x68] sm:$0xff] }
 0x2bf   : > { %v2912_v45 = vadd.f32 %v21350_v28, %v2619_v31  ;;  %17120 = vmatprep.mubr.msk.f32.mxu1 %vm3023_vm2, %v21548_v27 }
 0x2c1   : > { %v2976_v10 = vmax.f32 %v2912_v45, 0.0  ;;  %2654 = vrot.lane.b32.xlu0 %v2442_v47, %s20067_s22  ;;  %2686 = vrot.lane.b32.xlu1 %v2490_v22, %s20070_s25 }
 0x2c3   : > { %3142 = vst.msk [vmem:[#allocation2 + $0x100] sm:$0xff] %vm3023_vm2, %v2976_v10 }
 0x2c5   : > { %2684 = vrot.lane.b32.xlu0 %v2489_v36, %s20070_s25  ;;  %2766 = vrot.lane.b32.xlu1 %v2550_v2, %s20071_s28 }
 0x2c9   : > { %2762 = vrot.lane.b32.xlu0 %v2548_v16, %s20071_s28  ;;  %2656 = vrot.lane.b32.xlu1 %v2443_v19, %s20067_s22 }
 0x2cd   : > { %2805 = vrot.lane.b32.xlu0 %v2549_v37, %s20072_s24  ;;  %2807 = vrot.lane.b32.xlu1 %v2551_v5, %s20072_s24 }
 0x2d1   : > { %2855 = vrot.lane.b32.xlu0 %v2598_v13, %s20068_s23  ;;  %2859 = vrot.lane.b32.xlu1 %v2600_v18, %s20068_s23 }
 0x2d5   : > { %2718 = vrot.lane.b32.xlu0 %v2506_v50, %s20069_s19  ;;  %2720 = vrot.lane.b32.xlu1 %v2507_v63, %s20069_s19 }
 0x2d9   : > { %2768 = vrot.lane.b32.xlu0 %v2551_v5, %s20071_s28  ;;  %2772 = vrot.lane.b32.xlu1 %v2553_v8, %s20071_s28 }
 0x2dd   : > { %2624 = vrot.lane.b32.xlu0 %v2427_v3, %s20066_s16  ;;  %2626 = vrot.lane.b32.xlu1 %v2428_v51, %s20066_s16 }
 0x2e1   : > { %2861 = vrot.lane.b32.xlu0 %v2601_v17, %s20068_s23 }
 0x2e5   : > { %2688 = vrot.lane.b32.xlu0 %v2491_v1, %s20070_s25  ;;  %v21682_v1 = vld [vmem:[#allocation2 + $0xa8] sm:$0xff] }
 0x2e9   : > { %2770 = vrot.lane.b32.xlu0 %v2552_v25, %s20071_s28 }
 0x2ed   : > { %2809 = vrot.lane.b32.xlu0 %v2553_v8, %s20072_s24 }
 0x2ef   : > { %v2842_v29 = vpop.permute.xlu0 %2841  ;;  %v2840_v49 = vpop.permute.xlu1 %2839 }
 0x2f0   : > { %v2872_v41 = vsel %vm2871_vm5, %v2840_v49, %v2842_v29 }
 0x2f1   : > { %v2902_v40 = vadd.f32 %v21350_v28, %v2872_v41  ;;  %2658 = vrot.lane.b32.xlu0 %v2444_v4, %s20067_s22 }
 0x2f3   : > { %v2966_v46 = vmax.f32 %v2902_v40, 0.0  ;;  %v2846_v7 = vpop.permute.xlu0 %2845  ;;  %v2844_v61 = vpop.permute.xlu1 %2843  ;;  %v21689_v40 = vld [vmem:[#allocation2 + $0xb0] sm:$0xff] }
 0x2f4   : > { %v2873_v26 = vsel %vm2871_vm5, %v2844_v61, %v2846_v7 }
 0x2f5   : > { %3132 = vst.msk [vmem:[#allocation2 + $0x90] sm:$0xff] %vm3023_vm2, %v2966_v46  ;;  %v2910_v53 = vadd.f32 %v21350_v28, %v2873_v26  ;;  %v21694_v46 = vld [vmem:[#allocation2 + $0xb8] sm:$0xff] }
 0x2f7   : > { %v2974_v60 = vmax.f32 %v2910_v53, 0.0  ;;  %v2711_v54 = vpop.permute.xlu0 %2710 }
 0x2f8   : > { %v2899_v20 = vadd.f32 %v21350_v28, %v2711_v54 }
 0x2f9   : > { %3140 = vst.msk [vmem:[#allocation2 + $0xe0] sm:$0xff] %vm3023_vm2, %v2974_v60 }
 0x2fa   : > { %v2963_v15 = vmax.f32 %v2899_v20, 0.0 }
 0x2fb   : > { %v2679_v58 = vpop.permute.xlu0 %2678  ;;  %v2751_v37 = vpop.permute.xlu1 %2750 }
 0x2fc   : > { %3129 = vst.msk [vmem:[#allocation2 + $0x78] sm:$0xff] %vm3023_vm2, %v2963_v15  ;;  %v2898_v39 = vadd.f32 %v21350_v28, %v2679_v58  ;;  %v21677_v17 = vld [vmem:[#allocation2 + $0x90] sm:$0xff] }
 0x2fd   : > { %26077 = vst [vmem:[#allocation10_spill] sm:$0xff] %v21677_v17 }
 0x2fe   : > { %v2962_v9 = vmax.f32 %v2898_v39, 0.0  ;;  %v15129_v39 = vld [vmem:[%s26022_s3 + $0x50] sm:$0xff] }
 0x2ff   : > { %v2753_v55 = vpop.permute.xlu0 %2752  ;;  %v2651_v35 = vpop.permute.xlu1 %2650 }
 0x300   : > { %3128 = vst.msk [vmem:[#allocation2 + $0x70] sm:$0xff] %vm3023_vm2, %v2962_v9  ;;  %v2783_v52 = vsel %vm2782_vm6, %v2751_v37, %v2753_v55  ;;  %v2913_v12 = vadd.f32 %v21350_v28, %v2651_v35  ;;  %v15130_v9 = vld [vmem:[%s26022_s3 + $0x58] sm:$0xff] }
 0x301   : > { %v2900_v0 = vadd.f32 %v21350_v28, %v2783_v52  ;;  %v21724_v35 = vpack.c.bf16 %v15130_v9, %v15129_v39 }
 0x302   : > { %v2977_v31 = vmax.f32 %v2913_v12, 0.0 }
 0x303   : > { %v2964_v22 = vmax.f32 %v2900_v0, 0.0  ;;  %v2800_v45 = vpop.permute.xlu0 %2799  ;;  %v2467_v47 = vpop.permute.xlu1 %2466  ;;  %18113 = vmatprep.subr.bf16.mxu1 %v21724_v35 }
 0x304   : > { %3143 = vst.msk [vmem:[#allocation2 + $0x108] sm:$0xff] %vm3023_vm2, %v2977_v31  ;;  %v2901_v43 = vadd.f32 %v21350_v28, %v2800_v45  ;;  %v2476_v10 = vsel %vm2405_vm4, %v21428_v14, %v2467_v47  ;;  %v2508_v36 = vmax.f32 %v21356_v34, %v2467_v47 }
 0x305   : > { %3130 = vst.msk [vmem:[#allocation2 + $0x80] sm:$0xff] %vm3023_vm2, %v2964_v22  ;;  %v2492_v2 = vmax.f32 %v21236_v44, %v2476_v10  ;;  %v21658_v44 = vld [vmem:[#allocation2 + $0x78] sm:$0xff] }
 0x306   : > { %v2965_v16 = vmax.f32 %v2901_v43, 0.0  ;;  %2722 = vrot.lane.b32.xlu0 %v2508_v36, %s20069_s19 }
 0x307   : > { %v2713_v19 = vpop.permute.xlu0 %2712  ;;  %v2531_v30 = vpop.permute.xlu1 %2530  ;;  %2690 = vrot.lane.b32.xlu1 %v2492_v2, %s20070_s25  ;;  %v21650_v23 = vld [vmem:[#allocation2 + $0x70] sm:$0xff] }
 0x308   : > { %3131 = vst.msk [vmem:[#allocation2 + $0x88] sm:$0xff] %vm3023_vm2, %v2965_v16  ;;  %v2907_v62 = vadd.f32 %v21350_v28, %v2713_v19  ;;  %v2554_v14 = vmax.f32 %v21356_v34, %v2531_v30  ;;  %v2555_v5 = vmax.f32 %v21360_v56, %v2531_v30  ;;  %17121 = vmatmul.mubr.msk.f32.gmra.mrb[90].mxu1 %vm3023_vm2, %v21650_v23 }
 0x309   : > { %17123 = vmatprep.mubr.msk.f32.mxu1 %vm3023_vm2, %v21658_v44 }
 0x30a   : > { %v2971_v13 = vmax.f32 %v2907_v62, 0.0  ;;  %2776 = vrot.lane.b32.xlu0 %v2555_v5, %s20071_s28 }
 0x30b   : > { %v2681_v18 = vpop.permute.xlu0 %2680  ;;  %v2755_v50 = vpop.permute.xlu1 %2754  ;;  %2774 = vrot.lane.b32.xlu1 %v2554_v14, %s20071_s28 }
 0x30c   : > { %3137 = vst.msk [vmem:[#allocation2 + $0xc8] sm:$0xff] %vm3023_vm2, %v2971_v13  ;;  %v2906_v34 = vadd.f32 %v21350_v28, %v2681_v18  ;;  %v21666_v63 = vld [vmem:[#allocation2 + $0x80] sm:$0xff] }
 0x30d   : > { %17124 = vmatmul.mubr.msk.f32.gmra.mrb[92].mxu1 %vm3023_vm2, %v21666_v63  ;;  %v21749_v13 = vld [vmem:[#allocation2 + $0xe0] sm:$0xff] }
 0x30e   : > { %v2970_v8 = vmax.f32 %v2906_v34, 0.0  ;;  %26078 = vst [vmem:[#allocation11_spill] sm:$0xff] %v21749_v13 }
 0x30f   : > { %v2850_v32 = vpop.permute.xlu0 %2849  ;;  %v2848_v42 = vpop.permute.xlu1 %2847  ;;  %2811 = vrot.lane.b32.xlu1 %v2555_v5, %s20072_s24  ;;  %v21671_v3 = vld [vmem:[#allocation2 + $0x88] sm:$0xff] }
 0x310   : > { %3136 = vst.msk [vmem:[#allocation2 + $0xc0] sm:$0xff] %vm3023_vm2, %v2970_v8  ;;  %v2874_v51 = vsel %vm2871_vm5, %v2848_v42, %v2850_v32  ;;  %17126 = vmatprep.mubr.msk.f32.mxu1 %vm3023_vm2, %v21671_v3 }
 0x311   : > { %v2918_v57 = vadd.f32 %v21350_v28, %v2874_v51  ;;  %17127 = vmatmul.mubr.msk.f32.gmra.mrb[94].mxu1 %vm3023_vm2, %v21677_v17 }
 0x312   : > { %17129 = vmatprep.mubr.msk.f32.mxu1 %vm3023_vm2, %v21682_v1 }
 0x313   : > { %v2982_v25 = vmax.f32 %v2918_v57, 0.0  ;;  %v2621_v11 = vpop.permute.xlu0 %2620  ;;  %v2579_v4 = vpop.permute.xlu1 %2578  ;;  %v21708_v54 = vld [vmem:[#allocation2 + $0xc8] sm:$0xff]  ;;  %v21760_v57 = vld [vmem:[#allocation2 + $0x100] sm:$0xff] }
 0x314   : > { %v2920_v29 = vadd.f32 %v21350_v28, %v2621_v11  ;;  %v2602_v49 = vmax.f32 %v21360_v56, %v2579_v4  ;;  %v2603_v41 = vmax.f32 %v21315_v33, %v2579_v4  ;;  %v21766_v11 = vld [vmem:[#allocation2 + $0x108] sm:$0xff] }
 0x315   : > { %3148 = vst.msk [vmem:[#allocation2 + $0x130] sm:$0xff] %vm3023_vm2, %v2982_v25  ;;  %17130 = vmatmul.mubr.msk.f32.gmra.mrb[96].mxu1 %vm3023_vm2, %v21689_v40 }
 0x316   : > { %v2984_v7 = vmax.f32 %v2920_v29, 0.0  ;;  %17132 = vmatprep.mubr.msk.f32.mxu1 %vm3023_vm2, %v21694_v46  ;;  %2865 = vrot.lane.b32.xlu1 %v2603_v41, %s20068_s23 }
 0x317   : > { %2863 = vrot.lane.b32.xlu0 %v2602_v49, %s20068_s23  ;;  %v2757_v56 = vpop.permute.xlu0 %2756  ;;  %v2653_v61 = vpop.permute.xlu1 %2652  ;;  %v21700_v33 = vld [vmem:[#allocation2 + $0xc0] sm:$0xff] }
 0x318   : > { %3150 = vst.msk [vmem:[#allocation2 + $0x150] sm:$0xff] %vm3023_vm2, %v2984_v7  ;;  %v2784_v26 = vsel %vm2782_vm6, %v2755_v50, %v2757_v56  ;;  %v2921_v53 = vadd.f32 %v21350_v28, %v2653_v61  ;;  %v21754_v50 = vld [vmem:[#allocation2 + $0xf8] sm:$0xff] }
 0x319   : > { %v2908_v60 = vadd.f32 %v21350_v28, %v2784_v26  ;;  %17133 = vmatmul.mubr.msk.f32.gmra.mrb[98].mxu1 %vm3023_vm2, %v21700_v33 }
 0x31a   : > { %v2985_v20 = vmax.f32 %v2921_v53, 0.0  ;;  %17135 = vmatprep.mubr.msk.f32.mxu1 %vm3023_vm2, %v21708_v54  ;;  %2403 = vrot.lane.b32.xlu1 %v21257_v48, %s20065_s14 }
 0x31b   : > { %v2972_v15 = vmax.f32 %v2908_v60, 0.0  ;;  %2363 = vrot.lane.b32.xlu0 %v21255_v21, %s20065_s14  ;;  %v2802_v58 = vpop.permute.xlu0 %2801  ;;  %v2759_v37 = vpop.permute.xlu1 %2758 }
 0x31c   : > { %3151 = vst.msk [vmem:[#allocation2 + $0x158] sm:$0xff] %vm3023_vm2, %v2985_v20  ;;  %v2909_v55 = vadd.f32 %v21350_v28, %v2802_v58 }
 0x31d   : > { %3138 = vst.msk [vmem:[#allocation2 + $0xd0] sm:$0xff] %vm3023_vm2, %v2972_v15 }
 0x31e   : > { %v2973_v52 = vmax.f32 %v2909_v55, 0.0  ;;  %2532 = vrot.lane.b32.xlu1 %v21383_v24, %s20065_s14 }
 0x31f   : > { %2468 = vrot.lane.b32.xlu0 %v21381_v59, %s20065_s14  ;;  %v2715_v12 = vpop.permute.xlu0 %2714  ;;  %v2852_v0 = vpop.permute.xlu1 %2851 }
 0x320   : > { %3139 = vst.msk [vmem:[#allocation2 + $0xd8] sm:$0xff] %vm3023_vm2, %v2973_v52  ;;  %v2915_v31 = vadd.f32 %v21350_v28, %v2715_v12 }
 0x322   : > { %v2979_v22 = vmax.f32 %v2915_v31, 0.0 }
 0x323   : > { %v2683_v45 = vpop.permute.xlu0 %2682  ;;  %v2623_v47 = vpop.permute.xlu1 %2622 }
 0x324   : > { %3145 = vst.msk [vmem:[#allocation2 + $0x118] sm:$0xff] %vm3023_vm2, %v2979_v22  ;;  %v2914_v43 = vadd.f32 %v21350_v28, %v2683_v45  ;;  %v2928_v10 = vadd.f32 %v21350_v28, %v2623_v47  ;;  %v21737_v36 = vld [vmem:[#allocation2 + $0xd0] sm:$0xff] }
 0x325   : > { %17136 = vmatmul.mubr.msk.f32.gmra.mrb[100].mxu1 %vm3023_vm2, %v21737_v36  ;;  %v21797_v47 = vld [vmem:[#allocation2 + $0x130] sm:$0xff] }
 0x326   : > { %v2978_v2 = vmax.f32 %v2914_v43, 0.0  ;;  %v2992_v16 = vmax.f32 %v2928_v10, 0.0  ;;  %26079 = vst [vmem:[#allocation12_spill] sm:$0xff] %v21797_v47  ;;  %v21802_v10 = vld [vmem:[#allocation2 + $0x148] sm:$0xff] }
 0x327   : > { %v2854_v19 = vpop.permute.xlu0 %2853  ;;  %v2717_v30 = vpop.permute.xlu1 %2716  ;;  %v21741_v62 = vld [vmem:[#allocation2 + $0xd8] sm:$0xff] }
 0x328   : > { %3144 = vst.msk [vmem:[#allocation2 + $0x110] sm:$0xff] %vm3023_vm2, %v2978_v2  ;;  %3158 = vst.msk [vmem:[#allocation2 + $0x1a0] sm:$0xff] %vm3023_vm2, %v2992_v16  ;;  %v2875_v14 = vsel %vm2871_vm5, %v2852_v0, %v2854_v19  ;;  %v2923_v5 = vadd.f32 %v21350_v28, %v2717_v30  ;;  %17138 = vmatprep.mubr.msk.f32.mxu1 %vm3023_vm2, %v21741_v62 }
 0x329   : > { %v2926_v18 = vadd.f32 %v21350_v28, %v2875_v14  ;;  %17139 = vmatmul.mubr.msk.f32.gmra.mrb[102].mxu1 %vm3023_vm2, %v21749_v13 }
 0x32a   : > { %v2987_v34 = vmax.f32 %v2923_v5, 0.0  ;;  %17141 = vmatprep.mubr.msk.f32.mxu1 %vm3023_vm2, %v21754_v50 }
 0x32b   : > { %v2990_v8 = vmax.f32 %v2926_v18, 0.0  ;;  %v2761_v32 = vpop.permute.xlu0 %2760  ;;  %v2765_v42 = vpop.permute.xlu1 %2764  ;;  %v21776_v56 = vld [vmem:[#allocation2 + $0x118] sm:$0xff]  ;;  %v21809_v18 = vld [vmem:[#allocation2 + $0x150] sm:$0xff] }
 0x32c   : > { %3153 = vst.msk [vmem:[#allocation2 + $0x168] sm:$0xff] %vm3023_vm2, %v2987_v34  ;;  %v2785_v51 = vsel %vm2782_vm6, %v2759_v37, %v2761_v32  ;;  %v21814_v34 = vld [vmem:[#allocation2 + $0x158] sm:$0xff] }
 0x32d   : > { %3156 = vst.msk [vmem:[#allocation2 + $0x180] sm:$0xff] %vm3023_vm2, %v2990_v8  ;;  %v2916_v25 = vadd.f32 %v21350_v28, %v2785_v51  ;;  %17142 = vmatmul.mubr.msk.f32.gmra.mrb[104].mxu1 %vm3023_vm2, %v21760_v57 }
 0x32e   : > { %17144 = vmatprep.mubr.msk.f32.mxu1 %vm3023_vm2, %v21766_v11 }
 0x32f   : > { %v2980_v4 = vmax.f32 %v2916_v25, 0.0  ;;  %v2804_v29 = vpop.permute.xlu0 %2803  ;;  %v2858_v49 = vpop.permute.xlu1 %2857  ;;  %v21770_v41 = vld [vmem:[#allocation2 + $0x110] sm:$0xff] }
 0x330   : > { %v2917_v7 = vadd.f32 %v21350_v28, %v2804_v29 }
 0x331   : > { %3146 = vst.msk [vmem:[#allocation2 + $0x120] sm:$0xff] %vm3023_vm2, %v2980_v4  ;;  %17145 = vmatmul.mubr.msk.f32.gmra.mrb[106].mxu1 %vm3023_vm2, %v21770_v41 }
 0x332   : > { %v2981_v61 = vmax.f32 %v2917_v7, 0.0  ;;  %17147 = vmatprep.mubr.msk.f32.mxu1 %vm3023_vm2, %v21776_v56 }
 0x333   : > { %v2655_v26 = vpop.permute.xlu0 %2654  ;;  %v2687_v53 = vpop.permute.xlu1 %2686  ;;  %v21826_v7 = vld [vmem:[#allocation2 + $0x168] sm:$0xff] }
 0x334   : > { %3147 = vst.msk [vmem:[#allocation2 + $0x128] sm:$0xff] %vm3023_vm2, %v2981_v61  ;;  %v2929_v60 = vadd.f32 %v21350_v28, %v2655_v26  ;;  %v2930_v20 = vadd.f32 %v21350_v28, %v2687_v53 }
 0x336   : > { %v2993_v15 = vmax.f32 %v2929_v60, 0.0  ;;  %v2994_v58 = vmax.f32 %v2930_v20, 0.0 }
 0x337   : > { %v2685_v37 = vpop.permute.xlu0 %2684  ;;  %v2767_v39 = vpop.permute.xlu1 %2766 }
 0x338   : > { %3159 = vst.msk [vmem:[#allocation2 + $0x1a8] sm:$0xff] %vm3023_vm2, %v2993_v15  ;;  %3160 = vst.msk [vmem:[#allocation2 + $0x1b0] sm:$0xff] %vm3023_vm2, %v2994_v58  ;;  %v2922_v9 = vadd.f32 %v21350_v28, %v2685_v37  ;;  %v21786_v55 = vld [vmem:[#allocation2 + $0x120] sm:$0xff] }
 0x339   : > { %17148 = vmatmul.mubr.msk.f32.gmra.mrb[108].mxu1 %vm3023_vm2, %v21786_v55 }
 0x33a   : > { %v2986_v52 = vmax.f32 %v2922_v9, 0.0 }
 0x33b   : > { %v2763_v12 = vpop.permute.xlu0 %2762  ;;  %v2657_v0 = vpop.permute.xlu1 %2656  ;;  %v21790_v31 = vld [vmem:[#allocation2 + $0x128] sm:$0xff] }
 0x33c   : > { %3152 = vst.msk [vmem:[#allocation2 + $0x160] sm:$0xff] %vm3023_vm2, %v2986_v52  ;;  %v2786_v22 = vsel %vm2782_vm6, %v2763_v12, %v2765_v42  ;;  %v2937_v45 = vadd.f32 %v21350_v28, %v2657_v0  ;;  %17150 = vmatprep.mubr.msk.f32.mxu1 %vm3023_vm2, %v21790_v31  ;;  %v21844_v0 = vld [vmem:[#allocation2 + $0x180] sm:$0xff] }
 0x33d   : > { %v2924_v43 = vadd.f32 %v21350_v28, %v2786_v22  ;;  %17151 = vmatmul.mubr.msk.f32.gmra.mrb[110].mxu1 %vm3023_vm2, %v21797_v47  ;;  %26080 = vst [vmem:[#allocation13_spill] sm:$0xff] %v21844_v0 }
 0x33e   : > { %v3001_v2 = vmax.f32 %v2937_v45, 0.0  ;;  %17153 = vmatprep.mubr.msk.f32.mxu1 %vm3023_vm2, %v21802_v10  ;;  %v21849_v45 = vld [vmem:[#allocation2 + $0x198] sm:$0xff] }
 0x33f   : > { %v2988_v16 = vmax.f32 %v2924_v43, 0.0  ;;  %v2806_v19 = vpop.permute.xlu0 %2805  ;;  %v2808_v30 = vpop.permute.xlu1 %2807 }
 0x340   : > { %3167 = vst.msk [vmem:[#allocation2 + $0x1f8] sm:$0xff] %vm3023_vm2, %v3001_v2  ;;  %v2925_v14 = vadd.f32 %v21350_v28, %v2806_v19  ;;  %v2933_v5 = vadd.f32 %v21350_v28, %v2808_v30  ;;  %v21855_v30 = vld [vmem:[#allocation2 + $0x1a0] sm:$0xff] }
 0x341   : > { %3154 = vst.msk [vmem:[#allocation2 + $0x170] sm:$0xff] %vm3023_vm2, %v2988_v16  ;;  %17154 = vmatmul.mubr.msk.f32.gmra.mrb[112].mxu1 %vm3023_vm2, %v21809_v18 }
 0x342   : > { %v2989_v8 = vmax.f32 %v2925_v14, 0.0  ;;  %v2997_v32 = vmax.f32 %v2933_v5, 0.0  ;;  %17156 = vmatprep.mubr.msk.f32.mxu1 %vm3023_vm2, %v21814_v34  ;;  %v21860_v14 = vld [vmem:[#allocation2 + $0x1a8] sm:$0xff] }
 0x343   : > { %v2856_v42 = vpop.permute.xlu0 %2855  ;;  %v2860_v51 = vpop.permute.xlu1 %2859  ;;  %v21818_v25 = vld [vmem:[#allocation2 + $0x160] sm:$0xff] }
 0x344   : > { %3155 = vst.msk [vmem:[#allocation2 + $0x178] sm:$0xff] %vm3023_vm2, %v2989_v8  ;;  %3163 = vst.msk [vmem:[#allocation2 + $0x1c8] sm:$0xff] %vm3023_vm2, %v2997_v32  ;;  %v2876_v4 = vsel %vm2871_vm5, %v2856_v42, %v2858_v49 }
 0x345   : > { %v2934_v29 = vadd.f32 %v21350_v28, %v2876_v4  ;;  %17157 = vmatmul.mubr.msk.f32.gmra.mrb[114].mxu1 %vm3023_vm2, %v21818_v25  ;;  %v21867_v4 = vld [vmem:[#allocation2 + $0x1b0] sm:$0xff] }
 0x346   : > { %17159 = vmatprep.mubr.msk.f32.mxu1 %vm3023_vm2, %v21826_v7 }
 0x347   : > { %v2998_v61 = vmax.f32 %v2934_v29, 0.0  ;;  %v2719_v26 = vpop.permute.xlu0 %2718  ;;  %v2721_v53 = vpop.permute.xlu1 %2720 }
 0x348   : > { %v2931_v60 = vadd.f32 %v21350_v28, %v2719_v26  ;;  %v2939_v20 = vadd.f32 %v21350_v28, %v2721_v53  ;;  %v21832_v15 = vld [vmem:[#allocation2 + $0x170] sm:$0xff] }
 0x349   : > { %3164 = vst.msk [vmem:[#allocation2 + $0x1d0] sm:$0xff] %vm3023_vm2, %v2998_v61  ;;  %17160 = vmatmul.mubr.msk.f32.gmra.mrb[116].mxu1 %vm3023_vm2, %v21832_v15 }
 0x34a   : > { %v2995_v49 = vmax.f32 %v2931_v60, 0.0  ;;  %v3003_v58 = vmax.f32 %v2939_v20, 0.0 }
 0x34b   : > { %v2769_v37 = vpop.permute.xlu0 %2768  ;;  %v2773_v9 = vpop.permute.xlu1 %2772  ;;  %v21837_v52 = vld [vmem:[#allocation2 + $0x178] sm:$0xff] }
 0x34c   : > { %3161 = vst.msk [vmem:[#allocation2 + $0x1b8] sm:$0xff] %vm3023_vm2, %v2995_v49  ;;  %3169 = vst.msk [vmem:[#allocation2 + $0x208] sm:$0xff] %vm3023_vm2, %v3003_v58  ;;  %v2787_v12 = vsel %vm2782_vm6, %v2767_v39, %v2769_v37  ;;  %17162 = vmatprep.mubr.msk.f32.mxu1 %vm3023_vm2, %v21837_v52 }
 0x34d   : > { %v2932_v22 = vadd.f32 %v21350_v28, %v2787_v12  ;;  %17163 = vmatmul.mubr.msk.f32.gmra.mrb[118].mxu1 %vm3023_vm2, %v21844_v0 }
 0x34e   : > { %17165 = vmatprep.mubr.msk.f32.mxu1 %vm3023_vm2, %v21849_v45 }
 0x34f   : > { %v2996_v43 = vmax.f32 %v2932_v22, 0.0  ;;  %v2625_v2 = vpop.permute.xlu0 %2624  ;;  %v2627_v16 = vpop.permute.xlu1 %2626 }
 0x350   : > { %v2936_v39 = vadd.f32 %v21350_v28, %v2625_v2  ;;  %v2944_v19 = vadd.f32 %v21350_v28, %v2627_v16  ;;  %v21888_v12 = vld [vmem:[#allocation2 + $0x1d0] sm:$0xff] }
 0x351   : > { %3162 = vst.msk [vmem:[#allocation2 + $0x1c0] sm:$0xff] %vm3023_vm2, %v2996_v43  ;;  %17166 = vmatmul.mubr.msk.f32.gmra.mrb[120].mxu1 %vm3023_vm2, %v21855_v30  ;;  %26081 = vst [vmem:[#allocation14_spill] sm:$0xff] %v21888_v12  ;;  %v21893_v43 = vld [vmem:[#allocation2 + $0x1e8] sm:$0xff] }
 0x352   : > { %v3000_v5 = vmax.f32 %v2936_v39, 0.0  ;;  %v3008_v8 = vmax.f32 %v2944_v19, 0.0  ;;  %17168 = vmatprep.mubr.msk.f32.mxu1 %vm3023_vm2, %v21860_v14  ;;  %26082 = vst [vmem:[#allocation15_spill] sm:$0xff] %v21893_v43  ;;  %v21900_v39 = vld [vmem:[%s26021_s2] ss:$0 sm:$0xff] }
 0x353   : > { %v2862_v32 = vpop.permute.xlu0 %2861  ;;  %v21872_v61 = vld [vmem:[#allocation2 + $0x1b8] sm:$0xff] }
 0x354   : > { %3166 = vst.msk [vmem:[#allocation2 + $0x1f0] sm:$0xff] %vm3023_vm2, %v3000_v5  ;;  %3174 = vst.msk [vmem:[#allocation2 + $0x240] sm:$0xff] %vm3023_vm2, %v3008_v8  ;;  %v2877_v42 = vsel %vm2871_vm5, %v2860_v51, %v2862_v32  ;;  %v21882_v51 = vld [vmem:[#allocation2 + $0x1c8] sm:$0xff] }
 0x355   : > { %v2942_v29 = vadd.f32 %v21350_v28, %v2877_v42  ;;  %17169 = vmatmul.mubr.msk.f32.gmra.mrb[122].mxu1 %vm3023_vm2, %v21867_v4 }
 0x356   : > { %17171 = vmatprep.mubr.msk.f32.mxu1 %vm3023_vm2, %v21872_v61 }
 0x357   : > { %v3006_v26 = vmax.f32 %v2942_v29, 0.0  ;;  %v2689_v53 = vpop.permute.xlu0 %2688  ;;  %v21918_v29 = vld [vmem:[#allocation2 + $0x208] sm:$0xff] }
 0x358   : > { %v2938_v60 = vadd.f32 %v21350_v28, %v2689_v53  ;;  %v21877_v20 = vld [vmem:[#allocation2 + $0x1c0] sm:$0xff] }
 0x359   : > { %3172 = vst.msk [vmem:[#allocation2 + $0x220] sm:$0xff] %vm3023_vm2, %v3006_v26  ;;  %17172 = vmatmul.mubr.msk.f32.gmra.mrb[124].mxu1 %vm3023_vm2, %v21877_v20 }
 0x35a   : > { %v3002_v49 = vmax.f32 %v2938_v60, 0.0  ;;  %17174 = vmatprep.mubr.msk.f32.mxu1 %vm3023_vm2, %v21882_v51 }
 0x35b   : > { %v2771_v58 = vpop.permute.xlu0 %2770  ;;  %v21903_v19 = vld [vmem:[#allocation2 + $0x1f0] sm:$0xff] }
 0x35c   : > { %3168 = vst.msk [vmem:[#allocation2 + $0x200] sm:$0xff] %vm3023_vm2, %v3002_v49  ;;  %v2788_v37 = vsel %vm2782_vm6, %v2771_v58, %v2773_v9  ;;  %v21935_v58 = vld [vmem:[#allocation2 + $0x238] sm:$0xff] }
 0x35d   : > { %v2940_v22 = vadd.f32 %v21350_v28, %v2788_v37  ;;  %17175 = vmatmul.mubr.msk.f32.gmra.mrb[126].mxu1 %vm3023_vm2, %v21888_v12  ;;  %v21908_v28 = vld [vmem:[#allocation2 + $0x1f8] sm:$0xff]  ;;  %26084 = vst [vmem:[#allocation17_spill] sm:$0xff] %v21935_v58  ;;  %v21939_v37 = vld [vmem:[#allocation2 + $0x240] sm:$0xff] }
 0x35e   : > { %17177 = vmatprep.mubr.msk.f32.mxu1 %vm3023_vm2, %v21893_v43 }
 0x35f   : > { %v3004_v2 = vmax.f32 %v2940_v22, 0.0  ;;  %v2810_v16 = vpop.permute.xlu0 %2809 }
 0x360   : > { %v2941_v9 = vadd.f32 %v21900_v39, %v2810_v16  ;;  %v21931_v49 = vld [vmem:[#allocation2 + $0x220] sm:$0xff] }
 0x361   : > { %3170 = vst.msk [vmem:[#allocation2 + $0x210] sm:$0xff] %vm3023_vm2, %v3004_v2  ;;  %17178 = vmatmul.mubr.msk.f32.gmra.mrb[128].mxu1 %vm3023_vm2, %v21903_v19  ;;  %26083 = vst [vmem:[#allocation16_spill] sm:$0xff] %v21931_v49 }
 0x362   : > { %v3005_v5 = vmax.f32 %v2941_v9, 0.0  ;;  %17180 = vmatprep.mubr.msk.f32.mxu1 %vm3023_vm2, %v21908_v28 }
 0x363   : > { %v2659_v8 = vpop.permute.xlu0 %2658  ;;  %v21912_v32 = vld [vmem:[#allocation2 + $0x200] sm:$0xff] }
 0x364   : > { %3171 = vst.msk [vmem:[#allocation2 + $0x218] sm:$0xff] %vm3023_vm2, %v3005_v5  ;;  %v2945_v42 = vadd.f32 %v21900_v39, %v2659_v8 }
 0x365   : > { %17181 = vmatmul.mubr.msk.f32.gmra.mrb[130].mxu1 %vm3023_vm2, %v21912_v32 }
 0x366   : > { %v3009_v26 = vmax.f32 %v2945_v42, 0.0  ;;  %17183 = vmatprep.mubr.msk.f32.mxu1 %vm3023_vm2, %v21918_v29 }
 0x368   : > { %3175 = vst.msk [vmem:[#allocation2 + $0x248] sm:$0xff] %vm3023_vm2, %v3009_v26  ;;  %v21923_v53 = vld [vmem:[#allocation2 + $0x210] sm:$0xff] }
 0x369   : > { %17184 = vmatmul.mubr.msk.f32.gmra.mrb[132].mxu1 %vm3023_vm2, %v21923_v53 }
 0x36b   : > { %v21927_v60 = vld [vmem:[#allocation2 + $0x218] sm:$0xff] }
 0x36c   : > { %17186 = vmatprep.mubr.msk.f32.mxu1 %vm3023_vm2, %v21927_v60 }
 0x36d   : > { %17187 = vmatmul.mubr.msk.f32.gmra.mrb[134].mxu1 %vm3023_vm2, %v21931_v49 }
 0x36e   : > { %17189 = vmatprep.mubr.msk.f32.mxu1 %vm3023_vm2, %v21935_v58 }
 0x36f   : > { %v21943_v22 = vld [vmem:[#allocation2 + $0x248] sm:$0xff] }
 0x370   : > { %26085 = vst [vmem:[#allocation18_spill] sm:$0xff] %v21943_v22 }
 0x371   : > { %17190 = vmatmul.mubr.msk.f32.gmra.mrb[136].mxu1 %vm3023_vm2, %v21939_v37 }
 0x372   : > { %17192 = vmatprep.mubr.msk.f32.mxu1 %vm3023_vm2, %v21943_v22 }
 0x378   : > { %v2723_v2 = vpop.permute.xlu0 %2722 }
 0x379   : > { %v2947_v16 = vadd.f32 %v21900_v39, %v2723_v2  ;;  %v2691_v9 = vpop.permute.xlu1 %2690 }
 0x37a   : > { %v2946_v5 = vadd.f32 %v21900_v39, %v2691_v9 }
 0x37b   : > { %v3011_v8 = vmax.f32 %v2947_v16, 0.0 }
 0x37c   : > { %v3010_v42 = vmax.f32 %v2946_v5, 0.0  ;;  %v2777_v26 = vpop.permute.xlu0 %2776 }
 0x37d   : > { %3177 = vst.msk [vmem:[#allocation2 + $0x258] sm:$0xff] %vm3023_vm2, %v3011_v8  ;;  %v2775_v49 = vpop.permute.xlu1 %2774 }
 0x37e   : > { %3176 = vst.msk [vmem:[#allocation2 + $0x250] sm:$0xff] %vm3023_vm2, %v3010_v42  ;;  %v2789_v12 = vsel %vm2782_vm6, %v2775_v49, %v2777_v26 }
 0x37f   : > { %v2948_v0 = vadd.f32 %v21900_v39, %v2789_v12 }
 0x381   : > { %v3012_v47 = vmax.f32 %v2948_v0, 0.0  ;;  %v2812_v13 = vpop.permute.xlu1 %2811 }
 0x382   : > { %v2949_v17 = vadd.f32 %v21900_v39, %v2812_v13 }
 0x383   : > { %3178 = vst.msk [vmem:[#allocation2 + $0x260] sm:$0xff] %vm3023_vm2, %v3012_v47 }
 0x384   : > { %v3013_v2 = vmax.f32 %v2949_v17, 0.0  ;;  %v21960_v16 = vld [vmem:[#allocation2 + $0x258] sm:$0xff] }
 0x385   : > { %v21955_v9 = vld [vmem:[#allocation2 + $0x250] sm:$0xff]  ;;  %26087 = vst [vmem:[#allocation20_spill] sm:$0xff] %v21960_v16 }
 0x386   : > { %26086 = vst [vmem:[#allocation19_spill] sm:$0xff] %v21955_v9  ;;  %3179 = vst.msk [vmem:[#allocation2 + $0x268] sm:$0xff] %vm3023_vm2, %v3013_v2  ;;  %17193 = vmatmul.mubr.msk.f32.gmra.mrb[138].mxu1 %vm3023_vm2, %v21955_v9 }
 0x387   : > { %17195 = vmatprep.mubr.msk.f32.mxu1 %vm3023_vm2, %v21960_v16 }
 0x388   : > { %v2866_v12 = vpop.permute.xlu1 %2865 }
 0x389   : > { %v2864_v0 = vpop.permute.xlu0 %2863 }
 0x38a   : > { %v2878_v49 = vsel %vm2871_vm5, %v2864_v0, %v2866_v12  ;;  %v21965_v13 = vld [vmem:[#allocation2 + $0x260] sm:$0xff] }
 0x38b   : > { %26088 = vst [vmem:[#allocation21_spill] sm:$0xff] %v21965_v13  ;;  %v2950_v17 = vadd.f32 %v21900_v39, %v2878_v49  ;;  %17196 = vmatmul.mubr.msk.f32.gmra.mrb[140].mxu1 %vm3023_vm2, %v21965_v13 }
 0x38c   : > { %v2404_v47 = vpop.permute.xlu1 %2403 }
 0x38d   : > { %v3014_v5 = vmax.f32 %v2950_v17, 0.0  ;;  %v2364_v8 = vpop.permute.xlu0 %2363  ;;  %v2445_v42 = vmax.f32 %v21257_v48, %v2404_v47  ;;  %v21971_v26 = vld [vmem:[#allocation2 + $0x268] sm:$0xff] }
 0x38e   : > { %v2380_v2 = vmax.f32 %v21255_v21, %v2364_v8  ;;  %v2413_v16 = vsel %vm2405_vm4, %v2364_v8, %v2404_v47  ;;  %17198 = vmatprep.mubr.msk.f32.mxu1 %vm3023_vm2, %v21971_v26 }
 0x38f   : > { %3180 = vst.msk [vmem:[#allocation2 + $0x270] sm:$0xff] %vm3023_vm2, %v3014_v5  ;;  %v2429_v12 = vmax.f32 %v21255_v21, %v2413_v16  ;;  %2660 = vrot.lane.b32.xlu1 %v2445_v42, %s20067_s22  ;;  %v3189_v21 = vld [vmem:[#allocation2] sm:$0xff] }
 0x390   : > { %v2951_v0 = vadd.f32 %v21900_v39, %v2380_v2  ;;  %v2533_v22 = vpop.permute.xlu1 %2532  ;;  %v22014_v2 = vld [vmem:[#allocation2 + $0x20] sm:$0xff] }
 0x391   : > { %v2469_v49 = vpop.permute.xlu0 %2468  ;;  %2628 = vrot.lane.b32.xlu0 %v2429_v12, %s20066_s16  ;;  %v2557_v16 = vmax.f32 %v21383_v24, %v2533_v22  ;;  %v2556_v42 = vmax.f32 %v21381_v59, %v2533_v22  ;;  %v22009_v22 = vld [vmem:[#allocation2 + $0x18] sm:$0xff]  ;;  %v15133_v12 = vld [vmem:[%s26022_s3 + $0x70] sm:$0xf] }
 0x392   : > { %v3015_v17 = vmax.f32 %v2951_v0, 0.0  ;;  %v2477_v13 = vsel %vm2405_vm4, %v2404_v47, %v2469_v49  ;;  %v2509_v9 = vmax.f32 %v21381_v59, %v2469_v49  ;;  %v22003_v47 = vld [vmem:[#allocation2 + $0x10] sm:$0xff]  ;;  %v15200_v0 = vld [vmem:[%s26022_s3 + $0x80] sm:$0xff]  ;;  %v22029_v49 = vld [vmem:[#allocation2 + $0x28] sm:$0xff] }
 0x393   : > { %v2493_v8 = vmax.f32 %v21257_v48, %v2477_v13  ;;  %v15131_v48 = vld [vmem:[%s26022_s3 + $0x60] sm:$0xff]  ;;  %v3190_v13 = vld [vmem:[#allocation2 + $0x8] sm:$0xff] }
 0x394   : > { %3181 = vst.msk [vmem:[#allocation2 + $0x288] sm:$0xff] %vm3023_vm2, %v3015_v17  ;;  %2724 = vrot.lane.b32.xlu1 %v2509_v9, %s20069_s19  ;;  %v15132_v9 = vld [vmem:[%s26022_s3 + $0x68] sm:$0xff]  ;;  %v22031_v17 = vld [vmem:[#allocation2 + $0x30] sm:$0xff] }
 0x395   : > { %2692 = vrot.lane.b32.xlu0 %v2493_v8, %s20070_s25  ;;  %v18116_v59 = vpack.c.bf16 %v15132_v9, %v15131_v48  ;;  %v22064_v48 = vld [vmem:[#allocation2 + $0xa0] sm:$0xff] }
 0x396   : > { %v21989_v5 = vld [vmem:[#allocation2 + $0x270] sm:$0xff] }
 0x397   : > { %17199 = vmatmul.mubr.msk.f32.gmra.mrb[142].mxu1 %vm3023_vm2, %v21989_v5 }
 0x398   : > { %2780 = vrot.lane.b32.xlu1 %v2557_v16, %s20071_s28  ;;  %17211 = vmatprep.mubr.msk.f32.mxu1 %vm3023_vm2, %v3189_v21  ;;  %v22040_v21 = vld [vmem:[#allocation2 + $0x38] sm:$0xff] }
 0x399   : > { %2778 = vrot.lane.b32.xlu0 %v2556_v42, %s20071_s28  ;;  %v22050_v42 = vld [vmem:[#allocation2 + $0x58] sm:$0xff] }
 0x39b   : > { %17212 = vmatmul.mubr.msk.f32.vlgmr.msra.gmra.mrb[80].mxu1 %vm3023_vm2, %v3190_v13  ;;  %v22156_v13 = vld [vmem:[#allocation2 + $0x230] sm:$0xff] }
 0x39c   : > { %18115 = vmatpush3.bf16.msra.mxu1 %v21724_v35  ;;  %2580 = vrot.lane.b32.xlu1 %v21321_v6, %s20065_s14  ;;  %v15199_v35 = vld [vmem:[%s26022_s3 + $0x78] sm:$0xff]  ;;  %26089 = vst [vmem:[#allocation22_spill] sm:$0xff] %v22156_v13 }
 0x39d   : > { %2813 = vrot.lane.b32.xlu0 %v2557_v16, %s20072_s24  ;;  %17214 = vmatprep.mubr.msk.f32.mxu1 %vm3023_vm2, %v22003_v47  ;;  %v22034_v8 = vpack.c.bf16 %v15200_v0, %v15199_v35  ;;  %v22043_v16 = vld [vmem:[#allocation2 + $0x50] sm:$0xff] }
 0x39e   : > { %18117 = vmatprep.subr.bf16.mxu1 %v18116_v59 }
 0x39f   : > { %17215 = vmatmul.mubr.msk.f32.gmra.mrb[82].mxu1 %vm3023_vm2, %v22009_v22 }
 0x3a0   : > { %17217 = vmatprep.mubr.msk.f32.mxu1 %vm3023_vm2, %v22014_v2  ;;  %18119 = vmatpush3.bf16.msra.mxu1 %v18116_v59 }
 0x3a1   : > { %17315 = vmatprep.subr.msk.mxu1 %vm3521_vm3, %v15133_v12 }
 0x3a3   : > { %17218 = vmatmul.mubr.msk.f32.gmra.mrb[84].mxu1 %vm3023_vm2, %v22029_v49 }
 0x3a4   : > { %17220 = vmatprep.mubr.msk.f32.mxu1 %vm3023_vm2, %v22031_v17  ;;  %17316 = vmatpush3.msk.msra.mxu1 %vm3521_vm3, %v15133_v12 }
 0x3a5   : > { %18121 = vmatprep.subr.bf16.mxu1 %v22034_v8 }
 0x3a7   : > { %17221 = vmatmul.mubr.msk.f32.gmra.mrb[86].mxu1 %vm3023_vm2, %v22040_v21 }
 0x3a8   : > { %17223 = vmatprep.mubr.msk.f32.mxu1 %vm3023_vm2, %v22043_v16 }
 0x3ab   : > { %17224 = vmatmul.mubr.msk.f32.gmra.mrb[88].mxu1 %vm3023_vm2, %v22050_v42 }
 0x3ac   : > { %17226 = vmatprep.mubr.msk.f32.mxu1 %vm3023_vm2, %v21544_v38  ;;  %v22082_v38 = vld [vmem:[#allocation2 + $0xf0] sm:$0xff] }
 0x3af   : > { %17227 = vmatmul.mubr.msk.f32.gmra.mrb[90].mxu1 %vm3023_vm2, %v21548_v27  ;;  %v22100_v27 = vld [vmem:[#allocation2 + $0x140] sm:$0xff] }
 0x3b0   : > { %17229 = vmatprep.mubr.msk.f32.mxu1 %vm3023_vm2, %v21650_v23  ;;  %v22118_v23 = vld [vmem:[#allocation2 + $0x190] sm:$0xff] }
 0x3b3   : > { %17230 = vmatmul.mubr.msk.f32.gmra.mrb[92].mxu1 %vm3023_vm2, %v21658_v44  ;;  %v22136_v44 = vld [vmem:[#allocation2 + $0x1e0] sm:$0xff] }
 0x3b4   : > { %17232 = vmatprep.mubr.msk.f32.mxu1 %vm3023_vm2, %v21666_v63 }
 0x3b7   : > { %17233 = vmatmul.mubr.msk.f32.gmra.mrb[94].mxu1 %vm3023_vm2, %v21671_v3 }
 0x3b8   : > { %17235 = vmatprep.mubr.msk.f32.mxu1 %vm3023_vm2, %v22064_v48 }
 0x3bb   : > { %17236 = vmatmul.mubr.msk.f32.gmra.mrb[96].mxu1 %vm3023_vm2, %v21682_v1 }
 0x3bc   : > { %17238 = vmatprep.mubr.msk.f32.mxu1 %vm3023_vm2, %v21689_v40 }
 0x3bf   : > { %17239 = vmatmul.mubr.msk.f32.gmra.mrb[98].mxu1 %vm3023_vm2, %v21694_v46 }
 0x3c0   : > { %17241 = vmatprep.mubr.msk.f32.mxu1 %vm3023_vm2, %v21700_v33 }
 0x3c3   : > { %17242 = vmatmul.mubr.msk.f32.gmra.mrb[100].mxu1 %vm3023_vm2, %v21708_v54 }
 0x3c4   : > { %17244 = vmatprep.mubr.msk.f32.mxu1 %vm3023_vm2, %v21737_v36 }
 0x3c7   : > { %17245 = vmatmul.mubr.msk.f32.gmra.mrb[102].mxu1 %vm3023_vm2, %v21741_v62 }
 0x3c8   : > { %17247 = vmatprep.mubr.msk.f32.mxu1 %vm3023_vm2, %v22082_v38 }
 0x3cb   : > { %17248 = vmatmul.mubr.msk.f32.gmra.mrb[104].mxu1 %vm3023_vm2, %v21754_v50 }
 0x3cc   : > { %17250 = vmatprep.mubr.msk.f32.mxu1 %vm3023_vm2, %v21760_v57 }
 0x3cf   : > { %17251 = vmatmul.mubr.msk.f32.gmra.mrb[106].mxu1 %vm3023_vm2, %v21766_v11 }
 0x3d0   : > { %17253 = vmatprep.mubr.msk.f32.mxu1 %vm3023_vm2, %v21770_v41 }
 0x3d3   : > { %17254 = vmatmul.mubr.msk.f32.gmra.mrb[108].mxu1 %vm3023_vm2, %v21776_v56 }
 0x3d4   : > { %17256 = vmatprep.mubr.msk.f32.mxu1 %vm3023_vm2, %v21786_v55 }
 0x3d7   : > { %17257 = vmatmul.mubr.msk.f32.gmra.mrb[110].mxu1 %vm3023_vm2, %v21790_v31 }
 0x3d8   : > { %17259 = vmatprep.mubr.msk.f32.mxu1 %vm3023_vm2, %v22100_v27 }
 0x3db   : > { %17260 = vmatmul.mubr.msk.f32.gmra.mrb[112].mxu1 %vm3023_vm2, %v21802_v10 }
 0x3dc   : > { %17262 = vmatprep.mubr.msk.f32.mxu1 %vm3023_vm2, %v21809_v18 }
 0x3df   : > { %17263 = vmatmul.mubr.msk.f32.gmra.mrb[114].mxu1 %vm3023_vm2, %v21814_v34 }
 0x3e0   : > { %17265 = vmatprep.mubr.msk.f32.mxu1 %vm3023_vm2, %v21818_v25 }
 0x3e3   : > { %17266 = vmatmul.mubr.msk.f32.gmra.mrb[116].mxu1 %vm3023_vm2, %v21826_v7 }
 0x3e4   : > { %17268 = vmatprep.mubr.msk.f32.mxu1 %vm3023_vm2, %v21832_v15 }
 0x3e7   : > { %17269 = vmatmul.mubr.msk.f32.gmra.mrb[118].mxu1 %vm3023_vm2, %v21837_v52 }
 0x3e8   : > { %17271 = vmatprep.mubr.msk.f32.mxu1 %vm3023_vm2, %v22118_v23 }
 0x3eb   : > { %17272 = vmatmul.mubr.msk.f32.gmra.mrb[120].mxu1 %vm3023_vm2, %v21849_v45 }
 0x3ec   : > { %17274 = vmatprep.mubr.msk.f32.mxu1 %vm3023_vm2, %v21855_v30 }
 0x3ef   : > { %17275 = vmatmul.mubr.msk.f32.gmra.mrb[122].mxu1 %vm3023_vm2, %v21860_v14 }
 0x3f0   : > { %17277 = vmatprep.mubr.msk.f32.mxu1 %vm3023_vm2, %v21867_v4 }
 0x3f3   : > { %17278 = vmatmul.mubr.msk.f32.gmra.mrb[124].mxu1 %vm3023_vm2, %v21872_v61 }
 0x3f4   : > { %17280 = vmatprep.mubr.msk.f32.mxu1 %vm3023_vm2, %v21877_v20 }
 0x3f7   : > { %17281 = vmatmul.mubr.msk.f32.gmra.mrb[126].mxu1 %vm3023_vm2, %v21882_v51 }
 0x3f8   : > { %17283 = vmatprep.mubr.msk.f32.mxu1 %vm3023_vm2, %v22136_v44 }
 0x3fb   : > { %17284 = vmatmul.mubr.msk.f32.gmra.mrb[128].mxu1 %vm3023_vm2, %v21893_v43 }
 0x3fc   : > { %17286 = vmatprep.mubr.msk.f32.mxu1 %vm3023_vm2, %v21903_v19 }
 0x3ff   : > { %17287 = vmatmul.mubr.msk.f32.gmra.mrb[130].mxu1 %vm3023_vm2, %v21908_v28 }
 0x400   : > { %17289 = vmatprep.mubr.msk.f32.mxu1 %vm3023_vm2, %v21912_v32 }
 0x401   : > { %v2661_v1 = vpop.permute.xlu1 %2660 }
 0x402   : > { %v2953_v50 = vadd.f32 %v21900_v39, %v2661_v1 }
 0x403   : > { %17290 = vmatmul.mubr.msk.f32.gmra.mrb[132].mxu1 %vm3023_vm2, %v21918_v29  ;;  %v2629_v10 = vpop.permute.xlu0 %2628 }
 0x404   : > { %v3017_v45 = vmax.f32 %v2953_v50, 0.0  ;;  %v2952_v9 = vadd.f32 %v21900_v39, %v2629_v10  ;;  %17292 = vmatprep.mubr.msk.f32.mxu1 %vm3023_vm2, %v21923_v53 }
 0x406   : > { %3183 = vst.msk [vmem:[#allocation2 + $0x298] sm:$0xff] %vm3023_vm2, %v3017_v45  ;;  %v3016_v59 = vmax.f32 %v2952_v9, 0.0  ;;  %v2725_v12 = vpop.permute.xlu1 %2724 }
 0x407   : > { %v2955_v35 = vadd.f32 %v21900_v39, %v2725_v12  ;;  %17293 = vmatmul.mubr.msk.f32.gmra.mrb[134].mxu1 %vm3023_vm2, %v21927_v60  ;;  %v2693_v0 = vpop.permute.xlu0 %2692 }
 0x408   : > { %3182 = vst.msk [vmem:[#allocation2 + $0x290] sm:$0xff] %vm3023_vm2, %v3016_v59  ;;  %v2954_v1 = vadd.f32 %v21900_v39, %v2693_v0  ;;  %17295 = vmatprep.mubr.msk.f32.mxu1 %vm3023_vm2, %v22156_v13 }
 0x409   : > { %v3019_v50 = vmax.f32 %v2955_v35, 0.0 }
 0x40a   : > { %v3018_v10 = vmax.f32 %v2954_v1, 0.0  ;;  %v2781_v43 = vpop.permute.xlu1 %2780 }
 0x40b   : > { %3185 = vst.msk [vmem:[#allocation2 + $0x2a8] sm:$0xff] %vm3023_vm2, %v3019_v50  ;;  %17296 = vmatmul.mubr.msk.f32.gmra.mrb[136].mxu1 %vm3023_vm2, %v21935_v58  ;;  %v2779_v45 = vpop.permute.xlu0 %2778  ;;  %v26090_v50 = vld [vmem:[#allocation18_spill] sm:$0xff] }
 0x40c   : > { %3184 = vst.msk [vmem:[#allocation2 + $0x2a0] sm:$0xff] %vm3023_vm2, %v3018_v10  ;;  %v2790_v9 = vsel %vm2782_vm6, %v2779_v45, %v2781_v43  ;;  %17298 = vmatprep.mubr.msk.f32.mxu1 %vm3023_vm2, %v21939_v37  ;;  %v26091_v10 = vld [vmem:[#allocation19_spill] sm:$0xff]  ;;  %v26092_v45 = vld [vmem:[#allocation20_spill] sm:$0xff] }
 0x40d   : > { %v2956_v59 = vadd.f32 %v21900_v39, %v2790_v9  ;;  %v15203_v9 = vld [vmem:[%s26022_s3 + $0x98] sm:$0xf] }
 0x40e   : > { %v2581_v12 = vpop.permute.xlu1 %2580 }
 0x40f   : > { %v3020_v0 = vmax.f32 %v2956_v59, 0.0  ;;  %v2604_v35 = vmax.f32 %v21383_v24, %v2581_v12  ;;  %v2605_v1 = vmax.f32 %v21321_v6, %v2581_v12  ;;  %17299 = vmatmul.mubr.msk.f32.gmra.mrb[138].mxu1 %vm3023_vm2, %v26090_v50  ;;  %v2814_v58 = vpop.permute.xlu0 %2813  ;;  %v26093_v6 = vld [vmem:[#allocation21_spill] sm:$0xff]  ;;  %v15269_v59 = vld [vmem:[%s26022_s3 + $0xa0] sm:$0xff]  ;;  %v22238_v12 = vld [vmem:[#allocation2 + $0x78] sm:$0xff] }
 0x410   : > { %v2957_v13 = vadd.f32 %v21900_v39, %v2814_v58  ;;  %17301 = vmatprep.mubr.msk.f32.mxu1 %vm3023_vm2, %v26091_v10  ;;  %v15201_v24 = vld [vmem:[%s26022_s3 + $0x88] sm:$0xff]  ;;  %v15202_v58 = vld [vmem:[%s26022_s3 + $0x90] sm:$0xff] }
 0x411   : > { %3186 = vst.msk [vmem:[#allocation2 + $0x2b0] sm:$0xff] %vm3023_vm2, %v3020_v0  ;;  %2869 = vrot.lane.b32.xlu1 %v2605_v1, %s20068_s23  ;;  %2867 = vrot.lane.b32.xlu0 %v2604_v35, %s20068_s23  ;;  %v26094_v0 = vld [vmem:[#allocation10_spill] sm:$0xff]  ;;  %v22248_v35 = vld [vmem:[#allocation2 + $0x98] sm:$0xff]  ;;  %v22406_v1 = vld [vmem:[#allocation2 + $0xa8] sm:$0xff]  ;;  %s14785_s23 = sshll.u32 %s26134_s20, 3 }
 0x412   : > { %v3021_v43 = vmax.f32 %v2957_v13, 0.0  ;;  %v18124_v13 = vpack.c.bf16 %v15202_v58, %v15201_v24  ;;  %26101 = vst [vmem:[#allocation19_spill] sm:$0xff] %v22406_v1  ;;  %v22414_v24 = vld [vmem:[#allocation2 + $0xb8] sm:$0xff]  ;;  %v22418_v58 = vld [vmem:[#allocation2 + $0xc0] sm:$0xff]  ;;  %s501_s22 = scalar_lea.vmem %s26030_s11, %s14785_s23 }
 0x413   : > { %17302 = vmatmul.mubr.msk.f32.gmra.mrb[140].mxu1 %vm3023_vm2, %v26092_v45 }
 0x414   : > { %3187 = vst.msk [vmem:[#allocation2 + $0x2b8] sm:$0xff] %vm3023_vm2, %v3021_v43  ;;  %17304 = vmatprep.mubr.msk.f32.mxu1 %vm3023_vm2, %v26093_v6  ;;  %v22410_v43 = vld [vmem:[#allocation2 + $0xb0] sm:$0xff] }
 0x417   : > { %17305 = vmatmul.mubr.msk.f32.gmra.mrb[142].mxu1 %vm3023_vm2, %v21971_v26 }
 0x418   : > { %17317 = vmatprep.mubr.msk.f32.mxu1 %vm3023_vm2, %v22003_v47  ;;  %v15270_v47 = vld [vmem:[%s26022_s3 + $0xa8] sm:$0xff] }
 0x41b   : > { %17318 = vmatmul.mubr.msk.f32.vlgmr.msra.gmra.mrb[80].mxu1 %vm3023_vm2, %v22009_v22  ;;  %v4497_v22 = vld [vmem:[#allocation2 + $0x40] sm:$0xff] }
 0x41c   : > { %18123 = vmatpush3.bf16.msra.mxu1 %v22034_v8  ;;  %17320 = vmatprep.mubr.msk.f32.mxu1 %vm3023_vm2, %v22014_v2  ;;  %v22218_v2 = vpack.c.bf16 %v15270_v47, %v15269_v59  ;;  %v4498_v8 = vld [vmem:[#allocation2 + $0x48] sm:$0xff]  ;;  %v22436_v59 = vld [vmem:[#allocation2 + $0xf8] sm:$0xff]  ;;  %v22440_v47 = vld [vmem:[#allocation2 + $0x100] sm:$0xff] }
 0x41d   : > { %18125 = vmatprep.subr.bf16.mxu1 %v18124_v13  ;;  %26102 = vst [vmem:[#allocation20_spill] sm:$0xff] %v22436_v59 }
 0x41f   : > { %17321 = vmatmul.mubr.msk.f32.gmra.mrb[82].mxu1 %vm3023_vm2, %v22029_v49  ;;  %v22226_v49 = vld [vmem:[#allocation2 + $0x60] sm:$0xff] }
 0x420   : > { %17323 = vmatprep.mubr.msk.f32.mxu1 %vm3023_vm2, %v22031_v17  ;;  %18127 = vmatpush3.bf16.msra.mxu1 %v18124_v13  ;;  %v22230_v17 = vld [vmem:[#allocation2 + $0x68] sm:$0xff]  ;;  %v22426_v13 = vld [vmem:[#allocation2 + $0xd0] sm:$0xff] }
 0x421   : > { %17421 = vmatprep.subr.msk.mxu1 %vm3521_vm3, %v15203_v9 }
 0x423   : > { %17324 = vmatmul.mubr.msk.f32.gmra.mrb[84].mxu1 %vm3023_vm2, %v22040_v21  ;;  %v22234_v21 = vld [vmem:[#allocation2 + $0x70] sm:$0xff] }
 0x424   : > { %17326 = vmatprep.mubr.msk.f32.mxu1 %vm3023_vm2, %v4497_v22  ;;  %17422 = vmatpush3.msk.msra.mxu1 %vm3521_vm3, %v15203_v9  ;;  %v22430_v9 = vld [vmem:[#allocation2 + $0xd8] sm:$0xff]  ;;  %v22444_v22 = vld [vmem:[#allocation2 + $0x108] sm:$0xff] }
 0x425   : > { %18129 = vmatprep.subr.bf16.mxu1 %v22218_v2 }
 0x427   : > { %17327 = vmatmul.mubr.msk.f32.gmra.mrb[86].mxu1 %vm3023_vm2, %v4498_v8  ;;  %v22456_v8 = vld [vmem:[#allocation2 + $0x120] sm:$0xff] }
 0x428   : > { %17329 = vmatprep.mubr.msk.f32.mxu1 %vm3023_vm2, %v22226_v49 }
 0x42b   : > { %17330 = vmatmul.mubr.msk.f32.gmra.mrb[88].mxu1 %vm3023_vm2, %v22230_v17 }
 0x42c   : > { %17332 = vmatprep.mubr.msk.f32.mxu1 %vm3023_vm2, %v22234_v21 }
 0x42f   : > { %17333 = vmatmul.mubr.msk.f32.gmra.mrb[90].mxu1 %vm3023_vm2, %v22238_v12 }
 0x430   : > { %17335 = vmatprep.mubr.msk.f32.mxu1 %vm3023_vm2, %v21666_v63  ;;  %v26095_v63 = vld [vmem:[#allocation11_spill] sm:$0xff] }
 0x433   : > { %17336 = vmatmul.mubr.msk.f32.gmra.mrb[92].mxu1 %vm3023_vm2, %v21671_v3  ;;  %v22266_v3 = vld [vmem:[#allocation2 + $0xe8] sm:$0xff] }
 0x434   : > { %17338 = vmatprep.mubr.msk.f32.mxu1 %vm3023_vm2, %v26094_v0  ;;  %v22460_v0 = vld [vmem:[#allocation2 + $0x128] sm:$0xff] }
 0x437   : > { %17339 = vmatmul.mubr.msk.f32.gmra.mrb[94].mxu1 %vm3023_vm2, %v22248_v35 }
 0x438   : > { %17341 = vmatprep.mubr.msk.f32.mxu1 %vm3023_vm2, %v21689_v40  ;;  %v26096_v40 = vld [vmem:[#allocation12_spill] sm:$0xff] }
 0x43b   : > { %17342 = vmatmul.mubr.msk.f32.gmra.mrb[96].mxu1 %vm3023_vm2, %v21694_v46  ;;  %v22284_v46 = vld [vmem:[#allocation2 + $0x138] sm:$0xff] }
 0x43c   : > { %17344 = vmatprep.mubr.msk.f32.mxu1 %vm3023_vm2, %v21700_v33  ;;  %v26097_v33 = vld [vmem:[#allocation13_spill] sm:$0xff] }
 0x43f   : > { %17345 = vmatmul.mubr.msk.f32.gmra.mrb[98].mxu1 %vm3023_vm2, %v21708_v54  ;;  %v22302_v54 = vld [vmem:[#allocation2 + $0x188] sm:$0xff] }
 0x440   : > { %17347 = vmatprep.mubr.msk.f32.mxu1 %vm3023_vm2, %v21737_v36  ;;  %v26098_v36 = vld [vmem:[#allocation14_spill] sm:$0xff] }
 0x443   : > { %17348 = vmatmul.mubr.msk.f32.gmra.mrb[100].mxu1 %vm3023_vm2, %v21741_v62  ;;  %v22320_v62 = vld [vmem:[#allocation2 + $0x1d8] sm:$0xff] }
 0x444   : > { %17350 = vmatprep.mubr.msk.f32.mxu1 %vm3023_vm2, %v26095_v63  ;;  %v22466_v63 = vld [vmem:[#allocation2 + $0x148] sm:$0xff] }
 0x445   : > { %26103 = vst [vmem:[#allocation21_spill] sm:$0xff] %v22466_v63 }
 0x447   : > { %17351 = vmatmul.mubr.msk.f32.gmra.mrb[102].mxu1 %vm3023_vm2, %v22266_v3 }
 0x448   : > { %17353 = vmatprep.mubr.msk.f32.mxu1 %vm3023_vm2, %v21760_v57 }
 0x44b   : > { %17354 = vmatmul.mubr.msk.f32.gmra.mrb[104].mxu1 %vm3023_vm2, %v21766_v11 }
 0x44c   : > { %17356 = vmatprep.mubr.msk.f32.mxu1 %vm3023_vm2, %v21770_v41 }
 0x44f   : > { %17357 = vmatmul.mubr.msk.f32.gmra.mrb[106].mxu1 %vm3023_vm2, %v21776_v56  ;;  %v26099_v56 = vld [vmem:[#allocation16_spill] sm:$0xff] }
 0x450   : > { %17359 = vmatprep.mubr.msk.f32.mxu1 %vm3023_vm2, %v21786_v55  ;;  %v22339_v55 = vld [vmem:[#allocation2 + $0x228] sm:$0xff] }
 0x453   : > { %17360 = vmatmul.mubr.msk.f32.gmra.mrb[108].mxu1 %vm3023_vm2, %v21790_v31 }
 0x454   : > { %17362 = vmatprep.mubr.msk.f32.mxu1 %vm3023_vm2, %v26096_v40  ;;  %v22470_v40 = vld [vmem:[#allocation2 + $0x150] sm:$0xff] }
 0x457   : > { %17363 = vmatmul.mubr.msk.f32.gmra.mrb[110].mxu1 %vm3023_vm2, %v22284_v46 }
 0x458   : > { %17365 = vmatprep.mubr.msk.f32.mxu1 %vm3023_vm2, %v21809_v18 }
 0x45b   : > { %17366 = vmatmul.mubr.msk.f32.gmra.mrb[112].mxu1 %vm3023_vm2, %v21814_v34  ;;  %v22359_v34 = vld [vmem:[#allocation2 + $0x278] sm:$0xff] }
 0x45c   : > { %17368 = vmatprep.mubr.msk.f32.mxu1 %vm3023_vm2, %v21818_v25  ;;  %26100 = vst [vmem:[#allocation18_spill] sm:$0xff] %v22359_v34  ;;  %v15271_v25 = vld [vmem:[%s26022_s3 + $0xb0] sm:$0xff] }
 0x45f   : > { %17369 = vmatmul.mubr.msk.f32.gmra.mrb[114].mxu1 %vm3023_vm2, %v21826_v7  ;;  %v15272_v7 = vld [vmem:[%s26022_s3 + $0xb8] sm:$0xff] }
 0x460   : > { %17371 = vmatprep.mubr.msk.f32.mxu1 %vm3023_vm2, %v21832_v15  ;;  %v18132_v15 = vpack.c.bf16 %v15272_v7, %v15271_v25  ;;  %v22651_v25 = vld [vmem:[#allocation2 + $0x130] sm:$0xff]  ;;  %v22669_v7 = vld [vmem:[#allocation2 + $0x180] sm:$0xff] }
 0x463   : > { %17372 = vmatmul.mubr.msk.f32.gmra.mrb[116].mxu1 %vm3023_vm2, %v21837_v52  ;;  %v15273_v52 = vld [vmem:[%s26022_s3 + $0xc0] sm:$0xf] }
 0x464   : > { %17374 = vmatprep.mubr.msk.f32.mxu1 %vm3023_vm2, %v26097_v33  ;;  %v22474_v33 = vld [vmem:[#allocation2 + $0x158] sm:$0xff] }
 0x467   : > { %17375 = vmatmul.mubr.msk.f32.gmra.mrb[118].mxu1 %vm3023_vm2, %v22302_v54 }
 0x468   : > { %17377 = vmatprep.mubr.msk.f32.mxu1 %vm3023_vm2, %v21855_v30  ;;  %v15339_v30 = vld [vmem:[%s26022_s3 + $0xc8] sm:$0xff] }
 0x46b   : > { %17378 = vmatmul.mubr.msk.f32.gmra.mrb[120].mxu1 %vm3023_vm2, %v21860_v14  ;;  %v15340_v14 = vld [vmem:[%s26022_s3 + $0xd0] sm:$0xff] }
 0x46c   : > { %17380 = vmatprep.mubr.msk.f32.mxu1 %vm3023_vm2, %v21867_v4 }
 0x46f   : > { %17381 = vmatmul.mubr.msk.f32.gmra.mrb[122].mxu1 %vm3023_vm2, %v21872_v61 }
 0x470   : > { %17383 = vmatprep.mubr.msk.f32.mxu1 %vm3023_vm2, %v21877_v20 }
 0x473   : > { %17384 = vmatmul.mubr.msk.f32.gmra.mrb[124].mxu1 %vm3023_vm2, %v21882_v51 }
 0x474   : > { %17386 = vmatprep.mubr.msk.f32.mxu1 %vm3023_vm2, %v26098_v36  ;;  %v22478_v36 = vld [vmem:[#allocation2 + $0x160] sm:$0xff] }
 0x477   : > { %17387 = vmatmul.mubr.msk.f32.gmra.mrb[126].mxu1 %vm3023_vm2, %v22320_v62 }
 0x478   : > { %17389 = vmatprep.mubr.msk.f32.mxu1 %vm3023_vm2, %v21903_v19 }
 0x47b   : > { %17390 = vmatmul.mubr.msk.f32.gmra.mrb[128].mxu1 %vm3023_vm2, %v21908_v28 }
 0x47c   : > { %17392 = vmatprep.mubr.msk.f32.mxu1 %vm3023_vm2, %v21912_v32 }
 0x47f   : > { %17393 = vmatmul.mubr.msk.f32.gmra.mrb[130].mxu1 %vm3023_vm2, %v21918_v29 }
 0x480   : > { %17395 = vmatprep.mubr.msk.f32.mxu1 %vm3023_vm2, %v21923_v53 }
 0x483   : > { %17396 = vmatmul.mubr.msk.f32.gmra.mrb[132].mxu1 %vm3023_vm2, %v21927_v60  ;;  %v2870_v57 = vpop.permute.xlu1 %2869  ;;  %v2868_v11 = vpop.permute.xlu0 %2867 }
 0x484   : > { %v2879_v41 = vsel %vm2871_vm5, %v2868_v11, %v2870_v57  ;;  %17398 = vmatprep.mubr.msk.f32.mxu1 %vm3023_vm2, %v26099_v56  ;;  %v22486_v57 = vld [vmem:[#allocation2 + $0x170] sm:$0xff]  ;;  %v22490_v11 = vld [vmem:[#allocation2 + $0x178] sm:$0xff]  ;;  %v22500_v56 = vld [vmem:[#allocation2 + $0x1a0] sm:$0xff] }
 0x485   : > { %v2958_v31 = vadd.f32 %v21900_v39, %v2879_v41  ;;  %v22390_v39 = vpack.c.bf16 %v15340_v14, %v15339_v30  ;;  %v22496_v41 = vld [vmem:[#allocation2 + $0x198] sm:$0xff]  ;;  %v22687_v30 = vld [vmem:[#allocation2 + $0x1c0] sm:$0xff]  ;;  %v22691_v14 = vld [vmem:[#allocation2 + $0x1c8] sm:$0xff] }
 0x486   : > { %26104 = vst [vmem:[#allocation10_spill] sm:$0xff] %v22496_v41 }
 0x487   : > { %v3022_v18 = vmax.f32 %v2958_v31, 0.0  ;;  %17399 = vmatmul.mubr.msk.f32.gmra.mrb[134].mxu1 %vm3023_vm2, %v22339_v55  ;;  %v22504_v31 = vld [vmem:[#allocation2 + $0x1a8] sm:$0xff] }
 0x488   : > { %17401 = vmatprep.mubr.msk.f32.mxu1 %vm3023_vm2, %v21939_v37 }
 0x489   : > { %3188 = vst.msk [vmem:[#allocation2 + $0x2c0] sm:$0xff] %vm3023_vm2, %v3022_v18  ;;  %v22633_v18 = vld [vmem:[#allocation2 + $0xe0] sm:$0xff] }
 0x48b   : > { %17402 = vmatmul.mubr.msk.f32.gmra.mrb[136].mxu1 %vm3023_vm2, %v26090_v50 }
 0x48c   : > { %17404 = vmatprep.mubr.msk.f32.mxu1 %vm3023_vm2, %v26091_v10 }
 0x48f   : > { %17405 = vmatmul.mubr.msk.f32.gmra.mrb[138].mxu1 %vm3023_vm2, %v26092_v45 }
 0x490   : > { %17407 = vmatprep.mubr.msk.f32.mxu1 %vm3023_vm2, %v26093_v6 }
 0x493   : > { %17408 = vmatmul.mubr.msk.f32.gmra.mrb[140].mxu1 %vm3023_vm2, %v21971_v26 }
 0x494   : > { %17410 = vmatprep.mubr.msk.f32.mxu1 %vm3023_vm2, %v21989_v5  ;;  %v22394_v5 = vld [vmem:[#allocation2 + $0x80] sm:$0xff] }
 0x497   : > { %17411 = vmatmul.mubr.msk.f32.gmra.mrb[142].mxu1 %vm3023_vm2, %v22359_v34  ;;  %v22777_v34 = vld [vmem:[#allocation2 + $0x2c0] sm:$0xff] }
 0x498   : > { %17423 = vmatprep.mubr.msk.f32.mxu1 %vm3023_vm2, %v22043_v16  ;;  %v22400_v16 = vld [vmem:[#allocation2 + $0x88] sm:$0xff] }
 0x49b   : > { %17424 = vmatmul.mubr.msk.f32.vlgmr.msra.gmra.mrb[80].mxu1 %vm3023_vm2, %v22050_v42 }
 0x49c   : > { %17426 = vmatprep.mubr.msk.f32.mxu1 %vm3023_vm2, %v22226_v49  ;;  %18131 = vmatpush3.bf16.msra.mxu1 %v22218_v2  ;;  %v22448_v2 = vld [vmem:[#allocation2 + $0x110] sm:$0xff] }
 0x49d   : > { %18133 = vmatprep.subr.bf16.mxu1 %v18132_v15 }
 0x49f   : > { %17427 = vmatmul.mubr.msk.f32.gmra.mrb[82].mxu1 %vm3023_vm2, %v22230_v17 }
 0x4a0   : > { %17429 = vmatprep.mubr.msk.f32.mxu1 %vm3023_vm2, %v22234_v21  ;;  %18135 = vmatpush3.bf16.msra.mxu1 %v18132_v15  ;;  %v22679_v15 = vld [vmem:[#allocation2 + $0x1b0] sm:$0xff] }
 0x4a1   : > { %17527 = vmatprep.subr.msk.mxu1 %vm3521_vm3, %v15273_v52 }
 0x4a3   : > { %17430 = vmatmul.mubr.msk.f32.gmra.mrb[84].mxu1 %vm3023_vm2, %v22238_v12 }
 0x4a4   : > { %17432 = vmatprep.mubr.msk.f32.mxu1 %vm3023_vm2, %v22394_v5  ;;  %17528 = vmatpush3.msk.msra.mxu1 %vm3521_vm3, %v15273_v52  ;;  %v22683_v52 = vld [vmem:[#allocation2 + $0x1b8] sm:$0xff] }
 0x4a5   : > { %18137 = vmatprep.subr.bf16.mxu1 %v22390_v39 }
 0x4a7   : > { %17433 = vmatmul.mubr.msk.f32.gmra.mrb[86].mxu1 %vm3023_vm2, %v22400_v16 }
 0x4a8   : > { %17435 = vmatprep.mubr.msk.f32.mxu1 %vm3023_vm2, %v22064_v48  ;;  %v22422_v48 = vld [vmem:[#allocation2 + $0xc8] sm:$0xff] }
 0x4ab   : > { %17436 = vmatmul.mubr.msk.f32.gmra.mrb[88].mxu1 %vm3023_vm2, %v22406_v1 }
 0x4ac   : > { %17438 = vmatprep.mubr.msk.f32.mxu1 %vm3023_vm2, %v22410_v43 }
 0x4af   : > { %17439 = vmatmul.mubr.msk.f32.gmra.mrb[90].mxu1 %vm3023_vm2, %v22414_v24 }
 0x4b0   : > { %17441 = vmatprep.mubr.msk.f32.mxu1 %vm3023_vm2, %v22418_v58 }
 0x4b3   : > { %17442 = vmatmul.mubr.msk.f32.gmra.mrb[92].mxu1 %vm3023_vm2, %v22422_v48 }
 0x4b4   : > { %17444 = vmatprep.mubr.msk.f32.mxu1 %vm3023_vm2, %v22426_v13 }
 0x4b7   : > { %17445 = vmatmul.mubr.msk.f32.gmra.mrb[94].mxu1 %vm3023_vm2, %v22430_v9 }
 0x4b8   : > { %17447 = vmatprep.mubr.msk.f32.mxu1 %vm3023_vm2, %v22082_v38  ;;  %v22452_v38 = vld [vmem:[#allocation2 + $0x118] sm:$0xff] }
 0x4bb   : > { %17448 = vmatmul.mubr.msk.f32.gmra.mrb[96].mxu1 %vm3023_vm2, %v22436_v59 }
 0x4bc   : > { %17450 = vmatprep.mubr.msk.f32.mxu1 %vm3023_vm2, %v22440_v47 }
 0x4bf   : > { %17451 = vmatmul.mubr.msk.f32.gmra.mrb[98].mxu1 %vm3023_vm2, %v22444_v22 }
 0x4c0   : > { %17453 = vmatprep.mubr.msk.f32.mxu1 %vm3023_vm2, %v22448_v2 }
 0x4c3   : > { %17454 = vmatmul.mubr.msk.f32.gmra.mrb[100].mxu1 %vm3023_vm2, %v22452_v38 }
 0x4c4   : > { %17456 = vmatprep.mubr.msk.f32.mxu1 %vm3023_vm2, %v22456_v8 }
 0x4c7   : > { %17457 = vmatmul.mubr.msk.f32.gmra.mrb[102].mxu1 %vm3023_vm2, %v22460_v0 }
 0x4c8   : > { %17459 = vmatprep.mubr.msk.f32.mxu1 %vm3023_vm2, %v22100_v27  ;;  %v22482_v27 = vld [vmem:[#allocation2 + $0x168] sm:$0xff] }
 0x4cb   : > { %17460 = vmatmul.mubr.msk.f32.gmra.mrb[104].mxu1 %vm3023_vm2, %v22466_v63 }
 0x4cc   : > { %17462 = vmatprep.mubr.msk.f32.mxu1 %vm3023_vm2, %v22470_v40 }
 0x4cf   : > { %17463 = vmatmul.mubr.msk.f32.gmra.mrb[106].mxu1 %vm3023_vm2, %v22474_v33 }
 0x4d0   : > { %17465 = vmatprep.mubr.msk.f32.mxu1 %vm3023_vm2, %v22478_v36 }
 0x4d3   : > { %17466 = vmatmul.mubr.msk.f32.gmra.mrb[108].mxu1 %vm3023_vm2, %v22482_v27 }
 0x4d4   : > { %17468 = vmatprep.mubr.msk.f32.mxu1 %vm3023_vm2, %v22486_v57 }
 0x4d7   : > { %17469 = vmatmul.mubr.msk.f32.gmra.mrb[110].mxu1 %vm3023_vm2, %v22490_v11 }
 0x4d8   : > { %17471 = vmatprep.mubr.msk.f32.mxu1 %vm3023_vm2, %v22118_v23  ;;  %v26105_v23 = vld [vmem:[#allocation15_spill] sm:$0xff] }
 0x4db   : > { %17472 = vmatmul.mubr.msk.f32.gmra.mrb[112].mxu1 %vm3023_vm2, %v22496_v41 }
 0x4dc   : > { %17474 = vmatprep.mubr.msk.f32.mxu1 %vm3023_vm2, %v22500_v56 }
 0x4df   : > { %17475 = vmatmul.mubr.msk.f32.gmra.mrb[114].mxu1 %vm3023_vm2, %v22504_v31 }
 0x4e0   : > { %17477 = vmatprep.mubr.msk.f32.mxu1 %vm3023_vm2, %v21867_v4  ;;  %v26106_v4 = vld [vmem:[#allocation22_spill] sm:$0xff] }
 0x4e3   : > { %17478 = vmatmul.mubr.msk.f32.gmra.mrb[116].mxu1 %vm3023_vm2, %v21872_v61  ;;  %v26107_v61 = vld [vmem:[#allocation17_spill] sm:$0xff] }
 0x4e4   : > { %17480 = vmatprep.mubr.msk.f32.mxu1 %vm3023_vm2, %v21877_v20  ;;  %v22546_v20 = vld [vmem:[#allocation2 + $0x280] sm:$0xff]  ;;  %26115 = vst [vmem:[#allocation17_spill] sm:$0xff] %v22777_v34 }
 0x4e5   : > { %26108 = vst [vmem:[#allocation11_spill] sm:$0xff] %v22546_v20 }
 0x4e7   : > { %17481 = vmatmul.mubr.msk.f32.gmra.mrb[118].mxu1 %vm3023_vm2, %v21882_v51  ;;  %v22552_v51 = vld [vmem:[#allocation2 + $0x288] sm:$0xff] }
 0x4e8   : > { %17483 = vmatprep.mubr.msk.f32.mxu1 %vm3023_vm2, %v22136_v44  ;;  %26109 = vst [vmem:[#allocation12_spill] sm:$0xff] %v22552_v51 }
 0x4eb   : > { %17484 = vmatmul.mubr.msk.f32.gmra.mrb[120].mxu1 %vm3023_vm2, %v26105_v23  ;;  %v22699_v23 = vld [vmem:[#allocation2 + $0x1e8] sm:$0xff] }
 0x4ec   : > { %17486 = vmatprep.mubr.msk.f32.mxu1 %vm3023_vm2, %v21903_v19  ;;  %v22556_v19 = vld [vmem:[#allocation2 + $0x290] sm:$0xff]  ;;  %26113 = vst [vmem:[#allocation15_spill] sm:$0xff] %v22699_v23 }
 0x4ef   : > { %17487 = vmatmul.mubr.msk.f32.gmra.mrb[122].mxu1 %vm3023_vm2, %v21908_v28  ;;  %v22560_v28 = vld [vmem:[#allocation2 + $0x298] sm:$0xff] }
 0x4f0   : > { %17489 = vmatprep.mubr.msk.f32.mxu1 %vm3023_vm2, %v21912_v32  ;;  %26110 = vst [vmem:[#allocation13_spill] sm:$0xff] %v22560_v28  ;;  %v22564_v32 = vld [vmem:[#allocation2 + $0x2a0] sm:$0xff] }
 0x4f3   : > { %17490 = vmatmul.mubr.msk.f32.gmra.mrb[124].mxu1 %vm3023_vm2, %v21918_v29  ;;  %v22568_v29 = vld [vmem:[#allocation2 + $0x2a8] sm:$0xff] }
 0x4f4   : > { %17492 = vmatprep.mubr.msk.f32.mxu1 %vm3023_vm2, %v21923_v53  ;;  %v22572_v53 = vld [vmem:[#allocation2 + $0x2b0] sm:$0xff] }
 0x4f5   : > { %26111 = vst [vmem:[#allocation14_spill] sm:$0xff] %v22572_v53 }
 0x4f7   : > { %17493 = vmatmul.mubr.msk.f32.gmra.mrb[126].mxu1 %vm3023_vm2, %v21927_v60  ;;  %v22576_v60 = vld [vmem:[#allocation2 + $0x2b8] sm:$0xff] }
 0x4f8   : > { %17495 = vmatprep.mubr.msk.f32.mxu1 %vm3023_vm2, %v26106_v4  ;;  %26112 = vst [vmem:[#allocation16_spill] sm:$0xff] %v22576_v60  ;;  %v22703_v4 = vld [vmem:[#allocation2 + $0x1f0] sm:$0xff] }
 0x4fb   : > { %17496 = vmatmul.mubr.msk.f32.gmra.mrb[128].mxu1 %vm3023_vm2, %v26107_v61  ;;  %v22707_v61 = vld [vmem:[#allocation2 + $0x1f8] sm:$0xff] }
 0x4fc   : > { %17498 = vmatprep.mubr.msk.f32.mxu1 %vm3023_vm2, %v21939_v37  ;;  %v15341_v37 = vld [vmem:[%s26022_s3 + $0xd8] sm:$0xff] }
 0x4ff   : > { %17499 = vmatmul.mubr.msk.f32.gmra.mrb[130].mxu1 %vm3023_vm2, %v26090_v50  ;;  %v15343_v50 = vld [vmem:[%s26022_s3 + $0xe8] sm:$0xf] }
 0x500   : > { %17501 = vmatprep.mubr.msk.f32.mxu1 %vm3023_vm2, %v26091_v10  ;;  %v15409_v10 = vld [vmem:[%s26022_s3 + $0xf0] sm:$0xff] }
 0x503   : > { %17502 = vmatmul.mubr.msk.f32.gmra.mrb[132].mxu1 %vm3023_vm2, %v26092_v45 }
 0x504   : > { %17504 = vmatprep.mubr.msk.f32.mxu1 %vm3023_vm2, %v26093_v6  ;;  %v22615_v6 = vld [vmem:[#allocation2 + $0x90] sm:$0xff] }
 0x507   : > { %17505 = vmatmul.mubr.msk.f32.gmra.mrb[134].mxu1 %vm3023_vm2, %v21971_v26  ;;  %v15342_v26 = vld [vmem:[%s26022_s3 + $0xe0] sm:$0xff] }
 0x508   : > { %17507 = vmatprep.mubr.msk.f32.mxu1 %vm3023_vm2, %v22546_v20  ;;  %v18140_v44 = vpack.c.bf16 %v15342_v26, %v15341_v37  ;;  %v22711_v37 = vld [vmem:[#allocation2 + $0x200] sm:$0xff]  ;;  %v22715_v26 = vld [vmem:[#allocation2 + $0x208] sm:$0xff] }
 0x509   : > { %v22735_v20 = vld [vmem:[#allocation2 + $0x240] sm:$0xff] }
 0x50b   : > { %17508 = vmatmul.mubr.msk.f32.gmra.mrb[136].mxu1 %vm3023_vm2, %v22552_v51 }
 0x50c   : > { %17510 = vmatprep.mubr.msk.f32.mxu1 %vm3023_vm2, %v22556_v19 }
 0x50f   : > { %17511 = vmatmul.mubr.msk.f32.gmra.mrb[138].mxu1 %vm3023_vm2, %v22560_v28 }
 0x510   : > { %17513 = vmatprep.mubr.msk.f32.mxu1 %vm3023_vm2, %v22564_v32 }
 0x513   : > { %17514 = vmatmul.mubr.msk.f32.gmra.mrb[140].mxu1 %vm3023_vm2, %v22568_v29 }
 0x514   : > { %17516 = vmatprep.mubr.msk.f32.mxu1 %vm3023_vm2, %v22572_v53 }
 0x517   : > { %17517 = vmatmul.mubr.msk.f32.gmra.mrb[142].mxu1 %vm3023_vm2, %v22576_v60 }
 0x518   : > { %17529 = vmatprep.mubr.msk.f32.mxu1 %vm3023_vm2, %v22050_v42  ;;  %v15410_v42 = vld [vmem:[%s26022_s3 + $0xf8] sm:$0xff] }
 0x519   : > { %v22607_v45 = vpack.c.bf16 %v15410_v42, %v15409_v10  ;;  %v22727_v10 = vld [vmem:[#allocation2 + $0x220] sm:$0xff]  ;;  %v22731_v42 = vld [vmem:[#allocation2 + $0x238] sm:$0xff] }
 0x51a   : > { %26114 = vst [vmem:[#allocation22_spill] sm:$0xff] %v22731_v42 }
 0x51b   : > { %17530 = vmatmul.mubr.msk.f32.vlgmr.msra.gmra.mrb[80].mxu1 %vm3023_vm2, %v22226_v49 }
 0x51c   : > { %17532 = vmatprep.mubr.msk.f32.mxu1 %vm3023_vm2, %v22230_v17  ;;  %18139 = vmatpush3.bf16.msra.mxu1 %v22390_v39  ;;  %v22695_v39 = vld [vmem:[#allocation2 + $0x1d0] sm:$0xff] }
 0x51d   : > { %18141 = vmatprep.subr.bf16.mxu1 %v18140_v44 }
 0x51f   : > { %17533 = vmatmul.mubr.msk.f32.gmra.mrb[82].mxu1 %vm3023_vm2, %v22234_v21 }
 0x520   : > { %17535 = vmatprep.mubr.msk.f32.mxu1 %vm3023_vm2, %v22238_v12  ;;  %18143 = vmatpush3.bf16.msra.mxu1 %v18140_v44  ;;  %v22719_v44 = vld [vmem:[#allocation2 + $0x210] sm:$0xff] }
 0x521   : > { %17633 = vmatprep.subr.msk.mxu1 %vm3521_vm3, %v15343_v50 }
 0x523   : > { %17536 = vmatmul.mubr.msk.f32.gmra.mrb[84].mxu1 %vm3023_vm2, %v22394_v5 }
 0x524   : > { %17538 = vmatprep.mubr.msk.f32.mxu1 %vm3023_vm2, %v22400_v16  ;;  %17634 = vmatpush3.msk.msra.mxu1 %vm3521_vm3, %v15343_v50  ;;  %v22723_v50 = vld [vmem:[#allocation2 + $0x218] sm:$0xff] }
 0x525   : > { %18145 = vmatprep.subr.bf16.mxu1 %v22607_v45 }
 0x527   : > { %17539 = vmatmul.mubr.msk.f32.gmra.mrb[86].mxu1 %vm3023_vm2, %v22615_v6 }
 0x528   : > { %17541 = vmatprep.mubr.msk.f32.mxu1 %vm3023_vm2, %v22406_v1  ;;  %v22759_v1 = vld [vmem:[#allocation2 + $0x270] sm:$0xff] }
 0x52b   : > { %17542 = vmatmul.mubr.msk.f32.gmra.mrb[88].mxu1 %vm3023_vm2, %v22410_v43 }
 0x52c   : > { %17544 = vmatprep.mubr.msk.f32.mxu1 %vm3023_vm2, %v22414_v24 }
 0x52f   : > { %17545 = vmatmul.mubr.msk.f32.gmra.mrb[90].mxu1 %vm3023_vm2, %v22418_v58 }
 0x530   : > { %17547 = vmatprep.mubr.msk.f32.mxu1 %vm3023_vm2, %v22422_v48 }
 0x533   : > { %17548 = vmatmul.mubr.msk.f32.gmra.mrb[92].mxu1 %vm3023_vm2, %v22426_v13 }
 0x534   : > { %17550 = vmatprep.mubr.msk.f32.mxu1 %vm3023_vm2, %v22430_v9 }
 0x537   : > { %17551 = vmatmul.mubr.msk.f32.gmra.mrb[94].mxu1 %vm3023_vm2, %v22633_v18 }
 0x538   : > { %17553 = vmatprep.mubr.msk.f32.mxu1 %vm3023_vm2, %v22436_v59  ;;  %v22755_v59 = vld [vmem:[#allocation2 + $0x268] sm:$0xff] }
 0x53b   : > { %17554 = vmatmul.mubr.msk.f32.gmra.mrb[96].mxu1 %vm3023_vm2, %v22440_v47 }
 0x53c   : > { %17556 = vmatprep.mubr.msk.f32.mxu1 %vm3023_vm2, %v22444_v22 }
 0x53f   : > { %17557 = vmatmul.mubr.msk.f32.gmra.mrb[98].mxu1 %vm3023_vm2, %v22448_v2 }
 0x540   : > { %17559 = vmatprep.mubr.msk.f32.mxu1 %vm3023_vm2, %v22452_v38 }
 0x543   : > { %17560 = vmatmul.mubr.msk.f32.gmra.mrb[100].mxu1 %vm3023_vm2, %v22456_v8 }
 0x544   : > { %17562 = vmatprep.mubr.msk.f32.mxu1 %vm3023_vm2, %v22460_v0 }
 0x547   : > { %17563 = vmatmul.mubr.msk.f32.gmra.mrb[102].mxu1 %vm3023_vm2, %v22651_v25 }
 0x548   : > { %17565 = vmatprep.mubr.msk.f32.mxu1 %vm3023_vm2, %v22466_v63  ;;  %v22747_v63 = vld [vmem:[#allocation2 + $0x258] sm:$0xff] }
 0x54b   : > { %17566 = vmatmul.mubr.msk.f32.gmra.mrb[104].mxu1 %vm3023_vm2, %v22470_v40 }
 0x54c   : > { %17568 = vmatprep.mubr.msk.f32.mxu1 %vm3023_vm2, %v22474_v33 }
 0x54f   : > { %17569 = vmatmul.mubr.msk.f32.gmra.mrb[106].mxu1 %vm3023_vm2, %v22478_v36 }
 0x550   : > { %17571 = vmatprep.mubr.msk.f32.mxu1 %vm3023_vm2, %v22482_v27 }
 0x553   : > { %17572 = vmatmul.mubr.msk.f32.gmra.mrb[108].mxu1 %vm3023_vm2, %v22486_v57 }
 0x554   : > { %17574 = vmatprep.mubr.msk.f32.mxu1 %vm3023_vm2, %v22490_v11 }
 0x557   : > { %17575 = vmatmul.mubr.msk.f32.gmra.mrb[110].mxu1 %vm3023_vm2, %v22669_v7 }
 0x558   : > { %17577 = vmatprep.mubr.msk.f32.mxu1 %vm3023_vm2, %v22496_v41  ;;  %v22743_v41 = vld [vmem:[#allocation2 + $0x250] sm:$0xff] }
 0x55b   : > { %17578 = vmatmul.mubr.msk.f32.gmra.mrb[112].mxu1 %vm3023_vm2, %v22500_v56 }
 0x55c   : > { %17580 = vmatprep.mubr.msk.f32.mxu1 %vm3023_vm2, %v22504_v31 }
 0x55f   : > { %17581 = vmatmul.mubr.msk.f32.gmra.mrb[114].mxu1 %vm3023_vm2, %v22679_v15 }
 0x560   : > { %17583 = vmatprep.mubr.msk.f32.mxu1 %vm3023_vm2, %v22683_v52 }
 0x563   : > { %17584 = vmatmul.mubr.msk.f32.gmra.mrb[116].mxu1 %vm3023_vm2, %v22687_v30 }
 0x564   : > { %17586 = vmatprep.mubr.msk.f32.mxu1 %vm3023_vm2, %v22691_v14 }
 0x567   : > { %17587 = vmatmul.mubr.msk.f32.gmra.mrb[118].mxu1 %vm3023_vm2, %v22695_v39 }
 0x568   : > { %17589 = vmatprep.mubr.msk.f32.mxu1 %vm3023_vm2, %v22699_v23  ;;  %v22739_v23 = vld [vmem:[#allocation2 + $0x248] sm:$0xff] }
 0x56b   : > { %17590 = vmatmul.mubr.msk.f32.gmra.mrb[120].mxu1 %vm3023_vm2, %v22703_v4 }
 0x56c   : > { %17592 = vmatprep.mubr.msk.f32.mxu1 %vm3023_vm2, %v22707_v61 }
 0x56f   : > { %17593 = vmatmul.mubr.msk.f32.gmra.mrb[122].mxu1 %vm3023_vm2, %v22711_v37 }
 0x570   : > { %17595 = vmatprep.mubr.msk.f32.mxu1 %vm3023_vm2, %v22715_v26 }
 0x573   : > { %17596 = vmatmul.mubr.msk.f32.gmra.mrb[124].mxu1 %vm3023_vm2, %v22719_v44 }
 0x574   : > { %17598 = vmatprep.mubr.msk.f32.mxu1 %vm3023_vm2, %v22723_v50 }
 0x577   : > { %17599 = vmatmul.mubr.msk.f32.gmra.mrb[126].mxu1 %vm3023_vm2, %v22727_v10 }
 0x578   : > { %17601 = vmatprep.mubr.msk.f32.mxu1 %vm3023_vm2, %v22731_v42  ;;  %v22751_v42 = vld [vmem:[#allocation2 + $0x260] sm:$0xff] }
 0x57b   : > { %17602 = vmatmul.mubr.msk.f32.gmra.mrb[128].mxu1 %vm3023_vm2, %v22735_v20 }
 0x57c   : > { %17604 = vmatprep.mubr.msk.f32.mxu1 %vm3023_vm2, %v22739_v23 }
 0x57f   : > { %17605 = vmatmul.mubr.msk.f32.gmra.mrb[130].mxu1 %vm3023_vm2, %v22743_v41 }
 0x580   : > { %17607 = vmatprep.mubr.msk.f32.mxu1 %vm3023_vm2, %v22747_v63 }
 0x583   : > { %17608 = vmatmul.mubr.msk.f32.gmra.mrb[132].mxu1 %vm3023_vm2, %v22751_v42 }
 0x584   : > { %17610 = vmatprep.mubr.msk.f32.mxu1 %vm3023_vm2, %v22755_v59 }
 0x587   : > { %17611 = vmatmul.mubr.msk.f32.gmra.mrb[134].mxu1 %vm3023_vm2, %v22759_v1 }
 0x588   : > { %17613 = vmatprep.mubr.msk.f32.mxu1 %vm3023_vm2, %v22552_v51  ;;  %v15411_v51 = vld [vmem:[%s26022_s3 + $0x100] sm:$0xff] }
 0x58b   : > { %17614 = vmatmul.mubr.msk.f32.gmra.mrb[136].mxu1 %vm3023_vm2, %v22556_v19 }
 0x58c   : > { %17616 = vmatprep.mubr.msk.f32.mxu1 %vm3023_vm2, %v22560_v28  ;;  %v15412_v28 = vld [vmem:[%s26022_s3 + $0x108] sm:$0xff] }
 0x58f   : > { %17617 = vmatmul.mubr.msk.f32.gmra.mrb[138].mxu1 %vm3023_vm2, %v22564_v32 }
 0x590   : > { %17619 = vmatprep.mubr.msk.f32.mxu1 %vm3023_vm2, %v22568_v29 }
 0x593   : > { %17620 = vmatmul.mubr.msk.f32.gmra.mrb[140].mxu1 %vm3023_vm2, %v22572_v53  ;;  %v18148_v53 = vpack.c.bf16 %v15412_v28, %v15411_v51  ;;  %v15483_v51 = vld [vmem:[%s26022_s3 + $0x138] sm:$0xf]  ;;  %v15549_v28 = vld [vmem:[%s26022_s3 + $0x140] sm:$0xff] }
 0x594   : > { %17622 = vmatprep.mubr.msk.f32.mxu1 %vm3023_vm2, %v22576_v60  ;;  %v15413_v60 = vld [vmem:[%s26022_s3 + $0x110] sm:$0xf] }
 0x597   : > { %17623 = vmatmul.mubr.msk.f32.gmra.mrb[142].mxu1 %vm3023_vm2, %v22777_v34  ;;  %v15479_v34 = vld [vmem:[%s26022_s3 + $0x118] sm:$0xff] }
 0x598   : > { %17635 = vmatprep.mubr.msk.f32.mxu1 %vm3023_vm2, %v22226_v49  ;;  %v15480_v49 = vld [vmem:[%s26022_s3 + $0x120] sm:$0xff] }
 0x59b   : > { %17636 = vmatmul.mubr.msk.f32.vlgmr.msra.gmra.mrb[80].mxu1 %vm3023_vm2, %v22230_v17  ;;  %v22808_v17 = vpack.c.bf16 %v15480_v49, %v15479_v34  ;;  %v15482_v34 = vld [vmem:[%s26022_s3 + $0x130] sm:$0xff]  ;;  %v23099_v49 = vld [vmem:[#allocation2 + $0xb8] sm:$0xff] }
 0x59c   : > { %17638 = vmatprep.mubr.msk.f32.mxu1 %vm3023_vm2, %v22234_v21  ;;  %18147 = vmatpush3.bf16.msra.mxu1 %v22607_v45  ;;  %v26116_v21 = vld [vmem:[#allocation18_spill] sm:$0xff] }
 0x59d   : > { %18149 = vmatprep.subr.bf16.mxu1 %v18148_v53 }
 0x59f   : > { %17639 = vmatmul.mubr.msk.f32.gmra.mrb[82].mxu1 %vm3023_vm2, %v22238_v12  ;;  %v26117_v12 = vld [vmem:[#allocation13_spill] sm:$0xff] }
 0x5a0   : > { %17641 = vmatprep.mubr.msk.f32.mxu1 %vm3023_vm2, %v22394_v5  ;;  %18151 = vmatpush3.bf16.msra.mxu1 %v18148_v53  ;;  %v15550_v53 = vld [vmem:[%s26022_s3 + $0x148] sm:$0xff] }
 0x5a1   : > { %17739 = vmatprep.subr.msk.mxu1 %vm3521_vm3, %v15413_v60 }
 0x5a3   : > { %17642 = vmatmul.mubr.msk.f32.gmra.mrb[84].mxu1 %vm3023_vm2, %v22400_v16  ;;  %v26121_v16 = vld [vmem:[#allocation19_spill] sm:$0xff] }
 0x5a4   : > { %17644 = vmatprep.mubr.msk.f32.mxu1 %vm3023_vm2, %v22615_v6  ;;  %17740 = vmatpush3.msk.msra.mxu1 %vm3521_vm3, %v15413_v60  ;;  %v7358_v60 = vld [vmem:[#allocation2 + $0xf0] sm:$0xff] }
 0x5a5   : > { %18153 = vmatprep.subr.bf16.mxu1 %v22808_v17  ;;  %v23095_v6 = vld [vmem:[#allocation2 + $0xb0] sm:$0xff] }
 0x5a7   : > { %17645 = vmatmul.mubr.msk.f32.gmra.mrb[86].mxu1 %vm3023_vm2, %v22248_v35  ;;  %v26118_v35 = vld [vmem:[#allocation14_spill] sm:$0xff] }
 0x5a8   : > { %17647 = vmatprep.mubr.msk.f32.mxu1 %vm3023_vm2, %v22410_v43 }
 0x5ab   : > { %17648 = vmatmul.mubr.msk.f32.gmra.mrb[88].mxu1 %vm3023_vm2, %v22414_v24 }
 0x5ac   : > { %17650 = vmatprep.mubr.msk.f32.mxu1 %vm3023_vm2, %v22418_v58 }
 0x5af   : > { %17651 = vmatmul.mubr.msk.f32.gmra.mrb[90].mxu1 %vm3023_vm2, %v22422_v48 }
 0x5b0   : > { %17653 = vmatprep.mubr.msk.f32.mxu1 %vm3023_vm2, %v22426_v13 }
 0x5b3   : > { %17654 = vmatmul.mubr.msk.f32.gmra.mrb[92].mxu1 %vm3023_vm2, %v22430_v9 }
 0x5b4   : > { %17656 = vmatprep.mubr.msk.f32.mxu1 %vm3023_vm2, %v22633_v18 }
 0x5b7   : > { %17657 = vmatmul.mubr.msk.f32.gmra.mrb[94].mxu1 %vm3023_vm2, %v22266_v3  ;;  %v26119_v3 = vld [vmem:[#allocation16_spill] sm:$0xff] }
 0x5b8   : > { %17659 = vmatprep.mubr.msk.f32.mxu1 %vm3023_vm2, %v22440_v47 }
 0x5bb   : > { %17660 = vmatmul.mubr.msk.f32.gmra.mrb[96].mxu1 %vm3023_vm2, %v22444_v22 }
 0x5bc   : > { %17662 = vmatprep.mubr.msk.f32.mxu1 %vm3023_vm2, %v22448_v2 }
 0x5bf   : > { %17663 = vmatmul.mubr.msk.f32.gmra.mrb[98].mxu1 %vm3023_vm2, %v22452_v38 }
 0x5c0   : > { %17665 = vmatprep.mubr.msk.f32.mxu1 %vm3023_vm2, %v22456_v8 }
 0x5c3   : > { %17666 = vmatmul.mubr.msk.f32.gmra.mrb[100].mxu1 %vm3023_vm2, %v22460_v0 }
 0x5c4   : > { %17668 = vmatprep.mubr.msk.f32.mxu1 %vm3023_vm2, %v22651_v25 }
 0x5c7   : > { %17669 = vmatmul.mubr.msk.f32.gmra.mrb[102].mxu1 %vm3023_vm2, %v22284_v46  ;;  %v26120_v46 = vld [vmem:[#allocation17_spill] sm:$0xff] }
 0x5c8   : > { %17671 = vmatprep.mubr.msk.f32.mxu1 %vm3023_vm2, %v22470_v40 }
 0x5cb   : > { %17672 = vmatmul.mubr.msk.f32.gmra.mrb[104].mxu1 %vm3023_vm2, %v22474_v33 }
 0x5cc   : > { %17674 = vmatprep.mubr.msk.f32.mxu1 %vm3023_vm2, %v22478_v36 }
 0x5cf   : > { %17675 = vmatmul.mubr.msk.f32.gmra.mrb[106].mxu1 %vm3023_vm2, %v22482_v27 }
 0x5d0   : > { %17677 = vmatprep.mubr.msk.f32.mxu1 %vm3023_vm2, %v22486_v57 }
 0x5d3   : > { %17678 = vmatmul.mubr.msk.f32.gmra.mrb[108].mxu1 %vm3023_vm2, %v22490_v11 }
 0x5d4   : > { %17680 = vmatprep.mubr.msk.f32.mxu1 %vm3023_vm2, %v22669_v7 }
 0x5d7   : > { %17681 = vmatmul.mubr.msk.f32.gmra.mrb[110].mxu1 %vm3023_vm2, %v22302_v54  ;;  %v22928_v54 = vld [vmem:[#allocation2 + $0x2c8] sm:$0xff] }
 0x5d8   : > { %17683 = vmatprep.mubr.msk.f32.mxu1 %vm3023_vm2, %v22500_v56 }
 0x5db   : > { %17684 = vmatmul.mubr.msk.f32.gmra.mrb[112].mxu1 %vm3023_vm2, %v22504_v31 }
 0x5dc   : > { %17686 = vmatprep.mubr.msk.f32.mxu1 %vm3023_vm2, %v22679_v15 }
 0x5df   : > { %17687 = vmatmul.mubr.msk.f32.gmra.mrb[114].mxu1 %vm3023_vm2, %v22683_v52 }
 0x5e0   : > { %17689 = vmatprep.mubr.msk.f32.mxu1 %vm3023_vm2, %v22687_v30 }
 0x5e3   : > { %17690 = vmatmul.mubr.msk.f32.gmra.mrb[116].mxu1 %vm3023_vm2, %v22691_v14 }
 0x5e4   : > { %17692 = vmatprep.mubr.msk.f32.mxu1 %vm3023_vm2, %v22695_v39 }
 0x5e7   : > { %17693 = vmatmul.mubr.msk.f32.gmra.mrb[118].mxu1 %vm3023_vm2, %v22320_v62  ;;  %v7350_v62 = vld [vmem:[#allocation2 + $0xa0] sm:$0xff] }
 0x5e8   : > { %17695 = vmatprep.mubr.msk.f32.mxu1 %vm3023_vm2, %v22703_v4 }
 0x5eb   : > { %17696 = vmatmul.mubr.msk.f32.gmra.mrb[120].mxu1 %vm3023_vm2, %v22707_v61 }
 0x5ec   : > { %17698 = vmatprep.mubr.msk.f32.mxu1 %vm3023_vm2, %v22711_v37 }
 0x5ef   : > { %17699 = vmatmul.mubr.msk.f32.gmra.mrb[122].mxu1 %vm3023_vm2, %v22715_v26 }
 0x5f0   : > { %17701 = vmatprep.mubr.msk.f32.mxu1 %vm3023_vm2, %v22719_v44 }
 0x5f3   : > { %17702 = vmatmul.mubr.msk.f32.gmra.mrb[124].mxu1 %vm3023_vm2, %v22723_v50 }
 0x5f4   : > { %17704 = vmatprep.mubr.msk.f32.mxu1 %vm3023_vm2, %v22727_v10 }
 0x5f7   : > { %17705 = vmatmul.mubr.msk.f32.gmra.mrb[126].mxu1 %vm3023_vm2, %v22339_v55  ;;  %v15481_v55 = vld [vmem:[%s26022_s3 + $0x128] sm:$0xff] }
 0x5f8   : > { %17707 = vmatprep.mubr.msk.f32.mxu1 %vm3023_vm2, %v22735_v20  ;;  %v18156_v5 = vpack.c.bf16 %v15482_v34, %v15481_v55  ;;  %v23128_v55 = vld [vmem:[#allocation2 + $0x100] sm:$0xff]  ;;  %v23132_v34 = vld [vmem:[#allocation2 + $0x108] sm:$0xff] }
 0x5fb   : > { %17708 = vmatmul.mubr.msk.f32.gmra.mrb[128].mxu1 %vm3023_vm2, %v22739_v23 }
 0x5fc   : > { %17710 = vmatprep.mubr.msk.f32.mxu1 %vm3023_vm2, %v22743_v41 }
 0x5ff   : > { %17711 = vmatmul.mubr.msk.f32.gmra.mrb[130].mxu1 %vm3023_vm2, %v22747_v63 }
 0x600   : > { %17713 = vmatprep.mubr.msk.f32.mxu1 %vm3023_vm2, %v22751_v42 }
 0x603   : > { %17714 = vmatmul.mubr.msk.f32.gmra.mrb[132].mxu1 %vm3023_vm2, %v22755_v59 }
 0x604   : > { %17716 = vmatprep.mubr.msk.f32.mxu1 %vm3023_vm2, %v22759_v1 }
 0x607   : > { %17717 = vmatmul.mubr.msk.f32.gmra.mrb[134].mxu1 %vm3023_vm2, %v26116_v21  ;;  %v15553_v21 = vld [vmem:[%s26022_s3 + $0x160] sm:$0xf] }
 0x608   : > { %17719 = vmatprep.mubr.msk.f32.mxu1 %vm3023_vm2, %v22556_v19 }
 0x60b   : > { %17720 = vmatmul.mubr.msk.f32.gmra.mrb[136].mxu1 %vm3023_vm2, %v26117_v12 }
 0x60c   : > { %17722 = vmatprep.mubr.msk.f32.mxu1 %vm3023_vm2, %v22564_v32 }
 0x60f   : > { %17723 = vmatmul.mubr.msk.f32.gmra.mrb[138].mxu1 %vm3023_vm2, %v22568_v29 }
 0x610   : > { %17725 = vmatprep.mubr.msk.f32.mxu1 %vm3023_vm2, %v26118_v35 }
 0x613   : > { %17726 = vmatmul.mubr.msk.f32.gmra.mrb[140].mxu1 %vm3023_vm2, %v26119_v3 }
 0x614   : > { %17728 = vmatprep.mubr.msk.f32.mxu1 %vm3023_vm2, %v26120_v46 }
 0x617   : > { %17729 = vmatmul.mubr.msk.f32.gmra.mrb[142].mxu1 %vm3023_vm2, %v22928_v54 }
 0x618   : > { %17741 = vmatprep.mubr.msk.f32.mxu1 %vm3023_vm2, %v7350_v62  ;;  %v8073_v62 = vld [vmem:[#allocation2 + $0xf8] sm:$0xff] }
 0x61b   : > { %17742 = vmatmul.mubr.msk.f32.vlgmr.msra.gmra.mrb[80].mxu1 %vm3023_vm2, %v26121_v16  ;;  %v23140_v16 = vld [vmem:[#allocation2 + $0x118] sm:$0xff] }
 0x61c   : > { %17744 = vmatprep.mubr.msk.f32.mxu1 %vm3023_vm2, %v22410_v43  ;;  %18155 = vmatpush3.bf16.msra.mxu1 %v22808_v17  ;;  %v22958_v43 = vpack.c.bf16 %v15550_v53, %v15549_v28  ;;  %v23104_v17 = vld [vmem:[#allocation2 + $0xc0] sm:$0xff]  ;;  %v8081_v28 = vld [vmem:[#allocation2 + $0x148] sm:$0xff]  ;;  %v23155_v53 = vld [vmem:[#allocation2 + $0x150] sm:$0xff] }
 0x61d   : > { %18157 = vmatprep.subr.bf16.mxu1 %v18156_v5 }
 0x61f   : > { %17745 = vmatmul.mubr.msk.f32.gmra.mrb[82].mxu1 %vm3023_vm2, %v22414_v24  ;;  %v26122_v24 = vld [vmem:[#allocation20_spill] sm:$0xff] }
 0x620   : > { %17747 = vmatprep.mubr.msk.f32.mxu1 %vm3023_vm2, %v22418_v58  ;;  %18159 = vmatpush3.bf16.msra.mxu1 %v18156_v5  ;;  %v7366_v58 = vld [vmem:[#allocation2 + $0x140] sm:$0xff]  ;;  %v23136_v5 = vld [vmem:[#allocation2 + $0x110] sm:$0xff] }
 0x621   : > { %17845 = vmatprep.subr.msk.mxu1 %vm3521_vm3, %v15483_v51 }
 0x623   : > { %17748 = vmatmul.mubr.msk.f32.gmra.mrb[84].mxu1 %vm3023_vm2, %v22422_v48  ;;  %v26123_v48 = vld [vmem:[#allocation21_spill] sm:$0xff] }
 0x624   : > { %17750 = vmatprep.mubr.msk.f32.mxu1 %vm3023_vm2, %v22426_v13  ;;  %17846 = vmatpush3.msk.msra.mxu1 %vm3521_vm3, %v15483_v51  ;;  %v7374_v13 = vld [vmem:[#allocation2 + $0x190] sm:$0xff]  ;;  %v23148_v51 = vld [vmem:[#allocation2 + $0x128] sm:$0xff] }
 0x625   : > { %18161 = vmatprep.subr.bf16.mxu1 %v22958_v43 }
 0x627   : > { %17751 = vmatmul.mubr.msk.f32.gmra.mrb[86].mxu1 %vm3023_vm2, %v22430_v9  ;;  %v26124_v9 = vld [vmem:[#allocation10_spill] sm:$0xff] }
 0x628   : > { %17753 = vmatprep.mubr.msk.f32.mxu1 %vm3023_vm2, %v7358_v60  ;;  %v23163_v60 = vld [vmem:[#allocation2 + $0x160] sm:$0xff] }
 0x62b   : > { %17754 = vmatmul.mubr.msk.f32.gmra.mrb[88].mxu1 %vm3023_vm2, %v26122_v24  ;;  %v23167_v24 = vld [vmem:[#allocation2 + $0x168] sm:$0xff] }
 0x62c   : > { %17756 = vmatprep.mubr.msk.f32.mxu1 %vm3023_vm2, %v22440_v47  ;;  %v7382_v47 = vld [vmem:[#allocation2 + $0x1e0] sm:$0xff] }
 0x62f   : > { %17757 = vmatmul.mubr.msk.f32.gmra.mrb[90].mxu1 %vm3023_vm2, %v22444_v22  ;;  %v26125_v22 = vld [vmem:[#allocation15_spill] sm:$0xff] }
 0x630   : > { %17759 = vmatprep.mubr.msk.f32.mxu1 %vm3023_vm2, %v22448_v2  ;;  %v7390_v2 = vld [vmem:[#allocation2 + $0x230] sm:$0xff] }
 0x633   : > { %17760 = vmatmul.mubr.msk.f32.gmra.mrb[92].mxu1 %vm3023_vm2, %v22452_v38  ;;  %v26126_v38 = vld [vmem:[#allocation22_spill] sm:$0xff] }
 0x634   : > { %17762 = vmatprep.mubr.msk.f32.mxu1 %vm3023_vm2, %v22456_v8  ;;  %v26127_v8 = vld [vmem:[#allocation11_spill] sm:$0xff] }
 0x637   : > { %17763 = vmatmul.mubr.msk.f32.gmra.mrb[94].mxu1 %vm3023_vm2, %v22460_v0  ;;  %v26128_v0 = vld [vmem:[#allocation12_spill] sm:$0xff] }
 0x638   : > { %17765 = vmatprep.mubr.msk.f32.mxu1 %vm3023_vm2, %v7366_v58  ;;  %v23175_v58 = vld [vmem:[#allocation2 + $0x178] sm:$0xff] }
 0x63b   : > { %17766 = vmatmul.mubr.msk.f32.gmra.mrb[96].mxu1 %vm3023_vm2, %v26123_v48  ;;  %v8089_v48 = vld [vmem:[#allocation2 + $0x198] sm:$0xff] }
 0x63c   : > { %17768 = vmatprep.mubr.msk.f32.mxu1 %vm3023_vm2, %v22470_v40  ;;  %v7406_v40 = vld [vmem:[#allocation2 + $0x2d0] sm:$0xff] }
 0x63f   : > { %17769 = vmatmul.mubr.msk.f32.gmra.mrb[98].mxu1 %vm3023_vm2, %v22474_v33  ;;  %v23060_v33 = vld [vmem:[#allocation2 + $0x2d8] sm:$0xff] }
 0x640   : > { %17771 = vmatprep.mubr.msk.f32.mxu1 %vm3023_vm2, %v22478_v36  ;;  %v23062_v36 = vld [vmem:[#allocation2 + $0x2e0] sm:$0xff] }
 0x643   : > { %17772 = vmatmul.mubr.msk.f32.gmra.mrb[100].mxu1 %vm3023_vm2, %v22482_v27  ;;  %v23068_v27 = vld [vmem:[#allocation2 + $0x2e8] sm:$0xff] }
 0x644   : > { %17774 = vmatprep.mubr.msk.f32.mxu1 %vm3023_vm2, %v22486_v57  ;;  %v23070_v57 = vld [vmem:[#allocation2 + $0x2f0] sm:$0xff] }
 0x647   : > { %17775 = vmatmul.mubr.msk.f32.gmra.mrb[102].mxu1 %vm3023_vm2, %v22490_v11  ;;  %v23076_v11 = vld [vmem:[#allocation2 + $0x2f8] sm:$0xff] }
 0x648   : > { %17777 = vmatprep.mubr.msk.f32.mxu1 %vm3023_vm2, %v7374_v13  ;;  %v23182_v13 = vld [vmem:[#allocation2 + $0x1a0] sm:$0xff] }
 0x64b   : > { %17778 = vmatmul.mubr.msk.f32.gmra.mrb[104].mxu1 %vm3023_vm2, %v26124_v9  ;;  %v23186_v9 = vld [vmem:[#allocation2 + $0x1a8] sm:$0xff] }
 0x64c   : > { %17780 = vmatprep.mubr.msk.f32.mxu1 %vm3023_vm2, %v22500_v56  ;;  %v23078_v56 = vld [vmem:[#allocation2 + $0x300] sm:$0xff] }
 0x64f   : > { %17781 = vmatmul.mubr.msk.f32.gmra.mrb[106].mxu1 %vm3023_vm2, %v22504_v31  ;;  %v23084_v31 = vld [vmem:[#allocation2 + $0x308] sm:$0xff] }
 0x650   : > { %17783 = vmatprep.mubr.msk.f32.mxu1 %vm3023_vm2, %v22679_v15 }
 0x653   : > { %17784 = vmatmul.mubr.msk.f32.gmra.mrb[108].mxu1 %vm3023_vm2, %v22683_v52 }
 0x654   : > { %17786 = vmatprep.mubr.msk.f32.mxu1 %vm3023_vm2, %v22687_v30 }
 0x657   : > { %17787 = vmatmul.mubr.msk.f32.gmra.mrb[110].mxu1 %vm3023_vm2, %v22691_v14 }
 0x658   : > { %17789 = vmatprep.mubr.msk.f32.mxu1 %vm3023_vm2, %v7382_v47  ;;  %v8813_v47 = vld [vmem:[#allocation2 + $0x1f8] sm:$0xff] }
 0x65b   : > { %17790 = vmatmul.mubr.msk.f32.gmra.mrb[112].mxu1 %vm3023_vm2, %v26125_v22 }
 0x65c   : > { %17792 = vmatprep.mubr.msk.f32.mxu1 %vm3023_vm2, %v22703_v4 }
 0x65f   : > { %17793 = vmatmul.mubr.msk.f32.gmra.mrb[114].mxu1 %vm3023_vm2, %v22707_v61 }
 0x660   : > { %17795 = vmatprep.mubr.msk.f32.mxu1 %vm3023_vm2, %v22711_v37 }
 0x663   : > { %17796 = vmatmul.mubr.msk.f32.gmra.mrb[116].mxu1 %vm3023_vm2, %v22715_v26 }
 0x664   : > { %17798 = vmatprep.mubr.msk.f32.mxu1 %vm3023_vm2, %v22719_v44 }
 0x667   : > { %17799 = vmatmul.mubr.msk.f32.gmra.mrb[118].mxu1 %vm3023_vm2, %v22723_v50 }
 0x668   : > { %17801 = vmatprep.mubr.msk.f32.mxu1 %vm3023_vm2, %v7390_v2  ;;  %v8815_v2 = vld [vmem:[#allocation2 + $0x208] sm:$0xff] }
 0x66b   : > { %17802 = vmatmul.mubr.msk.f32.gmra.mrb[120].mxu1 %vm3023_vm2, %v26126_v38 }
 0x66c   : > { %17804 = vmatprep.mubr.msk.f32.mxu1 %vm3023_vm2, %v22735_v20 }
 0x66f   : > { %17805 = vmatmul.mubr.msk.f32.gmra.mrb[122].mxu1 %vm3023_vm2, %v22739_v23 }
 0x670   : > { %17807 = vmatprep.mubr.msk.f32.mxu1 %vm3023_vm2, %v22743_v41 }
 0x673   : > { %17808 = vmatmul.mubr.msk.f32.gmra.mrb[124].mxu1 %vm3023_vm2, %v22747_v63 }
 0x674   : > { %17810 = vmatprep.mubr.msk.f32.mxu1 %vm3023_vm2, %v22751_v42 }
 0x677   : > { %17811 = vmatmul.mubr.msk.f32.gmra.mrb[126].mxu1 %vm3023_vm2, %v22755_v59 }
 0x678   : > { %17813 = vmatprep.mubr.msk.f32.mxu1 %vm3023_vm2, %v26127_v8  ;;  %v8817_v8 = vld [vmem:[#allocation2 + $0x218] sm:$0xff] }
 0x67b   : > { %17814 = vmatmul.mubr.msk.f32.gmra.mrb[128].mxu1 %vm3023_vm2, %v26128_v0  ;;  %v8818_v0 = vld [vmem:[#allocation2 + $0x220] sm:$0xff] }
 0x67c   : > { %17816 = vmatprep.mubr.msk.f32.mxu1 %vm3023_vm2, %v22556_v19  ;;  %v15551_v19 = vld [vmem:[%s26022_s3 + $0x150] sm:$0xff] }
 0x67f   : > { %17817 = vmatmul.mubr.msk.f32.gmra.mrb[130].mxu1 %vm3023_vm2, %v26117_v12  ;;  %v23111_v12 = vld [vmem:[#allocation2 + $0xc8] sm:$0xff] }
 0x680   : > { %17819 = vmatprep.mubr.msk.f32.mxu1 %vm3023_vm2, %v22564_v32  ;;  %v15552_v32 = vld [vmem:[%s26022_s3 + $0x158] sm:$0xff] }
 0x681   : > { %v18164_v45 = vpack.c.bf16 %v15552_v32, %v15551_v19  ;;  %v8821_v19 = vld [vmem:[#allocation2 + $0x248] sm:$0xff]  ;;  %v8822_v32 = vld [vmem:[#allocation2 + $0x250] sm:$0xff] }
 0x683   : > { %17820 = vmatmul.mubr.msk.f32.gmra.mrb[132].mxu1 %vm3023_vm2, %v22568_v29  ;;  %v8065_v29 = vld [vmem:[#allocation2 + $0xa8] sm:$0xff] }
 0x684   : > { %17822 = vmatprep.mubr.msk.f32.mxu1 %vm3023_vm2, %v26118_v35  ;;  %v23116_v35 = vld [vmem:[#allocation2 + $0xd0] sm:$0xff] }
 0x687   : > { %17823 = vmatmul.mubr.msk.f32.gmra.mrb[134].mxu1 %vm3023_vm2, %v26119_v3  ;;  %v23120_v3 = vld [vmem:[#allocation2 + $0xd8] sm:$0xff] }
 0x688   : > { %17825 = vmatprep.mubr.msk.f32.mxu1 %vm3023_vm2, %v7406_v40  ;;  %v8819_v40 = vld [vmem:[#allocation2 + $0x228] sm:$0xff] }
 0x68b   : > { %17826 = vmatmul.mubr.msk.f32.gmra.mrb[136].mxu1 %vm3023_vm2, %v23060_v33 }
 0x68c   : > { %17828 = vmatprep.mubr.msk.f32.mxu1 %vm3023_vm2, %v23062_v36 }
 0x68f   : > { %17829 = vmatmul.mubr.msk.f32.gmra.mrb[138].mxu1 %vm3023_vm2, %v23068_v27 }
 0x690   : > { %17831 = vmatprep.mubr.msk.f32.mxu1 %vm3023_vm2, %v23070_v57 }
 0x693   : > { %17832 = vmatmul.mubr.msk.f32.gmra.mrb[140].mxu1 %vm3023_vm2, %v23076_v11 }
 0x694   : > { %17834 = vmatprep.mubr.msk.f32.mxu1 %vm3023_vm2, %v23078_v56 }
 0x697   : > { %17835 = vmatmul.mubr.msk.f32.gmra.mrb[142].mxu1 %vm3023_vm2, %v23084_v31 }
 0x698   : > { %17847 = vmatprep.mubr.msk.f32.mxu1 %vm3023_vm2, %v8065_v29  ;;  %v9688_v29 = vld [vmem:[#allocation6 + $0x98] sm:$0xff] }
 0x69b   : > { %17848 = vmatmul.mubr.msk.f32.vlgmr.msra.gmra.mrb[80].mxu1 %vm3023_vm2, %v23095_v6 }
 0x69c   : > { %17850 = vmatprep.mubr.msk.f32.mxu1 %vm3023_vm2, %v23099_v49  ;;  %18163 = vmatpush3.bf16.msra.mxu1 %v22958_v43  ;;  %v23159_v43 = vld [vmem:[#allocation2 + $0x158] sm:$0xff] }
 0x69d   : > { %18165 = vmatprep.subr.bf16.mxu1 %v18164_v45 }
 0x69f   : > { %17851 = vmatmul.mubr.msk.f32.gmra.mrb[82].mxu1 %vm3023_vm2, %v23104_v17 }
 0x6a0   : > { %17853 = vmatprep.mubr.msk.f32.mxu1 %vm3023_vm2, %v23111_v12  ;;  %18167 = vmatpush3.bf16.msra.mxu1 %v18164_v45  ;;  %v9690_v45 = vld [vmem:[#allocation6 + $0xa8] sm:$0xff] }
 0x6a1   : > { %17951 = vmatprep.subr.msk.mxu1 %vm3521_vm3, %v15553_v21 }
 0x6a3   : > { %17854 = vmatmul.mubr.msk.f32.gmra.mrb[84].mxu1 %vm3023_vm2, %v23116_v35 }
 0x6a4   : > { %17856 = vmatprep.mubr.msk.f32.mxu1 %vm3023_vm2, %v23120_v3  ;;  %17952 = vmatpush3.msk.msra.mxu1 %vm3521_vm3, %v15553_v21  ;;  %v8823_v21 = vld [vmem:[#allocation2 + $0x258] sm:$0xff] }
 0x6a7   : > { %17857 = vmatmul.mubr.msk.f32.gmra.mrb[86].mxu1 %vm3023_vm2, %v22633_v18  ;;  %v23144_v18 = vld [vmem:[#allocation2 + $0x120] sm:$0xff] }
 0x6a8   : > { %17859 = vmatprep.mubr.msk.f32.mxu1 %vm3023_vm2, %v8073_v62  ;;  %v9694_v62 = vld [vmem:[#allocation6 + $0xc8] sm:$0xff] }
 0x6ab   : > { %17860 = vmatmul.mubr.msk.f32.gmra.mrb[88].mxu1 %vm3023_vm2, %v23128_v55 }
 0x6ac   : > { %17862 = vmatprep.mubr.msk.f32.mxu1 %vm3023_vm2, %v23132_v34 }
 0x6af   : > { %17863 = vmatmul.mubr.msk.f32.gmra.mrb[90].mxu1 %vm3023_vm2, %v23136_v5 }
 0x6b0   : > { %17865 = vmatprep.mubr.msk.f32.mxu1 %vm3023_vm2, %v23140_v16 }
 0x6b3   : > { %17866 = vmatmul.mubr.msk.f32.gmra.mrb[92].mxu1 %vm3023_vm2, %v23144_v18 }
 0x6b4   : > { %17868 = vmatprep.mubr.msk.f32.mxu1 %vm3023_vm2, %v23148_v51 }
 0x6b7   : > { %17869 = vmatmul.mubr.msk.f32.gmra.mrb[94].mxu1 %vm3023_vm2, %v22651_v25  ;;  %v23171_v25 = vld [vmem:[#allocation2 + $0x170] sm:$0xff] }
 0x6b8   : > { %17871 = vmatprep.mubr.msk.f32.mxu1 %vm3023_vm2, %v8081_v28  ;;  %v8827_v28 = vld [vmem:[#allocation2 + $0x278] sm:$0xff] }
 0x6bb   : > { %17872 = vmatmul.mubr.msk.f32.gmra.mrb[96].mxu1 %vm3023_vm2, %v23155_v53 }
 0x6bc   : > { %17874 = vmatprep.mubr.msk.f32.mxu1 %vm3023_vm2, %v23159_v43 }
 0x6bf   : > { %17875 = vmatmul.mubr.msk.f32.gmra.mrb[98].mxu1 %vm3023_vm2, %v23163_v60 }
 0x6c0   : > { %17877 = vmatprep.mubr.msk.f32.mxu1 %vm3023_vm2, %v23167_v24 }
 0x6c3   : > { %17878 = vmatmul.mubr.msk.f32.gmra.mrb[100].mxu1 %vm3023_vm2, %v23171_v25 }
 0x6c4   : > { %17880 = vmatprep.mubr.msk.f32.mxu1 %vm3023_vm2, %v23175_v58 }
 0x6c7   : > { %17881 = vmatmul.mubr.msk.f32.gmra.mrb[102].mxu1 %vm3023_vm2, %v22669_v7  ;;  %v8113_v7 = vld [vmem:[#allocation2 + $0x288] sm:$0xff] }
 0x6c8   : > { %17883 = vmatprep.mubr.msk.f32.mxu1 %vm3023_vm2, %v8089_v48  ;;  %v9700_v48 = vld [vmem:[#allocation6 + $0xf8] sm:$0xff] }
 0x6cb   : > { %17884 = vmatmul.mubr.msk.f32.gmra.mrb[104].mxu1 %vm3023_vm2, %v23182_v13 }
 0x6cc   : > { %17886 = vmatprep.mubr.msk.f32.mxu1 %vm3023_vm2, %v23186_v9 }
 0x6cf   : > { %17887 = vmatmul.mubr.msk.f32.gmra.mrb[106].mxu1 %vm3023_vm2, %v22679_v15  ;;  %v23253_v15 = vld [vmem:[#allocation2 + $0x2b8] sm:$0xff] }
 0x6d0   : > { %17889 = vmatprep.mubr.msk.f32.mxu1 %vm3023_vm2, %v22683_v52  ;;  %v23273_v52 = vld [vmem:[#allocation2 + $0x310] sm:$0xff] }
 0x6d3   : > { %17890 = vmatmul.mubr.msk.f32.gmra.mrb[108].mxu1 %vm3023_vm2, %v22687_v30  ;;  %v8786_v30 = vld [vmem:[#allocation2 + $0xe0] sm:$0xff] }
 0x6d4   : > { %17892 = vmatprep.mubr.msk.f32.mxu1 %vm3023_vm2, %v22691_v14  ;;  %v8787_v14 = vld [vmem:[#allocation2 + $0xe8] sm:$0xff] }
 0x6d7   : > { %17893 = vmatmul.mubr.msk.f32.gmra.mrb[110].mxu1 %vm3023_vm2, %v22695_v39  ;;  %v8794_v39 = vld [vmem:[#allocation2 + $0x130] sm:$0xff] }
 0x6d8   : > { %17895 = vmatprep.mubr.msk.f32.mxu1 %vm3023_vm2, %v26125_v22  ;;  %v8814_v22 = vld [vmem:[#allocation2 + $0x200] sm:$0xff] }
 0x6db   : > { %17896 = vmatmul.mubr.msk.f32.gmra.mrb[112].mxu1 %vm3023_vm2, %v22703_v4  ;;  %v8802_v4 = vld [vmem:[#allocation2 + $0x180] sm:$0xff] }
 0x6dc   : > { %17898 = vmatprep.mubr.msk.f32.mxu1 %vm3023_vm2, %v22707_v61  ;;  %v8803_v61 = vld [vmem:[#allocation2 + $0x188] sm:$0xff] }
 0x6df   : > { %17899 = vmatmul.mubr.msk.f32.gmra.mrb[114].mxu1 %vm3023_vm2, %v22711_v37  ;;  %v8806_v37 = vld [vmem:[#allocation2 + $0x1b0] sm:$0xff] }
 0x6e0   : > { %17901 = vmatprep.mubr.msk.f32.mxu1 %vm3023_vm2, %v22715_v26  ;;  %v8807_v26 = vld [vmem:[#allocation2 + $0x1b8] sm:$0xff] }
 0x6e3   : > { %17902 = vmatmul.mubr.msk.f32.gmra.mrb[116].mxu1 %vm3023_vm2, %v22719_v44  ;;  %v8808_v44 = vld [vmem:[#allocation2 + $0x1c0] sm:$0xff] }
 0x6e4   : > { %17904 = vmatprep.mubr.msk.f32.mxu1 %vm3023_vm2, %v22723_v50  ;;  %v8809_v50 = vld [vmem:[#allocation2 + $0x1c8] sm:$0xff] }
 0x6e7   : > { %17905 = vmatmul.mubr.msk.f32.gmra.mrb[118].mxu1 %vm3023_vm2, %v22727_v10  ;;  %v8810_v10 = vld [vmem:[#allocation2 + $0x1d0] sm:$0xff] }
 0x6e8   : > { %17907 = vmatprep.mubr.msk.f32.mxu1 %vm3023_vm2, %v26126_v38  ;;  %v8816_v38 = vld [vmem:[#allocation2 + $0x210] sm:$0xff] }
 0x6eb   : > { %17908 = vmatmul.mubr.msk.f32.gmra.mrb[120].mxu1 %vm3023_vm2, %v22735_v20  ;;  %v23233_v20 = vld [vmem:[#allocation2 + $0x290] sm:$0xff] }
 0x6ec   : > { %17910 = vmatprep.mubr.msk.f32.mxu1 %vm3023_vm2, %v22739_v23  ;;  %v8795_v23 = vld [vmem:[#allocation2 + $0x138] sm:$0xff] }
 0x6ef   : > { %17911 = vmatmul.mubr.msk.f32.gmra.mrb[122].mxu1 %vm3023_vm2, %v22743_v41  ;;  %v23237_v41 = vld [vmem:[#allocation2 + $0x298] sm:$0xff] }
 0x6f0   : > { %17913 = vmatprep.mubr.msk.f32.mxu1 %vm3023_vm2, %v22747_v63  ;;  %v23241_v63 = vld [vmem:[#allocation2 + $0x2a0] sm:$0xff] }
 0x6f3   : > { %17914 = vmatmul.mubr.msk.f32.gmra.mrb[124].mxu1 %vm3023_vm2, %v22751_v42  ;;  %v8811_v42 = vld [vmem:[#allocation2 + $0x1d8] sm:$0xff] }
 0x6f4   : > { %17916 = vmatprep.mubr.msk.f32.mxu1 %vm3023_vm2, %v22755_v59  ;;  %v23245_v59 = vld [vmem:[#allocation2 + $0x2a8] sm:$0xff] }
 0x6f7   : > { %17917 = vmatmul.mubr.msk.f32.gmra.mrb[126].mxu1 %vm3023_vm2, %v22759_v1  ;;  %v23249_v1 = vld [vmem:[#allocation2 + $0x2b0] sm:$0xff] }
 0x6f8   : > { %17919 = vmatprep.mubr.msk.f32.mxu1 %vm3023_vm2, %v8113_v7  ;;  %v9699_v7 = vld [vmem:[#allocation6 + $0xf0] sm:$0xff] }
 0x6fb   : > { %17920 = vmatmul.mubr.msk.f32.gmra.mrb[128].mxu1 %vm3023_vm2, %v23233_v20 }
 0x6fc   : > { %17922 = vmatprep.mubr.msk.f32.mxu1 %vm3023_vm2, %v23237_v41 }
 0x6ff   : > { %17923 = vmatmul.mubr.msk.f32.gmra.mrb[130].mxu1 %vm3023_vm2, %v23241_v63 }
 0x700   : > { %17925 = vmatprep.mubr.msk.f32.mxu1 %vm3023_vm2, %v23245_v59 }
 0x703   : > { %17926 = vmatmul.mubr.msk.f32.gmra.mrb[132].mxu1 %vm3023_vm2, %v23249_v1 }
 0x704   : > { %17928 = vmatprep.mubr.msk.f32.mxu1 %vm3023_vm2, %v23253_v15 }
 0x707   : > { %17929 = vmatmul.mubr.msk.f32.gmra.mrb[134].mxu1 %vm3023_vm2, %v26120_v46  ;;  %v8812_v46 = vld [vmem:[#allocation2 + $0x1f0] sm:$0xff] }
 0x708   : > { %17931 = vmatprep.mubr.msk.f32.mxu1 %vm3023_vm2, %v23060_v33  ;;  %v8820_v33 = vld [vmem:[#allocation2 + $0x240] sm:$0xff] }
 0x70b   : > { %17932 = vmatmul.mubr.msk.f32.gmra.mrb[136].mxu1 %vm3023_vm2, %v23062_v36 }
 0x70c   : > { %17934 = vmatprep.mubr.msk.f32.mxu1 %vm3023_vm2, %v23068_v27 }
 0x70f   : > { %17935 = vmatmul.mubr.msk.f32.gmra.mrb[138].mxu1 %vm3023_vm2, %v23070_v57 }
 0x710   : > { %17937 = vmatprep.mubr.msk.f32.mxu1 %vm3023_vm2, %v23076_v11 }
 0x713   : > { %17938 = vmatmul.mubr.msk.f32.gmra.mrb[140].mxu1 %vm3023_vm2, %v23078_v56 }
 0x714   : > { %17940 = vmatprep.mubr.msk.f32.mxu1 %vm3023_vm2, %v23084_v31 }
 0x717   : > { %17941 = vmatmul.mubr.msk.f32.gmra.mrb[142].mxu1 %vm3023_vm2, %v23273_v52 }
 0x718   : > { %17953 = vmatprep.mubr.msk.f32.mxu1 %vm3023_vm2, %v23095_v6  ;;  %v18168_v6 = vpack.c.bf16 %v9690_v45, %v9688_v29  ;;  %v10142_v29 = vld [vmem:[#allocation6 + $0x128] sm:$0xff]  ;;  %v10144_v45 = vld [vmem:[#allocation6 + $0x138] sm:$0xff] }
 0x71a   : > { %18169 = vmatprep.subr.bf16.mxu0 %v18168_v6  ;;  %v18200_v6 = vpack.c.bf16 %v10144_v45, %v10142_v29 }
 0x71b   : > { %17954 = vmatmul.mubr.msk.f32.vlgmr.msra.gmra.mrb[80].mxu1 %vm3023_vm2, %v23099_v49  ;;  %v9687_v49 = vld [vmem:[#allocation6 + $0x90] sm:$0xff] }
 0x71c   : > { %17956 = vmatprep.mubr.msk.f32.mxu1 %vm3023_vm2, %v23104_v17  ;;  %v9689_v17 = vld [vmem:[#allocation6 + $0xa0] sm:$0xff] }
 0x71f   : > { %17957 = vmatmul.mubr.msk.f32.gmra.mrb[82].mxu1 %vm3023_vm2, %v23111_v12  ;;  %v18170_v12 = vpack.c.bf16 %v9689_v17, %v9687_v49 }
 0x720   : > { %17959 = vmatprep.mubr.msk.f32.mxu1 %vm3023_vm2, %v23116_v35  ;;  %v8824_v35 = vld [vmem:[#allocation2 + $0x260] sm:$0xff] }
 0x721   : > { %18171 = vmatpush1.bf16.msra.mxu0 %v18170_v12 }
 0x723   : > { %17960 = vmatmul.mubr.msk.f32.gmra.mrb[84].mxu1 %vm3023_vm2, %v23120_v3  ;;  %v9692_v3 = vld [vmem:[#allocation6 + $0xb8] sm:$0xff] }
 0x724   : > { %17962 = vmatprep.mubr.msk.f32.mxu1 %vm3023_vm2, %v8786_v30  ;;  %v9701_v30 = vld [vmem:[#allocation6 + $0x100] sm:$0xff] }
 0x727   : > { %17963 = vmatmul.mubr.msk.f32.gmra.mrb[86].mxu1 %vm3023_vm2, %v8787_v14  ;;  %v23347_v14 = vld [vmem:[#allocation4] sm:$0xff] }
 0x728   : > { %17965 = vmatprep.mubr.msk.f32.mxu1 %vm3023_vm2, %v23128_v55  ;;  %v18172_v55 = vpack.c.bf16 %v9694_v62, %v9692_v3  ;;  %9589 = vst.msk [vmem:[#allocation3 + $0x38] sm:$0xff] %vm9581_vm7, %v23347_v14  ;;  %9582 = vst.msk [vmem:[#allocation3] sm:$0xff] %vm9581_vm7, %v23347_v14 }
 0x729   : > { %9583 = vst.msk [vmem:[#allocation3 + $0x8] sm:$0xff] %vm9581_vm7, %v23347_v14  ;;  %9584 = vst.msk [vmem:[#allocation3 + $0x10] sm:$0xff] %vm9581_vm7, %v23347_v14 }
 0x72a   : > { %18173 = vmatprep.subr.bf16.mxu0 %v18172_v55  ;;  %9585 = vst.msk [vmem:[#allocation3 + $0x18] sm:$0xff] %vm9581_vm7, %v23347_v14  ;;  %9586 = vst.msk [vmem:[#allocation3 + $0x20] sm:$0xff] %vm9581_vm7, %v23347_v14 }
 0x72b   : > { %17966 = vmatmul.mubr.msk.f32.gmra.mrb[88].mxu1 %vm3023_vm2, %v23132_v34  ;;  %v9691_v34 = vld [vmem:[#allocation6 + $0xb0] sm:$0xff]  ;;  %9587 = vst.msk [vmem:[#allocation3 + $0x28] sm:$0xff] %vm9581_vm7, %v23347_v14  ;;  %9588 = vst.msk [vmem:[#allocation3 + $0x30] sm:$0xff] %vm9581_vm7, %v23347_v14 }
 0x72c   : > { %17968 = vmatprep.mubr.msk.f32.mxu1 %vm3023_vm2, %v23136_v5  ;;  %v9693_v5 = vld [vmem:[#allocation6 + $0xc0] sm:$0xff]  ;;  %9590 = vst.msk [vmem:[#allocation3 + $0x40] sm:$0xff] %vm9581_vm7, %v23347_v14  ;;  %9591 = vst.msk [vmem:[#allocation3 + $0x48] sm:$0xff] %vm9581_vm7, %v23347_v14 }
 0x72d   : > { %9592 = vst.msk [vmem:[#allocation3 + $0x50] sm:$0xff] %vm9581_vm7, %v23347_v14  ;;  %9593 = vst.msk [vmem:[#allocation3 + $0x58] sm:$0xff] %vm9581_vm7, %v23347_v14 }
 0x72e   : > { %9594 = vst.msk [vmem:[#allocation3 + $0x60] sm:$0xff] %vm9581_vm7, %v23347_v14  ;;  %9595 = vst.msk [vmem:[#allocation3 + $0x68] sm:$0xff] %vm9581_vm7, %v23347_v14 }
 0x72f   : > { %17969 = vmatmul.mubr.msk.f32.gmra.mrb[90].mxu1 %vm3023_vm2, %v23140_v16  ;;  %v8825_v16 = vld [vmem:[#allocation2 + $0x268] sm:$0xff]  ;;  %9596 = vst.msk [vmem:[#allocation3 + $0x70] sm:$0xff] %vm9581_vm7, %v23347_v14  ;;  %9597 = vst.msk [vmem:[#allocation3 + $0x78] sm:$0xff] %vm9581_vm7, %v23347_v14 }
 0x730   : > { %17971 = vmatprep.mubr.msk.f32.mxu1 %vm3023_vm2, %v23144_v18  ;;  %v18174_v18 = vpack.c.bf16 %v9693_v5, %v9691_v34  ;;  %9598 = vst.msk [vmem:[#allocation3 + $0x80] sm:$0xff] %vm9581_vm7, %v23347_v14  ;;  %9599 = vst.msk [vmem:[#allocation3 + $0x88] sm:$0xff] %vm9581_vm7, %v23347_v14 }
 0x731   : > { %9600 = vst.msk [vmem:[#allocation3 + $0x90] sm:$0xff] %vm9581_vm7, %v23347_v14  ;;  %9601 = vst.msk [vmem:[#allocation3 + $0x98] sm:$0xff] %vm9581_vm7, %v23347_v14 }
 0x732   : > { %18175 = vmatpush1.bf16.msra.mxu0 %v18174_v18  ;;  %9602 = vst.msk [vmem:[#allocation3 + $0xa0] sm:$0xff] %vm9581_vm7, %v23347_v14  ;;  %9603 = vst.msk [vmem:[#allocation3 + $0xa8] sm:$0xff] %vm9581_vm7, %v23347_v14 }
 0x733   : > { %17972 = vmatmul.mubr.msk.f32.gmra.mrb[92].mxu1 %vm3023_vm2, %v23148_v51  ;;  %v8826_v51 = vld [vmem:[#allocation2 + $0x270] sm:$0xff]  ;;  %9604 = vst.msk [vmem:[#allocation3 + $0xb0] sm:$0xff] %vm9581_vm7, %v23347_v14  ;;  %9605 = vst.msk [vmem:[#allocation3 + $0xb8] sm:$0xff] %vm9581_vm7, %v23347_v14 }
 0x734   : > { %17974 = vmatprep.mubr.msk.f32.mxu1 %vm3023_vm2, %v8794_v39  ;;  %9606 = vst.msk [vmem:[#allocation3 + $0xc0] sm:$0xff] %vm9581_vm7, %v23347_v14  ;;  %9607 = vst.msk [vmem:[#allocation3 + $0xc8] sm:$0xff] %vm9581_vm7, %v23347_v14  ;;  %v9704_v39 = vld [vmem:[#allocation6 + $0x118] sm:$0xff] }
 0x735   : > { %9608 = vst.msk [vmem:[#allocation3 + $0xd0] sm:$0xff] %vm9581_vm7, %v23347_v14  ;;  %9609 = vst.msk [vmem:[#allocation3 + $0xd8] sm:$0xff] %vm9581_vm7, %v23347_v14 }
 0x736   : > { %9610 = vst.msk [vmem:[#allocation3 + $0xe0] sm:$0xff] %vm9581_vm7, %v23347_v14  ;;  %9611 = vst.msk [vmem:[#allocation3 + $0xe8] sm:$0xff] %vm9581_vm7, %v23347_v14 }
 0x737   : > { %17975 = vmatmul.mubr.msk.f32.gmra.mrb[94].mxu1 %vm3023_vm2, %v8795_v23  ;;  %9612 = vst.msk [vmem:[#allocation3 + $0xf0] sm:$0xff] %vm9581_vm7, %v23347_v14  ;;  %9613 = vst.msk [vmem:[#allocation3 + $0xf8] sm:$0xff] %vm9581_vm7, %v23347_v14  ;;  %v9703_v23 = vld [vmem:[#allocation6 + $0x110] sm:$0xff] }
 0x738   : > { %17977 = vmatprep.mubr.msk.f32.mxu1 %vm3023_vm2, %v23155_v53  ;;  %v9696_v53 = vld [vmem:[#allocation6 + $0xd8] sm:$0xff]  ;;  %9614 = vst.msk [vmem:[#allocation3 + $0x100] sm:$0xff] %vm9581_vm7, %v23347_v14  ;;  %9615 = vst.msk [vmem:[#allocation3 + $0x108] sm:$0xff] %vm9581_vm7, %v23347_v14 }
 0x739   : > { %9616 = vst.msk [vmem:[#allocation3 + $0x110] sm:$0xff] %vm9581_vm7, %v23347_v14  ;;  %9617 = vst.msk [vmem:[#allocation3 + $0x118] sm:$0xff] %vm9581_vm7, %v23347_v14 }
 0x73b   : > { %17978 = vmatmul.mubr.msk.f32.gmra.mrb[96].mxu1 %vm3023_vm2, %v23159_v43  ;;  %v9698_v43 = vld [vmem:[#allocation6 + $0xe8] sm:$0xff] }
 0x73c   : > { %17980 = vmatprep.mubr.msk.f32.mxu1 %vm3023_vm2, %v23163_v60  ;;  %v18176_v60 = vpack.c.bf16 %v9698_v43, %v9696_v53 }
 0x73e   : > { %18177 = vmatprep.subr.bf16.mxu0 %v18176_v60 }
 0x73f   : > { %17981 = vmatmul.mubr.msk.f32.gmra.mrb[98].mxu1 %vm3023_vm2, %v23167_v24  ;;  %v9695_v24 = vld [vmem:[#allocation6 + $0xd0] sm:$0xff] }
 0x740   : > { %17983 = vmatprep.mubr.msk.f32.mxu1 %vm3023_vm2, %v23171_v25  ;;  %v9697_v25 = vld [vmem:[#allocation6 + $0xe0] sm:$0xff] }
 0x743   : > { %17984 = vmatmul.mubr.msk.f32.gmra.mrb[100].mxu1 %vm3023_vm2, %v23175_v58  ;;  %v18178_v58 = vpack.c.bf16 %v9697_v25, %v9695_v24 }
 0x744   : > { %17986 = vmatprep.mubr.msk.f32.mxu1 %vm3023_vm2, %v8802_v4  ;;  %v23429_v4 = vld [vmem:[#allocation3 + $0x8] sm:$0xff] }
 0x745   : > { %18179 = vmatpush1.bf16.msra.mxu0 %v18178_v58 }
 0x747   : > { %17987 = vmatmul.mubr.msk.f32.gmra.mrb[102].mxu1 %vm3023_vm2, %v8803_v61  ;;  %v9653_v61 = vld [vmem:[#allocation6 + $0x10] sm:$0xff] }
 0x748   : > { %17989 = vmatprep.mubr.msk.f32.mxu1 %vm3023_vm2, %v23182_v13  ;;  %v9702_v13 = vld [vmem:[#allocation6 + $0x108] sm:$0xff] }
 0x74b   : > { %17990 = vmatmul.mubr.msk.f32.gmra.mrb[104].mxu1 %vm3023_vm2, %v23186_v9  ;;  %v18180_v9 = vpack.c.bf16 %v9702_v13, %v9700_v48 }
 0x74c   : > { %17992 = vmatprep.mubr.msk.f32.mxu1 %vm3023_vm2, %v8806_v37 }
 0x74d   : > { %18181 = vmatprep.subr.bf16.mxu0 %v18180_v9 }
 0x74f   : > { %17993 = vmatmul.mubr.msk.f32.gmra.mrb[106].mxu1 %vm3023_vm2, %v8807_v26  ;;  %v9658_v26 = vld [vmem:[#allocation6 + $0x38] sm:$0xff] }
 0x750   : > { %17995 = vmatprep.mubr.msk.f32.mxu1 %vm3023_vm2, %v8808_v44 }
 0x753   : > { %17996 = vmatmul.mubr.msk.f32.gmra.mrb[108].mxu1 %vm3023_vm2, %v8809_v50  ;;  %v9657_v50 = vld [vmem:[#allocation6 + $0x30] sm:$0xff] }
 0x754   : > { %17998 = vmatprep.mubr.msk.f32.mxu1 %vm3023_vm2, %v8810_v10  ;;  %v9662_v10 = vld [vmem:[#allocation6 + $0x58] sm:$0xff] }
 0x757   : > { %17999 = vmatmul.mubr.msk.f32.gmra.mrb[110].mxu1 %vm3023_vm2, %v8811_v42 }
 0x758   : > { %18001 = vmatprep.mubr.msk.f32.mxu1 %vm3023_vm2, %v8812_v46  ;;  %v9659_v46 = vld [vmem:[#allocation6 + $0x40] sm:$0xff] }
 0x75b   : > { %18002 = vmatmul.mubr.msk.f32.gmra.mrb[112].mxu1 %vm3023_vm2, %v8813_v47  ;;  %v9661_v47 = vld [vmem:[#allocation6 + $0x50] sm:$0xff] }
 0x75c   : > { %18004 = vmatprep.mubr.msk.f32.mxu1 %vm3023_vm2, %v8814_v22  ;;  %v18194_v22 = vpack.c.bf16 %v9661_v47, %v9659_v46 }
 0x75f   : > { %18005 = vmatmul.mubr.msk.f32.gmra.mrb[114].mxu1 %vm3023_vm2, %v8815_v2  ;;  %v9664_v2 = vld [vmem:[#allocation6 + $0x68] sm:$0xff] }
 0x760   : > { %18007 = vmatprep.mubr.msk.f32.mxu1 %vm3023_vm2, %v8816_v38  ;;  %v9666_v38 = vld [vmem:[#allocation6 + $0x78] sm:$0xff] }
 0x763   : > { %18008 = vmatmul.mubr.msk.f32.gmra.mrb[116].mxu1 %vm3023_vm2, %v8817_v8  ;;  %v9663_v8 = vld [vmem:[#allocation6 + $0x60] sm:$0xff] }
 0x764   : > { %18010 = vmatprep.mubr.msk.f32.mxu1 %vm3023_vm2, %v8818_v0  ;;  %v18196_v0 = vpack.c.bf16 %v9666_v38, %v9664_v2 }
 0x767   : > { %18011 = vmatmul.mubr.msk.f32.gmra.mrb[118].mxu1 %vm3023_vm2, %v8819_v40  ;;  %v9665_v40 = vld [vmem:[#allocation6 + $0x70] sm:$0xff] }
 0x768   : > { %18013 = vmatprep.mubr.msk.f32.mxu1 %vm3023_vm2, %v8820_v33  ;;  %v18198_v33 = vpack.c.bf16 %v9665_v40, %v9663_v8 }
 0x76b   : > { %18014 = vmatmul.mubr.msk.f32.gmra.mrb[120].mxu1 %vm3023_vm2, %v8821_v19  ;;  %v9668_v19 = vld [vmem:[#allocation6 + $0x88] sm:$0xff] }
 0x76c   : > { %18016 = vmatprep.mubr.msk.f32.mxu1 %vm3023_vm2, %v8822_v32  ;;  %v9667_v32 = vld [vmem:[#allocation6 + $0x80] sm:$0xff] }
 0x76f   : > { %18017 = vmatmul.mubr.msk.f32.gmra.mrb[122].mxu1 %vm3023_vm2, %v8823_v21 }
 0x770   : > { %18019 = vmatprep.mubr.msk.f32.mxu1 %vm3023_vm2, %v8824_v35 }
 0x773   : > { %18020 = vmatmul.mubr.msk.f32.gmra.mrb[124].mxu1 %vm3023_vm2, %v8825_v16 }
 0x774   : > { %18022 = vmatprep.mubr.msk.f32.mxu1 %vm3023_vm2, %v8826_v51  ;;  %v23472_v51 = vld [vmem:[%s26023_s4] ss:$0 sm:$0xff] }
 0x777   : > { %18023 = vmatmul.mubr.msk.f32.gmra.mrb[126].mxu1 %vm3023_vm2, %v8827_v28 }
 0x778   : > { %18025 = vmatprep.mubr.msk.f32.mxu1 %vm3023_vm2, %v23233_v20  ;;  %v18182_v20 = vpack.c.bf16 %v9701_v30, %v9699_v7 }
 0x77a   : > { %18183 = vmatpush1.bf16.msra.mxu0 %v18182_v20 }
 0x77b   : > { %18026 = vmatmul.mubr.msk.f32.gmra.mrb[128].mxu1 %vm3023_vm2, %v23237_v41  ;;  %9769 = vmatprep.subr.mxu0 %v9704_v39  ;;  %v8834_v41 = vld [vmem:[#allocation2 + $0x2c0] sm:$0xff] }
 0x77c   : > { %18028 = vmatprep.mubr.msk.f32.mxu1 %vm3023_vm2, %v23241_v63  ;;  %v23437_v63 = vld [vmem:[#allocation3 + $0x10] sm:$0xff] }
 0x77e   : > { %9770 = vmatpush1.msra.mxu0 %v9703_v23 }
 0x77f   : > { %18029 = vmatmul.mubr.msk.f32.gmra.mrb[130].mxu1 %vm3023_vm2, %v23245_v59  ;;  %15620 = vmatmul.mubr.msk.f32.vlgmr.msra.gmra.mrb[76].mxu0 %vm9581_vm7, %v23429_v4  ;;  %v23446_v59 = vld [vmem:[#allocation3 + $0x18] sm:$0xff] }
 0x780   : > { %18031 = vmatprep.mubr.msk.f32.mxu1 %vm3023_vm2, %v23249_v1  ;;  %9823 = vmatprep.mubr.f32.mxu0 %v23347_v14  ;;  %v23455_v1 = vld [vmem:[#allocation3 + $0x20] sm:$0xff] }
 0x783   : > { %18032 = vmatmul.mubr.msk.f32.gmra.mrb[132].mxu1 %vm3023_vm2, %v23253_v15  ;;  %15621 = vmatmul.mubr.msk.f32.gmra.mrb[78].mxu0 %vm9581_vm7, %v23437_v63 }
 0x784   : > { %18034 = vmatprep.mubr.msk.f32.mxu1 %vm3023_vm2, %v8834_v41  ;;  %9829 = vmatprep.mubr.f32.mxu0 %v23347_v14 }
 0x787   : > { %18035 = vmatmul.mubr.msk.f32.gmra.mrb[134].mxu1 %vm3023_vm2, %v22928_v54  ;;  %15622 = vmatmul.mubr.msk.f32.gmra.mrb[80].mxu0 %vm9581_vm7, %v23446_v59  ;;  %v8843_v54 = vld [vmem:[#allocation2 + $0x318] sm:$0xff] }
 0x788   : > { %18037 = vmatprep.mubr.msk.f32.mxu1 %vm3023_vm2, %v23062_v36  ;;  %9835 = vmatprep.mubr.f32.mxu0 %v23347_v14  ;;  %v9652_v36 = vld [vmem:[#allocation6 + $0x8] sm:$0xff] }
 0x78b   : > { %18038 = vmatmul.mubr.msk.f32.gmra.mrb[136].mxu1 %vm3023_vm2, %v23068_v27  ;;  %15623 = vmatmul.mubr.msk.f32.gmra.mrb[82].mxu0 %vm9581_vm7, %v23455_v1  ;;  %v9654_v27 = vld [vmem:[#allocation6 + $0x18] sm:$0xff] }
 0x78c   : > { %18040 = vmatprep.mubr.msk.f32.mxu1 %vm3023_vm2, %v23070_v57  ;;  %9841 = vmatprep.mubr.f32.mxu0 %v23347_v14  ;;  %v9651_v57 = vld [vmem:[#allocation6] sm:$0xff]  ;;  %v18184_v15 = vpack.c.bf16 %v9654_v27, %v9652_v36 }
 0x78d   : > { %v18186_v37 = vpack.c.bf16 %v9653_v61, %v9651_v57 }
 0x78e   : > { %18185 = vmatprep.subr.bf16.mxu0 %v18184_v15 }
 0x78f   : > { %18041 = vmatmul.mubr.msk.f32.gmra.mrb[138].mxu1 %vm3023_vm2, %v23076_v11  ;;  %18187 = vmatpush1.bf16.msra.mxu0 %v18186_v37  ;;  %v9656_v11 = vld [vmem:[#allocation6 + $0x28] sm:$0xff] }
 0x790   : > { %18043 = vmatprep.mubr.msk.f32.mxu1 %vm3023_vm2, %v23078_v56  ;;  %v9655_v56 = vld [vmem:[#allocation6 + $0x20] sm:$0xff]  ;;  %v18188_v44 = vpack.c.bf16 %v9658_v26, %v9656_v11 }
 0x792   : > { %18189 = vmatprep.subr.bf16.mxu0 %v18188_v44 }
 0x793   : > { %18044 = vmatmul.mubr.msk.f32.gmra.mrb[140].mxu1 %vm3023_vm2, %v23084_v31  ;;  %v18190_v31 = vpack.c.bf16 %v9657_v50, %v9655_v56 }
 0x794   : > { %18046 = vmatprep.mubr.msk.f32.mxu1 %vm3023_vm2, %v23273_v52  ;;  %v9660_v52 = vld [vmem:[#allocation6 + $0x48] sm:$0xff] }
 0x795   : > { %18191 = vmatpush1.bf16.msra.mxu0 %v18190_v31  ;;  %v18192_v42 = vpack.c.bf16 %v9662_v10, %v9660_v52 }
 0x797   : > { %18047 = vmatmul.mubr.msk.f32.gmra.mrb[142].mxu1 %vm3023_vm2, %v8843_v54  ;;  %18193 = vmatprep.subr.bf16.mxu0 %v18192_v42 }
 0x799   : > { %18195 = vmatpush1.bf16.msra.mxu0 %v18194_v22 }
 0x79a   : > { %18197 = vmatprep.subr.bf16.mxu0 %v18196_v0 }
 0x79d   : > { %18199 = vmatpush1.bf16.msra.mxu0 %v18198_v33 }
 0x79e   : > { %9978 = vmatprep.subr.mxu0 %v9668_v19 }
 0x7a1   : > { %9979 = vmatpush1.msra.mxu0 %v9667_v32 }
 0x7a2   : > { %18201 = vmatprep.subr.bf16.mxu0 %v18200_v6 }
 0x7ee   : > { %v17955_v49 = vpop.f32.mrb[80].mxu1 }
 0x7ef   : > { %v9111_v17 = vpop.f32.mrb[81].mxu1 }
 0x7f2   : > { %v17958_v21 = vpop.f32.mrb[82].mxu1 }
 0x7f3   : > { %v9121_v12 = vpop.f32.mrb[83].mxu1 }
 0x7f6   : > { %v17961_v35 = vpop.f32.mrb[84].mxu1 }
 0x7f7   : > { %v9131_v3 = vpop.f32.mrb[85].mxu1 }
 0x7fa   : > { %v17964_v62 = vpop.f32.mrb[86].mxu1 }
 0x7fb   : > { %v9141_v55 = vpop.f32.mrb[87].mxu1 }
 0x7fe   : > { %v17967_v34 = vpop.f32.mrb[88].mxu1 }
 0x7ff   : > { %v9495_v5 = vmax.f32 %v17955_v49, %v17967_v34  ;;  %v9151_v16 = vpop.f32.mrb[89].mxu1 }
 0x800   : > { %v9494_v18 = vmax.f32 %v9111_v17, %v9151_v16 }
 0x802   : > { %v9526_v28 = vmax.f32 %v9494_v18, %v9495_v5  ;;  %v17970_v53 = vpop.f32.mrb[90].mxu1 }
 0x803   : > { %v9497_v43 = vmax.f32 %v17958_v21, %v17970_v53  ;;  %v9161_v60 = vpop.f32.mrb[91].mxu1 }
 0x804   : > { %v9549_v24 = vadd.f32 %v23472_v51, %v9526_v28  ;;  %v9496_v25 = vmax.f32 %v9121_v12, %v9161_v60 }
 0x806   : > { %v9565_v58 = vmax.f32 %v9549_v24, 0.0  ;;  %v9527_v48 = vmax.f32 %v9496_v25, %v9497_v43  ;;  %v17973_v13 = vpop.f32.mrb[92].mxu1 }
 0x807   : > { %v9499_v9 = vmax.f32 %v17961_v35, %v17973_v13  ;;  %v9171_v7 = vpop.f32.mrb[93].mxu1 }
 0x808   : > { %9619 = vst.msk [vmem:[#allocation3 + $0x38] sm:$0xff] %vm9581_vm7, %v9565_v58  ;;  %v9550_v30 = vadd.f32 %v23472_v51, %v9527_v48  ;;  %v9498_v20 = vmax.f32 %v9131_v3, %v9171_v7 }
 0x80a   : > { %v9566_v39 = vmax.f32 %v9550_v30, 0.0  ;;  %v9528_v23 = vmax.f32 %v9498_v20, %v9499_v9  ;;  %v17976_v41 = vpop.f32.mrb[94].mxu1 }
 0x80b   : > { %v9501_v54 = vmax.f32 %v17964_v62, %v17976_v41  ;;  %v9181_v36 = vpop.f32.mrb[95].mxu1 }
 0x80c   : > { %9620 = vst.msk [vmem:[#allocation3 + $0x40] sm:$0xff] %vm9581_vm7, %v9566_v39  ;;  %v9551_v27 = vadd.f32 %v23472_v51, %v9528_v23  ;;  %v9500_v57 = vmax.f32 %v9141_v55, %v9181_v36 }
 0x80e   : > { %v9567_v15 = vmax.f32 %v9551_v27, 0.0  ;;  %v9529_v61 = vmax.f32 %v9500_v57, %v9501_v54  ;;  %v17979_v37 = vpop.f32.mrb[96].mxu1 }
 0x80f   : > { %v9191_v11 = vpop.f32.mrb[97].mxu1  ;;  %v23479_v26 = vld [vmem:[#allocation3 + $0x38] sm:$0xff] }
 0x810   : > { %9621 = vst.msk [vmem:[#allocation3 + $0x48] sm:$0xff] %vm9581_vm7, %v9567_v15  ;;  %v9552_v56 = vadd.f32 %v23472_v51, %v9529_v61  ;;  %15624 = vmatmul.mubr.msk.f32.gmra.mrb[84].mxu0 %vm9581_vm7, %v23479_v26 }
 0x811   : > { %9847 = vmatprep.mubr.f32.mxu0 %v23347_v14 }
 0x812   : > { %v9568_v44 = vmax.f32 %v9552_v56, 0.0  ;;  %v17982_v50 = vpop.f32.mrb[98].mxu1 }
 0x813   : > { %v9201_v31 = vpop.f32.mrb[99].mxu1  ;;  %v23486_v52 = vld [vmem:[#allocation3 + $0x40] sm:$0xff] }
 0x814   : > { %9622 = vst.msk [vmem:[#allocation3 + $0x50] sm:$0xff] %vm9581_vm7, %v9568_v44  ;;  %15625 = vmatmul.mubr.msk.f32.gmra.mrb[86].mxu0 %vm9581_vm7, %v23486_v52 }
 0x815   : > { %9853 = vmatprep.mubr.f32.mxu0 %v23347_v14 }
 0x816   : > { %v17985_v10 = vpop.f32.mrb[100].mxu1 }
 0x817   : > { %v9211_v42 = vpop.f32.mrb[101].mxu1  ;;  %v23492_v46 = vld [vmem:[#allocation3 + $0x48] sm:$0xff] }
 0x818   : > { %15626 = vmatmul.mubr.msk.f32.gmra.mrb[88].mxu0 %vm9581_vm7, %v23492_v46 }
 0x819   : > { %9859 = vmatprep.mubr.f32.mxu0 %v23347_v14 }
 0x81a   : > { %v17988_v47 = vpop.f32.mrb[102].mxu1 }
 0x81b   : > { %v9221_v22 = vpop.f32.mrb[103].mxu1  ;;  %v23497_v2 = vld [vmem:[#allocation3 + $0x50] sm:$0xff] }
 0x81c   : > { %15627 = vmatmul.mubr.msk.f32.gmra.mrb[90].mxu0 %vm9581_vm7, %v23497_v2 }
 0x81d   : > { %9865 = vmatprep.mubr.f32.mxu0 %v23347_v14 }
 0x81e   : > { %v17991_v38 = vpop.f32.mrb[104].mxu1 }
 0x81f   : > { %v9503_v8 = vmax.f32 %v17979_v37, %v17991_v38  ;;  %v9231_v0 = vpop.f32.mrb[105].mxu1 }
 0x820   : > { %v9502_v40 = vmax.f32 %v9191_v11, %v9231_v0 }
 0x822   : > { %v9530_v33 = vmax.f32 %v9502_v40, %v9503_v8  ;;  %v17994_v19 = vpop.f32.mrb[106].mxu1 }
 0x823   : > { %v9505_v32 = vmax.f32 %v17982_v50, %v17994_v19  ;;  %v9241_v29 = vpop.f32.mrb[107].mxu1 }
 0x824   : > { %v9553_v45 = vadd.f32 %v23472_v51, %v9530_v33  ;;  %v9504_v6 = vmax.f32 %v9201_v31, %v9241_v29 }
 0x826   : > { %v9569_v49 = vmax.f32 %v9553_v45, 0.0  ;;  %v9531_v17 = vmax.f32 %v9504_v6, %v9505_v32  ;;  %v17997_v21 = vpop.f32.mrb[108].mxu1 }
 0x827   : > { %v9507_v12 = vmax.f32 %v17985_v10, %v17997_v21  ;;  %v9251_v35 = vpop.f32.mrb[109].mxu1 }
 0x828   : > { %9623 = vst.msk [vmem:[#allocation3 + $0x68] sm:$0xff] %vm9581_vm7, %v9569_v49  ;;  %v9554_v3 = vadd.f32 %v23472_v51, %v9531_v17  ;;  %v9506_v62 = vmax.f32 %v9211_v42, %v9251_v35 }
 0x82a   : > { %v9570_v55 = vmax.f32 %v9554_v3, 0.0  ;;  %v9532_v34 = vmax.f32 %v9506_v62, %v9507_v12  ;;  %v18000_v5 = vpop.f32.mrb[110].mxu1 }
 0x82b   : > { %v9509_v16 = vmax.f32 %v17988_v47, %v18000_v5  ;;  %v9261_v18 = vpop.f32.mrb[111].mxu1 }
 0x82c   : > { %9624 = vst.msk [vmem:[#allocation3 + $0x70] sm:$0xff] %vm9581_vm7, %v9570_v55  ;;  %v9555_v28 = vadd.f32 %v23472_v51, %v9532_v34  ;;  %v9508_v53 = vmax.f32 %v9221_v22, %v9261_v18 }
 0x82e   : > { %v9571_v43 = vmax.f32 %v9555_v28, 0.0  ;;  %v9533_v60 = vmax.f32 %v9508_v53, %v9509_v16  ;;  %v18003_v24 = vpop.f32.mrb[112].mxu1 }
 0x82f   : > { %v9271_v25 = vpop.f32.mrb[113].mxu1  ;;  %v23507_v58 = vld [vmem:[#allocation3 + $0x68] sm:$0xff] }
 0x830   : > { %9625 = vst.msk [vmem:[#allocation3 + $0x78] sm:$0xff] %vm9581_vm7, %v9571_v43  ;;  %v9556_v48 = vadd.f32 %v23472_v51, %v9533_v60  ;;  %15628 = vmatmul.mubr.msk.f32.gmra.mrb[92].mxu0 %vm9581_vm7, %v23507_v58  ;;  %v10141_v43 = vld [vmem:[#allocation6 + $0x120] sm:$0xff]  ;;  %v10143_v60 = vld [vmem:[#allocation6 + $0x130] sm:$0xff] }
 0x831   : > { %9871 = vmatprep.mubr.f32.mxu0 %v23347_v14 }
 0x832   : > { %v9572_v13 = vmax.f32 %v9556_v48, 0.0  ;;  %v18006_v9 = vpop.f32.mrb[114].mxu1  ;;  %v10146_v48 = vld [vmem:[#allocation6 + $0x148] sm:$0xff] }
 0x833   : > { %v9281_v7 = vpop.f32.mrb[115].mxu1  ;;  %v23514_v30 = vld [vmem:[#allocation3 + $0x70] sm:$0xff] }
 0x834   : > { %9626 = vst.msk [vmem:[#allocation3 + $0x80] sm:$0xff] %vm9581_vm7, %v9572_v13  ;;  %15629 = vmatmul.mubr.msk.f32.gmra.mrb[94].mxu0 %vm9581_vm7, %v23514_v30  ;;  %v10148_v13 = vld [vmem:[#allocation6 + $0x158] sm:$0xff] }
 0x835   : > { %9877 = vmatprep.mubr.f32.mxu0 %v23347_v14 }
 0x836   : > { %v18009_v20 = vpop.f32.mrb[116].mxu1 }
 0x837   : > { %v9291_v39 = vpop.f32.mrb[117].mxu1  ;;  %v23520_v23 = vld [vmem:[#allocation3 + $0x78] sm:$0xff] }
 0x838   : > { %15630 = vmatmul.mubr.msk.f32.gmra.mrb[96].mxu0 %vm9581_vm7, %v23520_v23 }
 0x839   : > { %9883 = vmatprep.mubr.f32.mxu0 %v23347_v14 }
 0x83a   : > { %v18012_v41 = vpop.f32.mrb[118].mxu1 }
 0x83b   : > { %v9301_v54 = vpop.f32.mrb[119].mxu1  ;;  %v23525_v36 = vld [vmem:[#allocation3 + $0x80] sm:$0xff] }
 0x83c   : > { %15631 = vmatmul.mubr.msk.f32.gmra.mrb[98].mxu0 %vm9581_vm7, %v23525_v36 }
 0x83d   : > { %9889 = vmatprep.mubr.f32.mxu0 %v23347_v14 }
 0x83e   : > { %v18015_v27 = vpop.f32.mrb[120].mxu1 }
 0x83f   : > { %v9511_v57 = vmax.f32 %v18003_v24, %v18015_v27  ;;  %v9311_v15 = vpop.f32.mrb[121].mxu1 }
 0x840   : > { %v9510_v61 = vmax.f32 %v9271_v25, %v9311_v15  ;;  %v10150_v15 = vld [vmem:[#allocation6 + $0x168] sm:$0xff] }
 0x842   : > { %v9534_v37 = vmax.f32 %v9510_v61, %v9511_v57  ;;  %v18018_v11 = vpop.f32.mrb[122].mxu1  ;;  %v10152_v61 = vld [vmem:[#allocation6 + $0x178] sm:$0xff] }
 0x843   : > { %v9513_v56 = vmax.f32 %v18006_v9, %v18018_v11  ;;  %v9321_v44 = vpop.f32.mrb[123].mxu1  ;;  %v9635_v9 = vld [vmem:[#allocation3] sm:$0xff] }
 0x844   : > { %v9557_v50 = vadd.f32 %v23472_v51, %v9534_v37  ;;  %v9512_v31 = vmax.f32 %v9281_v7, %v9321_v44  ;;  %v18202_v7 = vpack.c.bf16 %v10143_v60, %v10141_v43  ;;  %v10158_v43 = vld [vmem:[#allocation6 + $0x1a8] sm:$0xff]  ;;  %v10419_v60 = vld [vmem:[#allocation6 + $0x1b8] sm:$0xff] }
 0x846   : > { %v9573_v10 = vmax.f32 %v9557_v50, 0.0  ;;  %v9535_v42 = vmax.f32 %v9512_v31, %v9513_v56  ;;  %v18021_v47 = vpop.f32.mrb[124].mxu1  ;;  %v18208_v50 = vpack.c.bf16 %v10152_v61, %v10150_v15  ;;  %v10149_v31 = vld [vmem:[#allocation6 + $0x160] sm:$0xff]  ;;  %v10423_v15 = vld [vmem:[#allocation6 + $0x1d8] sm:$0xff]  ;;  %v10425_v61 = vld [vmem:[#allocation6 + $0x1e8] sm:$0xff] }
 0x847   : > { %v9515_v22 = vmax.f32 %v18009_v20, %v18021_v47  ;;  %v9331_v38 = vpop.f32.mrb[125].mxu1 }
 0x848   : > { %9627 = vst.msk [vmem:[#allocation3 + $0x98] sm:$0xff] %vm9581_vm7, %v9573_v10  ;;  %v9558_v8 = vadd.f32 %v23472_v51, %v9535_v42  ;;  %v9514_v0 = vmax.f32 %v9291_v39, %v9331_v38  ;;  %v18204_v39 = vpack.c.bf16 %v10148_v13, %v10146_v48  ;;  %v10151_v10 = vld [vmem:[#allocation6 + $0x170] sm:$0xff]  ;;  %v10156_v38 = vld [vmem:[#allocation6 + $0x198] sm:$0xff]  ;;  %v10421_v48 = vld [vmem:[#allocation6 + $0x1c8] sm:$0xff] }
 0x84a   : > { %v9574_v40 = vmax.f32 %v9558_v8, 0.0  ;;  %v9536_v33 = vmax.f32 %v9514_v0, %v9515_v22  ;;  %v18024_v19 = vpop.f32.mrb[126].mxu1  ;;  %v10154_v22 = vld [vmem:[#allocation6 + $0x188] sm:$0xff] }
 0x84b   : > { %v9517_v32 = vmax.f32 %v18012_v41, %v18024_v19  ;;  %v9341_v29 = vpop.f32.mrb[127].mxu1  ;;  %v10145_v41 = vld [vmem:[#allocation6 + $0x140] sm:$0xff] }
 0x84c   : > { %9628 = vst.msk [vmem:[#allocation3 + $0xa0] sm:$0xff] %vm9581_vm7, %v9574_v40  ;;  %v9559_v45 = vadd.f32 %v23472_v51, %v9536_v33  ;;  %v9516_v6 = vmax.f32 %v9301_v54, %v9341_v29  ;;  %v10147_v54 = vld [vmem:[#allocation6 + $0x150] sm:$0xff]  ;;  %v18210_v40 = vpack.c.bf16 %v10151_v10, %v10149_v31  ;;  %v18212_v29 = vpack.c.bf16 %v10156_v38, %v10154_v22  ;;  %v10429_v31 = vld [vmem:[#allocation6 + $0x208] sm:$0xff]  ;;  %v10428_v22 = vld [vmem:[#allocation6 + $0x200] sm:$0xff] }
 0x84d   : > { %v18206_v11 = vpack.c.bf16 %v10147_v54, %v10145_v41  ;;  %v23614_v54 = vld [vmem:[#allocation3 + $0x90] sm:$0xff]  ;;  %v10431_v38 = vld [vmem:[#allocation6 + $0x218] sm:$0xff] }
 0x84e   : > { %v9575_v49 = vmax.f32 %v9559_v45, 0.0  ;;  %v9537_v17 = vmax.f32 %v9516_v6, %v9517_v32  ;;  %v18027_v21 = vpop.f32.mrb[128].mxu1  ;;  %v10153_v45 = vld [vmem:[#allocation6 + $0x180] sm:$0xff]  ;;  %v10155_v6 = vld [vmem:[#allocation6 + $0x190] sm:$0xff] }
 0x84f   : > { %v9351_v12 = vpop.f32.mrb[129].mxu1  ;;  %v23535_v35 = vld [vmem:[#allocation3 + $0x98] sm:$0xff] }
 0x850   : > { %9629 = vst.msk [vmem:[#allocation3 + $0xa8] sm:$0xff] %vm9581_vm7, %v9575_v49  ;;  %v9560_v3 = vadd.f32 %v23472_v51, %v9537_v17  ;;  %15632 = vmatmul.mubr.msk.f32.gmra.mrb[100].mxu0 %vm9581_vm7, %v23535_v35 }
 0x851   : > { %9895 = vmatprep.mubr.f32.mxu0 %v23347_v14 }
 0x852   : > { %v9576_v62 = vmax.f32 %v9560_v3, 0.0  ;;  %v18030_v55 = vpop.f32.mrb[130].mxu1 }
 0x853   : > { %v9361_v34 = vpop.f32.mrb[131].mxu1  ;;  %v23542_v5 = vld [vmem:[#allocation3 + $0xa0] sm:$0xff] }
 0x854   : > { %9630 = vst.msk [vmem:[#allocation3 + $0xb0] sm:$0xff] %vm9581_vm7, %v9576_v62  ;;  %15633 = vmatmul.mubr.msk.f32.gmra.mrb[102].mxu0 %vm9581_vm7, %v23542_v5 }
 0x855   : > { %9901 = vmatprep.mubr.f32.mxu0 %v23347_v14 }
 0x856   : > { %v23548_v16 = vpop.f32.mrb[132].mxu1 }
 0x857   : > { %v9371_v18 = vpop.f32.mrb[133].mxu1  ;;  %v23550_v28 = vld [vmem:[#allocation3 + $0xa8] sm:$0xff] }
 0x858   : > { %15634 = vmatmul.mubr.msk.f32.gmra.mrb[104].mxu0 %vm9581_vm7, %v23550_v28 }
 0x859   : > { %9907 = vmatprep.mubr.f32.mxu0 %v23347_v14 }
 0x85a   : > { %v23555_v53 = vpop.f32.mrb[134].mxu1 }
 0x85b   : > { %v23557_v24 = vpop.f32.mrb[135].mxu1  ;;  %v23559_v25 = vld [vmem:[#allocation3 + $0xb0] sm:$0xff] }
 0x85c   : > { %15635 = vmatmul.mubr.msk.f32.gmra.mrb[106].mxu0 %vm9581_vm7, %v23559_v25 }
 0x85d   : > { %10026 = vmatprep.mubr.f32.mxu0 %v23347_v14 }
 0x85e   : > { %v18039_v20 = vpop.f32.mrb[136].mxu1 }
 0x85f   : > { %v9519_v27 = vmax.f32 %v18027_v21, %v18039_v20  ;;  %v9391_v57 = vpop.f32.mrb[137].mxu1  ;;  %v10157_v20 = vld [vmem:[#allocation6 + $0x1a0] sm:$0xff] }
 0x860   : > { %v9518_v37 = vmax.f32 %v9351_v12, %v9391_v57  ;;  %15636 = vmatmul.mubr.msk.f32.vlgmr.msra.gmra.mrb[76].mxu0 %vm9581_vm7, %v9635_v9  ;;  %v23583_v9 = vld [vmem:[#allocation3 + $0x30] sm:$0xff]  ;;  %v10420_v57 = vld [vmem:[#allocation6 + $0x1c0] sm:$0xff] }
 0x861   : > { %18203 = vmatpush1.bf16.msra.mxu0 %v18202_v7  ;;  %10032 = vmatprep.mubr.f32.mxu0 %v23347_v14 }
 0x862   : > { %v9538_v56 = vmax.f32 %v9518_v37, %v9519_v27  ;;  %v18042_v44 = vpop.f32.mrb[138].mxu1  ;;  %18205 = vmatprep.subr.bf16.mxu0 %v18204_v39  ;;  %v18216_v39 = vpack.c.bf16 %v10421_v48, %v10419_v60  ;;  %v10418_v27 = vld [vmem:[#allocation6 + $0x1b0] sm:$0xff]  ;;  %v10703_v60 = vld [vmem:[#allocation6 + $0x288] sm:$0xff]  ;;  %v10705_v48 = vld [vmem:[#allocation6 + $0x298] sm:$0xff] }
 0x863   : > { %v9521_v42 = vmax.f32 %v18030_v55, %v18042_v44  ;;  %v9401_v47 = vpop.f32.mrb[139].mxu1  ;;  %v18218_v37 = vpack.c.bf16 %v10420_v57, %v10418_v27  ;;  %v10424_v44 = vld [vmem:[#allocation6 + $0x1e0] sm:$0xff]  ;;  %v10708_v27 = vld [vmem:[#allocation6 + $0x2b0] sm:$0xff] }
 0x864   : > { %v9561_v8 = vadd.f32 %v23472_v51, %v9538_v56  ;;  %v9520_v0 = vmax.f32 %v9361_v34, %v9401_v47  ;;  %15637 = vmatmul.mubr.msk.f32.gmra.mrb[78].mxu0 %vm9581_vm7, %v23429_v4  ;;  %v18214_v4 = vpack.c.bf16 %v10155_v6, %v10153_v45  ;;  %v10422_v56 = vld [vmem:[#allocation6 + $0x1d0] sm:$0xff]  ;;  %v10695_v45 = vld [vmem:[#allocation6 + $0x248] sm:$0xff] }
 0x865   : > { %10038 = vmatprep.mubr.f32.mxu0 %v23347_v14  ;;  %18207 = vmatpush1.bf16.msra.mxu0 %v18206_v11  ;;  %v18220_v11 = vpack.c.bf16 %v10425_v61, %v10423_v15  ;;  %v18222_v10 = vpack.c.bf16 %v10424_v44, %v10422_v56  ;;  %v10426_v47 = vld [vmem:[#allocation6 + $0x1f0] sm:$0xff]  ;;  %v10711_v15 = vld [vmem:[#allocation6 + $0x2c8] sm:$0xff]  ;;  %v10972_v61 = vld [vmem:[#allocation6 + $0x2d8] sm:$0xff] }
 0x866   : > { %v9577_v33 = vmax.f32 %v9561_v8, 0.0  ;;  %v9539_v19 = vmax.f32 %v9520_v0, %v9521_v42  ;;  %v18045_v32 = vpop.f32.mrb[140].mxu1  ;;  %18209 = vmatprep.subr.bf16.mxu0 %v18208_v50  ;;  %v10427_v50 = vld [vmem:[#allocation6 + $0x1f8] sm:$0xff]  ;;  %v10433_v8 = vld [vmem:[#allocation6 + $0x228] sm:$0xff]  ;;  %v18226_v0 = vpack.c.bf16 %v10428_v22, %v10426_v47  ;;  %v10434_v6 = vld [vmem:[#allocation6 + $0x230] sm:$0xff] }
 0x867   : > { %v9523_v49 = vmax.f32 %v23548_v16, %v18045_v32  ;;  %v9411_v17 = vpop.f32.mrb[141].mxu1  ;;  %v18224_v42 = vpack.c.bf16 %v10429_v31, %v10427_v50  ;;  %v23716_v44 = vld [vmem:[#allocation4] sm:$0xff]  ;;  %v10976_v22 = vld [vmem:[#allocation6 + $0x2f8] sm:$0xff] }
 0x868   : > { %9631 = vst.msk [vmem:[#allocation3 + $0xc8] sm:$0xff] %vm9581_vm7, %v9577_v33  ;;  %v9562_v21 = vadd.f32 %v23472_v51, %v9539_v19  ;;  %v9522_v12 = vmax.f32 %v9371_v18, %v9411_v17  ;;  %15638 = vmatmul.mubr.msk.f32.gmra.mrb[80].mxu0 %vm9581_vm7, %v23437_v63  ;;  %v10432_v33 = vld [vmem:[#allocation6 + $0x220] sm:$0xff]  ;;  %v10127_v19 = vld [vmem:[#allocation3 + $0x28] sm:$0xff] }
 0x869   : > { %10044 = vmatprep.mubr.f32.mxu0 %v23347_v14  ;;  %18211 = vmatpush1.bf16.msra.mxu0 %v18210_v40  ;;  %v18228_v40 = vpack.c.bf16 %v10433_v8, %v10431_v38  ;;  %v23662_v17 = vld [vmem:[#allocation3 + $0x88] sm:$0xff]  ;;  %v23719_v50 = vld [vmem:[#allocation3 + $0xc0] sm:$0xff]  ;;  %12117 = vst.msk [vmem:[#allocation4 + $0x18] sm:$0xff] %vm12114_vm8, %v23716_v44  ;;  %12115 = vst.msk [vmem:[#allocation4 + $0x8] sm:$0xff] %vm12114_vm8, %v23716_v44 }
 0x86a   : > { %v9578_v3 = vmax.f32 %v9562_v21, 0.0  ;;  %v9540_v62 = vmax.f32 %v9522_v12, %v9523_v49  ;;  %v18048_v55 = vpop.f32.mrb[142].mxu1  ;;  %18213 = vmatprep.subr.bf16.mxu0 %v18212_v29  ;;  %v10435_v29 = vld [vmem:[#allocation6 + $0x238] sm:$0xff]  ;;  %v10694_v12 = vld [vmem:[#allocation6 + $0x240] sm:$0xff]  ;;  %v10978_v38 = vld [vmem:[#allocation6 + $0x308] sm:$0xff]  ;;  %12119 = vst.msk [vmem:[#allocation4 + $0x28] sm:$0xff] %vm12114_vm8, %v23716_v44 }
 0x86b   : > { %v9525_v34 = vmax.f32 %v23555_v53, %v18048_v55  ;;  %v9421_v16 = vpop.f32.mrb[143].mxu1  ;;  %v23676_v21 = vld [vmem:[#allocation3 + $0xb8] sm:$0xff]  ;;  %12121 = vst.msk [vmem:[#allocation4 + $0x38] sm:$0xff] %vm12114_vm8, %v23716_v44  ;;  %12123 = vst.msk [vmem:[#allocation4 + $0x48] sm:$0xff] %vm12114_vm8, %v23716_v44 }
 0x86c   : > { %9632 = vst.msk [vmem:[#allocation3 + $0xd0] sm:$0xff] %vm9581_vm7, %v9578_v3  ;;  %v9563_v18 = vadd.f32 %v23472_v51, %v9540_v62  ;;  %v9524_v13 = vmax.f32 %v23557_v24, %v9421_v16  ;;  %15639 = vmatmul.mubr.msk.f32.gmra.mrb[82].mxu0 %vm9581_vm7, %v23446_v59  ;;  %v10699_v3 = vld [vmem:[#allocation6 + $0x268] sm:$0xff]  ;;  %v10701_v62 = vld [vmem:[#allocation6 + $0x278] sm:$0xff]  ;;  %v10698_v16 = vld [vmem:[#allocation6 + $0x260] sm:$0xff] }
 0x86d   : > { %10050 = vmatprep.mubr.f32.mxu0 %v23347_v14  ;;  %18215 = vmatpush1.bf16.msra.mxu0 %v18214_v4  ;;  %v10696_v4 = vld [vmem:[#allocation6 + $0x250] sm:$0xff]  ;;  %12125 = vst.msk [vmem:[#allocation4 + $0x58] sm:$0xff] %vm12114_vm8, %v23716_v44  ;;  %12127 = vst.msk [vmem:[#allocation4 + $0x68] sm:$0xff] %vm12114_vm8, %v23716_v44 }
 0x86e   : > { %v9579_v7 = vmax.f32 %v9563_v18, 0.0  ;;  %v9541_v53 = vmax.f32 %v9524_v13, %v9525_v34  ;;  %10223 = vmatprep.subr.mxu0 %v10158_v43  ;;  %v18234_v55 = vpack.c.bf16 %v10696_v4, %v10694_v12  ;;  %v18236_v34 = vpack.c.bf16 %v10701_v62, %v10699_v3  ;;  %v10700_v43 = vld [vmem:[#allocation6 + $0x270] sm:$0xff]  ;;  %v10985_v3 = vld [vmem:[#allocation6 + $0x340] sm:$0xff]  ;;  %12129 = vst.msk [vmem:[#allocation4 + $0x78] sm:$0xff] %vm12114_vm8, %v23716_v44 }
 0x86f   : > { %v18238_v18 = vpack.c.bf16 %v10700_v43, %v10698_v16  ;;  %v18240_v13 = vpack.c.bf16 %v10705_v48, %v10703_v60  ;;  %v23724_v31 = vld [vmem:[#allocation3 + $0xc8] sm:$0xff]  ;;  %v11251_v16 = vld [vmem:[#allocation6 + $0x378] sm:$0xff]  ;;  %12131 = vst.msk [vmem:[#allocation4 + $0x88] sm:$0xff] %vm12114_vm8, %v23716_v44  ;;  %12133 = vst.msk [vmem:[#allocation4 + $0x98] sm:$0xff] %vm12114_vm8, %v23716_v44 }
 0x870   : > { %9633 = vst.msk [vmem:[#allocation3 + $0xd8] sm:$0xff] %vm9581_vm7, %v9579_v7  ;;  %v9564_v41 = vadd.f32 %v23472_v51, %v9541_v53  ;;  %15640 = vmatmul.mubr.msk.f32.gmra.mrb[84].mxu0 %vm9581_vm7, %v23583_v9  ;;  %v23600_v51 = vld [vmem:[#allocation3 + $0x60] sm:$0xff]  ;;  %v10704_v53 = vld [vmem:[#allocation6 + $0x290] sm:$0xff]  ;;  %v11253_v60 = vld [vmem:[#allocation6 + $0x388] sm:$0xff] }
 0x871   : > { %10056 = vmatprep.mubr.f32.mxu0 %v23347_v14  ;;  %10224 = vmatpush1.msra.mxu0 %v10157_v20  ;;  %v10702_v7 = vld [vmem:[#allocation6 + $0x280] sm:$0xff]  ;;  %v10707_v20 = vld [vmem:[#allocation6 + $0x2a8] sm:$0xff]  ;;  %v11255_v48 = vld [vmem:[#allocation6 + $0x398] sm:$0xff]  ;;  %12135 = vst.msk [vmem:[#allocation4 + $0xa8] sm:$0xff] %vm12114_vm8, %v23716_v44 }
 0x872   : > { %v9580_v24 = vmax.f32 %v9564_v41, 0.0  ;;  %18217 = vmatprep.subr.bf16.mxu0 %v18216_v39  ;;  %v10709_v39 = vld [vmem:[#allocation6 + $0x2b8] sm:$0xff]  ;;  %v18242_v41 = vpack.c.bf16 %v10704_v53, %v10702_v7  ;;  %v11252_v7 = vld [vmem:[#allocation6 + $0x380] sm:$0xff]  ;;  %v11254_v53 = vld [vmem:[#allocation6 + $0x390] sm:$0xff]  ;;  %12137 = vst.msk [vmem:[#allocation4 + $0xb8] sm:$0xff] %vm12114_vm8, %v23716_v44 }
 0x873   : > { %12139 = vst.msk [vmem:[#allocation4 + $0xc8] sm:$0xff] %vm12114_vm8, %v23716_v44  ;;  %12141 = vst.msk [vmem:[#allocation4 + $0xd8] sm:$0xff] %vm12114_vm8, %v23716_v44 }
 0x874   : > { %9634 = vst.msk [vmem:[#allocation3 + $0xe0] sm:$0xff] %vm9581_vm7, %v9580_v24  ;;  %15641 = vmatmul.mubr.msk.f32.gmra.mrb[86].mxu0 %vm9581_vm7, %v23479_v26  ;;  %v18244_v24 = vpack.c.bf16 %v10709_v39, %v10707_v20  ;;  %v10954_v20 = vld [vmem:[#allocation3 + $0x40] sm:$0xff]  ;;  %v11257_v39 = vld [vmem:[#allocation6 + $0x3a8] sm:$0xff] }
 0x875   : > { %10062 = vmatprep.mubr.f32.mxu0 %v23347_v14  ;;  %12143 = vst.msk [vmem:[#allocation4 + $0xe8] sm:$0xff] %vm12114_vm8, %v23716_v44  ;;  %12145 = vst.msk [vmem:[#allocation4 + $0xf8] sm:$0xff] %vm12114_vm8, %v23716_v44 }
 0x877   : > { %v23734_v47 = vld [vmem:[#allocation3 + $0xd8] sm:$0xff] }
 0x878   : > { %15642 = vmatmul.mubr.msk.f32.gmra.mrb[88].mxu0 %vm9581_vm7, %v23486_v52 }
 0x879   : > { %10068 = vmatprep.mubr.f32.mxu0 %v23347_v14 }
 0x87c   : > { %15643 = vmatmul.mubr.msk.f32.gmra.mrb[90].mxu0 %vm9581_vm7, %v23492_v46 }
 0x87d   : > { %10074 = vmatprep.mubr.f32.mxu0 %v23347_v14 }
 0x880   : > { %15644 = vmatmul.mubr.msk.f32.gmra.mrb[92].mxu0 %vm9581_vm7, %v23600_v51 }
 0x881   : > { %10080 = vmatprep.mubr.f32.mxu0 %v23347_v14 }
 0x884   : > { %15645 = vmatmul.mubr.msk.f32.gmra.mrb[94].mxu0 %vm9581_vm7, %v23507_v58 }
 0x885   : > { %10086 = vmatprep.mubr.f32.mxu0 %v23347_v14 }
 0x888   : > { %15646 = vmatmul.mubr.msk.f32.gmra.mrb[96].mxu0 %vm9581_vm7, %v23514_v30 }
 0x889   : > { %10092 = vmatprep.mubr.f32.mxu0 %v23347_v14 }
 0x88c   : > { %15647 = vmatmul.mubr.msk.f32.gmra.mrb[98].mxu0 %vm9581_vm7, %v23520_v23 }
 0x88d   : > { %10098 = vmatprep.mubr.f32.mxu0 %v23347_v14 }
 0x890   : > { %15648 = vmatmul.mubr.msk.f32.gmra.mrb[100].mxu0 %vm9581_vm7, %v23614_v54 }
 0x891   : > { %10104 = vmatprep.mubr.f32.mxu0 %v23347_v14 }
 0x894   : > { %15649 = vmatmul.mubr.msk.f32.gmra.mrb[102].mxu0 %vm9581_vm7, %v23535_v35 }
 0x895   : > { %10110 = vmatprep.mubr.f32.mxu0 %v23347_v14 }
 0x898   : > { %15650 = vmatmul.mubr.msk.f32.gmra.mrb[104].mxu0 %vm9581_vm7, %v23542_v5 }
 0x899   : > { %10116 = vmatprep.mubr.f32.mxu0 %v23347_v14 }
 0x89c   : > { %15651 = vmatmul.mubr.msk.f32.gmra.mrb[106].mxu0 %vm9581_vm7, %v23550_v28 }
 0x89d   : > { %10271 = vmatprep.mubr.f32.mxu0 %v23347_v14 }
 0x8a0   : > { %15652 = vmatmul.mubr.msk.f32.vlgmr.msra.gmra.mrb[76].mxu0 %vm9581_vm7, %v23437_v63  ;;  %v10430_v63 = vld [vmem:[#allocation6 + $0x210] sm:$0xff] }
 0x8a1   : > { %18219 = vmatpush1.bf16.msra.mxu0 %v18218_v37  ;;  %10277 = vmatprep.mubr.f32.mxu0 %v23347_v14  ;;  %v18230_v32 = vpack.c.bf16 %v10432_v33, %v10430_v63  ;;  %v10974_v37 = vld [vmem:[#allocation6 + $0x2e8] sm:$0xff]  ;;  %v10977_v63 = vld [vmem:[#allocation6 + $0x300] sm:$0xff]  ;;  %v10980_v33 = vld [vmem:[#allocation6 + $0x318] sm:$0xff] }
 0x8a2   : > { %18221 = vmatprep.subr.bf16.mxu0 %v18220_v11  ;;  %v10710_v11 = vld [vmem:[#allocation6 + $0x2c0] sm:$0xff]  ;;  %v18248_v56 = vpack.c.bf16 %v10974_v37, %v10972_v61  ;;  %v11261_v61 = vld [vmem:[#allocation6 + $0x3c8] sm:$0xff]  ;;  %v11263_v37 = vld [vmem:[#allocation6 + $0x3d8] sm:$0xff] }
 0x8a4   : > { %15653 = vmatmul.mubr.msk.f32.gmra.mrb[78].mxu0 %vm9581_vm7, %v23446_v59  ;;  %v10697_v59 = vld [vmem:[#allocation6 + $0x258] sm:$0xff] }
 0x8a5   : > { %10283 = vmatprep.mubr.f32.mxu0 %v23347_v14  ;;  %18223 = vmatpush1.bf16.msra.mxu0 %v18222_v10  ;;  %v18232_v49 = vpack.c.bf16 %v10697_v59, %v10695_v45  ;;  %v10971_v10 = vld [vmem:[#allocation6 + $0x2d0] sm:$0xff]  ;;  %v10981_v59 = vld [vmem:[#allocation6 + $0x320] sm:$0xff] }
 0x8a6   : > { %18225 = vmatprep.subr.bf16.mxu0 %v18224_v42  ;;  %v10973_v42 = vld [vmem:[#allocation6 + $0x2e0] sm:$0xff]  ;;  %v10979_v45 = vld [vmem:[#allocation6 + $0x310] sm:$0xff] }
 0x8a7   : > { %v18250_v8 = vpack.c.bf16 %v10973_v42, %v10971_v10  ;;  %v18258_v12 = vpack.c.bf16 %v10981_v59, %v10979_v45  ;;  %v11260_v10 = vld [vmem:[#allocation6 + $0x3c0] sm:$0xff]  ;;  %v11262_v42 = vld [vmem:[#allocation6 + $0x3d0] sm:$0xff]  ;;  %v11534_v59 = vld [vmem:[#allocation6 + $0x438] sm:$0xff] }
 0x8a8   : > { %15654 = vmatmul.mubr.msk.f32.gmra.mrb[80].mxu0 %vm9581_vm7, %v23455_v1  ;;  %v23648_v1 = vld [vmem:[#allocation3 + $0x58] sm:$0xff]  ;;  %v11531_v45 = vld [vmem:[#allocation6 + $0x420] sm:$0xff] }
 0x8a9   : > { %10289 = vmatprep.mubr.f32.mxu0 %v23347_v14  ;;  %18227 = vmatpush1.bf16.msra.mxu0 %v18226_v0  ;;  %v18252_v0 = vpack.c.bf16 %v10978_v38, %v10976_v22  ;;  %v10956_v22 = vld [vmem:[#allocation3 + $0x50] sm:$0xff]  ;;  %v18278_v38 = vpack.c.bf16 %v11262_v42, %v11260_v10  ;;  %v11815_v10 = vld [vmem:[#allocation6 + $0x4e8] sm:$0xff]  ;;  %v11817_v42 = vld [vmem:[#allocation6 + $0x4f8] sm:$0xff] }
 0x8aa   : > { %18229 = vmatprep.subr.bf16.mxu0 %v18228_v40  ;;  %v10975_v40 = vld [vmem:[#allocation6 + $0x2f0] sm:$0xff] }
 0x8ac   : > { %15655 = vmatmul.mubr.msk.f32.gmra.mrb[82].mxu0 %vm9581_vm7, %v10127_v19  ;;  %v10982_v19 = vld [vmem:[#allocation6 + $0x328] sm:$0xff] }
 0x8ad   : > { %10295 = vmatprep.mubr.f32.mxu0 %v23347_v14  ;;  %18231 = vmatpush1.bf16.msra.mxu0 %v18230_v32  ;;  %v18254_v32 = vpack.c.bf16 %v10977_v63, %v10975_v40  ;;  %v11528_v40 = vld [vmem:[#allocation6 + $0x408] sm:$0xff]  ;;  %v11264_v63 = vld [vmem:[#allocation6 + $0x3e0] sm:$0xff] }
 0x8ae   : > { %10500 = vmatprep.subr.mxu0 %v10435_v29  ;;  %v18256_v29 = vpack.c.bf16 %v10982_v19, %v10980_v33 }
 0x8b0   : > { %15656 = vmatmul.mubr.msk.f32.gmra.mrb[84].mxu0 %vm9581_vm7, %v23486_v52 }
 0x8b1   : > { %10301 = vmatprep.mubr.f32.mxu0 %v23347_v14  ;;  %10501 = vmatpush1.msra.mxu0 %v10434_v6  ;;  %v10984_v6 = vld [vmem:[#allocation6 + $0x338] sm:$0xff] }
 0x8b2   : > { %18233 = vmatprep.subr.bf16.mxu0 %v18232_v49  ;;  %v10986_v49 = vld [vmem:[#allocation6 + $0x348] sm:$0xff] }
 0x8b3   : > { %v18260_v4 = vpack.c.bf16 %v10986_v49, %v10984_v6  ;;  %v11536_v6 = vld [vmem:[#allocation6 + $0x448] sm:$0xff] }
 0x8b4   : > { %15657 = vmatmul.mubr.msk.f32.gmra.mrb[86].mxu0 %vm9581_vm7, %v23492_v46 }
 0x8b5   : > { %10307 = vmatprep.mubr.f32.mxu0 %v23347_v14 }
 0x8b8   : > { %15658 = vmatmul.mubr.msk.f32.gmra.mrb[88].mxu0 %vm9581_vm7, %v23497_v2 }
 0x8b9   : > { %10313 = vmatprep.mubr.f32.mxu0 %v23347_v14 }
 0x8bc   : > { %15659 = vmatmul.mubr.msk.f32.gmra.mrb[90].mxu0 %vm9581_vm7, %v23648_v1 }
 0x8bd   : > { %10319 = vmatprep.mubr.f32.mxu0 %v23347_v14 }
 0x8c0   : > { %15660 = vmatmul.mubr.msk.f32.gmra.mrb[92].mxu0 %vm9581_vm7, %v23514_v30 }
 0x8c1   : > { %10325 = vmatprep.mubr.f32.mxu0 %v23347_v14 }
 0x8c4   : > { %15661 = vmatmul.mubr.msk.f32.gmra.mrb[94].mxu0 %vm9581_vm7, %v23520_v23 }
 0x8c5   : > { %10331 = vmatprep.mubr.f32.mxu0 %v23347_v14 }
 0x8c8   : > { %15662 = vmatmul.mubr.msk.f32.gmra.mrb[96].mxu0 %vm9581_vm7, %v23525_v36 }
 0x8c9   : > { %10337 = vmatprep.mubr.f32.mxu0 %v23347_v14 }
 0x8cc   : > { %15663 = vmatmul.mubr.msk.f32.gmra.mrb[98].mxu0 %vm9581_vm7, %v23662_v17 }
 0x8cd   : > { %10343 = vmatprep.mubr.f32.mxu0 %v23347_v14 }
 0x8d0   : > { %15664 = vmatmul.mubr.msk.f32.gmra.mrb[100].mxu0 %vm9581_vm7, %v23542_v5 }
 0x8d1   : > { %10349 = vmatprep.mubr.f32.mxu0 %v23347_v14 }
 0x8d4   : > { %15665 = vmatmul.mubr.msk.f32.gmra.mrb[102].mxu0 %vm9581_vm7, %v23550_v28 }
 0x8d5   : > { %10355 = vmatprep.mubr.f32.mxu0 %v23347_v14 }
 0x8d8   : > { %15666 = vmatmul.mubr.msk.f32.gmra.mrb[104].mxu0 %vm9581_vm7, %v23559_v25 }
 0x8d9   : > { %10361 = vmatprep.mubr.f32.mxu0 %v23347_v14 }
 0x8dc   : > { %15667 = vmatmul.mubr.msk.f32.gmra.mrb[106].mxu0 %vm9581_vm7, %v23676_v21 }
 0x8dd   : > { %10548 = vmatprep.mubr.f32.mxu0 %v23347_v14 }
 0x8e0   : > { %15668 = vmatmul.mubr.msk.f32.vlgmr.msra.gmra.mrb[76].mxu0 %vm9581_vm7, %v23583_v9  ;;  %v10706_v9 = vld [vmem:[#allocation6 + $0x2a0] sm:$0xff] }
 0x8e1   : > { %18235 = vmatpush1.bf16.msra.mxu0 %v18234_v55  ;;  %10554 = vmatprep.mubr.f32.mxu0 %v23347_v14  ;;  %v18246_v57 = vpack.c.bf16 %v10708_v27, %v10706_v9  ;;  %v10988_v55 = vld [vmem:[#allocation6 + $0x358] sm:$0xff]  ;;  %v11256_v27 = vld [vmem:[#allocation6 + $0x3a0] sm:$0xff] }
 0x8e2   : > { %18237 = vmatprep.subr.bf16.mxu0 %v18236_v34  ;;  %v11249_v34 = vld [vmem:[#allocation6 + $0x368] sm:$0xff] }
 0x8e3   : > { %v18264_v43 = vpack.c.bf16 %v11251_v16, %v11249_v34  ;;  %v11537_v16 = vld [vmem:[#allocation6 + $0x450] sm:$0xff] }
 0x8e4   : > { %15669 = vmatmul.mubr.msk.f32.gmra.mrb[78].mxu0 %vm9581_vm7, %v23479_v26 }
 0x8e5   : > { %10560 = vmatprep.mubr.f32.mxu0 %v23347_v14  ;;  %18239 = vmatpush1.bf16.msra.mxu0 %v18238_v18 }
 0x8e6   : > { %18241 = vmatprep.subr.bf16.mxu0 %v18240_v13  ;;  %v18268_v13 = vpack.c.bf16 %v11255_v48, %v11253_v60  ;;  %v11542_v60 = vld [vmem:[#allocation6 + $0x478] sm:$0xff]  ;;  %v11803_v48 = vld [vmem:[#allocation6 + $0x488] sm:$0xff] }
 0x8e8   : > { %15670 = vmatmul.mubr.msk.f32.gmra.mrb[80].mxu0 %vm9581_vm7, %v23486_v52 }
 0x8e9   : > { %10566 = vmatprep.mubr.f32.mxu0 %v23347_v14  ;;  %18243 = vmatpush1.bf16.msra.mxu0 %v18242_v41  ;;  %v11259_v41 = vld [vmem:[#allocation6 + $0x3b8] sm:$0xff] }
 0x8ea   : > { %18245 = vmatprep.subr.bf16.mxu0 %v18244_v24  ;;  %v18270_v24 = vpack.c.bf16 %v11254_v53, %v11252_v7  ;;  %v18272_v9 = vpack.c.bf16 %v11259_v41, %v11257_v39  ;;  %v11804_v53 = vld [vmem:[#allocation6 + $0x490] sm:$0xff]  ;;  %v11809_v39 = vld [vmem:[#allocation6 + $0x4b8] sm:$0xff] }
 0x8ec   : > { %15671 = vmatmul.mubr.msk.f32.gmra.mrb[82].mxu0 %vm9581_vm7, %v23492_v46 }
 0x8ed   : > { %10572 = vmatprep.mubr.f32.mxu0 %v23347_v14  ;;  %18247 = vmatpush1.bf16.msra.mxu0 %v18246_v57  ;;  %v11258_v57 = vld [vmem:[#allocation6 + $0x3b0] sm:$0xff] }
 0x8ee   : > { %10776 = vmatprep.subr.mxu0 %v10711_v15  ;;  %v10955_v15 = vld [vmem:[#allocation3 + $0x48] sm:$0xff] }
 0x8f0   : > { %15672 = vmatmul.mubr.msk.f32.gmra.mrb[84].mxu0 %vm9581_vm7, %v23600_v51 }
 0x8f1   : > { %10578 = vmatprep.mubr.f32.mxu0 %v23347_v14  ;;  %10777 = vmatpush1.msra.mxu0 %v10710_v11  ;;  %v18274_v11 = vpack.c.bf16 %v11258_v57, %v11256_v27  ;;  %v11808_v27 = vld [vmem:[#allocation6 + $0x4b0] sm:$0xff]  ;;  %v11811_v57 = vld [vmem:[#allocation6 + $0x4c8] sm:$0xff] }
 0x8f2   : > { %18249 = vmatprep.subr.bf16.mxu0 %v18248_v56  ;;  %v18276_v56 = vpack.c.bf16 %v11263_v37, %v11261_v61 }
 0x8f4   : > { %15673 = vmatmul.mubr.msk.f32.gmra.mrb[86].mxu0 %vm9581_vm7, %v23507_v58 }
 0x8f5   : > { %10584 = vmatprep.mubr.f32.mxu0 %v23347_v14 }
 0x8f8   : > { %15674 = vmatmul.mubr.msk.f32.gmra.mrb[88].mxu0 %vm9581_vm7, %v23514_v30 }
 0x8f9   : > { %10590 = vmatprep.mubr.f32.mxu0 %v23347_v14 }
 0x8fc   : > { %15675 = vmatmul.mubr.msk.f32.gmra.mrb[90].mxu0 %vm9581_vm7, %v23520_v23 }
 0x8fd   : > { %10596 = vmatprep.mubr.f32.mxu0 %v23347_v14 }
 0x900   : > { %15676 = vmatmul.mubr.msk.f32.gmra.mrb[92].mxu0 %vm9581_vm7, %v23614_v54 }
 0x901   : > { %10602 = vmatprep.mubr.f32.mxu0 %v23347_v14 }
 0x904   : > { %15677 = vmatmul.mubr.msk.f32.gmra.mrb[94].mxu0 %vm9581_vm7, %v23535_v35 }
 0x905   : > { %10608 = vmatprep.mubr.f32.mxu0 %v23347_v14 }
 0x908   : > { %15678 = vmatmul.mubr.msk.f32.gmra.mrb[96].mxu0 %vm9581_vm7, %v23542_v5 }
 0x909   : > { %10614 = vmatprep.mubr.f32.mxu0 %v23347_v14  ;;  %v23729_v14 = vld [vmem:[#allocation3 + $0xd0] sm:$0xff] }
 0x90c   : > { %15679 = vmatmul.mubr.msk.f32.gmra.mrb[98].mxu0 %vm9581_vm7, %v23550_v28 }
 0x90d   : > { %10620 = vmatprep.mubr.f32.mxu0 %v23716_v44 }
 0x910   : > { %15680 = vmatmul.mubr.msk.f32.gmra.mrb[100].mxu0 %vm9581_vm7, %v23719_v50 }
 0x911   : > { %10626 = vmatprep.mubr.f32.mxu0 %v23716_v44 }
 0x914   : > { %15681 = vmatmul.mubr.msk.f32.gmra.mrb[102].mxu0 %vm9581_vm7, %v23724_v31 }
 0x915   : > { %10632 = vmatprep.mubr.f32.mxu0 %v23716_v44 }
 0x918   : > { %15682 = vmatmul.mubr.msk.f32.gmra.mrb[104].mxu0 %vm9581_vm7, %v23729_v14 }
 0x919   : > { %10638 = vmatprep.mubr.f32.mxu0 %v23716_v44 }
 0x91c   : > { %15683 = vmatmul.mubr.msk.f32.gmra.mrb[106].mxu0 %vm9581_vm7, %v23734_v47 }
 0x91d   : > { %10824 = vmatprep.mubr.f32.mxu0 %v23716_v44 }
 0x920   : > { %15684 = vmatmul.mubr.msk.f32.vlgmr.msra.gmra.mrb[76].mxu0 %vm9581_vm7, %v23479_v26  ;;  %v10983_v26 = vld [vmem:[#allocation6 + $0x330] sm:$0xff] }
 0x921   : > { %18251 = vmatpush1.bf16.msra.mxu0 %v18250_v8  ;;  %10830 = vmatprep.mubr.f32.mxu0 %v23716_v44  ;;  %v18262_v62 = vpack.c.bf16 %v10985_v3, %v10983_v26  ;;  %v11265_v8 = vld [vmem:[#allocation6 + $0x3e8] sm:$0xff]  ;;  %v11535_v26 = vld [vmem:[#allocation6 + $0x440] sm:$0xff] }
 0x922   : > { %18253 = vmatprep.subr.bf16.mxu0 %v18252_v0  ;;  %v11526_v0 = vld [vmem:[#allocation6 + $0x3f8] sm:$0xff]  ;;  %v23839_v3 = vld [vmem:[#allocation3 + $0x68] sm:$0xff] }
 0x923   : > { %v18280_v33 = vpack.c.bf16 %v11528_v40, %v11526_v0  ;;  %v11816_v0 = vld [vmem:[#allocation6 + $0x4f0] sm:$0xff] }
 0x924   : > { %15685 = vmatmul.mubr.msk.f32.gmra.mrb[78].mxu0 %vm9581_vm7, %v23486_v52  ;;  %v10987_v52 = vld [vmem:[#allocation6 + $0x350] sm:$0xff] }
 0x925   : > { %10836 = vmatprep.mubr.f32.mxu0 %v23716_v44  ;;  %18255 = vmatpush1.bf16.msra.mxu0 %v18254_v32 }
 0x926   : > { %18257 = vmatprep.subr.bf16.mxu0 %v18256_v29  ;;  %v11529_v29 = vld [vmem:[#allocation6 + $0x410] sm:$0xff] }
 0x927   : > { %v18286_v49 = vpack.c.bf16 %v11531_v45, %v11529_v29  ;;  %v23922_v29 = vld [vmem:[#allocation3 + $0xa8] sm:$0xff]  ;;  %v23927_v45 = vld [vmem:[#allocation3 + $0xb0] sm:$0xff] }
 0x928   : > { %15686 = vmatmul.mubr.msk.f32.gmra.mrb[80].mxu0 %vm9581_vm7, %v23492_v46  ;;  %v11248_v46 = vld [vmem:[#allocation6 + $0x360] sm:$0xff] }
 0x929   : > { %10842 = vmatprep.mubr.f32.mxu0 %v23716_v44  ;;  %18259 = vmatpush1.bf16.msra.mxu0 %v18258_v12  ;;  %v18288_v12 = vpack.c.bf16 %v11536_v6, %v11534_v59  ;;  %v15764_v59 = vld [vmem:[%s26026_s7 + $0x1b0] sm:$0xff]  ;;  %v15767_v6 = vld [vmem:[%s26026_s7 + $0x1c8] sm:$0xff] }
 0x92a   : > { %18261 = vmatprep.subr.bf16.mxu0 %v18260_v4  ;;  %v11533_v4 = vld [vmem:[#allocation6 + $0x430] sm:$0xff] }
 0x92b   : > { %v18290_v34 = vpack.c.bf16 %v11535_v26, %v11533_v4  ;;  %v18314_v4 = vpack.c.bf16 %v15767_v6, %v15764_v59  ;;  %v15784_v59 = vld [vmem:[%s26026_s7 + $0x250] sm:$0xff]  ;;  %v15787_v6 = vld [vmem:[%s26026_s7 + $0x268] sm:$0xff] }
 0x92c   : > { %15687 = vmatmul.mubr.msk.f32.gmra.mrb[82].mxu0 %vm9581_vm7, %v23497_v2  ;;  %v11250_v2 = vld [vmem:[#allocation6 + $0x370] sm:$0xff] }
 0x92d   : > { %10848 = vmatprep.mubr.f32.mxu0 %v23716_v44  ;;  %18263 = vmatpush1.bf16.msra.mxu0 %v18262_v62  ;;  %v18266_v18 = vpack.c.bf16 %v11250_v2, %v11248_v46  ;;  %v11538_v62 = vld [vmem:[#allocation6 + $0x458] sm:$0xff] }
 0x92e   : > { %11053 = vmatprep.subr.mxu0 %v10988_v55  ;;  %v11540_v55 = vld [vmem:[#allocation6 + $0x468] sm:$0xff]  ;;  %v23849_v2 = vld [vmem:[#allocation3 + $0x78] sm:$0xff] }
 0x930   : > { %15688 = vmatmul.mubr.msk.f32.gmra.mrb[84].mxu0 %vm9581_vm7, %v23507_v58  ;;  %v23784_v58 = vld [vmem:[#allocation3 + $0xe0] sm:$0xff] }
 0x931   : > { %10854 = vmatprep.mubr.f32.mxu0 %v23716_v44  ;;  %11054 = vmatpush1.msra.mxu0 %v10987_v52  ;;  %v11539_v52 = vld [vmem:[#allocation6 + $0x460] sm:$0xff] }
 0x932   : > { %18265 = vmatprep.subr.bf16.mxu0 %v18264_v43  ;;  %v23844_v43 = vld [vmem:[#allocation3 + $0x70] sm:$0xff]  ;;  %v18294_v46 = vpack.c.bf16 %v11539_v52, %v11537_v16 }
 0x933   : > { %v15776_v52 = vld [vmem:[%s26026_s7 + $0x210] sm:$0xff] }
 0x934   : > { %15689 = vmatmul.mubr.msk.f32.gmra.mrb[86].mxu0 %vm9581_vm7, %v23514_v30 }
 0x935   : > { %10860 = vmatprep.mubr.f32.mxu0 %v23716_v44 }
 0x938   : > { %15690 = vmatmul.mubr.msk.f32.gmra.mrb[88].mxu0 %vm9581_vm7, %v23520_v23 }
 0x939   : > { %10866 = vmatprep.mubr.f32.mxu0 %v23716_v44 }
 0x93c   : > { %15691 = vmatmul.mubr.msk.f32.gmra.mrb[90].mxu0 %vm9581_vm7, %v23525_v36 }
 0x93d   : > { %10872 = vmatprep.mubr.f32.mxu0 %v23716_v44 }
 0x940   : > { %15692 = vmatmul.mubr.msk.f32.gmra.mrb[92].mxu0 %vm9581_vm7, %v23535_v35 }
 0x941   : > { %10878 = vmatprep.mubr.f32.mxu0 %v23716_v44 }
 0x944   : > { %15693 = vmatmul.mubr.msk.f32.gmra.mrb[94].mxu0 %vm9581_vm7, %v23542_v5 }
 0x945   : > { %10884 = vmatprep.mubr.f32.mxu0 %v23716_v44 }
 0x948   : > { %15694 = vmatmul.mubr.msk.f32.gmra.mrb[96].mxu0 %vm9581_vm7, %v23550_v28 }
 0x949   : > { %10890 = vmatprep.mubr.f32.mxu0 %v23716_v44 }
 0x94c   : > { %15695 = vmatmul.mubr.msk.f32.gmra.mrb[98].mxu0 %vm9581_vm7, %v23559_v25 }
 0x94d   : > { %10896 = vmatprep.mubr.f32.mxu0 %v23716_v44 }
 0x950   : > { %15696 = vmatmul.mubr.msk.f32.gmra.mrb[100].mxu0 %vm9581_vm7, %v23724_v31 }
 0x951   : > { %10902 = vmatprep.mubr.f32.mxu0 %v23716_v44 }
 0x954   : > { %15697 = vmatmul.mubr.msk.f32.gmra.mrb[102].mxu0 %vm9581_vm7, %v23729_v14 }
 0x955   : > { %10908 = vmatprep.mubr.f32.mxu0 %v23716_v44 }
 0x958   : > { %15698 = vmatmul.mubr.msk.f32.gmra.mrb[104].mxu0 %vm9581_vm7, %v23734_v47 }
 0x959   : > { %10914 = vmatprep.mubr.f32.mxu0 %v23716_v44 }
 0x95c   : > { %15699 = vmatmul.mubr.msk.f32.gmra.mrb[106].mxu0 %vm9581_vm7, %v23784_v58 }
 0x95d   : > { %11101 = vmatprep.mubr.f32.mxu0 %v23716_v44 }
 0x960   : > { %15700 = vmatmul.mubr.msk.f32.vlgmr.msra.gmra.mrb[76].mxu0 %vm9581_vm7, %v10954_v20  ;;  %v11807_v20 = vld [vmem:[#allocation6 + $0x4a8] sm:$0xff] }
 0x961   : > { %18267 = vmatpush1.bf16.msra.mxu0 %v18266_v18  ;;  %11107 = vmatprep.mubr.f32.mxu0 %v23716_v44  ;;  %v11805_v18 = vld [vmem:[#allocation6 + $0x498] sm:$0xff] }
 0x962   : > { %18269 = vmatprep.subr.bf16.mxu0 %v18268_v13  ;;  %v11541_v13 = vld [vmem:[#allocation6 + $0x470] sm:$0xff]  ;;  %v18296_v7 = vpack.c.bf16 %v11805_v18, %v11803_v48 }
 0x964   : > { %15701 = vmatmul.mubr.msk.f32.gmra.mrb[78].mxu0 %vm9581_vm7, %v10955_v15  ;;  %v11813_v15 = vld [vmem:[#allocation6 + $0x4d8] sm:$0xff] }
 0x965   : > { %11113 = vmatprep.mubr.f32.mxu0 %v23716_v44  ;;  %18271 = vmatpush1.bf16.msra.mxu0 %v18270_v24  ;;  %v18300_v24 = vpack.c.bf16 %v11809_v39, %v11807_v20  ;;  %v18304_v37 = vpack.c.bf16 %v11813_v15, %v11811_v57  ;;  %v15791_v20 = vld [vmem:[%s26026_s7 + $0x288] sm:$0xff]  ;;  %v15797_v57 = vld [vmem:[%s26026_s7 + $0x2b8] sm:$0xff] }
 0x966   : > { %18273 = vmatprep.subr.bf16.mxu0 %v18272_v9  ;;  %v11806_v9 = vld [vmem:[#allocation6 + $0x4a0] sm:$0xff]  ;;  %v15795_v39 = vld [vmem:[%s26026_s7 + $0x2a8] sm:$0xff]  ;;  %v15801_v15 = vld [vmem:[%s26026_s7 + $0x2d8] sm:$0xff] }
 0x967   : > { %v18302_v61 = vpack.c.bf16 %v11808_v27, %v11806_v9  ;;  %v15794_v27 = vld [vmem:[%s26026_s7 + $0x2a0] sm:$0xff] }
 0x968   : > { %15702 = vmatmul.mubr.msk.f32.gmra.mrb[80].mxu0 %vm9581_vm7, %v10956_v22 }
 0x969   : > { %11119 = vmatprep.mubr.f32.mxu0 %v23716_v44  ;;  %18275 = vmatpush1.bf16.msra.mxu0 %v18274_v11  ;;  %v11810_v11 = vld [vmem:[#allocation6 + $0x4c0] sm:$0xff] }
 0x96a   : > { %18277 = vmatprep.subr.bf16.mxu0 %v18276_v56  ;;  %v11812_v56 = vld [vmem:[#allocation6 + $0x4d0] sm:$0xff] }
 0x96b   : > { %v18306_v22 = vpack.c.bf16 %v11812_v56, %v11810_v11  ;;  %v15800_v11 = vld [vmem:[%s26026_s7 + $0x2d0] sm:$0xff]  ;;  %v15803_v56 = vld [vmem:[%s26026_s7 + $0x2e8] sm:$0xff] }
 0x96c   : > { %15703 = vmatmul.mubr.msk.f32.gmra.mrb[82].mxu0 %vm9581_vm7, %v23648_v1  ;;  %v11532_v1 = vld [vmem:[#allocation6 + $0x428] sm:$0xff] }
 0x96d   : > { %11125 = vmatprep.mubr.f32.mxu0 %v23716_v44  ;;  %18279 = vmatpush1.bf16.msra.mxu0 %v18278_v38  ;;  %v18308_v38 = vpack.c.bf16 %v11817_v42, %v11815_v10  ;;  %v18338_v10 = vpack.c.bf16 %v15803_v56, %v15800_v11  ;;  %v15813_v42 = vld [vmem:[%s26026_s7 + $0x338] sm:$0xff]  ;;  %v12085_v11 = vld [vmem:[%s26025_s6] sm:$0x3] }
 0x96e   : > { %11330 = vmatprep.subr.mxu0 %v11265_v8  ;;  %v11814_v8 = vld [vmem:[#allocation6 + $0x4e0] sm:$0xff] }
 0x96f   : > { %v18310_v40 = vpack.c.bf16 %v11816_v0, %v11814_v8  ;;  %v15812_v8 = vld [vmem:[%s26026_s7 + $0x330] sm:$0xff]  ;;  %v15815_v0 = vld [vmem:[%s26026_s7 + $0x348] sm:$0xff] }
 0x970   : > { %15704 = vmatmul.mubr.msk.f32.gmra.mrb[84].mxu0 %vm9581_vm7, %v23514_v30  ;;  %v23831_v30 = vld [vmem:[#allocation3 + $0xe8] sm:$0xff] }
 0x971   : > { %11131 = vmatprep.mubr.f32.mxu0 %v23716_v44  ;;  %11331 = vmatpush1.msra.mxu0 %v11264_v63  ;;  %v23904_v63 = vld [vmem:[#allocation3 + $0x80] sm:$0xff] }
 0x972   : > { %18281 = vmatprep.subr.bf16.mxu0 %v18280_v33  ;;  %v11819_v33 = vld [vmem:[#allocation6 + $0x508] sm:$0xff] }
 0x974   : > { %15705 = vmatmul.mubr.msk.f32.gmra.mrb[86].mxu0 %vm9581_vm7, %v23520_v23  ;;  %v11525_v23 = vld [vmem:[#allocation6 + $0x3f0] sm:$0xff] }
 0x975   : > { %11137 = vmatprep.mubr.f32.mxu0 %v23716_v44 }
 0x978   : > { %15706 = vmatmul.mubr.msk.f32.gmra.mrb[88].mxu0 %vm9581_vm7, %v23525_v36  ;;  %v11527_v36 = vld [vmem:[#allocation6 + $0x400] sm:$0xff] }
 0x979   : > { %11143 = vmatprep.mubr.f32.mxu0 %v23716_v44  ;;  %v18282_v19 = vpack.c.bf16 %v11527_v36, %v11525_v23  ;;  %v15765_v23 = vld [vmem:[%s26026_s7 + $0x1b8] sm:$0xff]  ;;  %v15768_v36 = vld [vmem:[%s26026_s7 + $0x1d0] sm:$0xff] }
 0x97c   : > { %15707 = vmatmul.mubr.msk.f32.gmra.mrb[90].mxu0 %vm9581_vm7, %v23662_v17 }
 0x97d   : > { %11149 = vmatprep.mubr.f32.mxu0 %v23716_v44 }
 0x980   : > { %15708 = vmatmul.mubr.msk.f32.gmra.mrb[92].mxu0 %vm9581_vm7, %v23542_v5 }
 0x981   : > { %11155 = vmatprep.mubr.f32.mxu0 %v23716_v44 }
 0x984   : > { %15709 = vmatmul.mubr.msk.f32.gmra.mrb[94].mxu0 %vm9581_vm7, %v23550_v28 }
 0x985   : > { %11161 = vmatprep.mubr.f32.mxu0 %v23716_v44 }
 0x988   : > { %15710 = vmatmul.mubr.msk.f32.gmra.mrb[96].mxu0 %vm9581_vm7, %v23559_v25  ;;  %v11530_v25 = vld [vmem:[#allocation6 + $0x418] sm:$0xff] }
 0x989   : > { %11167 = vmatprep.mubr.f32.mxu0 %v23716_v44  ;;  %v18284_v32 = vpack.c.bf16 %v11532_v1, %v11530_v25  ;;  %v11818_v25 = vld [vmem:[#allocation6 + $0x500] sm:$0xff]  ;;  %v18312_v1 = vpack.c.bf16 %v15768_v36, %v15765_v23  ;;  %v24144_v23 = vld [vmem:[#allocation4 + $0x18] sm:$0xff]  ;;  %v20073_v36 = vmov 0.0|0.0  }
 0x98c   : > { %15711 = vmatmul.mubr.msk.f32.gmra.mrb[98].mxu0 %vm9581_vm7, %v23676_v21 }
 0x98d   : > { %11173 = vmatprep.mubr.f32.mxu0 %v23716_v44 }
 0x990   : > { %15712 = vmatmul.mubr.msk.f32.gmra.mrb[100].mxu0 %vm9581_vm7, %v23729_v14 }
 0x991   : > { %11179 = vmatprep.mubr.f32.mxu0 %v23716_v44 }
 0x994   : > { %15713 = vmatmul.mubr.msk.f32.gmra.mrb[102].mxu0 %vm9581_vm7, %v23734_v47 }
 0x995   : > { %11185 = vmatprep.mubr.f32.mxu0 %v23716_v44 }
 0x998   : > { %15714 = vmatmul.mubr.msk.f32.gmra.mrb[104].mxu0 %vm9581_vm7, %v23784_v58 }
 0x999   : > { %11191 = vmatprep.mubr.f32.mxu0 %v23716_v44 }
 0x99c   : > { %15715 = vmatmul.mubr.msk.f32.gmra.mrb[106].mxu0 %vm9581_vm7, %v23831_v30 }
 0x99d   : > { %11378 = vmatprep.mubr.f32.mxu0 %v23716_v44 }
 0x9a0   : > { %15716 = vmatmul.mubr.msk.f32.vlgmr.msra.gmra.mrb[76].mxu0 %vm9581_vm7, %v23600_v51  ;;  %v18292_v51 = vpack.c.bf16 %v11540_v55, %v11538_v62  ;;  %v15773_v62 = vld [vmem:[%s26026_s7 + $0x1f8] sm:$0xff] }
 0x9a1   : > { %18283 = vmatpush1.bf16.msra.mxu0 %v18282_v19  ;;  %11384 = vmatprep.mubr.f32.mxu0 %v23716_v44  ;;  %v11512_v19 = vld [vmem:[#allocation3 + $0x98] sm:$0xff] }
 0x9a2   : > { %18285 = vmatprep.subr.bf16.mxu0 %v18284_v32  ;;  %v23917_v32 = vld [vmem:[#allocation3 + $0xa0] sm:$0xff]  ;;  %v15777_v55 = vld [vmem:[%s26026_s7 + $0x218] sm:$0xff] }
 0x9a4   : > { %15717 = vmatmul.mubr.msk.f32.gmra.mrb[78].mxu0 %vm9581_vm7, %v23839_v3 }
 0x9a5   : > { %11390 = vmatprep.mubr.f32.mxu0 %v23716_v44  ;;  %18287 = vmatpush1.bf16.msra.mxu0 %v18286_v49  ;;  %v15771_v49 = vld [vmem:[%s26026_s7 + $0x1e8] sm:$0xff] }
 0x9a6   : > { %18289 = vmatprep.subr.bf16.mxu0 %v18288_v12  ;;  %v15774_v12 = vld [vmem:[%s26026_s7 + $0x200] sm:$0xff] }
 0x9a7   : > { %v18316_v26 = vpack.c.bf16 %v15774_v12, %v15771_v49  ;;  %v18358_v49 = vpack.c.bf16 %v15787_v6, %v15784_v59  ;;  %v15790_v12 = vld [vmem:[%s26026_s7 + $0x280] sm:$0xff] }
 0x9a8   : > { %15718 = vmatmul.mubr.msk.f32.gmra.mrb[80].mxu0 %vm9581_vm7, %v23844_v43 }
 0x9a9   : > { %11396 = vmatprep.mubr.f32.mxu0 %v23716_v44  ;;  %18291 = vmatpush1.bf16.msra.mxu0 %v18290_v34  ;;  %v15780_v34 = vld [vmem:[%s26026_s7 + $0x230] sm:$0xff] }
 0x9aa   : > { %18293 = vmatprep.subr.bf16.mxu0 %v18292_v51  ;;  %v18320_v16 = vpack.c.bf16 %v15780_v34, %v15777_v55  ;;  %v24184_v55 = vld [vmem:[#allocation4 + $0x28] sm:$0xff] }
 0x9ac   : > { %15719 = vmatmul.mubr.msk.f32.gmra.mrb[82].mxu0 %vm9581_vm7, %v23849_v2 }
 0x9ad   : > { %11402 = vmatprep.mubr.f32.mxu0 %v23716_v44  ;;  %18295 = vmatpush1.bf16.msra.mxu0 %v18294_v46  ;;  %v15779_v46 = vld [vmem:[%s26026_s7 + $0x228] sm:$0xff] }
 0x9ae   : > { %11607 = vmatprep.subr.mxu0 %v11542_v60  ;;  %v15783_v60 = vld [vmem:[%s26026_s7 + $0x248] sm:$0xff]  ;;  %v18322_v48 = vpack.c.bf16 %v15779_v46, %v15776_v52  ;;  %v15808_v46 = vld [vmem:[%s26026_s7 + $0x310] sm:$0xff] }
 0x9b0   : > { %15720 = vmatmul.mubr.msk.f32.gmra.mrb[84].mxu0 %vm9581_vm7, %v23614_v54  ;;  %v23890_v54 = vld [vmem:[#allocation3 + $0x108] sm:$0xff] }
 0x9b1   : > { %11408 = vmatprep.mubr.f32.mxu0 %v23716_v44  ;;  %11608 = vmatpush1.msra.mxu0 %v11541_v13  ;;  %v15782_v13 = vld [vmem:[%s26026_s7 + $0x240] sm:$0xff] }
 0x9b2   : > { %18297 = vmatprep.subr.bf16.mxu0 %v18296_v7  ;;  %v15785_v7 = vld [vmem:[%s26026_s7 + $0x258] sm:$0xff] }
 0x9b4   : > { %15721 = vmatmul.mubr.msk.f32.gmra.mrb[86].mxu0 %vm9581_vm7, %v23535_v35  ;;  %v11243_v35 = vld [vmem:[#allocation3 + $0xf0] sm:$0xff] }
 0x9b5   : > { %11414 = vmatprep.mubr.f32.mxu0 %v23716_v44 }
 0x9b8   : > { %15722 = vmatmul.mubr.msk.f32.gmra.mrb[88].mxu0 %vm9581_vm7, %v23542_v5  ;;  %v23880_v5 = vld [vmem:[#allocation3 + $0xf8] sm:$0xff] }
 0x9b9   : > { %11420 = vmatprep.mubr.f32.mxu0 %v23716_v44 }
 0x9bc   : > { %15723 = vmatmul.mubr.msk.f32.gmra.mrb[90].mxu0 %vm9581_vm7, %v23550_v28  ;;  %v23885_v28 = vld [vmem:[#allocation3 + $0x100] sm:$0xff] }
 0x9bd   : > { %11426 = vmatprep.mubr.f32.mxu0 %v23716_v44 }
 0x9c0   : > { %15724 = vmatmul.mubr.msk.f32.gmra.mrb[92].mxu0 %vm9581_vm7, %v23719_v50  ;;  %v11802_v50 = vld [vmem:[#allocation6 + $0x480] sm:$0xff] }
 0x9c1   : > { %11432 = vmatprep.mubr.f32.mxu0 %v23716_v44  ;;  %v18298_v41 = vpack.c.bf16 %v11804_v53, %v11802_v50  ;;  %v15788_v53 = vld [vmem:[%s26026_s7 + $0x270] sm:$0xff] }
 0x9c4   : > { %15725 = vmatmul.mubr.msk.f32.gmra.mrb[94].mxu0 %vm9581_vm7, %v23724_v31 }
 0x9c5   : > { %11438 = vmatprep.mubr.f32.mxu0 %v23716_v44 }
 0x9c8   : > { %15726 = vmatmul.mubr.msk.f32.gmra.mrb[96].mxu0 %vm9581_vm7, %v23729_v14 }
 0x9c9   : > { %11444 = vmatprep.mubr.f32.mxu0 %v23716_v44 }
 0x9cc   : > { %15727 = vmatmul.mubr.msk.f32.gmra.mrb[98].mxu0 %vm9581_vm7, %v23734_v47 }
 0x9cd   : > { %11450 = vmatprep.mubr.f32.mxu0 %v23716_v44 }
 0x9d0   : > { %15728 = vmatmul.mubr.msk.f32.gmra.mrb[100].mxu0 %vm9581_vm7, %v11243_v35  ;;  %v15789_v35 = vld [vmem:[%s26026_s7 + $0x278] sm:$0xff] }
 0x9d1   : > { %11456 = vmatprep.mubr.f32.mxu0 %v23716_v44 }
 0x9d4   : > { %15729 = vmatmul.mubr.msk.f32.gmra.mrb[102].mxu0 %vm9581_vm7, %v23880_v5 }
 0x9d5   : > { %11462 = vmatprep.mubr.f32.mxu0 %v23716_v44 }
 0x9d8   : > { %15730 = vmatmul.mubr.msk.f32.gmra.mrb[104].mxu0 %vm9581_vm7, %v23885_v28 }
 0x9d9   : > { %11468 = vmatprep.mubr.f32.mxu0 %v23716_v44 }
 0x9dc   : > { %15731 = vmatmul.mubr.msk.f32.gmra.mrb[106].mxu0 %vm9581_vm7, %v23890_v54 }
 0x9dd   : > { %11655 = vmatprep.mubr.f32.mxu0 %v23716_v44 }
 0x9e0   : > { %15732 = vmatmul.mubr.msk.f32.vlgmr.msra.gmra.mrb[76].mxu0 %vm9581_vm7, %v23839_v3  ;;  %v15770_v3 = vld [vmem:[%s26026_s7 + $0x1e0] sm:$0xff] }
 0x9e1   : > { %18299 = vmatpush1.bf16.msra.mxu0 %v18298_v41  ;;  %11661 = vmatprep.mubr.f32.mxu0 %v23716_v44  ;;  %v18318_v51 = vpack.c.bf16 %v15773_v62, %v15770_v3  ;;  %v15798_v41 = vld [vmem:[%s26026_s7 + $0x2c0] sm:$0xff]  ;;  %v15796_v3 = vld [vmem:[%s26026_s7 + $0x2b0] sm:$0xff]  ;;  %v15799_v62 = vld [vmem:[%s26026_s7 + $0x2c8] sm:$0xff] }
 0x9e2   : > { %18301 = vmatprep.subr.bf16.mxu0 %v18300_v24  ;;  %v18330_v24 = vpack.c.bf16 %v15791_v20, %v15788_v53  ;;  %v18332_v9 = vpack.c.bf16 %v15798_v41, %v15795_v39  ;;  %v18364_v34 = vpack.c.bf16 %v15799_v62, %v15796_v3  ;;  %v12087_v41 = vlaneseq }
 0x9e4   : > { %15733 = vmatmul.mubr.msk.f32.gmra.mrb[78].mxu0 %vm9581_vm7, %v23844_v43 }
 0x9e5   : > { %11667 = vmatprep.mubr.f32.mxu0 %v23716_v44  ;;  %18303 = vmatpush1.bf16.msra.mxu0 %v18302_v61  ;;  %v18334_v61 = vpack.c.bf16 %v15797_v57, %v15794_v27  ;;  %v24217_v27 = vshrl.u32 %v12087_v41, 7  ;;  %v24288_v41 = vld [vmem:[#allocation4] sm:$0xff] }
 0x9e6   : > { %18305 = vmatprep.subr.bf16.mxu0 %v18304_v37 }
 0x9e7   : > { %v12093_v56 = vsub.s32 1, %v24217_v27 }
 0x9e8   : > { %15734 = vmatmul.mubr.msk.f32.gmra.mrb[80].mxu0 %vm9581_vm7, %v23849_v2 }
 0x9e9   : > { %11673 = vmatprep.mubr.f32.mxu0 %v23716_v44  ;;  %18307 = vmatpush1.bf16.msra.mxu0 %v18306_v22  ;;  %v15816_v22 = vld [vmem:[%s26026_s7 + $0x350] sm:$0xff] }
 0x9ea   : > { %18309 = vmatprep.subr.bf16.mxu0 %v18308_v38  ;;  %v18344_v38 = vpack.c.bf16 %v15816_v22, %v15813_v42 }
 0x9ec   : > { %15735 = vmatmul.mubr.msk.f32.gmra.mrb[82].mxu0 %vm9581_vm7, %v23904_v63 }
 0x9ed   : > { %11679 = vmatprep.mubr.f32.mxu0 %v23716_v44  ;;  %18311 = vmatpush1.bf16.msra.mxu0 %v18310_v40  ;;  %v18346_v40 = vpack.c.bf16 %v15815_v0, %v15812_v8 }
 0x9ee   : > { %11884 = vmatprep.subr.mxu0 %v11819_v33  ;;  %v15769_v33 = vld [vmem:[%s26026_s7 + $0x1d8] sm:$0xff] }
 0x9f0   : > { %15736 = vmatmul.mubr.msk.f32.gmra.mrb[84].mxu0 %vm9581_vm7, %v11512_v19  ;;  %v15775_v19 = vld [vmem:[%s26026_s7 + $0x208] sm:$0xff] }
 0x9f1   : > { %11685 = vmatprep.mubr.f32.mxu0 %v23716_v44  ;;  %11885 = vmatpush1.msra.mxu0 %v11818_v25 }
 0x9f2   : > { %18313 = vmatprep.subr.bf16.mxu0 %v18312_v1  ;;  %v15772_v1 = vld [vmem:[%s26026_s7 + $0x1f0] sm:$0xff] }
 0x9f4   : > { %15737 = vmatmul.mubr.msk.f32.gmra.mrb[86].mxu0 %vm9581_vm7, %v23917_v32 }
 0x9f5   : > { %11691 = vmatprep.mubr.f32.mxu0 %v23716_v44 }
 0x9f8   : > { %15738 = vmatmul.mubr.msk.f32.gmra.mrb[88].mxu0 %vm9581_vm7, %v23922_v29 }
 0x9f9   : > { %11697 = vmatprep.mubr.f32.mxu0 %v23716_v44 }
 0x9fc   : > { %15739 = vmatmul.mubr.msk.f32.gmra.mrb[90].mxu0 %vm9581_vm7, %v23927_v45 }
 0x9fd   : > { %11703 = vmatprep.mubr.f32.mxu0 %v23716_v44 }
 0xa00   : > { %15740 = vmatmul.mubr.msk.f32.gmra.mrb[92].mxu0 %vm9581_vm7, %v23724_v31  ;;  %v23953_v31 = vld [vmem:[#allocation3 + $0x110] sm:$0xff] }
 0xa01   : > { %11709 = vmatprep.mubr.f32.mxu0 %v23716_v44 }
 0xa04   : > { %15741 = vmatmul.mubr.msk.f32.gmra.mrb[94].mxu0 %vm9581_vm7, %v23729_v14 }
 0xa05   : > { %11715 = vmatprep.mubr.f32.mxu0 %v23716_v44 }
 0xa08   : > { %15742 = vmatmul.mubr.msk.f32.gmra.mrb[96].mxu0 %vm9581_vm7, %v23734_v47 }
 0xa09   : > { %11721 = vmatprep.mubr.f32.mxu0 %v23716_v44 }
 0xa0c   : > { %15743 = vmatmul.mubr.msk.f32.gmra.mrb[98].mxu0 %vm9581_vm7, %v23784_v58 }
 0xa0d   : > { %11727 = vmatprep.mubr.f32.mxu0 %v23716_v44 }
 0xa10   : > { %15744 = vmatmul.mubr.msk.f32.gmra.mrb[100].mxu0 %vm9581_vm7, %v23880_v5  ;;  %v18326_v5 = vpack.c.bf16 %v15785_v7, %v15782_v13  ;;  %v12164_v13 = vld [vmem:[%s26026_s7 + $0x8] sm:$0xff]  ;;  %v12167_v7 = vld [vmem:[%s26026_s7 + $0x20] sm:$0xff] }
 0xa11   : > { %11733 = vmatprep.mubr.f32.mxu0 %v23716_v44 }
 0xa14   : > { %15745 = vmatmul.mubr.msk.f32.gmra.mrb[102].mxu0 %vm9581_vm7, %v23885_v28 }
 0xa15   : > { %11739 = vmatprep.mubr.f32.mxu0 %v23716_v44 }
 0xa18   : > { %15746 = vmatmul.mubr.msk.f32.gmra.mrb[104].mxu0 %vm9581_vm7, %v23890_v54 }
 0xa19   : > { %11745 = vmatprep.mubr.f32.mxu0 %v23716_v44 }
 0xa1c   : > { %15747 = vmatmul.mubr.msk.f32.gmra.mrb[106].mxu0 %vm9581_vm7, %v23953_v31 }
 0xa1d   : > { %11932 = vmatprep.mubr.f32.mxu0 %v23716_v44 }
 0xa20   : > { %15748 = vmatmul.mubr.msk.f32.vlgmr.msra.gmra.mrb[76].mxu0 %vm9581_vm7, %v23844_v43  ;;  %v15786_v43 = vld [vmem:[%s26026_s7 + $0x260] sm:$0xff] }
 0xa21   : > { %11938 = vmatprep.mubr.f32.mxu0 %v23716_v44  ;;  %18315 = vmatpush1.bf16.msra.mxu0 %v18314_v4  ;;  %v18324_v18 = vpack.c.bf16 %v15786_v43, %v15783_v60  ;;  %v15793_v4 = vld [vmem:[%s26026_s7 + $0x298] sm:$0xff]  ;;  %v15814_v43 = vld [vmem:[%s26026_s7 + $0x340] sm:$0xff] }
 0xa22   : > { %18317 = vmatprep.subr.bf16.mxu0 %v18316_v26  ;;  %v18361_v26 = vpack.c.bf16 %v15793_v4, %v15790_v12 }
 0xa24   : > { %15749 = vmatmul.mubr.msk.f32.gmra.mrb[78].mxu0 %vm9581_vm7, %v23849_v2  ;;  %v15792_v2 = vld [vmem:[%s26026_s7 + $0x290] sm:$0xff] }
 0xa25   : > { %11944 = vmatprep.mubr.f32.mxu0 %v23716_v44  ;;  %18319 = vmatpush1.bf16.msra.mxu0 %v18318_v51  ;;  %v18328_v50 = vpack.c.bf16 %v15792_v2, %v15789_v35  ;;  %v15802_v51 = vld [vmem:[%s26026_s7 + $0x2e0] sm:$0xff]  ;;  %v18375_v35 = vpack.c.bf16 %v12167_v7, %v12164_v13 }
 0xa26   : > { %18321 = vmatprep.subr.bf16.mxu0 %v18320_v16  ;;  %v15805_v16 = vld [vmem:[%s26026_s7 + $0x2f8] sm:$0xff] }
 0xa27   : > { %v18367_v52 = vpack.c.bf16 %v15805_v16, %v15802_v51 }
 0xa28   : > { %15750 = vmatmul.mubr.msk.f32.gmra.mrb[80].mxu0 %vm9581_vm7, %v23904_v63  ;;  %v15766_v63 = vld [vmem:[%s26026_s7 + $0x1c0] sm:$0xff] }
 0xa29   : > { %11950 = vmatprep.mubr.f32.mxu0 %v23716_v44  ;;  %18323 = vmatpush1.bf16.msra.mxu0 %v18322_v48  ;;  %v18349_v25 = vpack.c.bf16 %v15769_v33, %v15766_v63  ;;  %v15817_v48 = vld [vmem:[%s26026_s7 + $0x358] sm:$0xff] }
 0xa2a   : > { %18325 = vmatprep.subr.bf16.mxu0 %v18324_v18  ;;  %v18373_v18 = vpack.c.bf16 %v15817_v48, %v15814_v43  ;;  %v12170_v43 = vld [vmem:[%s26026_s7 + $0x38] sm:$0xff]  ;;  %v12173_v48 = vld [vmem:[%s26026_s7 + $0x50] sm:$0xff] }
 0xa2c   : > { %15751 = vmatmul.mubr.msk.f32.gmra.mrb[82].mxu0 %vm9581_vm7, %v23662_v17  ;;  %v15804_v17 = vld [vmem:[%s26026_s7 + $0x2f0] sm:$0xff] }
 0xa2d   : > { %11956 = vmatprep.mubr.f32.mxu0 %v23716_v44  ;;  %18327 = vmatpush1.bf16.msra.mxu0 %v18326_v5  ;;  %v18336_v37 = vpack.c.bf16 %v15804_v17, %v15801_v15 }
 0xa2e   : > { %18329 = vmatprep.subr.bf16.mxu0 %v18328_v50 }
 0xa30   : > { %15752 = vmatmul.mubr.msk.f32.gmra.mrb[84].mxu0 %vm9581_vm7, %v23917_v32  ;;  %v18352_v32 = vpack.c.bf16 %v15775_v19, %v15772_v1 }
 0xa31   : > { %11962 = vmatprep.mubr.f32.mxu0 %v23716_v44  ;;  %18331 = vmatpush1.bf16.msra.mxu0 %v18330_v24 }
 0xa32   : > { %18333 = vmatprep.subr.bf16.mxu0 %v18332_v9 }
 0xa34   : > { %15753 = vmatmul.mubr.msk.f32.gmra.mrb[86].mxu0 %vm9581_vm7, %v23922_v29  ;;  %v15778_v29 = vld [vmem:[%s26026_s7 + $0x220] sm:$0xff] }
 0xa35   : > { %11968 = vmatprep.mubr.f32.mxu0 %v23716_v44  ;;  %18335 = vmatpush1.bf16.msra.mxu0 %v18334_v61  ;;  %v12089_v61 = vsub.s32 0, %v24217_v27 }
 0xa36   : > { %18337 = vmatprep.subr.bf16.mxu0 %v18336_v37 }
 0xa38   : > { %15754 = vmatmul.mubr.msk.f32.gmra.mrb[88].mxu0 %vm9581_vm7, %v23927_v45  ;;  %v15781_v45 = vld [vmem:[%s26026_s7 + $0x238] sm:$0xff] }
 0xa39   : > { %11974 = vmatprep.mubr.f32.mxu0 %v23716_v44  ;;  %18339 = vmatpush1.bf16.msra.mxu0 %v18338_v10 }
 0xa3c   : > { %15755 = vmatmul.mubr.msk.f32.gmra.mrb[90].mxu0 %vm9581_vm7, %v23676_v21  ;;  %v11800_v21 = vld [vmem:[#allocation3 + $0x118] sm:$0xff] }
 0xa3d   : > { %11980 = vmatprep.mubr.f32.mxu0 %v23716_v44 }
 0xa40   : > { %15756 = vmatmul.mubr.msk.f32.gmra.mrb[92].mxu0 %vm9581_vm7, %v23729_v14  ;;  %v15807_v14 = vld [vmem:[%s26026_s7 + $0x308] sm:$0xff] }
 0xa41   : > { %11986 = vmatprep.mubr.f32.mxu0 %v23716_v44 }
 0xa44   : > { %15757 = vmatmul.mubr.msk.f32.gmra.mrb[94].mxu0 %vm9581_vm7, %v23734_v47  ;;  %v15810_v47 = vld [vmem:[%s26026_s7 + $0x320] sm:$0xff] }
 0xa45   : > { %11992 = vmatprep.mubr.f32.mxu0 %v23716_v44 }
 0xa48   : > { %15758 = vmatmul.mubr.msk.f32.gmra.mrb[96].mxu0 %vm9581_vm7, %v23784_v58  ;;  %v15806_v58 = vld [vmem:[%s26026_s7 + $0x300] sm:$0xff] }
 0xa49   : > { %11998 = vmatprep.mubr.f32.mxu0 %v23716_v44 }
 0xa4c   : > { %15759 = vmatmul.mubr.msk.f32.gmra.mrb[98].mxu0 %vm9581_vm7, %v23831_v30  ;;  %v18340_v30 = vpack.c.bf16 %v15810_v47, %v15807_v14  ;;  %v24226_v14 = vrot.slane %v12085_v11, %v12089_v61 }
 0xa4d   : > { %12004 = vmatprep.mubr.f32.mxu0 %v23716_v44 }
 0xa4e   : > { %18341 = vmatprep.subr.bf16.mxu0 %v18340_v30  ;;  %v24230_v30 = vrot.slane %v12085_v11, %v12093_v56  ;;  %v12178_v11 = vld [vmem:[%s26026_s7 + $0x78] sm:$0xff] }
 0xa50   : > { %15760 = vmatmul.mubr.msk.f32.gmra.mrb[100].mxu0 %vm9581_vm7, %v23885_v28  ;;  %v15809_v28 = vld [vmem:[%s26026_s7 + $0x318] sm:$0xff] }
 0xa51   : > { %12010 = vmatprep.mubr.f32.mxu0 %v23716_v44 }
 0xa54   : > { %15761 = vmatmul.mubr.msk.f32.gmra.mrb[102].mxu0 %vm9581_vm7, %v23890_v54  ;;  %v18342_v54 = vpack.c.bf16 %v15809_v28, %v15806_v58 }
 0xa55   : > { %12016 = vmatprep.mubr.f32.mxu0 %v23716_v44 }
 0xa56   : > { %18343 = vmatpush1.bf16.msra.mxu0 %v18342_v54 }
 0xa57   : > { %18345 = vmatprep.subr.bf16.mxu0 %v18344_v38 }
 0xa58   : > { %15762 = vmatmul.mubr.msk.f32.gmra.mrb[104].mxu0 %vm9581_vm7, %v23953_v31  ;;  %v18355_v31 = vpack.c.bf16 %v15781_v45, %v15778_v29 }
 0xa59   : > { %12022 = vmatprep.mubr.f32.mxu0 %v23716_v44 }
 0xa5a   : > { %18347 = vmatpush1.bf16.msra.mxu0 %v18346_v40 }
 0xa5b   : > { %18348 = vmatprep.subr.bf16.mxu0 %v20073_v36 }
 0xa5c   : > { %15763 = vmatmul.mubr.msk.f32.gmra.mrb[106].mxu0 %vm9581_vm7, %v11800_v21 }
 0xa5d   : > { %15818 = vmatprep.mubr.msk.f32.mxu0 %vm12114_vm8, %v24144_v23 }
 0xa60   : > { %12358 = vmatmul.mubr.f32.vlgmr.msra.gmra.mrb[108].mxu0 %v23716_v44 }
 0xa61   : > { %18350 = vmatpush1.bf16.msra.mxu0 %v18349_v25  ;;  %15819 = vmatprep.mubr.msk.f32.mxu0 %vm12114_vm8, %v24184_v55 }
 0xa62   : > { %18351 = vmatprep.subr.bf16.mxu0 %v20073_v36 }
 0xa64   : > { %12364 = vmatmul.mubr.f32.gmra.mrb[110].mxu0 %v23716_v44  ;;  %v15811_v44 = vld [vmem:[%s26026_s7 + $0x328] sm:$0xff] }
 0xa65   : > { %18353 = vmatpush1.bf16.msra.mxu0 %v18352_v32  ;;  %v18370_v60 = vpack.c.bf16 %v15811_v44, %v15808_v46  ;;  %v12163_v44 = vld [vmem:[%s26026_s7] sm:$0xff] }
 0xa66   : > { %18354 = vmatprep.subr.bf16.mxu0 %v20073_v36 }
 0xa69   : > { %18356 = vmatpush1.bf16.msra.mxu0 %v18355_v31 }
 0xa6a   : > { %18357 = vmatprep.subr.bf16.mxu0 %v20073_v36 }
 0xa6d   : > { %18359 = vmatpush1.bf16.msra.mxu0 %v18358_v49 }
 0xa6e   : > { %18360 = vmatprep.subr.bf16.mxu0 %v20073_v36 }
 0xa71   : > { %18362 = vmatpush1.bf16.msra.mxu0 %v18361_v26 }
 0xa72   : > { %18363 = vmatprep.subr.bf16.mxu0 %v20073_v36 }
 0xa75   : > { %18365 = vmatpush1.bf16.msra.mxu0 %v18364_v34 }
 0xa76   : > { %18366 = vmatprep.subr.bf16.mxu0 %v20073_v36 }
 0xa79   : > { %18368 = vmatpush1.bf16.msra.mxu0 %v18367_v52 }
 0xa7a   : > { %18369 = vmatprep.subr.bf16.mxu0 %v20073_v36 }
 0xa7d   : > { %18371 = vmatpush1.bf16.msra.mxu0 %v18370_v60  ;;  %v12166_v60 = vld [vmem:[%s26026_s7 + $0x18] sm:$0xff] }
 0xa7e   : > { %18372 = vmatprep.subr.bf16.mxu0 %v20073_v36  ;;  %v18377_v13 = vpack.c.bf16 %v12166_v60, %v12163_v44  ;;  %v12197_v44 = vld [vmem:[%s26026_s7 + $0x110] sm:$0xff] }
 0xa81   : > { %18374 = vmatpush1.bf16.msra.mxu0 %v18373_v18 }
 0xa82   : > { %18376 = vmatprep.subr.bf16.mxu0 %v18375_v35 }
 0xaf3   : > { %v11934_v2 = vpop.f32.mrb[76].mxu0 }
 0xaf4   : > { %v11936_v5 = vpop.f32.mrb[77].mxu0 }
 0xaf7   : > { %v11940_v50 = vpop.f32.mrb[78].mxu0 }
 0xaf8   : > { %v11942_v53 = vpop.f32.mrb[79].mxu0 }
 0xafb   : > { %v11946_v20 = vpop.f32.mrb[80].mxu0 }
 0xafc   : > { %v11948_v39 = vpop.f32.mrb[81].mxu0 }
 0xaff   : > { %v11952_v24 = vpop.f32.mrb[82].mxu0 }
 0xb00   : > { %v11954_v9 = vpop.f32.mrb[83].mxu0 }
 0xb03   : > { %v11958_v57 = vpop.f32.mrb[84].mxu0 }
 0xb04   : > { %v12061_v15 = vmax.f32 %v11934_v2, %v11958_v57  ;;  %v11960_v17 = vpop.f32.mrb[85].mxu0  ;;  %v18379_v2 = vpack.c.bf16 %v12173_v48, %v12170_v43 }
 0xb05   : > { %v12062_v37 = vmax.f32 %v11936_v5, %v11960_v17  ;;  %v12169_v5 = vld [vmem:[%s26026_s7 + $0x30] sm:$0xff] }
 0xb07   : > { %v11964_v10 = vpop.f32.mrb[86].mxu0 }
 0xb08   : > { %v12063_v21 = vmax.f32 %v11940_v50, %v11964_v10  ;;  %v11966_v47 = vpop.f32.mrb[87].mxu0  ;;  %v12172_v50 = vld [vmem:[%s26026_s7 + $0x48] sm:$0xff] }
 0xb09   : > { %v12064_v58 = vmax.f32 %v11942_v53, %v11966_v47  ;;  %v12185_v47 = vld [vmem:[%s26026_s7 + $0xb0] sm:$0xff] }
 0xb0a   : > { %v12077_v28 = vmax.f32 %v12061_v15, %v12063_v21  ;;  %v12182_v21 = vld [vmem:[%s26026_s7 + $0x98] sm:$0xff] }
 0xb0b   : > { %v12078_v54 = vmax.f32 %v12062_v37, %v12064_v58  ;;  %v11970_v42 = vpop.f32.mrb[88].mxu0  ;;  %v12175_v37 = vld [vmem:[%s26026_s7 + $0x60] sm:$0xff] }
 0xb0c   : > { %v12097_v22 = vadd.f32 %v24226_v14, %v12077_v28  ;;  %v12065_v38 = vmax.f32 %v11946_v20, %v11970_v42  ;;  %v11972_v8 = vpop.f32.mrb[89].mxu0  ;;  %v12176_v20 = vld [vmem:[%s26026_s7 + $0x68] sm:$0xff]  ;;  %v18385_v42 = vpack.c.bf16 %v12178_v11, %v12175_v37 }
 0xb0d   : > { %v12098_v0 = vadd.f32 %v24230_v30, %v12078_v54  ;;  %v12066_v40 = vmax.f32 %v11948_v39, %v11972_v8  ;;  %v12179_v39 = vld [vmem:[%s26026_s7 + $0x80] sm:$0xff]  ;;  %v12208_v37 = vld [vmem:[%s26026_s7 + $0x168] sm:$0xff] }
 0xb0e   : > { %v24234_v63 = vmax.f32 %v12097_v22, 0.0  ;;  %v18383_v17 = vpack.c.bf16 %v12179_v39, %v12176_v20  ;;  %v12202_v39 = vld [vmem:[%s26026_s7 + $0x138] sm:$0xff]  ;;  %v12212_v11 = vld [vmem:[%s26026_s7 + $0x188] sm:$0xff] }
 0xb0f   : > { %v12106_v33 = vmax.f32 %v12098_v0, 0.0  ;;  %v11976_v25 = vpop.f32.mrb[90].mxu0  ;;  %v18387_v0 = vpack.c.bf16 %v12185_v47, %v12182_v21 }
 0xb10   : > { %12147 = vst [vmem:[#allocation4 + $0x50] sm:$0xff] %v24234_v63  ;;  %v12067_v1 = vmax.f32 %v11952_v24, %v11976_v25  ;;  %v11978_v19 = vpop.f32.mrb[91].mxu0 }
 0xb11   : > { %12148 = vst.msk [vmem:[#allocation4 + $0x58] sm:$0xff] %vm12114_vm8, %v12106_v33  ;;  %v12068_v32 = vmax.f32 %v11954_v9, %v11978_v19  ;;  %v18381_v9 = vpack.c.bf16 %v12172_v50, %v12169_v5  ;;  %v12184_v33 = vld [vmem:[%s26026_s7 + $0xa8] sm:$0xff] }
 0xb12   : > { %v12079_v29 = vmax.f32 %v12065_v38, %v12067_v1  ;;  %v12188_v19 = vld [vmem:[%s26026_s7 + $0xc8] sm:$0xff] }
 0xb13   : > { %v12080_v45 = vmax.f32 %v12066_v40, %v12068_v32  ;;  %v11982_v31 = vpop.f32.mrb[92].mxu0  ;;  %v12181_v40 = vld [vmem:[%s26026_s7 + $0x90] sm:$0xff]  ;;  %v12191_v32 = vld [vmem:[%s26026_s7 + $0xe0] sm:$0xff] }
 0xb14   : > { %v12099_v59 = vadd.f32 %v24226_v14, %v12079_v29  ;;  %v11984_v6 = vpop.f32.mrb[93].mxu0 }
 0xb15   : > { %v12100_v49 = vadd.f32 %v24230_v30, %v12080_v45 }
 0xb16   : > { %v24240_v12 = vmax.f32 %v12099_v59, 0.0  ;;  %v18389_v59 = vpack.c.bf16 %v12184_v33, %v12181_v40  ;;  %v24417_v33 = vld [vmem:[#allocation4 + $0x48] sm:$0xff] }
 0xb17   : > { %v12108_v4 = vmax.f32 %v12100_v49, 0.0  ;;  %v11988_v26 = vpop.f32.mrb[94].mxu0 }
 0xb18   : > { %12149 = vst [vmem:[#allocation4 + $0x60] sm:$0xff] %v24240_v12  ;;  %v11990_v3 = vpop.f32.mrb[95].mxu0  ;;  %v24243_v62 = vld [vmem:[#allocation4 + $0x58] sm:$0xff] }
 0xb19   : > { %12150 = vst.msk [vmem:[#allocation4 + $0x68] sm:$0xff] %vm12114_vm8, %v12108_v4  ;;  %15820 = vmatprep.mubr.msk.f32.mxu0 %vm12114_vm8, %v24243_v62  ;;  %v18391_v4 = vpack.c.bf16 %v12191_v32, %v12188_v19  ;;  %v12183_v32 = vld [vmem:[%s26026_s7 + $0xa0] sm:$0xff] }
 0xb1a   : > { %12370 = vmatmul.mubr.f32.gmra.mrb[112].mxu0 %v24234_v63 }
 0xb1b   : > { %v24249_v34 = vpop.f32.mrb[96].mxu0 }
 0xb1c   : > { %v24251_v51 = vpop.f32.mrb[97].mxu0 }
 0xb1f   : > { %v24253_v16 = vpop.f32.mrb[98].mxu0 }
 0xb20   : > { %v24255_v52 = vpop.f32.mrb[99].mxu0  ;;  %v24257_v46 = vld [vmem:[#allocation4 + $0x68] sm:$0xff] }
 0xb21   : > { %15821 = vmatprep.mubr.msk.f32.mxu0 %vm12114_vm8, %v24257_v46 }
 0xb22   : > { %12376 = vmatmul.mubr.f32.gmra.mrb[114].mxu0 %v24240_v12 }
 0xb23   : > { %v12006_v18 = vpop.f32.mrb[100].mxu0  ;;  %15822 = vmatprep.mubr.msk.f32.mxu0 %vm12114_vm8, %v24144_v23 }
 0xb24   : > { %v12069_v7 = vmax.f32 %v11982_v31, %v12006_v18  ;;  %v12008_v35 = vpop.f32.mrb[101].mxu0 }
 0xb25   : > { %v12070_v53 = vmax.f32 %v11984_v6, %v12008_v35 }
 0xb26   : > { %12447 = vmatmul.mubr.f32.vlgmr.msra.gmra.mrb[116].mxu0 %v24288_v41 }
 0xb27   : > { %18378 = vmatpush1.bf16.msra.mxu0 %v18377_v13  ;;  %v12012_v24 = vpop.f32.mrb[102].mxu0  ;;  %15823 = vmatprep.mubr.msk.f32.mxu0 %vm12114_vm8, %v24184_v55  ;;  %v12193_v13 = vld [vmem:[%s26026_s7 + $0xf0] sm:$0xff] }
 0xb28   : > { %v12071_v57 = vmax.f32 %v11988_v26, %v12012_v24  ;;  %v12014_v15 = vpop.f32.mrb[103].mxu0  ;;  %18380 = vmatprep.subr.bf16.mxu0 %v18379_v2  ;;  %v12187_v26 = vld [vmem:[%s26026_s7 + $0xc0] sm:$0xff]  ;;  %v12200_v2 = vld [vmem:[%s26026_s7 + $0x128] sm:$0xff]  ;;  %v12206_v24 = vld [vmem:[%s26026_s7 + $0x158] sm:$0xff] }
 0xb29   : > { %v12072_v10 = vmax.f32 %v11990_v3, %v12014_v15  ;;  %v12190_v3 = vld [vmem:[%s26026_s7 + $0xd8] sm:$0xff] }
 0xb2a   : > { %v12081_v58 = vmax.f32 %v12069_v7, %v12071_v57  ;;  %12452 = vmatmul.mubr.f32.gmra.mrb[118].mxu0 %v24288_v41  ;;  %v18393_v48 = vpack.c.bf16 %v12190_v3, %v12187_v26  ;;  %v12196_v7 = vld [vmem:[%s26026_s7 + $0x108] sm:$0xff]  ;;  %v12198_v26 = vld [vmem:[%s26026_s7 + $0x118] sm:$0xff] }
 0xb2b   : > { %v12082_v28 = vmax.f32 %v12070_v53, %v12072_v10  ;;  %18382 = vmatpush1.bf16.msra.mxu0 %v18381_v9  ;;  %v12018_v54 = vpop.f32.mrb[104].mxu0  ;;  %15824 = vmatprep.mubr.msk.f32.mxu0 %vm12114_vm8, %v24243_v62  ;;  %v18397_v53 = vpack.c.bf16 %v12196_v7, %v12193_v13  ;;  %v12209_v9 = vld [vmem:[%s26026_s7 + $0x170] sm:$0xff]  ;;  %v12215_v10 = vld [vmem:[%s26026_s7 + $0x1a0] sm:$0xff]  ;;  %v15835_v13 = vld [vmem:[%s26026_s7 + $0x368] sm:$0xff] }
 0xb2c   : > { %v12101_v22 = vadd.f32 %v24226_v14, %v12081_v58  ;;  %v12073_v38 = vmax.f32 %v24249_v34, %v12018_v54  ;;  %v12020_v8 = vpop.f32.mrb[105].mxu0  ;;  %18384 = vmatprep.subr.bf16.mxu0 %v18383_v17  ;;  %v24337_v34 = vld [vmem:[#allocation4 + $0x8] sm:$0xff]  ;;  %v18403_v15 = vpack.c.bf16 %v12209_v9, %v12206_v24  ;;  %v12205_v17 = vld [vmem:[%s26026_s7 + $0x150] sm:$0xff]  ;;  %v18407_v47 = vpack.c.bf16 %v12215_v10, %v12212_v11  ;;  %v12211_v58 = vld [vmem:[%s26026_s7 + $0x180] sm:$0xff] }
 0xb2d   : > { %v12102_v25 = vadd.f32 %v24230_v30, %v12082_v28  ;;  %v12074_v1 = vmax.f32 %v24251_v51, %v12020_v8  ;;  %v18405_v21 = vpack.c.bf16 %v12208_v37, %v12205_v17  ;;  %v12214_v28 = vld [vmem:[%s26026_s7 + $0x198] sm:$0xff]  ;;  %v12171_v8 = vld [vmem:[%s26026_s7 + $0x40] sm:$0xff]  ;;  %v15840_v24 = vld [vmem:[%s26026_s7 + $0x390] sm:$0xff] }
 0xb2e   : > { %v24324_v29 = vmax.f32 %v12101_v22, 0.0  ;;  %12457 = vmatmul.mubr.f32.gmra.mrb[120].mxu0 %v24234_v63  ;;  %v18409_v54 = vpack.c.bf16 %v12214_v28, %v12211_v58  ;;  %v12168_v22 = vld [vmem:[%s26026_s7 + $0x28] sm:$0xff]  ;;  %v15838_v7 = vld [vmem:[%s26026_s7 + $0x380] sm:$0xff]  ;;  %v15849_v10 = vld [vmem:[%s26026_s7 + $0x3d8] sm:$0xff] }
 0xb2f   : > { %v12110_v45 = vmax.f32 %v12102_v25, 0.0  ;;  %18386 = vmatpush1.bf16.msra.mxu0 %v18385_v42  ;;  %v12024_v31 = vpop.f32.mrb[106].mxu0  ;;  %15825 = vmatprep.mubr.msk.f32.mxu0 %vm12114_vm8, %v24257_v46  ;;  %v12165_v42 = vld [vmem:[%s26026_s7 + $0x10] sm:$0xff]  ;;  %v15843_v9 = vld [vmem:[%s26026_s7 + $0x3a8] sm:$0xff]  ;;  %v15846_v11 = vld [vmem:[%s26026_s7 + $0x3c0] sm:$0xff] }
 0xb30   : > { %12151 = vst [vmem:[#allocation4 + $0x90] sm:$0xff] %v24324_v29  ;;  %v12075_v6 = vmax.f32 %v24253_v16, %v12024_v31  ;;  %v12026_v49 = vpop.f32.mrb[107].mxu0  ;;  %18388 = vmatprep.subr.bf16.mxu0 %v18387_v0  ;;  %v12194_v16 = vld [vmem:[%s26026_s7 + $0xf8] sm:$0xff]  ;;  %v12177_v25 = vld [vmem:[%s26026_s7 + $0x70] sm:$0xff]  ;;  %v18444_v17 = vpack.c.bf16 %v15843_v9, %v15840_v24 }
 0xb31   : > { %12152 = vst.msk [vmem:[#allocation4 + $0x98] sm:$0xff] %vm12114_vm8, %v12110_v45  ;;  %v12076_v51 = vmax.f32 %v24255_v52, %v12026_v49  ;;  %v18395_v52 = vpack.c.bf16 %v12197_v44, %v12194_v16  ;;  %v12174_v0 = vld [vmem:[%s26026_s7 + $0x58] sm:$0xff]  ;;  %v12207_v44 = vld [vmem:[%s26026_s7 + $0x160] sm:$0xff]  ;;  %v15852_v28 = vld [vmem:[%s26026_s7 + $0x3f0] sm:$0xff] }
 0xb32   : > { %v12083_v60 = vmax.f32 %v12073_v38, %v12075_v6  ;;  %12462 = vmatmul.mubr.f32.gmra.mrb[122].mxu0 %v24240_v12  ;;  %v18412_v38 = vpack.c.bf16 %v12168_v22, %v12165_v42  ;;  %v18415_v40 = vpack.c.bf16 %v12174_v0, %v12171_v8  ;;  %v12186_v45 = vld [vmem:[%s26026_s7 + $0xb8] sm:$0xff]  ;;  %v12192_v6 = vld [vmem:[%s26026_s7 + $0xe8] sm:$0xff]  ;;  %v15862_v22 = vld [vmem:[%s26026_s7 + $0x440] sm:$0xff] }
 0xb33   : > { %v12084_v43 = vmax.f32 %v12074_v1, %v12076_v51  ;;  %18390 = vmatpush1.bf16.msra.mxu0 %v18389_v59  ;;  %15826 = vmatprep.mubr.msk.f32.mxu0 %vm12114_vm8, %v24337_v34  ;;  %v12180_v1 = vld [vmem:[%s26026_s7 + $0x88] sm:$0xff]  ;;  %v18421_v31 = vpack.c.bf16 %v12186_v45, %v12183_v32  ;;  %v12189_v59 = vld [vmem:[%s26026_s7 + $0xd0] sm:$0xff]  ;;  %v15858_v0 = vld [vmem:[%s26026_s7 + $0x420] sm:$0xff] }
 0xb34   : > { %v24351_v18 = vadd.f32 %v24226_v14, %v12083_v60  ;;  %18392 = vmatprep.subr.bf16.mxu0 %v18391_v4  ;;  %v12203_v14 = vld [vmem:[%s26026_s7 + $0x140] sm:$0xff]  ;;  %v18418_v19 = vpack.c.bf16 %v12180_v1, %v12177_v25  ;;  %v18424_v49 = vpack.c.bf16 %v12192_v6, %v12189_v59  ;;  %v12201_v51 = vld [vmem:[%s26026_s7 + $0x130] sm:$0xff]  ;;  %v12210_v60 = vld [vmem:[%s26026_s7 + $0x178] sm:$0xff] }
 0xb35   : > { %v12104_v35 = vadd.f32 %v24230_v30, %v12084_v43  ;;  %v18399_v20 = vpack.c.bf16 %v12203_v14, %v12200_v2  ;;  %v12199_v30 = vld [vmem:[%s26026_s7 + $0x120] sm:$0xff]  ;;  %v18433_v43 = vpack.c.bf16 %v12210_v60, %v12207_v44  ;;  %v18438_v2 = vpack.c.bf16 %v15838_v7, %v15835_v13  ;;  %v15859_v42 = vld [vmem:[%s26026_s7 + $0x428] sm:$0xff]  ;;  %v15865_v25 = vld [vmem:[%s26026_s7 + $0x458] sm:$0xff] }
 0xb36   : > { %v12111_v5 = vmax.f32 %v24351_v18, 0.0  ;;  %v18401_v57 = vpack.c.bf16 %v12202_v39, %v12199_v30  ;;  %v12195_v4 = vld [vmem:[%s26026_s7 + $0x100] sm:$0xff]  ;;  %v18454_v8 = vpack.c.bf16 %v15862_v22, %v15859_v42  ;;  %v15868_v1 = vld [vmem:[%s26026_s7 + $0x470] sm:$0xff]  ;;  %v15871_v59 = vld [vmem:[%s26026_s7 + $0x488] sm:$0xff] }
 0xb37   : > { %v12112_v50 = vmax.f32 %v12104_v35, 0.0  ;;  %18394 = vmatpush1.bf16.msra.mxu0 %v18393_v48  ;;  %v18427_v3 = vpack.c.bf16 %v12198_v26, %v12195_v4  ;;  %v12213_v48 = vld [vmem:[%s26026_s7 + $0x190] sm:$0xff]  ;;  %v15834_v14 = vld [vmem:[%s26026_s7 + $0x360] sm:$0xff]  ;;  %v18458_v32 = vpack.c.bf16 %v15868_v1, %v15865_v25  ;;  %v15845_v24 = vld [vmem:[%s26026_s7 + $0x3b8] sm:$0xff] }
 0xb38   : > { %12153 = vst [vmem:[#allocation4 + $0xa0] sm:$0xff] %v12111_v5  ;;  %18396 = vmatprep.subr.bf16.mxu0 %v18395_v52  ;;  %v12216_v52 = vld [vmem:[%s26026_s7 + $0x1a8] sm:$0xff]  ;;  %v15864_v45 = vld [vmem:[%s26026_s7 + $0x450] sm:$0xff]  ;;  %v15874_v6 = vld [vmem:[%s26026_s7 + $0x4a0] sm:$0xff] }
 0xb39   : > { %12154 = vst.msk [vmem:[#allocation4 + $0xa8] sm:$0xff] %vm12114_vm8, %v12112_v50  ;;  %v18436_v35 = vpack.c.bf16 %v12216_v52, %v12213_v48  ;;  %v15837_v50 = vld [vmem:[%s26026_s7 + $0x378] sm:$0xff]  ;;  %v18462_v4 = vpack.c.bf16 %v15874_v6, %v15871_v59  ;;  %v15870_v26 = vld [vmem:[%s26026_s7 + $0x480] sm:$0xff]  ;;  %v15876_v60 = vld [vmem:[%s26026_s7 + $0x4b0] sm:$0xff] }
 0xb3a   : > { %v18440_v30 = vpack.c.bf16 %v15837_v50, %v15834_v14  ;;  %v15883_v48 = vld [vmem:[%s26026_s7 + $0x4e8] sm:$0xff]  ;;  %v15886_v52 = vld [vmem:[%s26026_s7 + $0x500] sm:$0xff]  ;;  %v15836_v50 = vld [vmem:[%s26026_s7 + $0x370] sm:$0xff] }
 0xb3b   : > { %18398 = vmatpush1.bf16.msra.mxu0 %v18397_v53  ;;  %v15841_v53 = vld [vmem:[%s26026_s7 + $0x398] sm:$0xff]  ;;  %v18470_v7 = vpack.c.bf16 %v15886_v52, %v15883_v48  ;;  %v15872_v22 = vld [vmem:[%s26026_s7 + $0x490] sm:$0xff]  ;;  %v15887_v1 = vld [vmem:[%s26026_s7 + $0x508] sm:$0xff] }
 0xb3c   : > { %18400 = vmatprep.subr.bf16.mxu0 %v18399_v20  ;;  %v15844_v20 = vld [vmem:[%s26026_s7 + $0x3b0] sm:$0xff]  ;;  %v15899_v6 = vld [vmem:[%s26026_s7 + $0x528] sm:$0xff] }
 0xb3d   : > { %v18442_v39 = vpack.c.bf16 %v15844_v20, %v15841_v53  ;;  %v15839_v53 = vld [vmem:[%s26026_s7 + $0x388] sm:$0xff]  ;;  %v15884_v25 = vld [vmem:[%s26026_s7 + $0x4f0] sm:$0xff] }
 0xb3e   : > { %v18475_v20 = vpack.c.bf16 %v15839_v53, %v15836_v50  ;;  %v15896_v59 = vld [vmem:[%s26026_s7 + $0x510] sm:$0xff]  ;;  %v15911_v52 = vld [vmem:[%s26026_s7 + $0x588] sm:$0xff]  ;;  %v15917_v50 = vld [vmem:[%s26026_s7 + $0x5b8] sm:$0xff] }
 0xb3f   : > { %18402 = vmatpush1.bf16.msra.mxu0 %v18401_v57  ;;  %v15847_v57 = vld [vmem:[%s26026_s7 + $0x3c8] sm:$0xff]  ;;  %v15908_v48 = vld [vmem:[%s26026_s7 + $0x570] sm:$0xff]  ;;  %v15921_v53 = vld [vmem:[%s26026_s7 + $0x5d8] sm:$0xff] }
 0xb40   : > { %18404 = vmatprep.subr.bf16.mxu0 %v18403_v15  ;;  %v15850_v15 = vld [vmem:[%s26026_s7 + $0x3e0] sm:$0xff]  ;;  %v15996_v18 = vld [vmem:[%s26026_s7 + $0x7f0] sm:$0xff] }
 0xb41   : > { %v18446_v37 = vpack.c.bf16 %v15850_v15, %v15847_v57  ;;  %v15848_v57 = vld [vmem:[%s26026_s7 + $0x3d0] sm:$0xff]  ;;  %v15851_v15 = vld [vmem:[%s26026_s7 + $0x3e8] sm:$0xff] }
 0xb43   : > { %18406 = vmatpush1.bf16.msra.mxu0 %v18405_v21  ;;  %v15853_v21 = vld [vmem:[%s26026_s7 + $0x3f8] sm:$0xff] }
 0xb44   : > { %18408 = vmatprep.subr.bf16.mxu0 %v18407_v47  ;;  %v15856_v47 = vld [vmem:[%s26026_s7 + $0x410] sm:$0xff] }
 0xb45   : > { %v18450_v58 = vpack.c.bf16 %v15856_v47, %v15853_v21  ;;  %v15860_v47 = vld [vmem:[%s26026_s7 + $0x430] sm:$0xff] }
 0xb47   : > { %18410 = vmatpush1.bf16.msra.mxu0 %v18409_v54  ;;  %v15855_v54 = vld [vmem:[%s26026_s7 + $0x408] sm:$0xff] }
 0xb48   : > { %18411 = vmatprep.subr.bf16.mxu0 %v20073_v36 }
 0xb4a   : > { %12544 = vmatmul.mubr.f32.vlgmr.msra.gmra.mrb[108].mxu0 %v24288_v41 }
 0xb4b   : > { %18413 = vmatpush1.bf16.msra.mxu0 %v18412_v38  ;;  %15827 = vmatprep.mubr.msk.f32.mxu0 %vm12114_vm8, %v24144_v23  ;;  %v18452_v38 = vpack.c.bf16 %v15855_v54, %v15852_v28  ;;  %v15866_v28 = vld [vmem:[%s26026_s7 + $0x460] sm:$0xff]  ;;  %v15869_v54 = vld [vmem:[%s26026_s7 + $0x478] sm:$0xff] }
 0xb4c   : > { %18414 = vmatprep.subr.bf16.mxu0 %v20073_v36  ;;  %v18490_v42 = vpack.c.bf16 %v15869_v54, %v15866_v28  ;;  %v15935_v28 = vld [vmem:[%s26026_s7 + $0x648] sm:$0xff] }
 0xb4d   : > { %v15939_v54 = vld [vmem:[%s26026_s7 + $0x668] sm:$0xff] }
 0xb4e   : > { %12550 = vmatmul.mubr.f32.gmra.mrb[110].mxu0 %v24288_v41 }
 0xb4f   : > { %18416 = vmatpush1.bf16.msra.mxu0 %v18415_v40  ;;  %15828 = vmatprep.mubr.msk.f32.mxu0 %vm12114_vm8, %v24417_v33  ;;  %v15861_v40 = vld [vmem:[%s26026_s7 + $0x438] sm:$0xff] }
 0xb50   : > { %18417 = vmatprep.subr.bf16.mxu0 %v20073_v36 }
 0xb52   : > { %12556 = vmatmul.mubr.f32.gmra.mrb[112].mxu0 %v24288_v41 }
 0xb53   : > { %15829 = vmatprep.mubr.msk.f32.mxu0 %vm12114_vm8, %v24243_v62  ;;  %18419 = vmatpush1.bf16.msra.mxu0 %v18418_v19  ;;  %v18456_v19 = vpack.c.bf16 %v15861_v40, %v15858_v0  ;;  %v15881_v0 = vld [vmem:[%s26026_s7 + $0x4d8] sm:$0xff] }
 0xb54   : > { %18420 = vmatprep.subr.bf16.mxu0 %v20073_v36 }
 0xb56   : > { %12562 = vmatmul.mubr.f32.gmra.mrb[114].mxu0 %v24234_v63 }
 0xb57   : > { %18422 = vmatpush1.bf16.msra.mxu0 %v18421_v31  ;;  %15830 = vmatprep.mubr.msk.f32.mxu0 %vm12114_vm8, %v24337_v34  ;;  %v12204_v34 = vld [vmem:[%s26026_s7 + $0x148] sm:$0xff] }
 0xb58   : > { %18423 = vmatprep.subr.bf16.mxu0 %v20073_v36  ;;  %v18430_v16 = vpack.c.bf16 %v12204_v34, %v12201_v51  ;;  %v15867_v31 = vld [vmem:[%s26026_s7 + $0x468] sm:$0xff]  ;;  %v15877_v51 = vld [vmem:[%s26026_s7 + $0x4b8] sm:$0xff]  ;;  %v15880_v34 = vld [vmem:[%s26026_s7 + $0x4d0] sm:$0xff] }
 0xb59   : > { %v18466_v44 = vpack.c.bf16 %v15880_v34, %v15877_v51  ;;  %v15902_v51 = vld [vmem:[%s26026_s7 + $0x540] sm:$0xff]  ;;  %v15905_v34 = vld [vmem:[%s26026_s7 + $0x558] sm:$0xff] }
 0xb5b   : > { %18425 = vmatpush1.bf16.msra.mxu0 %v18424_v49  ;;  %v18460_v49 = vpack.c.bf16 %v15867_v31, %v15864_v45  ;;  %v18499_v45 = vpack.c.bf16 %v15887_v1, %v15884_v25 }
 0xb5c   : > { %18426 = vmatprep.subr.bf16.mxu0 %v20073_v36 }
 0xb5f   : > { %18428 = vmatpush1.bf16.msra.mxu0 %v18427_v3  ;;  %v15873_v3 = vld [vmem:[%s26026_s7 + $0x498] sm:$0xff] }
 0xb60   : > { %18429 = vmatprep.subr.bf16.mxu0 %v20073_v36 }
 0xb63   : > { %18431 = vmatpush1.bf16.msra.mxu0 %v18430_v16  ;;  %v18464_v16 = vpack.c.bf16 %v15873_v3, %v15870_v26  ;;  %v18503_v26 = vpack.c.bf16 %v15899_v6, %v15896_v59  ;;  %v15901_v59 = vld [vmem:[%s26026_s7 + $0x538] sm:$0xff] }
 0xb64   : > { %18432 = vmatprep.subr.bf16.mxu0 %v20073_v36 }
 0xb67   : > { %18434 = vmatpush1.bf16.msra.mxu0 %v18433_v43  ;;  %v15879_v43 = vld [vmem:[%s26026_s7 + $0x4c8] sm:$0xff] }
 0xb68   : > { %18435 = vmatprep.subr.bf16.mxu0 %v20073_v36  ;;  %v18468_v13 = vpack.c.bf16 %v15879_v43, %v15876_v60  ;;  %v18507_v60 = vpack.c.bf16 %v15905_v34, %v15902_v51  ;;  %v15910_v51 = vld [vmem:[%s26026_s7 + $0x580] sm:$0xff]  ;;  %v15913_v34 = vld [vmem:[%s26026_s7 + $0x598] sm:$0xff] }
 0xb6b   : > { %18437 = vmatpush1.bf16.msra.mxu0 %v18436_v35  ;;  %v15882_v35 = vld [vmem:[%s26026_s7 + $0x4e0] sm:$0xff] }
 0xb6c   : > { %18439 = vmatprep.subr.bf16.mxu0 %v18438_v2  ;;  %v15885_v2 = vld [vmem:[%s26026_s7 + $0x4f8] sm:$0xff] }
 0xb6d   : > { %v18472_v14 = vpack.c.bf16 %v15885_v2, %v15882_v35  ;;  %v18511_v35 = vpack.c.bf16 %v15911_v52, %v15908_v48  ;;  %v15922_v52 = vld [vmem:[%s26026_s7 + $0x5e0] sm:$0xff] }
 0xb6e   : > { %12633 = vmatmul.mubr.f32.vlgmr.msra.gmra.mrb[116].mxu0 %v24288_v41 }
 0xb6f   : > { %18441 = vmatpush1.bf16.msra.mxu0 %v18440_v30  ;;  %15831 = vmatprep.mubr.msk.f32.mxu0 %vm12114_vm8, %v24144_v23  ;;  %v18448_v23 = vpack.c.bf16 %v15849_v10, %v15846_v11  ;;  %v24604_v30 = vld [vmem:[#allocation4 + $0x38] sm:$0xff] }
 0xb70   : > { %18443 = vmatprep.subr.bf16.mxu0 %v18442_v39  ;;  %v15842_v39 = vld [vmem:[%s26026_s7 + $0x3a0] sm:$0xff]  ;;  %v15857_v11 = vld [vmem:[%s26026_s7 + $0x418] sm:$0xff] }
 0xb71   : > { %v18478_v9 = vpack.c.bf16 %v15845_v24, %v15842_v39  ;;  %v24632_v10 = vld [vmem:[#allocation4 + $0x78] sm:$0xff]  ;;  %v15920_v39 = vld [vmem:[%s26026_s7 + $0x5d0] sm:$0xff]  ;;  %v15923_v24 = vld [vmem:[%s26026_s7 + $0x5e8] sm:$0xff] }
 0xb72   : > { %12638 = vmatmul.mubr.f32.gmra.mrb[118].mxu0 %v24288_v41 }
 0xb73   : > { %18445 = vmatpush1.bf16.msra.mxu0 %v18444_v17  ;;  %15832 = vmatprep.mubr.msk.f32.mxu0 %vm12114_vm8, %v24417_v33  ;;  %v18481_v17 = vpack.c.bf16 %v15851_v15, %v15848_v57  ;;  %v18519_v57 = vpack.c.bf16 %v15923_v24, %v15920_v39  ;;  %v15946_v39 = vld [vmem:[%s26026_s7 + $0x6a0] sm:$0xff]  ;;  %v15949_v24 = vld [vmem:[%s26026_s7 + $0x6b8] sm:$0xff] }
 0xb74   : > { %18447 = vmatprep.subr.bf16.mxu0 %v18446_v37  ;;  %v15854_v37 = vld [vmem:[%s26026_s7 + $0x400] sm:$0xff] }
 0xb75   : > { %v18484_v21 = vpack.c.bf16 %v15857_v11, %v15854_v37  ;;  %v15929_v37 = vld [vmem:[%s26026_s7 + $0x618] sm:$0xff] }
 0xb76   : > { %12643 = vmatmul.mubr.f32.gmra.mrb[120].mxu0 %v24288_v41  ;;  %v15933_v11 = vld [vmem:[%s26026_s7 + $0x638] sm:$0xff] }
 0xb77   : > { %15833 = vmatprep.mubr.msk.f32.mxu0 %vm12114_vm8, %v24243_v62  ;;  %18449 = vmatpush1.bf16.msra.mxu0 %v18448_v23  ;;  %v15863_v23 = vld [vmem:[%s26026_s7 + $0x448] sm:$0xff] }
 0xb78   : > { %18451 = vmatprep.subr.bf16.mxu0 %v18450_v58  ;;  %v18487_v58 = vpack.c.bf16 %v15863_v23, %v15860_v47 }
 0xb7a   : > { %12648 = vmatmul.mubr.f32.gmra.mrb[122].mxu0 %v24234_v63 }
 0xb7b   : > { %18453 = vmatpush1.bf16.msra.mxu0 %v18452_v38  ;;  %15888 = vmatprep.mubr.msk.f32.mxu0 %vm12114_vm8, %v24184_v55 }
 0xb7c   : > { %18455 = vmatprep.subr.bf16.mxu0 %v18454_v8  ;;  %v15878_v8 = vld [vmem:[%s26026_s7 + $0x4c0] sm:$0xff] }
 0xb7d   : > { %v18496_v40 = vpack.c.bf16 %v15881_v0, %v15878_v8  ;;  %v15941_v8 = vld [vmem:[%s26026_s7 + $0x678] sm:$0xff] }
 0xb7e   : > { %v15945_v0 = vld [vmem:[%s26026_s7 + $0x698] sm:$0xff] }
 0xb7f   : > { %18457 = vmatpush1.bf16.msra.mxu0 %v18456_v19  ;;  %v15897_v19 = vld [vmem:[%s26026_s7 + $0x518] sm:$0xff] }
 0xb80   : > { %18459 = vmatprep.subr.bf16.mxu0 %v18458_v32  ;;  %v15900_v32 = vld [vmem:[%s26026_s7 + $0x530] sm:$0xff] }
 0xb81   : > { %v18501_v31 = vpack.c.bf16 %v15900_v32, %v15897_v19  ;;  %v15944_v19 = vld [vmem:[%s26026_s7 + $0x690] sm:$0xff]  ;;  %v15947_v32 = vld [vmem:[%s26026_s7 + $0x6a8] sm:$0xff] }
 0xb83   : > { %18461 = vmatpush1.bf16.msra.mxu0 %v18460_v49  ;;  %v15903_v49 = vld [vmem:[%s26026_s7 + $0x548] sm:$0xff] }
 0xb84   : > { %18463 = vmatprep.subr.bf16.mxu0 %v18462_v4  ;;  %v15906_v4 = vld [vmem:[%s26026_s7 + $0x560] sm:$0xff] }
 0xb85   : > { %v18505_v3 = vpack.c.bf16 %v15906_v4, %v15903_v49  ;;  %v15904_v49 = vld [vmem:[%s26026_s7 + $0x550] sm:$0xff]  ;;  %v15907_v4 = vld [vmem:[%s26026_s7 + $0x568] sm:$0xff] }
 0xb87   : > { %18465 = vmatpush1.bf16.msra.mxu0 %v18464_v16  ;;  %v15909_v16 = vld [vmem:[%s26026_s7 + $0x578] sm:$0xff] }
 0xb88   : > { %18467 = vmatprep.subr.bf16.mxu0 %v18466_v44  ;;  %v15912_v44 = vld [vmem:[%s26026_s7 + $0x590] sm:$0xff] }
 0xb89   : > { %v18509_v43 = vpack.c.bf16 %v15912_v44, %v15909_v16  ;;  %v18544_v16 = vpack.c.bf16 %v15913_v34, %v15910_v51  ;;  %v15916_v44 = vld [vmem:[%s26026_s7 + $0x5b0] sm:$0xff] }
 0xb8a   : > { %v15988_v34 = vld [vmem:[%s26026_s7 + $0x7b0] sm:$0xff] }
 0xb8b   : > { %18469 = vmatpush1.bf16.msra.mxu0 %v18468_v13  ;;  %v15915_v13 = vld [vmem:[%s26026_s7 + $0x5a8] sm:$0xff] }
 0xb8c   : > { %18471 = vmatprep.subr.bf16.mxu0 %v18470_v7  ;;  %v15918_v7 = vld [vmem:[%s26026_s7 + $0x5c0] sm:$0xff] }
 0xb8d   : > { %v18513_v2 = vpack.c.bf16 %v15918_v7, %v15915_v13  ;;  %v15925_v13 = vld [vmem:[%s26026_s7 + $0x5f8] sm:$0xff] }
 0xb8e   : > { %v18550_v7 = vpack.c.bf16 %v15925_v13, %v15922_v52  ;;  %v15994_v52 = vld [vmem:[%s26026_s7 + $0x7e0] sm:$0xff]  ;;  %v15997_v13 = vld [vmem:[%s26026_s7 + $0x7f8] sm:$0xff] }
 0xb8f   : > { %18473 = vmatpush1.bf16.msra.mxu0 %v18472_v14  ;;  %v15914_v14 = vld [vmem:[%s26026_s7 + $0x5a0] sm:$0xff] }
 0xb90   : > { %18474 = vmatprep.subr.bf16.mxu0 %v20073_v36 }
 0xb92   : > { %12794 = vmatmul.mubr.f32.vlgmr.msra.gmra.mrb[108].mxu0 %v24288_v41 }
 0xb93   : > { %18476 = vmatpush1.bf16.msra.mxu0 %v18475_v20  ;;  %15889 = vmatprep.mubr.msk.f32.mxu0 %vm12114_vm8, %v24604_v30  ;;  %v18515_v20 = vpack.c.bf16 %v15917_v50, %v15914_v14  ;;  %v15934_v50 = vld [vmem:[%s26026_s7 + $0x640] sm:$0xff] }
 0xb94   : > { %18477 = vmatprep.subr.bf16.mxu0 %v20073_v36 }
 0xb96   : > { %12800 = vmatmul.mubr.f32.gmra.mrb[110].mxu0 %v24288_v41 }
 0xb97   : > { %15890 = vmatprep.mubr.msk.f32.mxu0 %vm12114_vm8, %v24257_v46  ;;  %18479 = vmatpush1.bf16.msra.mxu0 %v18478_v9  ;;  %v15927_v9 = vld [vmem:[%s26026_s7 + $0x608] sm:$0xff] }
 0xb98   : > { %18480 = vmatprep.subr.bf16.mxu0 %v20073_v36 }
 0xb9a   : > { %12806 = vmatmul.mubr.f32.gmra.mrb[112].mxu0 %v24240_v12 }
 0xb9b   : > { %18482 = vmatpush1.bf16.msra.mxu0 %v18481_v17  ;;  %15891 = vmatprep.mubr.msk.f32.mxu0 %vm12114_vm8, %v24632_v10  ;;  %v15926_v17 = vld [vmem:[%s26026_s7 + $0x600] sm:$0xff] }
 0xb9c   : > { %18483 = vmatprep.subr.bf16.mxu0 %v20073_v36  ;;  %v18523_v47 = vpack.c.bf16 %v15929_v37, %v15926_v17  ;;  %v15958_v17 = vld [vmem:[%s26026_s7 + $0x6c0] sm:$0xff]  ;;  %v15961_v37 = vld [vmem:[%s26026_s7 + $0x6d8] sm:$0xff] }
 0xb9e   : > { %12812 = vmatmul.mubr.f32.gmra.mrb[114].mxu0 %v24288_v41 }
 0xb9f   : > { %18485 = vmatpush1.bf16.msra.mxu0 %v18484_v21  ;;  %15892 = vmatprep.mubr.msk.f32.mxu0 %vm12114_vm8, %v24184_v55  ;;  %v15875_v55 = vld [vmem:[%s26026_s7 + $0x4a8] sm:$0xff]  ;;  %v15936_v21 = vld [vmem:[%s26026_s7 + $0x650] sm:$0xff] }
 0xba0   : > { %18486 = vmatprep.subr.bf16.mxu0 %v20073_v36  ;;  %v18493_v38 = vpack.c.bf16 %v15875_v55, %v15872_v22  ;;  %v18525_v23 = vpack.c.bf16 %v15936_v21, %v15933_v11  ;;  %v15965_v11 = vld [vmem:[%s26026_s7 + $0x6f8] sm:$0xff]  ;;  %v15968_v21 = vld [vmem:[%s26026_s7 + $0x710] sm:$0xff] }
 0xba3   : > { %18488 = vmatpush1.bf16.msra.mxu0 %v18487_v58  ;;  %v15932_v58 = vld [vmem:[%s26026_s7 + $0x630] sm:$0xff] }
 0xba4   : > { %18489 = vmatprep.subr.bf16.mxu0 %v20073_v36  ;;  %v18527_v22 = vpack.c.bf16 %v15935_v28, %v15932_v58  ;;  %v15964_v58 = vld [vmem:[%s26026_s7 + $0x6f0] sm:$0xff]  ;;  %v15967_v28 = vld [vmem:[%s26026_s7 + $0x708] sm:$0xff] }
 0xba7   : > { %18491 = vmatpush1.bf16.msra.mxu0 %v18490_v42  ;;  %v15942_v42 = vld [vmem:[%s26026_s7 + $0x680] sm:$0xff] }
 0xba8   : > { %18492 = vmatprep.subr.bf16.mxu0 %v20073_v36  ;;  %v18529_v55 = vpack.c.bf16 %v15942_v42, %v15939_v54  ;;  %v15971_v54 = vld [vmem:[%s26026_s7 + $0x728] sm:$0xff]  ;;  %v15974_v42 = vld [vmem:[%s26026_s7 + $0x740] sm:$0xff] }
 0xbab   : > { %18494 = vmatpush1.bf16.msra.mxu0 %v18493_v38  ;;  %v15938_v38 = vld [vmem:[%s26026_s7 + $0x660] sm:$0xff] }
 0xbac   : > { %18495 = vmatprep.subr.bf16.mxu0 %v20073_v36  ;;  %v18531_v25 = vpack.c.bf16 %v15941_v8, %v15938_v38  ;;  %v15970_v38 = vld [vmem:[%s26026_s7 + $0x720] sm:$0xff]  ;;  %v15973_v8 = vld [vmem:[%s26026_s7 + $0x738] sm:$0xff] }
 0xbaf   : > { %18497 = vmatpush1.bf16.msra.mxu0 %v18496_v40  ;;  %v15948_v40 = vld [vmem:[%s26026_s7 + $0x6b0] sm:$0xff] }
 0xbb0   : > { %18498 = vmatprep.subr.bf16.mxu0 %v20073_v36  ;;  %v18533_v1 = vpack.c.bf16 %v15948_v40, %v15945_v0  ;;  %v15977_v0 = vld [vmem:[%s26026_s7 + $0x758] sm:$0xff]  ;;  %v18574_v40 = vpack.c.bf16 %v15973_v8, %v15970_v38  ;;  %v25039_v38 = vld [vmem:[#allocation4 + $0xa8] sm:$0xff] }
 0xbb3   : > { %18500 = vmatpush1.bf16.msra.mxu0 %v18499_v45  ;;  %v18535_v45 = vpack.c.bf16 %v15947_v32, %v15944_v19  ;;  %v15979_v19 = vld [vmem:[%s26026_s7 + $0x768] sm:$0xff] }
 0xbb4   : > { %18502 = vmatprep.subr.bf16.mxu0 %v18501_v31  ;;  %v15898_v31 = vld [vmem:[%s26026_s7 + $0x520] sm:$0xff]  ;;  %v15983_v32 = vld [vmem:[%s26026_s7 + $0x788] sm:$0xff] }
 0xbb5   : > { %v18538_v6 = vpack.c.bf16 %v15901_v59, %v15898_v31  ;;  %v15982_v59 = vld [vmem:[%s26026_s7 + $0x780] sm:$0xff] }
 0xbb6   : > { %12883 = vmatmul.mubr.f32.vlgmr.msra.gmra.mrb[116].mxu0 %v24288_v41 }
 0xbb7   : > { %18504 = vmatpush1.bf16.msra.mxu0 %v18503_v26  ;;  %15893 = vmatprep.mubr.msk.f32.mxu0 %vm12114_vm8, %v24604_v30  ;;  %v18541_v26 = vpack.c.bf16 %v15907_v4, %v15904_v49  ;;  %v15989_v49 = vld [vmem:[%s26026_s7 + $0x7b8] sm:$0xff] }
 0xbb8   : > { %18506 = vmatprep.subr.bf16.mxu0 %v18505_v3  ;;  %v24813_v3 = vld [vmem:[#allocation4 + $0x88] sm:$0xff]  ;;  %v24951_v4 = vld [vmem:[#allocation4 + $0x58] sm:$0xff] }
 0xbba   : > { %12888 = vmatmul.mubr.f32.gmra.mrb[118].mxu0 %v24288_v41 }
 0xbbb   : > { %15894 = vmatprep.mubr.msk.f32.mxu0 %vm12114_vm8, %v24257_v46  ;;  %18508 = vmatpush1.bf16.msra.mxu0 %v18507_v60  ;;  %v15924_v46 = vld [vmem:[%s26026_s7 + $0x5f0] sm:$0xff]  ;;  %v15919_v60 = vld [vmem:[%s26026_s7 + $0x5c8] sm:$0xff] }
 0xbbc   : > { %18510 = vmatprep.subr.bf16.mxu0 %v18509_v43  ;;  %v18517_v30 = vpack.c.bf16 %v15924_v46, %v15921_v53  ;;  %v24832_v43 = vld [vmem:[#allocation4 + $0x98] sm:$0xff]  ;;  %v18547_v48 = vpack.c.bf16 %v15919_v60, %v15916_v44  ;;  %v15940_v46 = vld [vmem:[%s26026_s7 + $0x670] sm:$0xff]  ;;  %v15998_v44 = vld [vmem:[%s26026_s7 + $0x800] sm:$0xff] }
 0xbbe   : > { %12893 = vmatmul.mubr.f32.gmra.mrb[120].mxu0 %v24240_v12  ;;  %v15930_v12 = vld [vmem:[%s26026_s7 + $0x620] sm:$0xff] }
 0xbbf   : > { %18512 = vmatpush1.bf16.msra.mxu0 %v18511_v35  ;;  %15895 = vmatprep.mubr.msk.f32.mxu0 %vm12114_vm8, %v24632_v10  ;;  %v18521_v15 = vpack.c.bf16 %v15930_v12, %v15927_v9  ;;  %v15928_v35 = vld [vmem:[%s26026_s7 + $0x610] sm:$0xff]  ;;  %v15959_v9 = vld [vmem:[%s26026_s7 + $0x6c8] sm:$0xff]  ;;  %v15962_v12 = vld [vmem:[%s26026_s7 + $0x6e0] sm:$0xff] }
 0xbc0   : > { %18514 = vmatprep.subr.bf16.mxu0 %v18513_v2  ;;  %v15931_v2 = vld [vmem:[%s26026_s7 + $0x628] sm:$0xff] }
 0xbc1   : > { %v18553_v14 = vpack.c.bf16 %v15931_v2, %v15928_v35  ;;  %v16004_v35 = vld [vmem:[%s26026_s7 + $0x830] sm:$0xff]  ;;  %v18590_v2 = vpack.c.bf16 %v15997_v13, %v15994_v52  ;;  %v16029_v52 = vld [vmem:[%s26026_s7 + $0x8b8] sm:$0xff] }
 0xbc2   : > { %12898 = vmatmul.mubr.f32.gmra.mrb[122].mxu0 %v24288_v41  ;;  %v16033_v13 = vld [vmem:[%s26026_s7 + $0x8d8] sm:$0xff] }
 0xbc3   : > { %18516 = vmatpush1.bf16.msra.mxu0 %v18515_v20  ;;  %15950 = vmatprep.mubr.msk.f32.mxu0 %vm12114_vm8, %v24417_v33  ;;  %v15943_v20 = vld [vmem:[%s26026_s7 + $0x688] sm:$0xff] }
 0xbc4   : > { %18518 = vmatprep.subr.bf16.mxu0 %v18517_v30  ;;  %v18559_v30 = vpack.c.bf16 %v15943_v20, %v15940_v46  ;;  %v16010_v46 = vld [vmem:[%s26026_s7 + $0x860] sm:$0xff] }
 0xbc7   : > { %18520 = vmatpush1.bf16.msra.mxu0 %v18519_v57  ;;  %v18562_v57 = vpack.c.bf16 %v15949_v24, %v15946_v39  ;;  %v16006_v39 = vld [vmem:[%s26026_s7 + $0x840] sm:$0xff]  ;;  %v16009_v24 = vld [vmem:[%s26026_s7 + $0x858] sm:$0xff] }
 0xbc8   : > { %18522 = vmatprep.subr.bf16.mxu0 %v18521_v15  ;;  %v18564_v15 = vpack.c.bf16 %v15962_v12, %v15959_v9  ;;  %v18598_v9 = vpack.c.bf16 %v16009_v24, %v16006_v39  ;;  %v15960_v12 = vld [vmem:[%s26026_s7 + $0x6d0] sm:$0xff]  ;;  %v16041_v39 = vld [vmem:[%s26026_s7 + $0x918] sm:$0xff] }
 0xbc9   : > { %v16045_v24 = vld [vmem:[%s26026_s7 + $0x938] sm:$0xff] }
 0xbcb   : > { %18524 = vmatpush1.bf16.msra.mxu0 %v18523_v47  ;;  %v18566_v47 = vpack.c.bf16 %v15961_v37, %v15958_v17  ;;  %v15966_v17 = vld [vmem:[%s26026_s7 + $0x700] sm:$0xff]  ;;  %v15969_v37 = vld [vmem:[%s26026_s7 + $0x718] sm:$0xff] }
 0xbcc   : > { %18526 = vmatprep.subr.bf16.mxu0 %v18525_v23  ;;  %v18568_v23 = vpack.c.bf16 %v15968_v21, %v15965_v11  ;;  %v25010_v11 = vld [vmem:[#allocation4 + $0x50] sm:$0xff]  ;;  %v25013_v21 = vld [vmem:[#allocation4 + $0x68] sm:$0xff] }
 0xbcf   : > { %18528 = vmatpush1.bf16.msra.mxu0 %v18527_v22  ;;  %v18570_v22 = vpack.c.bf16 %v15967_v28, %v15964_v58  ;;  %v15975_v58 = vld [vmem:[%s26026_s7 + $0x748] sm:$0xff]  ;;  %v25024_v28 = vld [vmem:[#allocation4 + $0x60] sm:$0xff] }
 0xbd0   : > { %18530 = vmatprep.subr.bf16.mxu0 %v18529_v55  ;;  %v18572_v55 = vpack.c.bf16 %v15974_v42, %v15971_v54  ;;  %v15978_v42 = vld [vmem:[%s26026_s7 + $0x760] sm:$0xff] }
 0xbd3   : > { %18532 = vmatpush1.bf16.msra.mxu0 %v18531_v25 }
 0xbd4   : > { %18534 = vmatprep.subr.bf16.mxu0 %v18533_v1  ;;  %v15976_v1 = vld [vmem:[%s26026_s7 + $0x750] sm:$0xff] }
 0xbd7   : > { %18536 = vmatpush1.bf16.msra.mxu0 %v18535_v45  ;;  %v18578_v45 = vpack.c.bf16 %v15979_v19, %v15976_v1  ;;  %v15993_v1 = vld [vmem:[%s26026_s7 + $0x7d8] sm:$0xff] }
 0xbd8   : > { %18537 = vmatprep.subr.bf16.mxu0 %v20073_v36 }
 0xbda   : > { %13056 = vmatmul.mubr.f32.vlgmr.msra.gmra.mrb[108].mxu0 %v24288_v41 }
 0xbdb   : > { %15951 = vmatprep.mubr.msk.f32.mxu0 %vm12114_vm8, %v24243_v62  ;;  %18539 = vmatpush1.bf16.msra.mxu0 %v18538_v6  ;;  %v15985_v6 = vld [vmem:[%s26026_s7 + $0x798] sm:$0xff] }
 0xbdc   : > { %18540 = vmatprep.subr.bf16.mxu0 %v20073_v36 }
 0xbde   : > { %13062 = vmatmul.mubr.f32.gmra.mrb[110].mxu0 %v24234_v63 }
 0xbdf   : > { %18542 = vmatpush1.bf16.msra.mxu0 %v18541_v26  ;;  %15952 = vmatprep.mubr.msk.f32.mxu0 %vm12114_vm8, %v24813_v3  ;;  %v18582_v26 = vpack.c.bf16 %v15985_v6, %v15982_v59  ;;  %v16008_v59 = vld [vmem:[%s26026_s7 + $0x850] sm:$0xff]  ;;  %v16011_v6 = vld [vmem:[%s26026_s7 + $0x868] sm:$0xff] }
 0xbe0   : > { %18543 = vmatprep.subr.bf16.mxu0 %v20073_v36 }
 0xbe2   : > { %13068 = vmatmul.mubr.f32.gmra.mrb[112].mxu0 %v24288_v41 }
 0xbe3   : > { %15953 = vmatprep.mubr.msk.f32.mxu0 %vm12114_vm8, %v24832_v43  ;;  %18545 = vmatpush1.bf16.msra.mxu0 %v18544_v16  ;;  %v15991_v16 = vld [vmem:[%s26026_s7 + $0x7c8] sm:$0xff] }
 0xbe4   : > { %18546 = vmatprep.subr.bf16.mxu0 %v20073_v36  ;;  %v18586_v60 = vpack.c.bf16 %v15991_v16, %v15988_v34  ;;  %v16023_v34 = vld [vmem:[%s26026_s7 + $0x888] sm:$0xff] }
 0xbe5   : > { %v16027_v16 = vld [vmem:[%s26026_s7 + $0x8a8] sm:$0xff] }
 0xbe6   : > { %13074 = vmatmul.mubr.f32.gmra.mrb[114].mxu0 %v24324_v29 }
 0xbe7   : > { %18548 = vmatpush1.bf16.msra.mxu0 %v18547_v48  ;;  %15954 = vmatprep.mubr.msk.f32.mxu0 %vm12114_vm8, %v24417_v33  ;;  %v15937_v33 = vld [vmem:[%s26026_s7 + $0x658] sm:$0xff] }
 0xbe8   : > { %18549 = vmatprep.subr.bf16.mxu0 %v20073_v36  ;;  %v18556_v53 = vpack.c.bf16 %v15937_v33, %v15934_v50  ;;  %v16000_v50 = vld [vmem:[%s26026_s7 + $0x810] sm:$0xff]  ;;  %v16003_v33 = vld [vmem:[%s26026_s7 + $0x828] sm:$0xff] }
 0xbe9   : > { %v18594_v20 = vpack.c.bf16 %v16003_v33, %v16000_v50  ;;  %v16035_v50 = vld [vmem:[%s26026_s7 + $0x8e8] sm:$0xff] }
 0xbea   : > { %v16039_v33 = vld [vmem:[%s26026_s7 + $0x908] sm:$0xff] }
 0xbeb   : > { %18551 = vmatpush1.bf16.msra.mxu0 %v18550_v7  ;;  %v16001_v7 = vld [vmem:[%s26026_s7 + $0x818] sm:$0xff] }
 0xbec   : > { %18552 = vmatprep.subr.bf16.mxu0 %v20073_v36 }
 0xbef   : > { %18554 = vmatpush1.bf16.msra.mxu0 %v18553_v14  ;;  %v18592_v14 = vpack.c.bf16 %v16004_v35, %v16001_v7  ;;  %v16036_v7 = vld [vmem:[%s26026_s7 + $0x8f0] sm:$0xff] }
 0xbf0   : > { %18555 = vmatprep.subr.bf16.mxu0 %v20073_v36 }
 0xbf3   : > { %18557 = vmatpush1.bf16.msra.mxu0 %v18556_v53  ;;  %v16007_v53 = vld [vmem:[%s26026_s7 + $0x848] sm:$0xff] }
 0xbf4   : > { %18558 = vmatprep.subr.bf16.mxu0 %v20073_v36 }
 0xbf7   : > { %18560 = vmatpush1.bf16.msra.mxu0 %v18559_v30  ;;  %v18596_v30 = vpack.c.bf16 %v16010_v46, %v16007_v53  ;;  %v16042_v53 = vld [vmem:[%s26026_s7 + $0x920] sm:$0xff] }
 0xbf8   : > { %18561 = vmatprep.subr.bf16.mxu0 %v20073_v36 }
 0xbfb   : > { %18563 = vmatpush1.bf16.msra.mxu0 %v18562_v57  ;;  %v15963_v57 = vld [vmem:[%s26026_s7 + $0x6e8] sm:$0xff] }
 0xbfc   : > { %18565 = vmatprep.subr.bf16.mxu0 %v18564_v15  ;;  %v18601_v15 = vpack.c.bf16 %v15963_v57, %v15960_v12 }
 0xbfe   : > { %13145 = vmatmul.mubr.f32.vlgmr.msra.gmra.mrb[116].mxu0 %v24288_v41 }
 0xbff   : > { %15955 = vmatprep.mubr.msk.f32.mxu0 %vm12114_vm8, %v24243_v62  ;;  %18567 = vmatpush1.bf16.msra.mxu0 %v18566_v47  ;;  %v15980_v62 = vld [vmem:[%s26026_s7 + $0x770] sm:$0xff]  ;;  %v18604_v47 = vpack.c.bf16 %v15969_v37, %v15966_v17  ;;  %v16047_v17 = vld [vmem:[%s26026_s7 + $0x948] sm:$0xff] }
 0xc00   : > { %18569 = vmatprep.subr.bf16.mxu0 %v18568_v23  ;;  %v18576_v25 = vpack.c.bf16 %v15980_v62, %v15977_v0  ;;  %v15972_v23 = vld [vmem:[%s26026_s7 + $0x730] sm:$0xff]  ;;  %v15987_v62 = vld [vmem:[%s26026_s7 + $0x7a8] sm:$0xff] }
 0xc01   : > { %v18607_v54 = vpack.c.bf16 %v15975_v58, %v15972_v23  ;;  %v15984_v0 = vld [vmem:[%s26026_s7 + $0x790] sm:$0xff]  ;;  %v16051_v37 = vld [vmem:[%s26026_s7 + $0x968] sm:$0xff] }
 0xc02   : > { %13150 = vmatmul.mubr.f32.gmra.mrb[118].mxu0 %v24234_v63  ;;  %v15986_v63 = vld [vmem:[%s26026_s7 + $0x7a0] sm:$0xff] }
 0xc03   : > { %18571 = vmatpush1.bf16.msra.mxu0 %v18570_v22  ;;  %15956 = vmatprep.mubr.msk.f32.mxu0 %vm12114_vm8, %v24813_v3  ;;  %v18580_v31 = vpack.c.bf16 %v15986_v63, %v15983_v32  ;;  %v15981_v22 = vld [vmem:[%s26026_s7 + $0x778] sm:$0xff]  ;;  %v16002_v63 = vld [vmem:[%s26026_s7 + $0x820] sm:$0xff] }
 0xc04   : > { %18573 = vmatprep.subr.bf16.mxu0 %v18572_v55  ;;  %v25036_v55 = vld [vmem:[#allocation4 + $0x90] sm:$0xff]  ;;  %v18610_v8 = vpack.c.bf16 %v15981_v22, %v15978_v42  ;;  %v16053_v42 = vld [vmem:[%s26026_s7 + $0x978] sm:$0xff] }
 0xc05   : > { %v16057_v22 = vld [vmem:[%s26026_s7 + $0x998] sm:$0xff] }
 0xc06   : > { %13155 = vmatmul.mubr.f32.gmra.mrb[120].mxu0 %v24288_v41  ;;  %v15992_v41 = vld [vmem:[%s26026_s7 + $0x7d0] sm:$0xff] }
 0xc07   : > { %15957 = vmatprep.mubr.msk.f32.mxu0 %vm12114_vm8, %v24832_v43  ;;  %18575 = vmatpush1.bf16.msra.mxu0 %v18574_v40  ;;  %v18584_v51 = vpack.c.bf16 %v15992_v41, %v15989_v49  ;;  %v18613_v40 = vpack.c.bf16 %v15987_v62, %v15984_v0  ;;  %v16021_v49 = vld [vmem:[%s26026_s7 + $0x878] sm:$0xff]  ;;  %v16024_v41 = vld [vmem:[%s26026_s7 + $0x890] sm:$0xff] }
 0xc08   : > { %18577 = vmatprep.subr.bf16.mxu0 %v18576_v25  ;;  %v15990_v25 = vld [vmem:[%s26026_s7 + $0x7c0] sm:$0xff] }
 0xc09   : > { %v18616_v19 = vpack.c.bf16 %v15993_v1, %v15990_v25  ;;  %v16059_v25 = vld [vmem:[%s26026_s7 + $0x9a8] sm:$0xff] }
 0xc0a   : > { %13160 = vmatmul.mubr.f32.gmra.mrb[122].mxu0 %v24324_v29  ;;  %v15995_v29 = vld [vmem:[%s26026_s7 + $0x7e8] sm:$0xff] }
 0xc0b   : > { %18579 = vmatpush1.bf16.msra.mxu0 %v18578_v45  ;;  %16012 = vmatprep.mubr.msk.f32.mxu0 %vm12114_vm8, %v24951_v4  ;;  %v18588_v48 = vpack.c.bf16 %v15998_v44, %v15995_v29  ;;  %v16005_v45 = vld [vmem:[%s26026_s7 + $0x838] sm:$0xff]  ;;  %v16030_v29 = vld [vmem:[%s26026_s7 + $0x8c0] sm:$0xff]  ;;  %v16063_v1 = vld [vmem:[%s26026_s7 + $0x9c8] sm:$0xff] }
 0xc0c   : > { %18581 = vmatprep.subr.bf16.mxu0 %v18580_v31  ;;  %v18622_v31 = vpack.c.bf16 %v16005_v45, %v16002_v63  ;;  %v16065_v63 = vld [vmem:[%s26026_s7 + $0x9d8] sm:$0xff] }
 0xc0d   : > { %v16069_v45 = vld [vmem:[%s26026_s7 + $0x9f8] sm:$0xff] }
 0xc0f   : > { %18583 = vmatpush1.bf16.msra.mxu0 %v18582_v26  ;;  %v18627_v26 = vpack.c.bf16 %v16024_v41, %v16021_v49  ;;  %v16068_v49 = vld [vmem:[%s26026_s7 + $0x9f0] sm:$0xff]  ;;  %v16071_v41 = vld [vmem:[%s26026_s7 + $0xa08] sm:$0xff] }
 0xc10   : > { %18585 = vmatprep.subr.bf16.mxu0 %v18584_v51  ;;  %v16020_v51 = vld [vmem:[%s26026_s7 + $0x870] sm:$0xff] }
 0xc11   : > { %v18629_v44 = vpack.c.bf16 %v16023_v34, %v16020_v51  ;;  %v16025_v51 = vld [vmem:[%s26026_s7 + $0x898] sm:$0xff] }
 0xc13   : > { %18587 = vmatpush1.bf16.msra.mxu0 %v18586_v60  ;;  %v18631_v60 = vpack.c.bf16 %v16030_v29, %v16027_v16  ;;  %v16028_v16 = vld [vmem:[%s26026_s7 + $0x8b0] sm:$0xff]  ;;  %v16031_v29 = vld [vmem:[%s26026_s7 + $0x8c8] sm:$0xff] }
 0xc14   : > { %18589 = vmatprep.subr.bf16.mxu0 %v18588_v48  ;;  %v16026_v48 = vld [vmem:[%s26026_s7 + $0x8a0] sm:$0xff] }
 0xc15   : > { %v18633_v35 = vpack.c.bf16 %v16029_v52, %v16026_v48  ;;  %v16037_v48 = vld [vmem:[%s26026_s7 + $0x8f8] sm:$0xff]  ;;  %v25225_v52 = vld [vmem:[#allocation4] sm:$0xff] }
 0xc17   : > { %18591 = vmatpush1.bf16.msra.mxu0 %v18590_v2  ;;  %v18635_v2 = vpack.c.bf16 %v16036_v7, %v16033_v13  ;;  %v25231_v7 = vld [vmem:[#allocation4 + $0xb8] sm:$0xff] }
 0xc18   : > { %18593 = vmatprep.subr.bf16.mxu0 %v18592_v14  ;;  %v16032_v14 = vld [vmem:[%s26026_s7 + $0x8d0] sm:$0xff] }
 0xc19   : > { %v18637_v46 = vpack.c.bf16 %v16035_v50, %v16032_v14  ;;  %v25239_v14 = vld [vmem:[#allocation4 + $0xa0] sm:$0xff] }
 0xc1b   : > { %18595 = vmatpush1.bf16.msra.mxu0 %v18594_v20  ;;  %v18639_v20 = vpack.c.bf16 %v16042_v53, %v16039_v33  ;;  %v16046_v33 = vld [vmem:[%s26026_s7 + $0x940] sm:$0xff]  ;;  %v16049_v53 = vld [vmem:[%s26026_s7 + $0x958] sm:$0xff] }
 0xc1c   : > { %18597 = vmatprep.subr.bf16.mxu0 %v18596_v30  ;;  %v16038_v30 = vld [vmem:[%s26026_s7 + $0x900] sm:$0xff] }
 0xc1d   : > { %v18641_v12 = vpack.c.bf16 %v16041_v39, %v16038_v30  ;;  %v16055_v30 = vld [vmem:[%s26026_s7 + $0x988] sm:$0xff] }
 0xc1f   : > { %18599 = vmatpush1.bf16.msra.mxu0 %v18598_v9  ;;  %v16048_v9 = vld [vmem:[%s26026_s7 + $0x950] sm:$0xff] }
 0xc20   : > { %18600 = vmatprep.subr.bf16.mxu0 %v20073_v36  ;;  %v18643_v57 = vpack.c.bf16 %v16048_v9, %v16045_v24  ;;  %v16058_v24 = vld [vmem:[%s26026_s7 + $0x9a0] sm:$0xff] }
 0xc22   : > { %13317 = vmatmul.mubr.f32.vlgmr.msra.gmra.mrb[108].mxu0 %v25010_v11 }
 0xc23   : > { %16013 = vmatprep.mubr.msk.f32.mxu0 %vm12114_vm8, %v25013_v21  ;;  %18602 = vmatpush1.bf16.msra.mxu0 %v18601_v15  ;;  %v16044_v15 = vld [vmem:[%s26026_s7 + $0x930] sm:$0xff] }
 0xc24   : > { %18603 = vmatprep.subr.bf16.mxu0 %v20073_v36  ;;  %v18645_v23 = vpack.c.bf16 %v16047_v17, %v16044_v15  ;;  %v16070_v17 = vld [vmem:[%s26026_s7 + $0xa00] sm:$0xff] }
 0xc26   : > { %13323 = vmatmul.mubr.f32.gmra.mrb[110].mxu0 %v25024_v28 }
 0xc27   : > { %16014 = vmatprep.mubr.msk.f32.mxu0 %vm12114_vm8, %v24832_v43  ;;  %18605 = vmatpush1.bf16.msra.mxu0 %v18604_v47  ;;  %v20000_v47 = vld [vmem:[#allocation4 + $0xa0] sm:$0xff] }
 0xc28   : > { %18606 = vmatprep.subr.bf16.mxu0 %v20073_v36 }
 0xc2a   : > { %13329 = vmatmul.mubr.f32.gmra.mrb[112].mxu0 %v25036_v55 }
 0xc2b   : > { %16015 = vmatprep.mubr.msk.f32.mxu0 %vm12114_vm8, %v25039_v38  ;;  %18608 = vmatpush1.bf16.msra.mxu0 %v18607_v54  ;;  %v16050_v54 = vld [vmem:[%s26026_s7 + $0x960] sm:$0xff] }
 0xc2c   : > { %18609 = vmatprep.subr.bf16.mxu0 %v20073_v36  ;;  %v18649_v0 = vpack.c.bf16 %v16053_v42, %v16050_v54  ;;  %v16082_v54 = vld [vmem:[%s26026_s7 + $0xa20] sm:$0xff]  ;;  %v16085_v42 = vld [vmem:[%s26026_s7 + $0xa38] sm:$0xff] }
 0xc2e   : > { %13335 = vmatmul.mubr.f32.gmra.mrb[114].mxu0 %v12111_v5  ;;  %v15999_v5 = vld [vmem:[%s26026_s7 + $0x808] sm:$0xff] }
 0xc2f   : > { %18611 = vmatpush1.bf16.msra.mxu0 %v18610_v8  ;;  %16016 = vmatprep.mubr.msk.f32.mxu0 %vm12114_vm8, %v24951_v4  ;;  %v18619_v32 = vpack.c.bf16 %v15999_v5, %v15996_v18  ;;  %v18625_v4 = vpack.c.bf16 %v16011_v6, %v16008_v59  ;;  %v16060_v8 = vld [vmem:[%s26026_s7 + $0x9b0] sm:$0xff] }
 0xc30   : > { %18612 = vmatprep.subr.bf16.mxu0 %v20073_v36  ;;  %v18651_v62 = vpack.c.bf16 %v16060_v8, %v16057_v22  ;;  %v16089_v22 = vld [vmem:[%s26026_s7 + $0xa58] sm:$0xff]  ;;  %v16092_v8 = vld [vmem:[%s26026_s7 + $0xa70] sm:$0xff] }
 0xc33   : > { %18614 = vmatpush1.bf16.msra.mxu0 %v18613_v40  ;;  %v16056_v40 = vld [vmem:[%s26026_s7 + $0x990] sm:$0xff] }
 0xc34   : > { %18615 = vmatprep.subr.bf16.mxu0 %v20073_v36  ;;  %v18653_v18 = vpack.c.bf16 %v16059_v25, %v16056_v40  ;;  %v16088_v40 = vld [vmem:[%s26026_s7 + $0xa50] sm:$0xff]  ;;  %v16091_v25 = vld [vmem:[%s26026_s7 + $0xa68] sm:$0xff] }
 0xc37   : > { %18617 = vmatpush1.bf16.msra.mxu0 %v18616_v19  ;;  %v16066_v19 = vld [vmem:[%s26026_s7 + $0x9e0] sm:$0xff] }
 0xc38   : > { %18618 = vmatprep.subr.bf16.mxu0 %v20073_v36  ;;  %v18655_v5 = vpack.c.bf16 %v16066_v19, %v16063_v1  ;;  %v16095_v1 = vld [vmem:[%s26026_s7 + $0xa88] sm:$0xff]  ;;  %v16098_v19 = vld [vmem:[%s26026_s7 + $0xaa0] sm:$0xff] }
 0xc3b   : > { %18620 = vmatpush1.bf16.msra.mxu0 %v18619_v32  ;;  %v16062_v32 = vld [vmem:[%s26026_s7 + $0x9c0] sm:$0xff] }
 0xc3c   : > { %18621 = vmatprep.subr.bf16.mxu0 %v20073_v36  ;;  %v18657_v59 = vpack.c.bf16 %v16065_v63, %v16062_v32  ;;  %v16094_v32 = vld [vmem:[%s26026_s7 + $0xa80] sm:$0xff]  ;;  %v16097_v63 = vld [vmem:[%s26026_s7 + $0xa98] sm:$0xff] }
 0xc3f   : > { %18623 = vmatpush1.bf16.msra.mxu0 %v18622_v31  ;;  %v16072_v31 = vld [vmem:[%s26026_s7 + $0xa10] sm:$0xff] }
 0xc40   : > { %18624 = vmatprep.subr.bf16.mxu0 %v20073_v36  ;;  %v18659_v6 = vpack.c.bf16 %v16072_v31, %v16069_v45  ;;  %v16101_v45 = vld [vmem:[%s26026_s7 + $0xab8] sm:$0xff] }
 0xc43   : > { %18626 = vmatpush1.bf16.msra.mxu0 %v18625_v4  ;;  %v18661_v4 = vpack.c.bf16 %v16071_v41, %v16068_v49  ;;  %v16107_v49 = vld [vmem:[%s26026_s7 + $0xae8] sm:$0xff]  ;;  %v16110_v41 = vld [vmem:[%s26026_s7 + $0xb00] sm:$0xff] }
 0xc44   : > { %18628 = vmatprep.subr.bf16.mxu0 %v18627_v26  ;;  %v16022_v26 = vld [vmem:[%s26026_s7 + $0x880] sm:$0xff] }
 0xc45   : > { %v18664_v34 = vpack.c.bf16 %v16025_v51, %v16022_v26  ;;  %v18706_v26 = vpack.c.bf16 %v16110_v41, %v16107_v49  ;;  %v16106_v51 = vld [vmem:[%s26026_s7 + $0xae0] sm:$0xff]  ;;  %v16129_v41 = vld [vmem:[%s26026_s7 + $0xb98] sm:$0xff] }
 0xc46   : > { %13406 = vmatmul.mubr.f32.vlgmr.msra.gmra.mrb[116].mxu0 %v25010_v11  ;;  %v16054_v11 = vld [vmem:[%s26026_s7 + $0x980] sm:$0xff] }
 0xc47   : > { %16017 = vmatprep.mubr.msk.f32.mxu0 %vm12114_vm8, %v25013_v21  ;;  %18630 = vmatpush1.bf16.msra.mxu0 %v18629_v44  ;;  %v18647_v58 = vpack.c.bf16 %v16054_v11, %v16051_v37  ;;  %v18667_v44 = vpack.c.bf16 %v16031_v29, %v16028_v16  ;;  %v16073_v37 = vld [vmem:[%s26026_s7 + $0xa18] sm:$0xff]  ;;  %v16083_v11 = vld [vmem:[%s26026_s7 + $0xa28] sm:$0xff]  ;;  %v16116_v29 = vld [vmem:[%s26026_s7 + $0xb30] sm:$0xff] }
 0xc48   : > { %18632 = vmatprep.subr.bf16.mxu0 %v18631_v60  ;;  %v16034_v60 = vld [vmem:[%s26026_s7 + $0x8e0] sm:$0xff]  ;;  %v16113_v16 = vld [vmem:[%s26026_s7 + $0xb18] sm:$0xff] }
 0xc49   : > { %v18670_v13 = vpack.c.bf16 %v16037_v48, %v16034_v60  ;;  %v18710_v60 = vpack.c.bf16 %v16116_v29, %v16113_v16  ;;  %v16112_v48 = vld [vmem:[%s26026_s7 + $0xb10] sm:$0xff]  ;;  %v16126_v49 = vld [vmem:[%s26026_s7 + $0xb80] sm:$0xff] }
 0xc4a   : > { %13411 = vmatmul.mubr.f32.gmra.mrb[118].mxu0 %v25024_v28  ;;  %v16148_v16 = vld [vmem:[%s26026_s7 + $0xbf0] sm:$0xff] }
 0xc4b   : > { %16018 = vmatprep.mubr.msk.f32.mxu0 %vm12114_vm8, %v24832_v43  ;;  %18634 = vmatpush1.bf16.msra.mxu0 %v18633_v35  ;;  %v16040_v35 = vld [vmem:[%s26026_s7 + $0x910] sm:$0xff] }
 0xc4c   : > { %18636 = vmatprep.subr.bf16.mxu0 %v18635_v2  ;;  %v16043_v2 = vld [vmem:[%s26026_s7 + $0x928] sm:$0xff] }
 0xc4d   : > { %v18673_v50 = vpack.c.bf16 %v16043_v2, %v16040_v35  ;;  %v16119_v35 = vld [vmem:[%s26026_s7 + $0xb48] sm:$0xff]  ;;  %v16122_v2 = vld [vmem:[%s26026_s7 + $0xb60] sm:$0xff] }
 0xc4e   : > { %13416 = vmatmul.mubr.f32.gmra.mrb[120].mxu0 %v25036_v55 }
 0xc4f   : > { %16019 = vmatprep.mubr.msk.f32.mxu0 %vm12114_vm8, %v25039_v38  ;;  %18638 = vmatpush1.bf16.msra.mxu0 %v18637_v46  ;;  %v18676_v46 = vpack.c.bf16 %v16049_v53, %v16046_v33  ;;  %v18714_v33 = vpack.c.bf16 %v16122_v2, %v16119_v35  ;;  %v16118_v53 = vld [vmem:[%s26026_s7 + $0xb40] sm:$0xff] }
 0xc50   : > { %18640 = vmatprep.subr.bf16.mxu0 %v18639_v20  ;;  %v16052_v20 = vld [vmem:[%s26026_s7 + $0x970] sm:$0xff]  ;;  %v16154_v35 = vld [vmem:[%s26026_s7 + $0xc20] sm:$0xff] }
 0xc51   : > { %v18679_v39 = vpack.c.bf16 %v16055_v30, %v16052_v20  ;;  %v16125_v20 = vld [vmem:[%s26026_s7 + $0xb78] sm:$0xff]  ;;  %v16128_v30 = vld [vmem:[%s26026_s7 + $0xb90] sm:$0xff] }
 0xc52   : > { %13421 = vmatmul.mubr.f32.gmra.mrb[122].mxu0 %v20000_v47  ;;  %v16086_v47 = vld [vmem:[%s26026_s7 + $0xa40] sm:$0xff] }
 0xc53   : > { %18642 = vmatpush1.bf16.msra.mxu0 %v18641_v12  ;;  %16074 = vmatprep.mubr.msk.f32.mxu0 %vm12114_vm8, %v25013_v21  ;;  %v16064_v12 = vld [vmem:[%s26026_s7 + $0x9d0] sm:$0xff] }
 0xc54   : > { %18644 = vmatprep.subr.bf16.mxu0 %v18643_v57  ;;  %v16067_v57 = vld [vmem:[%s26026_s7 + $0x9e8] sm:$0xff] }
 0xc55   : > { %v18685_v15 = vpack.c.bf16 %v16067_v57, %v16064_v12  ;;  %v16131_v12 = vld [vmem:[%s26026_s7 + $0xba8] sm:$0xff]  ;;  %v16134_v57 = vld [vmem:[%s26026_s7 + $0xbc0] sm:$0xff] }
 0xc57   : > { %18646 = vmatpush1.bf16.msra.mxu0 %v18645_v23  ;;  %v18688_v23 = vpack.c.bf16 %v16073_v37, %v16070_v17  ;;  %v18722_v17 = vpack.c.bf16 %v16134_v57, %v16131_v12  ;;  %v16130_v37 = vld [vmem:[%s26026_s7 + $0xba0] sm:$0xff] }
 0xc58   : > { %18648 = vmatprep.subr.bf16.mxu0 %v18647_v58  ;;  %v18690_v58 = vpack.c.bf16 %v16086_v47, %v16083_v11  ;;  %v16133_v11 = vld [vmem:[%s26026_s7 + $0xbb8] sm:$0xff]  ;;  %v16166_v12 = vld [vmem:[%s26026_s7 + $0xc80] sm:$0xff] }
 0xc59   : > { %v18724_v47 = vpack.c.bf16 %v16133_v11, %v16130_v37  ;;  %v16165_v37 = vld [vmem:[%s26026_s7 + $0xc78] sm:$0xff] }
 0xc5a   : > { %v16169_v11 = vld [vmem:[%s26026_s7 + $0xc98] sm:$0xff] }
 0xc5b   : > { %18650 = vmatpush1.bf16.msra.mxu0 %v18649_v0  ;;  %v18692_v0 = vpack.c.bf16 %v16085_v42, %v16082_v54  ;;  %v16090_v42 = vld [vmem:[%s26026_s7 + $0xa60] sm:$0xff] }
 0xc5c   : > { %18652 = vmatprep.subr.bf16.mxu0 %v18651_v62  ;;  %v18694_v62 = vpack.c.bf16 %v16092_v8, %v16089_v22  ;;  %v16093_v22 = vld [vmem:[%s26026_s7 + $0xa78] sm:$0xff] }
 0xc5d   : > { %v18730_v8 = vpack.c.bf16 %v16093_v22, %v16090_v42  ;;  %v16171_v42 = vld [vmem:[%s26026_s7 + $0xca8] sm:$0xff] }
 0xc5e   : > { %v16175_v22 = vld [vmem:[%s26026_s7 + $0xcc8] sm:$0xff] }
 0xc5f   : > { %18654 = vmatpush1.bf16.msra.mxu0 %v18653_v18  ;;  %v18696_v18 = vpack.c.bf16 %v16091_v25, %v16088_v40  ;;  %v25426_v40 = vld [vmem:[#allocation4 + $0xc8] sm:$0xff] }
 0xc60   : > { %18656 = vmatprep.subr.bf16.mxu0 %v18655_v5  ;;  %v18698_v5 = vpack.c.bf16 %v16098_v19, %v16095_v1  ;;  %v16102_v1 = vld [vmem:[%s26026_s7 + $0xac0] sm:$0xff]  ;;  %v16105_v19 = vld [vmem:[%s26026_s7 + $0xad8] sm:$0xff] }
 0xc63   : > { %18658 = vmatpush1.bf16.msra.mxu0 %v18657_v59  ;;  %v16100_v59 = vld [vmem:[%s26026_s7 + $0xab0] sm:$0xff] }
 0xc64   : > { %18660 = vmatprep.subr.bf16.mxu0 %v18659_v6  ;;  %v16103_v6 = vld [vmem:[%s26026_s7 + $0xac8] sm:$0xff] }
 0xc67   : > { %18662 = vmatpush1.bf16.msra.mxu0 %v18661_v4  ;;  %v18704_v4 = vpack.c.bf16 %v16103_v6, %v16100_v59  ;;  %v16120_v59 = vld [vmem:[%s26026_s7 + $0xb50] sm:$0xff] }
 0xc68   : > { %18663 = vmatprep.subr.bf16.mxu0 %v20073_v36 }
 0xc6a   : > { %13579 = vmatmul.mubr.f32.vlgmr.msra.gmra.mrb[108].mxu0 %v25024_v28 }
 0xc6b   : > { %18665 = vmatpush1.bf16.msra.mxu0 %v18664_v34  ;;  %16075 = vmatprep.mubr.msk.f32.mxu0 %vm12114_vm8, %v24632_v10  ;;  %v16109_v34 = vld [vmem:[%s26026_s7 + $0xaf8] sm:$0xff] }
 0xc6c   : > { %18666 = vmatprep.subr.bf16.mxu0 %v20073_v36 }
 0xc6e   : > { %13585 = vmatmul.mubr.f32.gmra.mrb[110].mxu0 %v25225_v52 }
 0xc6f   : > { %16076 = vmatprep.mubr.msk.f32.mxu0 %vm12114_vm8, %v25039_v38  ;;  %18668 = vmatpush1.bf16.msra.mxu0 %v18667_v44  ;;  %v18708_v44 = vpack.c.bf16 %v16109_v34, %v16106_v51  ;;  %v16135_v51 = vld [vmem:[%s26026_s7 + $0xbc8] sm:$0xff]  ;;  %v16145_v34 = vld [vmem:[%s26026_s7 + $0xbd8] sm:$0xff] }
 0xc70   : > { %18669 = vmatprep.subr.bf16.mxu0 %v20073_v36 }
 0xc72   : > { %13591 = vmatmul.mubr.f32.gmra.mrb[112].mxu0 %v25239_v14 }
 0xc73   : > { %18671 = vmatpush1.bf16.msra.mxu0 %v18670_v13  ;;  %16077 = vmatprep.mubr.msk.f32.mxu0 %vm12114_vm8, %v25231_v7  ;;  %v16115_v13 = vld [vmem:[%s26026_s7 + $0xb28] sm:$0xff] }
 0xc74   : > { %18672 = vmatprep.subr.bf16.mxu0 %v20073_v36 }
 0xc76   : > { %13597 = vmatmul.mubr.f32.gmra.mrb[114].mxu0 %v25225_v52 }
 0xc77   : > { %18674 = vmatpush1.bf16.msra.mxu0 %v18673_v50  ;;  %16078 = vmatprep.mubr.msk.f32.mxu0 %vm12114_vm8, %v25013_v21  ;;  %v16061_v21 = vld [vmem:[%s26026_s7 + $0x9b8] sm:$0xff]  ;;  %v18712_v50 = vpack.c.bf16 %v16115_v13, %v16112_v48  ;;  %v16147_v48 = vld [vmem:[%s26026_s7 + $0xbe8] sm:$0xff] }
 0xc78   : > { %18675 = vmatprep.subr.bf16.mxu0 %v20073_v36  ;;  %v18682_v9 = vpack.c.bf16 %v16061_v21, %v16058_v24  ;;  %v18718_v24 = vpack.c.bf16 %v16128_v30, %v16125_v20  ;;  %v16124_v21 = vld [vmem:[%s26026_s7 + $0xb70] sm:$0xff]  ;;  %v16151_v13 = vld [vmem:[%s26026_s7 + $0xc08] sm:$0xff] }
 0xc79   : > { %v16160_v20 = vld [vmem:[%s26026_s7 + $0xc50] sm:$0xff] }
 0xc7b   : > { %18677 = vmatpush1.bf16.msra.mxu0 %v18676_v46  ;;  %v16121_v46 = vld [vmem:[%s26026_s7 + $0xb58] sm:$0xff] }
 0xc7c   : > { %18678 = vmatprep.subr.bf16.mxu0 %v20073_v36 }
 0xc7f   : > { %18680 = vmatpush1.bf16.msra.mxu0 %v18679_v39  ;;  %v18716_v39 = vpack.c.bf16 %v16121_v46, %v16118_v53  ;;  %v16153_v53 = vld [vmem:[%s26026_s7 + $0xc18] sm:$0xff] }
 0xc80   : > { %18681 = vmatprep.subr.bf16.mxu0 %v20073_v36  ;;  %v16157_v46 = vld [vmem:[%s26026_s7 + $0xc38] sm:$0xff] }
 0xc83   : > { %18683 = vmatpush1.bf16.msra.mxu0 %v18682_v9  ;;  %v16127_v9 = vld [vmem:[%s26026_s7 + $0xb88] sm:$0xff] }
 0xc84   : > { %18684 = vmatprep.subr.bf16.mxu0 %v20073_v36 }
 0xc87   : > { %18686 = vmatpush1.bf16.msra.mxu0 %v18685_v15  ;;  %v18720_v15 = vpack.c.bf16 %v16127_v9, %v16124_v21  ;;  %v16159_v21 = vld [vmem:[%s26026_s7 + $0xc48] sm:$0xff] }
 0xc88   : > { %18687 = vmatprep.subr.bf16.mxu0 %v20073_v36  ;;  %v16163_v9 = vld [vmem:[%s26026_s7 + $0xc68] sm:$0xff] }
 0xc8b   : > { %18689 = vmatpush1.bf16.msra.mxu0 %v18688_v23  ;;  %v16084_v23 = vld [vmem:[%s26026_s7 + $0xa30] sm:$0xff] }
 0xc8c   : > { %18691 = vmatprep.subr.bf16.mxu0 %v18690_v58  ;;  %v16087_v58 = vld [vmem:[%s26026_s7 + $0xa48] sm:$0xff] }
 0xc8d   : > { %v18727_v54 = vpack.c.bf16 %v16087_v58, %v16084_v23 }
 0xc8e   : > { %13668 = vmatmul.mubr.f32.vlgmr.msra.gmra.mrb[116].mxu0 %v25024_v28  ;;  %v16104_v28 = vld [vmem:[%s26026_s7 + $0xad0] sm:$0xff] }
 0xc8f   : > { %18693 = vmatpush1.bf16.msra.mxu0 %v18692_v0  ;;  %16079 = vmatprep.mubr.msk.f32.mxu0 %vm12114_vm8, %v24632_v10  ;;  %v18700_v10 = vpack.c.bf16 %v16097_v63, %v16094_v32  ;;  %v18702_v31 = vpack.c.bf16 %v16104_v28, %v16101_v45  ;;  %v16096_v0 = vld [vmem:[%s26026_s7 + $0xa90] sm:$0xff]  ;;  %v16111_v63 = vld [vmem:[%s26026_s7 + $0xb08] sm:$0xff]  ;;  %v16114_v28 = vld [vmem:[%s26026_s7 + $0xb20] sm:$0xff] }
 0xc90   : > { %18695 = vmatprep.subr.bf16.mxu0 %v18694_v62  ;;  %v16099_v62 = vld [vmem:[%s26026_s7 + $0xaa8] sm:$0xff]  ;;  %v16108_v32 = vld [vmem:[%s26026_s7 + $0xaf0] sm:$0xff] }
 0xc91   : > { %v18733_v25 = vpack.c.bf16 %v16099_v62, %v16096_v0  ;;  %v18739_v45 = vpack.c.bf16 %v16111_v63, %v16108_v32  ;;  %v16180_v32 = vld [vmem:[%s26026_s7 + $0xcf0] sm:$0xff]  ;;  %v16183_v63 = vld [vmem:[%s26026_s7 + $0xd08] sm:$0xff] }
 0xc92   : > { %13673 = vmatmul.mubr.f32.gmra.mrb[118].mxu0 %v25225_v52 }
 0xc93   : > { %16080 = vmatprep.mubr.msk.f32.mxu0 %vm12114_vm8, %v25039_v38  ;;  %18697 = vmatpush1.bf16.msra.mxu0 %v18696_v18  ;;  %v25438_v18 = vld [vmem:[#allocation4 + $0xd8] sm:$0xff] }
 0xc94   : > { %18699 = vmatprep.subr.bf16.mxu0 %v18698_v5  ;;  %v18736_v5 = vpack.c.bf16 %v16105_v19, %v16102_v1  ;;  %v16181_v1 = vld [vmem:[%s26026_s7 + $0xcf8] sm:$0xff]  ;;  %v16184_v19 = vld [vmem:[%s26026_s7 + $0xd10] sm:$0xff] }
 0xc96   : > { %13678 = vmatmul.mubr.f32.gmra.mrb[120].mxu0 %v25239_v14 }
 0xc97   : > { %18701 = vmatpush1.bf16.msra.mxu0 %v18700_v10  ;;  %16081 = vmatprep.mubr.msk.f32.mxu0 %vm12114_vm8, %v25231_v7  ;;  %v16117_v10 = vld [vmem:[%s26026_s7 + $0xb38] sm:$0xff] }
 0xc98   : > { %18703 = vmatprep.subr.bf16.mxu0 %v18702_v31  ;;  %v18742_v31 = vpack.c.bf16 %v16117_v10, %v16114_v28  ;;  %v16190_v28 = vld [vmem:[%s26026_s7 + $0xd40] sm:$0xff]  ;;  %v18779_v10 = vpack.c.bf16 %v16183_v63, %v16180_v32  ;;  %v16167_v32 = vld [vmem:[%s26026_s7 + $0xc88] sm:$0xff] }
 0xc9a   : > { %13683 = vmatmul.mubr.f32.gmra.mrb[122].mxu0 %v25225_v52 }
 0xc9b   : > { %18705 = vmatpush1.bf16.msra.mxu0 %v18704_v4  ;;  %16136 = vmatprep.mubr.msk.f32.mxu0 %vm12114_vm8, %v24813_v3  ;;  %v18748_v4 = vpack.c.bf16 %v16129_v41, %v16126_v49  ;;  %v16196_v49 = vld [vmem:[%s26026_s7 + $0xd70] sm:$0xff] }
 0xc9c   : > { %18707 = vmatprep.subr.bf16.mxu0 %v18706_v26  ;;  %v16132_v26 = vld [vmem:[%s26026_s7 + $0xbb0] sm:$0xff] }
 0xc9d   : > { %v18751_v29 = vpack.c.bf16 %v16135_v51, %v16132_v26  ;;  %v16192_v26 = vld [vmem:[%s26026_s7 + $0xd50] sm:$0xff]  ;;  %v16195_v51 = vld [vmem:[%s26026_s7 + $0xd68] sm:$0xff] }
 0xc9f   : > { %18709 = vmatpush1.bf16.msra.mxu0 %v18708_v44  ;;  %v18753_v44 = vpack.c.bf16 %v16148_v16, %v16145_v34  ;;  %v16146_v34 = vld [vmem:[%s26026_s7 + $0xbe0] sm:$0xff] }
 0xca0   : > { %18711 = vmatprep.subr.bf16.mxu0 %v18710_v60  ;;  %v16144_v60 = vld [vmem:[%s26026_s7 + $0xbd0] sm:$0xff]  ;;  %v14534_v16 = vld [vmem:[%s26028_s9 + $0x80] sm:$0xff] }
 0xca1   : > { %v18755_v2 = vpack.c.bf16 %v16147_v48, %v16144_v60  ;;  %v18787_v60 = vpack.c.bf16 %v16195_v51, %v16192_v26  ;;  %v16185_v26 = vld [vmem:[%s26026_s7 + $0xd18] sm:$0xff] }
 0xca3   : > { %18713 = vmatpush1.bf16.msra.mxu0 %v18712_v50  ;;  %v18757_v50 = vpack.c.bf16 %v16154_v35, %v16151_v13  ;;  %v14519_v13 = vld [vmem:[%s26028_s9 + $0x8] sm:$0xff]  ;;  %v14536_v35 = vld [vmem:[%s26028_s9 + $0x90] sm:$0xff] }
 0xca4   : > { %18715 = vmatprep.subr.bf16.mxu0 %v18714_v33  ;;  %v16150_v33 = vld [vmem:[%s26026_s7 + $0xc00] sm:$0xff] }
 0xca5   : > { %v18759_v30 = vpack.c.bf16 %v16153_v53, %v16150_v33 }
 0xca7   : > { %18717 = vmatpush1.bf16.msra.mxu0 %v18716_v39  ;;  %v18761_v39 = vpack.c.bf16 %v16160_v20, %v16157_v46  ;;  %v14520_v46 = vld [vmem:[%s26028_s9 + $0x10] sm:$0xff]  ;;  %v14521_v20 = vld [vmem:[%s26028_s9 + $0x18] sm:$0xff] }
 0xca8   : > { %18719 = vmatprep.subr.bf16.mxu0 %v18718_v24  ;;  %v16156_v24 = vld [vmem:[%s26026_s7 + $0xc30] sm:$0xff] }
 0xca9   : > { %v18763_v57 = vpack.c.bf16 %v16159_v21, %v16156_v24  ;;  %v18885_v24 = vpack.c.bf16 %v14521_v20, %v14520_v46  ;;  %v16216_v46 = vld [vmem:[%s26026_s7 + $0xdd0] sm:$0xff] }
 0xcab   : > { %18721 = vmatpush1.bf16.msra.mxu0 %v18720_v15  ;;  %v18765_v15 = vpack.c.bf16 %v16166_v12, %v16163_v9  ;;  %v14522_v9 = vld [vmem:[%s26028_s9 + $0x20] sm:$0xff]  ;;  %v14523_v12 = vld [vmem:[%s26028_s9 + $0x28] sm:$0xff] }
 0xcac   : > { %18723 = vmatprep.subr.bf16.mxu0 %v18722_v17  ;;  %v16162_v17 = vld [vmem:[%s26026_s7 + $0xc60] sm:$0xff] }
 0xcad   : > { %v18767_v23 = vpack.c.bf16 %v16165_v37, %v16162_v17  ;;  %v14540_v37 = vld [vmem:[%s26028_s9 + $0xb0] sm:$0xff] }
 0xcaf   : > { %18725 = vmatpush1.bf16.msra.mxu0 %v18724_v47  ;;  %v16172_v47 = vld [vmem:[%s26026_s7 + $0xcb0] sm:$0xff] }
 0xcb0   : > { %18726 = vmatprep.subr.bf16.mxu0 %v20073_v36  ;;  %v18769_v58 = vpack.c.bf16 %v16172_v47, %v16169_v11  ;;  %v14541_v11 = vld [vmem:[%s26028_s9 + $0xb8] sm:$0xff]  ;;  %v18889_v47 = vpack.c.bf16 %v14523_v12, %v14522_v9  ;;  %v16222_v9 = vld [vmem:[%s26026_s7 + $0xe00] sm:$0xff] }
 0xcb2   : > { %13841 = vmatmul.mubr.f32.vlgmr.msra.gmra.mrb[108].mxu0 %v25225_v52 }
 0xcb3   : > { %16137 = vmatprep.mubr.msk.f32.mxu0 %vm12114_vm8, %v24832_v43  ;;  %18728 = vmatpush1.bf16.msra.mxu0 %v18727_v54  ;;  %v16168_v54 = vld [vmem:[%s26026_s7 + $0xc90] sm:$0xff] }
 0xcb4   : > { %18729 = vmatprep.subr.bf16.mxu0 %v20073_v36  ;;  %v18771_v0 = vpack.c.bf16 %v16171_v42, %v16168_v54  ;;  %v14525_v54 = vld [vmem:[%s26028_s9 + $0x38] sm:$0xff]  ;;  %v16158_v42 = vld [vmem:[%s26026_s7 + $0xc40] sm:$0xff] }
 0xcb6   : > { %13847 = vmatmul.mubr.f32.gmra.mrb[110].mxu0 %v25036_v55 }
 0xcb7   : > { %18731 = vmatpush1.bf16.msra.mxu0 %v18730_v8  ;;  %16138 = vmatprep.mubr.msk.f32.mxu0 %vm12114_vm8, %v25426_v40  ;;  %v16178_v8 = vld [vmem:[%s26026_s7 + $0xce0] sm:$0xff] }
 0xcb8   : > { %18732 = vmatprep.subr.bf16.mxu0 %v20073_v36  ;;  %v18773_v62 = vpack.c.bf16 %v16178_v8, %v16175_v22  ;;  %v16161_v22 = vld [vmem:[%s26026_s7 + $0xc58] sm:$0xff]  ;;  %v18891_v8 = vpack.c.bf16 %v14541_v11, %v14540_v37 }
 0xcb9   : > { %v16225_v37 = vld [vmem:[%s26026_s7 + $0xe18] sm:$0xff] }
 0xcba   : > { %13853 = vmatmul.mubr.f32.gmra.mrb[112].mxu0 %v25225_v52 }
 0xcbb   : > { %18734 = vmatpush1.bf16.msra.mxu0 %v18733_v25  ;;  %16139 = vmatprep.mubr.msk.f32.mxu0 %vm12114_vm8, %v25438_v18  ;;  %v16177_v25 = vld [vmem:[%s26026_s7 + $0xcd8] sm:$0xff] }
 0xcbc   : > { %18735 = vmatprep.subr.bf16.mxu0 %v20073_v36 }
 0xcbe   : > { %13859 = vmatmul.mubr.f32.gmra.mrb[114].mxu0 %v25225_v52 }
 0xcbf   : > { %18737 = vmatpush1.bf16.msra.mxu0 %v18736_v5  ;;  %16140 = vmatprep.mubr.msk.f32.mxu0 %vm12114_vm8, %v24813_v3  ;;  %v16123_v3 = vld [vmem:[%s26026_s7 + $0xb68] sm:$0xff]  ;;  %v18777_v5 = vpack.c.bf16 %v16184_v19, %v16181_v1  ;;  %v14526_v1 = vld [vmem:[%s26028_s9 + $0x40] sm:$0xff] }
 0xcc0   : > { %18738 = vmatprep.subr.bf16.mxu0 %v20073_v36  ;;  %v18745_v6 = vpack.c.bf16 %v16123_v3, %v16120_v59  ;;  %v16186_v59 = vld [vmem:[%s26026_s7 + $0xd20] sm:$0xff]  ;;  %v16189_v3 = vld [vmem:[%s26026_s7 + $0xd38] sm:$0xff]  ;;  %v14527_v19 = vld [vmem:[%s26028_s9 + $0x48] sm:$0xff] }
 0xcc1   : > { %v18783_v41 = vpack.c.bf16 %v16189_v3, %v16186_v59  ;;  %v20002_v59 = vld [vmem:[#allocation4 + $0x98] sm:$0xff] }
 0xcc3   : > { %18740 = vmatpush1.bf16.msra.mxu0 %v18739_v45  ;;  %v16187_v45 = vld [vmem:[%s26026_s7 + $0xd28] sm:$0xff] }
 0xcc4   : > { %18741 = vmatprep.subr.bf16.mxu0 %v20073_v36 }
 0xcc7   : > { %18743 = vmatpush1.bf16.msra.mxu0 %v18742_v31  ;;  %v18781_v31 = vpack.c.bf16 %v16190_v28, %v16187_v45  ;;  %v18897_v45 = vpack.c.bf16 %v14527_v19, %v14526_v1  ;;  %v16236_v19 = vld [vmem:[%s26026_s7 + $0xe70] sm:$0xff] }
 0xcc8   : > { %18744 = vmatprep.subr.bf16.mxu0 %v20073_v36 }
 0xccb   : > { %18746 = vmatpush1.bf16.msra.mxu0 %v18745_v6  ;;  %v16193_v6 = vld [vmem:[%s26026_s7 + $0xd58] sm:$0xff] }
 0xccc   : > { %18747 = vmatprep.subr.bf16.mxu0 %v20073_v36 }
 0xccf   : > { %18749 = vmatpush1.bf16.msra.mxu0 %v18748_v4  ;;  %v18785_v4 = vpack.c.bf16 %v16196_v49, %v16193_v6  ;;  %v16176_v6 = vld [vmem:[%s26026_s7 + $0xcd0] sm:$0xff]  ;;  %v16179_v49 = vld [vmem:[%s26026_s7 + $0xce8] sm:$0xff] }
 0xcd0   : > { %18750 = vmatprep.subr.bf16.mxu0 %v20073_v36 }
 0xcd3   : > { %18752 = vmatpush1.bf16.msra.mxu0 %v18751_v29  ;;  %v14535_v29 = vld [vmem:[%s26028_s9 + $0x88] sm:$0xff] }
 0xcd4   : > { %18754 = vmatprep.subr.bf16.mxu0 %v18753_v44  ;;  %v14518_v44 = vld [vmem:[%s26028_s9] sm:$0xff]  ;;  %v18879_v48 = vpack.c.bf16 %v14535_v29, %v14534_v16  ;;  %v16191_v16 = vld [vmem:[%s26026_s7 + $0xd48] sm:$0xff] }
 0xcd5   : > { %v18881_v33 = vpack.c.bf16 %v14519_v13, %v14518_v44  ;;  %v16194_v44 = vld [vmem:[%s26026_s7 + $0xd60] sm:$0xff] }
 0xcd6   : > { %13930 = vmatmul.mubr.f32.vlgmr.msra.gmra.mrb[116].mxu0 %v25225_v52  ;;  %18880 = vmatprep.subr.bf16.mxu1 %v18879_v48  ;;  %v16207_v48 = vld [vmem:[%s26026_s7 + $0xd88] sm:$0xff]  ;;  %v16210_v13 = vld [vmem:[%s26026_s7 + $0xda0] sm:$0xff] }
 0xcd7   : > { %16141 = vmatprep.mubr.msk.f32.mxu0 %vm12114_vm8, %v24832_v43  ;;  %18756 = vmatpush1.bf16.msra.mxu0 %v18755_v2  ;;  %v14537_v2 = vld [vmem:[%s26028_s9 + $0x98] sm:$0xff] }
 0xcd8   : > { %18758 = vmatprep.subr.bf16.mxu0 %v18757_v50  ;;  %v16149_v50 = vld [vmem:[%s26026_s7 + $0xbf8] sm:$0xff]  ;;  %v18883_v53 = vpack.c.bf16 %v14537_v2, %v14536_v35  ;;  %18882 = vmatpush3.bf16.msra.mxu1 %v18881_v33  ;;  %v18816_v2 = vpack.c.bf16 %v16210_v13, %v16207_v48  ;;  %v16208_v48 = vld [vmem:[%s26026_s7 + $0xd90] sm:$0xff]  ;;  %v16211_v13 = vld [vmem:[%s26026_s7 + $0xda8] sm:$0xff] }
 0xcd9   : > { %v18790_v21 = vpack.c.bf16 %v16149_v50, %v16146_v34  ;;  %v16188_v34 = vld [vmem:[%s26026_s7 + $0xd30] sm:$0xff]  ;;  %v16206_v50 = vld [vmem:[%s26026_s7 + $0xd80] sm:$0xff]  ;;  %v16209_v33 = vld [vmem:[%s26026_s7 + $0xd98] sm:$0xff] }
 0xcda   : > { %13935 = vmatmul.mubr.f32.gmra.mrb[118].mxu0 %v25036_v55  ;;  %18884 = vmatprep.subr.bf16.mxu1 %v18883_v53  ;;  %v18811_v29 = vpack.c.bf16 %v16191_v16, %v16188_v34  ;;  %v16213_v53 = vld [vmem:[%s26026_s7 + $0xdb8] sm:$0xff]  ;;  %v18818_v20 = vpack.c.bf16 %v16209_v33, %v16206_v50 }
 0xcdb   : > { %18760 = vmatpush1.bf16.msra.mxu0 %v18759_v30  ;;  %16142 = vmatprep.mubr.msk.f32.mxu0 %vm12114_vm8, %v25426_v40  ;;  %v16174_v40 = vld [vmem:[%s26026_s7 + $0xcc0] sm:$0xff]  ;;  %v16217_v50 = vld [vmem:[%s26026_s7 + $0xdd8] sm:$0xff] }
 0xcdc   : > { %18762 = vmatprep.subr.bf16.mxu0 %v18761_v39  ;;  %v14538_v30 = vld [vmem:[%s26028_s9 + $0xa0] sm:$0xff]  ;;  %v14539_v39 = vld [vmem:[%s26028_s9 + $0xa8] sm:$0xff]  ;;  %18886 = vmatpush3.bf16.msra.mxu1 %v18885_v24 }
 0xcdd   : > { %v18887_v17 = vpack.c.bf16 %v14539_v39, %v14538_v30  ;;  %v18820_v30 = vpack.c.bf16 %v16216_v46, %v16213_v53  ;;  %v16212_v39 = vld [vmem:[%s26026_s7 + $0xdb0] sm:$0xff]  ;;  %v16215_v24 = vld [vmem:[%s26026_s7 + $0xdc8] sm:$0xff] }
 0xcde   : > { %13940 = vmatmul.mubr.f32.gmra.mrb[120].mxu0 %v25225_v52  ;;  %v18822_v12 = vpack.c.bf16 %v16215_v24, %v16212_v39  ;;  %v16220_v53 = vld [vmem:[%s26026_s7 + $0xdf0] sm:$0xff]  ;;  %v16223_v46 = vld [vmem:[%s26026_s7 + $0xe08] sm:$0xff]  ;;  %v16226_v39 = vld [vmem:[%s26026_s7 + $0xe20] sm:$0xff] }
 0xcdf   : > { %18764 = vmatpush1.bf16.msra.mxu0 %v18763_v57  ;;  %16143 = vmatprep.mubr.msk.f32.mxu0 %vm12114_vm8, %v25438_v18  ;;  %v16152_v57 = vld [vmem:[%s26026_s7 + $0xc10] sm:$0xff]  ;;  %v16229_v24 = vld [vmem:[%s26026_s7 + $0xe38] sm:$0xff] }
 0xce0   : > { %18766 = vmatprep.subr.bf16.mxu0 %v18765_v15  ;;  %v16155_v15 = vld [vmem:[%s26026_s7 + $0xc28] sm:$0xff]  ;;  %18888 = vmatprep.subr.bf16.mxu1 %v18887_v17  ;;  %v16221_v17 = vld [vmem:[%s26026_s7 + $0xdf8] sm:$0xff] }
 0xce1   : > { %18890 = vmatpush3.bf16.msra.mxu1 %v18889_v47  ;;  %v16224_v47 = vld [vmem:[%s26026_s7 + $0xe10] sm:$0xff] }
 0xce2   : > { %13945 = vmatmul.mubr.f32.gmra.mrb[122].mxu0 %v25225_v52  ;;  %18892 = vmatprep.subr.bf16.mxu1 %v18891_v8  ;;  %v16233_v8 = vld [vmem:[%s26026_s7 + $0xe58] sm:$0xff] }
 0xce3   : > { %18768 = vmatpush1.bf16.msra.mxu0 %v18767_v23  ;;  %16198 = vmatprep.mubr.msk.f32.mxu0 %vm12114_vm8, %v24832_v43  ;;  %v18775_v43 = vpack.c.bf16 %v16177_v25, %v16174_v40  ;;  %v18793_v23 = vpack.c.bf16 %v16155_v15, %v16152_v57  ;;  %v18796_v25 = vpack.c.bf16 %v16161_v22, %v16158_v42  ;;  %v16218_v15 = vld [vmem:[%s26026_s7 + $0xde0] sm:$0xff] }
 0xce4   : > { %18770 = vmatprep.subr.bf16.mxu0 %v18769_v58  ;;  %v14524_v58 = vld [vmem:[%s26028_s9 + $0x30] sm:$0xff]  ;;  %v16230_v22 = vld [vmem:[%s26026_s7 + $0xe40] sm:$0xff] }
 0xce5   : > { %v18893_v40 = vpack.c.bf16 %v14525_v54, %v14524_v58  ;;  %v16231_v58 = vld [vmem:[%s26026_s7 + $0xe48] sm:$0xff]  ;;  %v16234_v54 = vld [vmem:[%s26026_s7 + $0xe60] sm:$0xff] }
 0xce6   : > { %v18832_v42 = vpack.c.bf16 %v16234_v54, %v16231_v58  ;;  %v16256_v54 = vld [vmem:[%s26026_s7 + $0xf10] sm:$0xff] }
 0xce7   : > { %18772 = vmatpush1.bf16.msra.mxu0 %v18771_v0  ;;  %v14542_v0 = vld [vmem:[%s26028_s9 + $0xc0] sm:$0xff]  ;;  %18894 = vmatpush3.bf16.msra.mxu1 %v18893_v40  ;;  %v25814_v40 = vld [vmem:[#allocation4 + $0xa8] sm:$0xff] }
 0xce8   : > { %18774 = vmatprep.subr.bf16.mxu0 %v18773_v62  ;;  %v14543_v62 = vld [vmem:[%s26028_s9 + $0xc8] sm:$0xff] }
 0xce9   : > { %v18895_v63 = vpack.c.bf16 %v14543_v62, %v14542_v0  ;;  %v16237_v0 = vld [vmem:[%s26026_s7 + $0xe78] sm:$0xff]  ;;  %v16240_v62 = vld [vmem:[%s26026_s7 + $0xe90] sm:$0xff] }
 0xcea   : > { %v18836_v1 = vpack.c.bf16 %v16240_v62, %v16237_v0  ;;  %v14547_v62 = vld [vmem:[%s26028_s9 + $0xe8] sm:$0xff] }
 0xceb   : > { %18776 = vmatpush1.bf16.msra.mxu0 %v18775_v43  ;;  %v25689_v43 = vld [vmem:[#allocation4 + $0xe8] sm:$0xff]  ;;  %18896 = vmatprep.subr.bf16.mxu1 %v18895_v63  ;;  %v16246_v63 = vld [vmem:[%s26026_s7 + $0xec0] sm:$0xff] }
 0xcec   : > { %18778 = vmatprep.subr.bf16.mxu0 %v18777_v5  ;;  %v16164_v5 = vld [vmem:[%s26026_s7 + $0xc70] sm:$0xff]  ;;  %18898 = vmatpush3.bf16.msra.mxu1 %v18897_v45 }
 0xced   : > { %v18799_v28 = vpack.c.bf16 %v16167_v32, %v16164_v5  ;;  %v16239_v5 = vld [vmem:[%s26026_s7 + $0xe88] sm:$0xff] }
 0xcee   : > { %v16243_v32 = vld [vmem:[%s26026_s7 + $0xea8] sm:$0xff]  ;;  %v18838_v45 = vpack.c.bf16 %v16239_v5, %v16236_v19  ;;  %v14548_v5 = vld [vmem:[%s26028_s9 + $0xf0] sm:$0xff] }
 0xcef   : > { %18780 = vmatpush1.bf16.msra.mxu0 %v18779_v10  ;;  %v16170_v10 = vld [vmem:[%s26026_s7 + $0xca0] sm:$0xff] }
 0xcf0   : > { %18782 = vmatprep.subr.bf16.mxu0 %v18781_v31  ;;  %v16173_v31 = vld [vmem:[%s26026_s7 + $0xcb8] sm:$0xff] }
 0xcf1   : > { %v18802_v3 = vpack.c.bf16 %v16173_v31, %v16170_v10  ;;  %v16242_v10 = vld [vmem:[%s26026_s7 + $0xea0] sm:$0xff]  ;;  %v16245_v31 = vld [vmem:[%s26026_s7 + $0xeb8] sm:$0xff] }
 0xcf3   : > { %18784 = vmatpush1.bf16.msra.mxu0 %v18783_v41  ;;  %v18805_v41 = vpack.c.bf16 %v16179_v49, %v16176_v6  ;;  %v18842_v6 = vpack.c.bf16 %v16245_v31, %v16242_v10 }
 0xcf4   : > { %18786 = vmatprep.subr.bf16.mxu0 %v18785_v4  ;;  %v16182_v4 = vld [vmem:[%s26026_s7 + $0xd00] sm:$0xff] }
 0xcf5   : > { %v18808_v51 = vpack.c.bf16 %v16185_v26, %v16182_v4  ;;  %v16251_v4 = vld [vmem:[%s26026_s7 + $0xee8] sm:$0xff] }
 0xcf6   : > { %v16255_v26 = vld [vmem:[%s26026_s7 + $0xf08] sm:$0xff] }
 0xcf7   : > { %18788 = vmatpush1.bf16.msra.mxu0 %v18787_v60  ;;  %v16197_v60 = vld [vmem:[%s26026_s7 + $0xd78] sm:$0xff] }
 0xcf8   : > { %18789 = vmatprep.subr.bf16.mxu0 %v20073_v36  ;;  %v18814_v35 = vpack.c.bf16 %v16197_v60, %v16194_v44  ;;  %v16257_v44 = vld [vmem:[%s26026_s7 + $0xf18] sm:$0xff] }
 0xcfa   : > { %14103 = vmatmul.mubr.f32.vlgmr.msra.gmra.mrb[108].mxu0 %v25036_v55 }
 0xcfb   : > { %16199 = vmatprep.mubr.msk.f32.mxu0 %vm12114_vm8, %v25039_v38  ;;  %18791 = vmatpush1.bf16.msra.mxu0 %v18790_v21  ;;  %v16219_v21 = vld [vmem:[%s26026_s7 + $0xde8] sm:$0xff] }
 0xcfc   : > { %18792 = vmatprep.subr.bf16.mxu0 %v20073_v36  ;;  %v18824_v57 = vpack.c.bf16 %v16222_v9, %v16219_v21  ;;  %v18862_v21 = vpack.c.bf16 %v16229_v24, %v16226_v39  ;;  %v16232_v9 = vld [vmem:[%s26026_s7 + $0xe50] sm:$0xff]  ;;  %v20004_v24 = vld [vmem:[#allocation4] sm:$0xff] }
 0xcfe   : > { %14109 = vmatmul.mubr.f32.gmra.mrb[110].mxu0 %v25239_v14 }
 0xcff   : > { %18794 = vmatpush1.bf16.msra.mxu0 %v18793_v23  ;;  %16200 = vmatprep.mubr.msk.f32.mxu0 %vm12114_vm8, %v25438_v18  ;;  %v16227_v23 = vld [vmem:[%s26026_s7 + $0xe28] sm:$0xff] }
 0xd00   : > { %18795 = vmatprep.subr.bf16.mxu0 %v20073_v36 }
 0xd02   : > { %14115 = vmatmul.mubr.f32.gmra.mrb[112].mxu0 %v25225_v52 }
 0xd03   : > { %18797 = vmatpush1.bf16.msra.mxu0 %v18796_v25  ;;  %16201 = vmatprep.mubr.msk.f32.mxu0 %vm12114_vm8, %v25689_v43  ;;  %v18834_v25 = vpack.c.bf16 %v16233_v8, %v16230_v22  ;;  %v14544_v22 = vld [vmem:[%s26028_s9 + $0xd0] sm:$0xff] }
 0xd04   : > { %18798 = vmatprep.subr.bf16.mxu0 %v20073_v36 }
 0xd06   : > { %14121 = vmatmul.mubr.f32.gmra.mrb[114].mxu0 %v25225_v52 }
 0xd07   : > { %18800 = vmatpush1.bf16.msra.mxu0 %v18799_v28  ;;  %16202 = vmatprep.mubr.msk.f32.mxu0 %vm12114_vm8, %v20002_v59  ;;  %v18840_v28 = vpack.c.bf16 %v16246_v63, %v16243_v32  ;;  %v16249_v59 = vld [vmem:[%s26026_s7 + $0xed8] sm:$0xff] }
 0xd08   : > { %18801 = vmatprep.subr.bf16.mxu0 %v20073_v36  ;;  %v14549_v32 = vld [vmem:[%s26028_s9 + $0xf8] sm:$0xff] }
 0xd09   : > { %v18907_v63 = vpack.c.bf16 %v14549_v32, %v14548_v5 }
 0xd0b   : > { %18803 = vmatpush1.bf16.msra.mxu0 %v18802_v3  ;;  %v16252_v3 = vld [vmem:[%s26026_s7 + $0xef0] sm:$0xff] }
 0xd0c   : > { %18804 = vmatprep.subr.bf16.mxu0 %v20073_v36  ;;  %v18844_v49 = vpack.c.bf16 %v16252_v3, %v16249_v59 }
 0xd0f   : > { %18806 = vmatpush1.bf16.msra.mxu0 %v18805_v41  ;;  %v16248_v41 = vld [vmem:[%s26026_s7 + $0xed0] sm:$0xff] }
 0xd10   : > { %18807 = vmatprep.subr.bf16.mxu0 %v20073_v36  ;;  %v18846_v34 = vpack.c.bf16 %v16251_v4, %v16248_v41 }
 0xd13   : > { %18809 = vmatpush1.bf16.msra.mxu0 %v18808_v51  ;;  %v16258_v51 = vld [vmem:[%s26026_s7 + $0xf20] sm:$0xff] }
 0xd14   : > { %18810 = vmatprep.subr.bf16.mxu0 %v20073_v36  ;;  %v18848_v16 = vpack.c.bf16 %v16258_v51, %v16255_v26  ;;  %v14495_v51 = vld [vmem:[%s26027_s8] sm:$0x7] }
 0xd17   : > { %18812 = vmatpush1.bf16.msra.mxu0 %v18811_v29  ;;  %v16254_v29 = vld [vmem:[%s26026_s7 + $0xf00] sm:$0xff] }
 0xd18   : > { %18813 = vmatprep.subr.bf16.mxu0 %v20073_v36  ;;  %v18850_v60 = vpack.c.bf16 %v16257_v44, %v16254_v29  ;;  %v14500_v29 = vrot.slane %v14495_v51, %v12089_v61 }
 0xd1b   : > { %18815 = vmatpush1.bf16.msra.mxu0 %v18814_v35  ;;  %v18853_v35 = vpack.c.bf16 %v16211_v13, %v16208_v48  ;;  %v14504_v48 = vrot.slane %v14495_v51, %v12093_v56  ;;  %v14553_v56 = vld [vmem:[%s26028_s9 + $0x118] sm:$0xff] }
 0xd1c   : > { %18817 = vmatprep.subr.bf16.mxu0 %v18816_v2  ;;  %v16214_v2 = vld [vmem:[%s26026_s7 + $0xdc0] sm:$0xff] }
 0xd1d   : > { %v18856_v33 = vpack.c.bf16 %v16217_v50, %v16214_v2  ;;  %v14550_v50 = vld [vmem:[%s26028_s9 + $0x100] sm:$0xff] }
 0xd1e   : > { %14192 = vmatmul.mubr.f32.vlgmr.msra.gmra.mrb[116].mxu0 %v25036_v55  ;;  %v16228_v55 = vld [vmem:[%s26026_s7 + $0xe30] sm:$0xff] }
 0xd1f   : > { %16203 = vmatprep.mubr.msk.f32.mxu0 %vm12114_vm8, %v25039_v38  ;;  %18819 = vmatpush1.bf16.msra.mxu0 %v18818_v20  ;;  %v18826_v38 = vpack.c.bf16 %v16221_v17, %v16218_v15  ;;  %v18828_v11 = vpack.c.bf16 %v16228_v55, %v16225_v37  ;;  %v18859_v20 = vpack.c.bf16 %v16223_v46, %v16220_v53  ;;  %v16238_v15 = vld [vmem:[%s26026_s7 + $0xe80] sm:$0xff]  ;;  %v16241_v17 = vld [vmem:[%s26026_s7 + $0xe98] sm:$0xff]  ;;  %v16244_v55 = vld [vmem:[%s26026_s7 + $0xeb0] sm:$0xff] }
 0xd20   : > { %18821 = vmatprep.subr.bf16.mxu0 %v18820_v30  ;;  %v14232_v30 = vld [vmem:[#allocation4 + $0xf8] sm:$0xff]  ;;  %v18868_v37 = vpack.c.bf16 %v16241_v17, %v16238_v15 }
 0xd22   : > { %14197 = vmatmul.mubr.f32.gmra.mrb[118].mxu0 %v25239_v14 }
 0xd23   : > { %18823 = vmatpush1.bf16.msra.mxu0 %v18822_v12  ;;  %16204 = vmatprep.mubr.msk.f32.mxu0 %vm12114_vm8, %v25438_v18  ;;  %v18830_v18 = vpack.c.bf16 %v16227_v23, %v16224_v47  ;;  %v16235_v12 = vld [vmem:[%s26026_s7 + $0xe68] sm:$0xff]  ;;  %v16250_v47 = vld [vmem:[%s26026_s7 + $0xee0] sm:$0xff]  ;;  %v16253_v23 = vld [vmem:[%s26026_s7 + $0xef8] sm:$0xff] }
 0xd24   : > { %18825 = vmatprep.subr.bf16.mxu0 %v18824_v57  ;;  %v18865_v57 = vpack.c.bf16 %v16235_v12, %v16232_v9  ;;  %v18874_v58 = vpack.c.bf16 %v16253_v23, %v16250_v47 }
 0xd26   : > { %14202 = vmatmul.mubr.f32.gmra.mrb[120].mxu0 %v25225_v52 }
 0xd27   : > { %18827 = vmatpush1.bf16.msra.mxu0 %v18826_v38  ;;  %16205 = vmatprep.mubr.msk.f32.mxu0 %vm12114_vm8, %v25689_v43  ;;  %v16247_v38 = vld [vmem:[%s26026_s7 + $0xec8] sm:$0xff] }
 0xd28   : > { %18829 = vmatprep.subr.bf16.mxu0 %v18828_v11  ;;  %v18871_v11 = vpack.c.bf16 %v16247_v38, %v16244_v55  ;;  %v14507_v55 = vsub.s32 2, %v24217_v27 }
 0xd2a   : > { %14207 = vmatmul.mubr.f32.gmra.mrb[122].mxu0 %v25225_v52  ;;  %v14508_v47 = vrot.slane %v14495_v51, %v14507_v55 }
 0xd2b   : > { %18831 = vmatpush1.bf16.msra.mxu0 %v18830_v18  ;;  %16260 = vmatprep.mubr.msk.f32.mxu0 %vm12114_vm8, %v25814_v40  ;;  %v16259_v18 = vld [vmem:[%s26026_s7 + $0xf28] sm:$0xff] }
 0xd2c   : > { %18833 = vmatprep.subr.bf16.mxu0 %v18832_v42  ;;  %v18877_v42 = vpack.c.bf16 %v16259_v18, %v16256_v54 }
 0xd2f   : > { %18835 = vmatpush1.bf16.msra.mxu0 %v18834_v25  ;;  %v14530_v25 = vld [vmem:[%s26028_s9 + $0x60] sm:$0xff] }
 0xd30   : > { %18837 = vmatprep.subr.bf16.mxu0 %v18836_v1  ;;  %v14531_v1 = vld [vmem:[%s26028_s9 + $0x68] sm:$0xff] }
 0xd31   : > { %v18905_v19 = vpack.c.bf16 %v14531_v1, %v14530_v25 }
 0xd33   : > { %18839 = vmatpush1.bf16.msra.mxu0 %v18838_v45  ;;  %v14532_v45 = vld [vmem:[%s26028_s9 + $0x70] sm:$0xff] }
 0xd34   : > { %18841 = vmatprep.subr.bf16.mxu0 %v18840_v28  ;;  %v14533_v28 = vld [vmem:[%s26028_s9 + $0x78] sm:$0xff] }
 0xd35   : > { %v18909_v10 = vpack.c.bf16 %v14533_v28, %v14532_v45 }
 0xd37   : > { %18843 = vmatpush1.bf16.msra.mxu0 %v18842_v6 }
 0xd38   : > { %18845 = vmatprep.subr.bf16.mxu0 %v18844_v49 }
 0xd3b   : > { %18847 = vmatpush1.bf16.msra.mxu0 %v18846_v34 }
 0xd3c   : > { %18849 = vmatprep.subr.bf16.mxu0 %v18848_v16 }
 0xd3f   : > { %18851 = vmatpush1.bf16.msra.mxu0 %v18850_v60 }
 0xd40   : > { %18852 = vmatprep.subr.bf16.mxu0 %v20073_v36 }
 0xd42   : > { %14365 = vmatmul.mubr.f32.vlgmr.msra.gmra.mrb[108].mxu0 %v25239_v14 }
 0xd43   : > { %18854 = vmatpush1.bf16.msra.mxu0 %v18853_v35  ;;  %16261 = vmatprep.mubr.msk.f32.mxu0 %vm12114_vm8, %v25231_v7 }
 0xd44   : > { %18855 = vmatprep.subr.bf16.mxu0 %v20073_v36 }
 0xd46   : > { %14371 = vmatmul.mubr.f32.gmra.mrb[110].mxu0 %v25225_v52 }
 0xd47   : > { %18857 = vmatpush1.bf16.msra.mxu0 %v18856_v33  ;;  %16262 = vmatprep.mubr.msk.f32.mxu0 %vm12114_vm8, %v25689_v43  ;;  %v14551_v33 = vld [vmem:[%s26028_s9 + $0x108] sm:$0xff] }
 0xd48   : > { %18858 = vmatprep.subr.bf16.mxu0 %v20073_v36 }
 0xd4a   : > { %14377 = vmatmul.mubr.f32.gmra.mrb[112].mxu0 %v25225_v52 }
 0xd4b   : > { %18860 = vmatpush1.bf16.msra.mxu0 %v18859_v20  ;;  %16263 = vmatprep.mubr.msk.f32.mxu0 %vm12114_vm8, %v14232_v30  ;;  %v18912_v20 = vpack.c.bf16 %v14551_v33, %v14550_v50 }
 0xd4c   : > { %18861 = vmatprep.subr.bf16.mxu0 %v20073_v36 }
 0xd4e   : > { %14383 = vmatmul.mubr.f32.gmra.mrb[114].mxu0 %v25225_v52 }
 0xd4f   : > { %18863 = vmatpush1.bf16.msra.mxu0 %v18862_v21  ;;  %16264 = vmatprep.mubr.msk.f32.mxu0 %vm12114_vm8, %v25814_v40 }
 0xd50   : > { %18864 = vmatprep.subr.bf16.mxu0 %v20073_v36 }
 0xd53   : > { %18866 = vmatpush1.bf16.msra.mxu0 %v18865_v57 }
 0xd54   : > { %18867 = vmatprep.subr.bf16.mxu0 %v20073_v36 }
 0xd57   : > { %18869 = vmatpush1.bf16.msra.mxu0 %v18868_v37 }
 0xd58   : > { %18870 = vmatprep.subr.bf16.mxu0 %v20073_v36 }
 0xd5b   : > { %18872 = vmatpush1.bf16.msra.mxu0 %v18871_v11 }
 0xd5c   : > { %18873 = vmatprep.subr.bf16.mxu0 %v20073_v36 }
 0xd5f   : > { %18875 = vmatpush1.bf16.msra.mxu0 %v18874_v58 }
 0xd60   : > { %18876 = vmatprep.subr.bf16.mxu0 %v20073_v36 }
 0xd63   : > { %18878 = vmatpush1.bf16.msra.mxu0 %v18877_v42 }
 0xd66   : > { %14454 = vmatmul.mubr.f32.vlgmr.msra.gmra.mrb[116].mxu0 %v25239_v14  ;;  %v14545_v14 = vld [vmem:[%s26028_s9 + $0xd8] sm:$0xff] }
 0xd67   : > { %16265 = vmatprep.mubr.msk.f32.mxu0 %vm12114_vm8, %v25231_v7  ;;  %v14528_v7 = vld [vmem:[%s26028_s9 + $0x50] sm:$0xff]  ;;  %v18899_v8 = vpack.c.bf16 %v14545_v14, %v14544_v22  ;;  %v16268_v14 = vld [vmem:[%s26029_s10] ss:$0 sm:$0xff] }
 0xd69   : > { %18900 = vmatprep.subr.bf16.mxu1 %v18899_v8 }
 0xd6a   : > { %14459 = vmatmul.mubr.f32.gmra.mrb[118].mxu0 %v25225_v52 }
 0xd6b   : > { %16266 = vmatprep.mubr.msk.f32.mxu0 %vm12114_vm8, %v25689_v43  ;;  %v14529_v43 = vld [vmem:[%s26028_s9 + $0x58] sm:$0xff] }
 0xd6c   : > { %v18901_v0 = vpack.c.bf16 %v14529_v43, %v14528_v7 }
 0xd6e   : > { %14464 = vmatmul.mubr.f32.gmra.mrb[120].mxu0 %v25225_v52  ;;  %18902 = vmatpush3.bf16.msra.mxu1 %v18901_v0 }
 0xd6f   : > { %16267 = vmatprep.mubr.msk.f32.mxu0 %vm12114_vm8, %v14232_v30  ;;  %v14552_v30 = vld [vmem:[%s26028_s9 + $0x110] sm:$0xff] }
 0xd70   : > { %v18915_v39 = vpack.c.bf16 %v14553_v56, %v14552_v30 }
 0xd72   : > { %14469 = vmatmul.mubr.f32.gmra.mrb[122].mxu0 %v25225_v52  ;;  %v14546_v52 = vld [vmem:[%s26028_s9 + $0xe0] sm:$0xff] }
 0xd73   : > { %v18903_v40 = vpack.c.bf16 %v14547_v62, %v14546_v52 }
 0xd75   : > { %18904 = vmatprep.subr.bf16.mxu1 %v18903_v40 }
 0xd76   : > { %18906 = vmatpush3.bf16.msra.mxu1 %v18905_v19 }
 0xd77   : > { %18908 = vmatprep.subr.bf16.mxu1 %v18907_v63 }
 0xd7a   : > { %18910 = vmatpush3.bf16.msra.mxu1 %v18909_v10 }
 0xd7b   : > { %18911 = vmatprep.subr.bf16.mxu1 %v20073_v36 }
 0xe15   : > { %v14366_v31 = vpop.f32.mrb[108].mxu0 }
 0xe16   : > { %v14368_v59 = vpop.f32.mrb[109].mxu0 }
 0xe19   : > { %v14372_v3 = vpop.f32.mrb[110].mxu0 }
 0xe1a   : > { %v14374_v6 = vpop.f32.mrb[111].mxu0 }
 0xe1d   : > { %v14378_v49 = vpop.f32.mrb[112].mxu0 }
 0xe1e   : > { %v14486_v41 = vmax.f32 %v14366_v31, %v14378_v49  ;;  %v14380_v4 = vpop.f32.mrb[113].mxu0 }
 0xe1f   : > { %v14487_v26 = vmax.f32 %v14368_v59, %v14380_v4 }
 0xe21   : > { %v14384_v34 = vpop.f32.mrb[114].mxu0 }
 0xe22   : > { %v14489_v16 = vmax.f32 %v14372_v3, %v14384_v34  ;;  %v14386_v44 = vpop.f32.mrb[115].mxu0 }
 0xe23   : > { %v14490_v60 = vmax.f32 %v14374_v6, %v14386_v44 }
 0xe24   : > { %v14492_v13 = vmax.f32 %v14486_v41, %v14489_v16 }
 0xe25   : > { %v14493_v35 = vmax.f32 %v14487_v26, %v14490_v60 }
 0xe26   : > { %v14512_v2 = vadd.f32 %v14500_v29, %v14492_v13 }
 0xe27   : > { %v14513_v53 = vadd.f32 %v14504_v48, %v14493_v35 }
 0xe28   : > { %v14515_v61 = vmax.f32 %v14512_v2, 0.0 }
 0xe29   : > { %v14516_v46 = vmax.f32 %v14513_v53, 0.0 }
 0xe2b   : > { %14629 = vmatprep.mubr.f32.mxu1 %v14516_v46 }
 0xe2c   : > { %14630 = vmatmul.mubr.f32.vlgmr.msra.gmra.mrb[144].mxu1 %v14515_v61 }
 0xe2d   : > { %18913 = vmatpush3.bf16.msra.mxu1 %v18912_v20  ;;  %18057 = vmatprep.mubr.msk.f32.mxu1 %vm20074_vm9, %v20004_v24 }
 0xe2e   : > { %18914 = vmatprep.subr.bf16.mxu1 %v20073_v36 }
 0xe31   : > { %18916 = vmatpush3.bf16.msra.mxu1 %v18915_v39 }
 0xe39   : > { %v14455_v21 = vpop.f32.mrb[116].mxu0 }
 0xe3a   : > { %v14457_v9 = vpop.f32.mrb[117].mxu0 }
 0xe3d   : > { %v14460_v12 = vpop.f32.mrb[118].mxu0 }
 0xe3e   : > { %v14462_v57 = vpop.f32.mrb[119].mxu0 }
 0xe41   : > { %v14465_v15 = vpop.f32.mrb[120].mxu0 }
 0xe42   : > { %v14488_v17 = vmax.f32 %v14455_v21, %v14465_v15  ;;  %v14467_v37 = vpop.f32.mrb[121].mxu0 }
 0xe45   : > { %v14470_v38 = vpop.f32.mrb[122].mxu0 }
 0xe46   : > { %v14491_v11 = vmax.f32 %v14460_v12, %v14470_v38  ;;  %v14472_v23 = vpop.f32.mrb[123].mxu0 }
 0xe48   : > { %v14494_v58 = vmax.f32 %v14488_v17, %v14491_v11 }
 0xe4a   : > { %v14514_v54 = vadd.f32 %v14508_v47, %v14494_v58 }
 0xe4c   : > { %v14517_v36 = vmax.f32 %v14514_v54, 0.0 }
 0xe4e   : > { %18058 = vmatmul.mubr.msk.f32.vlgmr.msra.gmra.mrb[146].mxu1 %vm14561_vm10, %v14517_v36 }
 0xeff   : > { %v16988_v18 = vpop.f32.mrb[144].mxu1 }
 0xf00   : > { %v16989_v42 = vpop.f32.mrb[145].mxu1 }
 0xf01   : > { %v16990_v22 = vadd.f32 %v16989_v42, %v16988_v18 }
 0xf03   : > { %v14632_v27 = vadd.f32 %v16990_v22, %v16268_v14 }
 0xf21   : > { %v14701_v7 = vpop.f32.mrb[146].mxu1 }
 0xf22   : > { %v14702_v8 = vadd.f32 %v14701_v7, %v14632_v27  ;;  %v18059_v43 = vpop.f32.mrb[147].mxu1 }
 0xf24   : > { %14705 = vst [vmem:[%s501_s22] sm:$0xff] %v14702_v8 }
 0xf25 PF: > { %s26129_s29 = sld [smem:[#allocation9_spill]]  ;;  %p19_p11 = scmp.ge.s32.totalorder %s20154_s21, 4  }
 0xf26   : > { %s26130_s17 = smov %s20055_s18  ;;  %s26132_s19 = smov %s20154_s21 }
 0xf27   :  { %21 = sbr.rel (!%p19_p11) target bundleno = 2 (0x2), region = 192 }
 0xf2b   : > { %s26131_s18 = smov %s26129_s29 }
 0xf2e   :  { %14725 = vsyncpa [#allocation7], 1 }
 0xf2f   :  { %14727 = vsyncpa [#allocation7 + $0x1], 1 }

</bundles_post_ra>
